<compile_context>
chip_gen: v7x
topology: tpu7x:2x2x1
jax: 0.10.0
libtpu: 0.0.40
codegen_flags: <defaults>
</compile_context>

<pallas_src>
import jax
import jax.numpy as jnp
from jax.experimental import pallas as pl
from jax.experimental.pallas import tpu as pltpu


# ----------------------------- Pallas kernels ------------------------------- #
def pointnet_feat_kernel(x_ref,
                         w1_ref, b1_ref, w2_ref, b2_ref,
                         w3_ref, b3_ref, w4_ref, b4_ref,
                         g_ref):
    """Per-point shared MLP (conv1..4 + folded BN) + running global max-pool.

    Grid = (batch, point-chunk).  g_ref is the (1, 512) output block for this
    batch item; its block index is constant over the point-chunk axis, so it
    stays VMEM-resident and is used directly as the max-pool accumulator.
    Zero-init (instead of -inf + per-chunk ReLU) is exact because ReLU is
    monotone: max(0, max_i h_i) == max_i relu(h_i).
    """
    n = pl.program_id(1)

    @pl.when(n == 0)
    def _init():
        g_ref[...] = jnp.zeros_like(g_ref)

    # bf16 matmul operands -> MXU; f32 accumulation / bias-add / ReLU (VPU).
    h = jnp.dot(x_ref[...], w1_ref[...], preferred_element_type=jnp.float32) + b1_ref[...]
    h = jnp.maximum(h, 0.0).astype(jnp.bfloat16)
    h = jnp.dot(h, w2_ref[...], preferred_element_type=jnp.float32) + b2_ref[...]
    h = jnp.maximum(h, 0.0).astype(jnp.bfloat16)
    h = jnp.dot(h, w3_ref[...], preferred_element_type=jnp.float32) + b3_ref[...]
    h = jnp.maximum(h, 0.0).astype(jnp.bfloat16)
    h = jnp.dot(h, w4_ref[...], preferred_element_type=jnp.float32) + b4_ref[...]
    # h: (TILE_N, 512) f32, pre-ReLU; the 0-floored running max applies the ReLU.

    g_ref[...] = jnp.maximum(g_ref[...], jnp.max(h, axis=0, keepdims=True))


def head_kernel(g_ref, wf1_ref, bf1_ref, wf2_ref, bf2_ref, out_ref):
    """Classifier head: fc1 + folded BN5 + ReLU, (dropout), fc2.

    Runs once for the whole batch (M = B): one batched matmul pair on the MXU
    instead of B separate M=1 matmuls inside the feature kernel.
    """
    g = g_ref[...].astype(jnp.bfloat16)                                    # (B, 512)
    f = jnp.dot(g, wf1_ref[...], preferred_element_type=jnp.float32) + bf1_ref[...]
    f = jnp.maximum(f, 0.0).astype(jnp.bfloat16)
    # TODO(synk): nn.Dropout(0.3) is identity in eval mode; training-mode RNG mask not implemented.
    out_ref[...] = (jnp.dot(f, wf2_ref[...], preferred_element_type=jnp.float32)
                    + bf2_ref[...])


# ------------------------------- Wrapper ------------------------------------ #
def _round_up(v, m):
    return ((v + m - 1) // m) * m


def simple_pointnet_forward(x, params, num_classes, max_tile_n=2048):
    """x: (B, N, 3) float32 point cloud.  params: folded f32 weights/biases."""
    B, N, C = x.shape
    assert C == 3
    assert max_tile_n % 16 == 0

    # Point-chunk tile: one chunk per batch item whenever N allows; multiple of
    # 16 rows (bf16 sublane pack) so downstream activation tiles stay unmasked.
    tile_n = min(max_tile_n, _round_up(N, 16))
    n_pad = _round_up(N, tile_n)
    if n_pad != N:
        # Pad with copies of the first point: duplicates don't change the max-pool.
        pad = jnp.broadcast_to(x[:, :1, :], (B, n_pad - N, C))
        x = jnp.concatenate([x, pad], axis=1)
    n_chunks = n_pad // tile_n

    # Pad xyz channels 3 -> 8 for an aligned first matmul; bf16 matmul operands.
    x = jnp.pad(x, ((0, 0), (0, 0), (0, 8 - C))).astype(jnp.bfloat16)

    w1 = jnp.pad(params["w1"], ((0, 8 - C), (0, 0))).astype(jnp.bfloat16)   # (8, 64)
    w2 = params["w2"].astype(jnp.bfloat16)
    w3 = params["w3"].astype(jnp.bfloat16)
    w4 = params["w4"].astype(jnp.bfloat16)
    b1, b2, b3, b4 = params["b1"], params["b2"], params["b3"], params["b4"]

    feat_operands = (x, w1, b1, w2, b2, w3, b3, w4, b4)

    # Weights / biases: full-array blocks with constant index maps -> VMEM-resident.
    def const_spec(a):
        nd = a.ndim
        return pl.BlockSpec(a.shape, lambda b, n, _nd=nd: (0,) * _nd)

    in_specs = [pl.BlockSpec((None, tile_n, 8), lambda b, n: (b, n, 0))]
    in_specs += [const_spec(a) for a in feat_operands[1:]]

    flops = 2 * B * n_pad * (8 * 64 + 64 * 128 + 128 * 256 + 256 * 512)
    bytes_accessed = (sum(int(a.size) * a.dtype.itemsize for a in feat_operands)
                      + B * 512 * 4)

    g = pl.pallas_call(
        pointnet_feat_kernel,
        out_shape=jax.ShapeDtypeStruct((B, 1, 512), jnp.float32),
        grid_spec=pltpu.PrefetchScalarGridSpec(
            num_scalar_prefetch=0,
            grid=(B, n_chunks),
            in_specs=in_specs,
            out_specs=pl.BlockSpec((None, 1, 512), lambda b, n: (b, 0, 0))),
        compiler_params=pltpu.CompilerParams(
            dimension_semantics=("parallel", "arbitrary"),
            vmem_limit_bytes=32 * 1024 * 1024),
        cost_estimate=pl.CostEstimate(flops=flops, transcendentals=0,
                                      bytes_accessed=bytes_accessed),
    )(*feat_operands).reshape(B, 512)

    # --- classifier head: one batched (M=B) matmul pair, lane-dense output --- #
    nc_pad = _round_up(num_classes, 128)
    wf1 = params["wf1"].astype(jnp.bfloat16)
    bf1 = params["bf1"]
    wf2 = jnp.pad(params["wf2"], ((0, 0), (0, nc_pad - num_classes))).astype(jnp.bfloat16)
    bf2 = jnp.pad(params["bf2"], ((0, 0), (0, nc_pad - num_classes)))       # f32

    out = pl.pallas_call(
        head_kernel,
        out_shape=jax.ShapeDtypeStruct((B, nc_pad), jnp.float32),
        grid=(1,),
        in_specs=[pl.BlockSpec((B, 512), lambda i: (0, 0)),
                  pl.BlockSpec((512, 256), lambda i: (0, 0)),
                  pl.BlockSpec((1, 256), lambda i: (0, 0)),
                  pl.BlockSpec((256, nc_pad), lambda i: (0, 0)),
                  pl.BlockSpec((1, nc_pad), lambda i: (0, 0))],
        out_specs=pl.BlockSpec((B, nc_pad), lambda i: (0, 0)),
    )(g, wf1, bf1, wf2, bf2)

    return out[:, :num_classes]


# ----------------------- Deterministic parameter setup ---------------------- #
def _bn_fold(w, b, gamma, beta, mean, var, eps=1e-5):
    """Fold BatchNorm (eval mode, running stats) into a preceding linear layer."""
    s = gamma / jnp.sqrt(var + eps)
    return w * s[None, :], (b - mean) * s + beta


def make_params(num_classes, key):
    dims = [(3, 64), (64, 128), (128, 256), (256, 512)]
    params = {}
    keys = jax.random.split(key, 16)
    ki = 0

    def bn_stats(c, idx):
        gamma = 1.0 + 0.01 * jnp.arange(c, dtype=jnp.float32)
        beta = 0.02 * jnp.arange(c, dtype=jnp.float32) - 0.01 * idx
        mean = 0.005 * jnp.arange(c, dtype=jnp.float32)
        var = 1.0 + 0.03 * (jnp.arange(c, dtype=jnp.float32) % 7)
        return gamma, beta, mean, var

    for i, (cin, cout) in enumerate(dims):
        w = jax.random.normal(keys[ki], (cin, cout), jnp.float32) * (1.0 / jnp.sqrt(cin)); ki += 1
        b = jax.random.normal(keys[ki], (cout,), jnp.float32) * 0.05; ki += 1
        wf, bf = _bn_fold(w, b, *bn_stats(cout, i))
        params[f"w{i+1}"] = wf
        params[f"b{i+1}"] = bf.reshape(1, cout)

    w = jax.random.normal(keys[ki], (512, 256), jnp.float32) * (1.0 / jnp.sqrt(512.0)); ki += 1
    b = jax.random.normal(keys[ki], (256,), jnp.float32) * 0.05; ki += 1
    wf, bf = _bn_fold(w, b, *bn_stats(256, 5))
    params["wf1"] = wf
    params["bf1"] = bf.reshape(1, 256)

    w = jax.random.normal(keys[ki], (256, num_classes), jnp.float32) * (1.0 / jnp.sqrt(256.0)); ki += 1
    b = jax.random.normal(keys[ki], (num_classes,), jnp.float32) * 0.05; ki += 1
    params["wf2"] = w
    params["bf2"] = b.reshape(1, num_classes)
    return params


# -------------------------- Pure-JAX reference ------------------------------ #
def reference_forward(x, params):
    """Mirrors the kernel's numerics: bf16 matmul operands, f32 accumulation."""
    B, N, _ = x.shape
    h = x.reshape(B * N, 3).astype(jnp.bfloat16)
    for i in range(1, 5):
        h = jnp.maximum(
            jnp.dot(h, params[f"w{i}"].astype(jnp.bfloat16),
                    preferred_element_type=jnp.float32) + params[f"b{i}"], 0.0)
        if i < 4:
            h = h.astype(jnp.bfloat16)
    g = jnp.max(h.reshape(B, N, 512), axis=1)
    f = jnp.maximum(
        jnp.dot(g.astype(jnp.bfloat16), params["wf1"].astype(jnp.bfloat16),
                preferred_element_type=jnp.float32) + params["bf1"], 0.0)
    return (jnp.dot(f.astype(jnp.bfloat16), params["wf2"].astype(jnp.bfloat16),
                    preferred_element_type=jnp.float32) + params["bf2"])


if __name__ == "__main__":
    B, N, num_classes = 4, 1000, 10
    key = jax.random.PRNGKey(0)
    k_x, k_p = jax.random.split(key)

    x = jax.random.normal(k_x, (B, N, 3), jnp.float32)   # (batch, points, xyz)
    params = make_params(num_classes, k_p)

    ref = reference_forward(x, params)

    # Default path: one point-chunk per batch item (tile_n = round_up(N, 16)).
    out = jax.block_until_ready(simple_pointnet_forward(x, params, num_classes))
    assert out.shape == (B, num_classes)
    assert jnp.allclose(out, ref, atol=2e-2, rtol=2e-2), "mismatch (single-chunk path)"

    # Multi-chunk path: exercises the running-max accumulator + point padding.
    out_mc = jax.block_until_ready(
        simple_pointnet_forward(x, params, num_classes, max_tile_n=256))
    assert jnp.allclose(out_mc, ref, atol=2e-2, rtol=2e-2), "mismatch (multi-chunk path)"

    print("KERNEL_OK")
</pallas_src>

<mosaic_0001>
module attributes {stable_mosaic.version = 11 : i64} {
  func.func @pointnet_feat_kernel(%arg0: i32, %arg1: i32, %arg2: memref<1x1008x8xbf16, #tpu.memory_space<vmem>>, %arg3: memref<8x64xbf16, #tpu.memory_space<vmem>>, %arg4: memref<1x64xf32, #tpu.memory_space<vmem>>, %arg5: memref<64x128xbf16, #tpu.memory_space<vmem>>, %arg6: memref<1x128xf32, #tpu.memory_space<vmem>>, %arg7: memref<128x256xbf16, #tpu.memory_space<vmem>>, %arg8: memref<1x256xf32, #tpu.memory_space<vmem>>, %arg9: memref<256x512xbf16, #tpu.memory_space<vmem>>, %arg10: memref<1x512xf32, #tpu.memory_space<vmem>>, %arg11: memref<1x1x512xf32, #tpu.memory_space<vmem>>) attributes {dimension_semantics = [#tpu.dimension_semantics<parallel>, #tpu.dimension_semantics<arbitrary>], iteration_bounds = array<i64: 4, 1>, scalar_prefetch = 0 : i64, scratch_operands = 0 : i64, tpu.core_type = #tpu.core_type<tc>, window_params = [{transform_indices = @transform_0, window_bounds = array<i64: 1, 1008, 8>}, {pipeline_mode = #tpu.pipeline_mode<synchronous>, transform_indices = @transform_1, window_bounds = array<i64: 8, 64>}, {pipeline_mode = #tpu.pipeline_mode<synchronous>, transform_indices = @transform_2, window_bounds = array<i64: 1, 64>}, {pipeline_mode = #tpu.pipeline_mode<synchronous>, transform_indices = @transform_3, window_bounds = array<i64: 64, 128>}, {pipeline_mode = #tpu.pipeline_mode<synchronous>, transform_indices = @transform_4, window_bounds = array<i64: 1, 128>}, {pipeline_mode = #tpu.pipeline_mode<synchronous>, transform_indices = @transform_5, window_bounds = array<i64: 128, 256>}, {pipeline_mode = #tpu.pipeline_mode<synchronous>, transform_indices = @transform_6, window_bounds = array<i64: 1, 256>}, {pipeline_mode = #tpu.pipeline_mode<synchronous>, transform_indices = @transform_7, window_bounds = array<i64: 256, 512>}, {pipeline_mode = #tpu.pipeline_mode<synchronous>, transform_indices = @transform_8, window_bounds = array<i64: 1, 512>}, {transform_indices = @transform_9, window_bounds = array<i64: 1, 1, 512>}]} {
    %c0_i32 = arith.constant 0 : i32
    %0 = arith.cmpi eq, %arg1, %c0_i32 : i32
    %1 = arith.extui %0 : i1 to i32
    %c0_i32_0 = arith.constant 0 : i32
    %2 = arith.cmpi ne, %1, %c0_i32_0 : i32
    scf.if %2 {
      %cst_32 = arith.constant 0.000000e+00 : f32
      %42 = vector.broadcast %cst_32 : f32 to vector<1x512xf32>
      %c0_33 = arith.constant 0 : index
      %c0_34 = arith.constant 0 : index
      %c0_35 = arith.constant 0 : index
      %43 = vector.load %arg11[%c0_33, %c0_34, %c0_35] : memref<1x1x512xf32, #tpu.memory_space<vmem>>, vector<1x1x512xf32>
      %44 = vector.shape_cast %43 : vector<1x1x512xf32> to vector<1x512xf32>
      %45 = vector.shape_cast %42 : vector<1x512xf32> to vector<1x1x512xf32>
      tpu.vector_store %arg11[%c0_33, %c0_34, %c0_35], %45 {strides = array<i32>} : memref<1x1x512xf32, #tpu.memory_space<vmem>>, vector<1x1x512xf32>,
    } else {
    }
    %c0 = arith.constant 0 : index
    %c0_1 = arith.constant 0 : index
    %c0_2 = arith.constant 0 : index
    %3 = vector.load %arg2[%c0, %c0_1, %c0_2] : memref<1x1008x8xbf16, #tpu.memory_space<vmem>>, vector<1x1008x8xbf16>
    %4 = vector.shape_cast %3 : vector<1x1008x8xbf16> to vector<1008x8xbf16>
    %c0_3 = arith.constant 0 : index
    %c0_4 = arith.constant 0 : index
    %5 = vector.load %arg3[%c0_3, %c0_4] : memref<8x64xbf16, #tpu.memory_space<vmem>>, vector<8x64xbf16>
    %cst = arith.constant dense<0.000000e+00> : vector<1008x64xf32>
    %6 = tpu.matmul %4, %5, %cst {dimension_numbers = #tpu.dot_dimension_numbers<[1], [0], [0], [1], [0, 0, 1, 1], [], []>} : vector<1008x8xbf16>, vector<8x64xbf16>, vector<1008x64xf32> -> vector<1008x64xf32>
    %c0_5 = arith.constant 0 : index
    %c0_6 = arith.constant 0 : index
    %7 = vector.load %arg4[%c0_5, %c0_6] : memref<1x64xf32, #tpu.memory_space<vmem>>, vector<1x64xf32>
    %8 = vector.broadcast %7 : vector<1x64xf32> to vector<1008x64xf32>
    %9 = arith.addf %6, %8 : vector<1008x64xf32>
    %cst_7 = arith.constant 0.000000e+00 : f32
    %10 = vector.broadcast %cst_7 : f32 to vector<1008x64xf32>
    %11 = arith.maximumf %9, %10 : vector<1008x64xf32>
    %12 = arith.truncf %11 : vector<1008x64xf32> to vector<1008x64xbf16>
    %c0_8 = arith.constant 0 : index
    %c0_9 = arith.constant 0 : index
    %13 = vector.load %arg5[%c0_8, %c0_9] : memref<64x128xbf16, #tpu.memory_space<vmem>>, vector<64x128xbf16>
    %cst_10 = arith.constant dense<0.000000e+00> : vector<1008x128xf32>
    %14 = tpu.matmul %12, %13, %cst_10 {dimension_numbers = #tpu.dot_dimension_numbers<[1], [0], [0], [1], [0, 0, 1, 1], [], []>} : vector<1008x64xbf16>, vector<64x128xbf16>, vector<1008x128xf32> -> vector<1008x128xf32>
    %c0_11 = arith.constant 0 : index
    %c0_12 = arith.constant 0 : index
    %15 = vector.load %arg6[%c0_11, %c0_12] : memref<1x128xf32, #tpu.memory_space<vmem>>, vector<1x128xf32>
    %16 = vector.broadcast %15 : vector<1x128xf32> to vector<1008x128xf32>
    %17 = arith.addf %14, %16 : vector<1008x128xf32>
    %cst_13 = arith.constant 0.000000e+00 : f32
    %18 = vector.broadcast %cst_13 : f32 to vector<1008x128xf32>
    %19 = arith.maximumf %17, %18 : vector<1008x128xf32>
    %20 = arith.truncf %19 : vector<1008x128xf32> to vector<1008x128xbf16>
    %c0_14 = arith.constant 0 : index
    %c0_15 = arith.constant 0 : index
    %21 = vector.load %arg7[%c0_14, %c0_15] : memref<128x256xbf16, #tpu.memory_space<vmem>>, vector<128x256xbf16>
    %cst_16 = arith.constant dense<0.000000e+00> : vector<1008x256xf32>
    %22 = tpu.matmul %20, %21, %cst_16 {dimension_numbers = #tpu.dot_dimension_numbers<[1], [0], [0], [1], [0, 0, 1, 1], [], []>} : vector<1008x128xbf16>, vector<128x256xbf16>, vector<1008x256xf32> -> vector<1008x256xf32>
    %c0_17 = arith.constant 0 : index
    %c0_18 = arith.constant 0 : index
    %23 = vector.load %arg8[%c0_17, %c0_18] : memref<1x256xf32, #tpu.memory_space<vmem>>, vector<1x256xf32>
    %24 = vector.broadcast %23 : vector<1x256xf32> to vector<1008x256xf32>
    %25 = arith.addf %22, %24 : vector<1008x256xf32>
    %cst_19 = arith.constant 0.000000e+00 : f32
    %26 = vector.broadcast %cst_19 : f32 to vector<1008x256xf32>
    %27 = arith.maximumf %25, %26 : vector<1008x256xf32>
    %28 = arith.truncf %27 : vector<1008x256xf32> to vector<1008x256xbf16>
    %c0_20 = arith.constant 0 : index
    %c0_21 = arith.constant 0 : index
    %29 = vector.load %arg9[%c0_20, %c0_21] : memref<256x512xbf16, #tpu.memory_space<vmem>>, vector<256x512xbf16>
    %cst_22 = arith.constant dense<0.000000e+00> : vector<1008x512xf32>
    %30 = tpu.matmul %28, %29, %cst_22 {dimension_numbers = #tpu.dot_dimension_numbers<[1], [0], [0], [1], [0, 0, 1, 1], [], []>} : vector<1008x256xbf16>, vector<256x512xbf16>, vector<1008x512xf32> -> vector<1008x512xf32>
    %c0_23 = arith.constant 0 : index
    %c0_24 = arith.constant 0 : index
    %31 = vector.load %arg10[%c0_23, %c0_24] : memref<1x512xf32, #tpu.memory_space<vmem>>, vector<1x512xf32>
    %32 = vector.broadcast %31 : vector<1x512xf32> to vector<1008x512xf32>
    %33 = arith.addf %30, %32 : vector<1008x512xf32>
    %c0_25 = arith.constant 0 : index
    %c0_26 = arith.constant 0 : index
    %c0_27 = arith.constant 0 : index
    %34 = vector.load %arg11[%c0_25, %c0_26, %c0_27] : memref<1x1x512xf32, #tpu.memory_space<vmem>>, vector<1x1x512xf32>
    %35 = vector.shape_cast %34 : vector<1x1x512xf32> to vector<1x512xf32>
    %cst_28 = arith.constant dense<0xFF800000> : vector<512xf32>
    %36 = vector.multi_reduction <maximumf>, %33, %cst_28 [0] : vector<1008x512xf32> to vector<512xf32>
    %37 = vector.shape_cast %36 : vector<512xf32> to vector<1x512xf32>
    %38 = arith.maximumf %35, %37 : vector<1x512xf32>
    %c0_29 = arith.constant 0 : index
    %c0_30 = arith.constant 0 : index
    %c0_31 = arith.constant 0 : index
    %39 = vector.load %arg11[%c0_29, %c0_30, %c0_31] : memref<1x1x512xf32, #tpu.memory_space<vmem>>, vector<1x1x512xf32>
    %40 = vector.shape_cast %39 : vector<1x1x512xf32> to vector<1x512xf32>
    %41 = vector.shape_cast %38 : vector<1x512xf32> to vector<1x1x512xf32>
    tpu.vector_store %arg11[%c0_29, %c0_30, %c0_31], %41 {strides = array<i32>} : memref<1x1x512xf32, #tpu.memory_space<vmem>>, vector<1x1x512xf32>,
    return
  }
  func.func @transform_0(%arg0: i32, %arg1: i32) -> (i32, i32, i32) {
    %c0_i32 = arith.constant 0 : i32
    %c0_i32_0 = arith.constant 0 : i32
    return %arg0, %arg1, %c0_i32 : i32, i32, i32
  }
  func.func @transform_1(%arg0: i32, %arg1: i32) -> (i32, i32) {
    %c0_i32 = arith.constant 0 : i32
    %c0_i32_0 = arith.constant 0 : i32
    %c0_i32_1 = arith.constant 0 : i32
    return %c0_i32, %c0_i32_0 : i32, i32
  }
  func.func @transform_2(%arg0: i32, %arg1: i32) -> (i32, i32) {
    %c0_i32 = arith.constant 0 : i32
    %c0_i32_0 = arith.constant 0 : i32
    %c0_i32_1 = arith.constant 0 : i32
    return %c0_i32, %c0_i32_0 : i32, i32
  }
  func.func @transform_3(%arg0: i32, %arg1: i32) -> (i32, i32) {
    %c0_i32 = arith.constant 0 : i32
    %c0_i32_0 = arith.constant 0 : i32
    %c0_i32_1 = arith.constant 0 : i32
    return %c0_i32, %c0_i32_0 : i32, i32
  }
  func.func @transform_4(%arg0: i32, %arg1: i32) -> (i32, i32) {
    %c0_i32 = arith.constant 0 : i32
    %c0_i32_0 = arith.constant 0 : i32
    %c0_i32_1 = arith.constant 0 : i32
    return %c0_i32, %c0_i32_0 : i32, i32
  }
  func.func @transform_5(%arg0: i32, %arg1: i32) -> (i32, i32) {
    %c0_i32 = arith.constant 0 : i32
    %c0_i32_0 = arith.constant 0 : i32
    %c0_i32_1 = arith.constant 0 : i32
    return %c0_i32, %c0_i32_0 : i32, i32
  }
  func.func @transform_6(%arg0: i32, %arg1: i32) -> (i32, i32) {
    %c0_i32 = arith.constant 0 : i32
    %c0_i32_0 = arith.constant 0 : i32
    %c0_i32_1 = arith.constant 0 : i32
    return %c0_i32, %c0_i32_0 : i32, i32
  }
  func.func @transform_7(%arg0: i32, %arg1: i32) -> (i32, i32) {
    %c0_i32 = arith.constant 0 : i32
    %c0_i32_0 = arith.constant 0 : i32
    %c0_i32_1 = arith.constant 0 : i32
    return %c0_i32, %c0_i32_0 : i32, i32
  }
  func.func @transform_8(%arg0: i32, %arg1: i32) -> (i32, i32) {
    %c0_i32 = arith.constant 0 : i32
    %c0_i32_0 = arith.constant 0 : i32
    %c0_i32_1 = arith.constant 0 : i32
    return %c0_i32, %c0_i32_0 : i32, i32
  }
  func.func @transform_9(%arg0: i32, %arg1: i32) -> (i32, i32, i32) {
    %c0_i32 = arith.constant 0 : i32
    %c0_i32_0 = arith.constant 0 : i32
    %c0_i32_1 = arith.constant 0 : i32
    return %arg0, %c0_i32, %c0_i32_0 : i32, i32, i32
  }
}

</mosaic_0001>

<bundles_post_ra>
// kernel: tpu_custom_call.1
= control target key start
LH: loop header
LB: loop body
LE: loop exit
PB: predicated region body
PF: predicated region fallthrough
CT: control target
= control target key end

     0   :  { %14 = vsyncpa [#allocation3], 0  ;;  %s10211_s0 = inlined_call_operand.vmem [shape: bf16[4,1008,8], index: 0, kind: input, shape index: {}]   ;;  %s10212_s1 = inlined_call_operand.vmem [shape: bf16[8,64], index: 1, kind: input, shape index: {}]   ;;  %s10213_s2 = inlined_call_operand.vmem [shape: f32[1,64], index: 2, kind: input, shape index: {}]   ;;  %s10214_s3 = inlined_call_operand.vmem [shape: bf16[64,128], index: 3, kind: input, shape index: {}]   ;;  %s10215_s4 = inlined_call_operand.vmem [shape: f32[1,128], index: 4, kind: input, shape index: {}]   ;;  %s10216_s5 = inlined_call_operand.vmem [shape: bf16[128,256], index: 5, kind: input, shape index: {}]   ;;  %s10217_s6 = inlined_call_operand.vmem [shape: f32[1,256], index: 6, kind: input, shape index: {}]   ;;  %s10218_s7 = inlined_call_operand.vmem [shape: bf16[256,512], index: 7, kind: input, shape index: {}]   ;;  %s10219_s8 = inlined_call_operand.vmem [shape: f32[1,512], index: 8, kind: input, shape index: {}]   ;;  %s10220_s9 = inlined_call_operand.hbm [shape: f32[4,1,512], index: 9, kind: output, shape index: {}]  }
   0x1   :  { %16 = vsyncpa [#allocation3 + $0x1], 0  ;;  %s7543_s30 = smov 0   ;;  %s7545_s10 = smov 0  }
   0x2   :  { %s7547_s11 = smov 0   ;;  %s7549_s12 = smov 0  }
   0x3   :  { %s7551_s13 = smov 0   ;;  %s7553_s14 = smov 0  }
   0x4 LB: > { %s6222_s15 = sadd.s32 4294967295, %s7486_s14   ;;  %s6223_s16 = sadd.s32 4294967294, %s7486_s14   ;;  %s7486_s14 = sphi %s7553_s14, %s22_s14   ;;  %s7482_s13 = sphi %s7551_s13, %s10429_s13   ;;  %s7478_s12 = sphi %s7549_s12, %s10428_s12   ;;  %s7474_s11 = sphi %s7547_s11, %s10427_s11   ;;  %s7470_s10 = sphi %s7545_s10, %s10426_s10   ;;  %s7466_s30 = sphi %s7543_s30, %s10425_s30  }
   0x5   : > { %s34_s17 = sadd.s32 1, %s7482_s13  ;;  %s237_s18 = sadd.s32 1, %s7474_s11 }
   0x6   : > { %p36_p0 = scmp.ge.s32.totalorder %s34_s17, 4  ;;  %p247_p1 = scmp.ne.s32.totalorder %s7474_s11, %s7470_s10 }
   0x7   : > { %p248_p2 = scmp.eq.s32.totalorder %s6222_s15, 3  ;;  %p253_p3 = scmp.ne.s32.totalorder %s7470_s10, %s7466_s30 }
   0x8   : > { %s10431_s17 = smov (%p36_p0, %s34_s17), 0  ;;  %p254_p5 = scmp.eq.s32.totalorder %s6223_s16, 3 }
   0x9   : > { %p7583_p4 = por %p248_p2, %p247_p1  ;;  %s234_s20 = ssub.s32 %s7482_s13, %s10431_s17 }
   0xa   : > { %p6226_p6 = scmp.ge.s32.totalorder %s7486_s14, 1  ;;  %p235_p7 = scmp.eq.s32.totalorder %s234_s20, 0 }
   0xb   : > { %p7590_p8 = por %p254_p5, %p253_p3  ;;  %p309_p9 = scmp.lt.s32.totalorder %s7486_s14, 5 }
   0xc   : > { %s7596_s22 = scalar_select %p235_p7, %s7474_s11, %s237_s18  }
   0xd   : > { %p310_p10 = pnand %p6226_p6, %p309_p9 }
   0xf   : > { %313 = sbr.rel (%p310_p10) target bundleno = 1753 (0x6d9), region = 56 }
  0x16   : > { %v495_v0 = vld [vmem:[%s10212_s1] sm:$0xf]  ;;  %vm1008_vm0 = vcmask 1043456   ;;  %p350_p11 = scmp.lt.s32.totalorder %s7478_s12, 3  ;;  %v10221_v1 = vmov 0.0   ;;  %vm7489_vm1 = vmmov 0  }
  0x17   : > { %7155 = vmatprep.subr.bf16.mxu1 %v10221_v1  ;;  %v1010_v2 = vsel %vm1008_vm0, %v495_v0, 0  ;;  %6771 = vmatprep.mubr.msk.bf16.mxu1 %vm7489_vm1, %v10221_v1  ;;  %v7218_v3 = vld [vmem:[%s10214_s3] sm:$0xff]   ;;  %vm818_vm2 = vcmask 64512   ;;  %v7231_v5 = vld [vmem:[%s10214_s3 + $0x8] sm:$0xff]   ;;  %v7248_v8 = vld [vmem:[%s10214_s3 + $0x10] sm:$0xff]   ;;  %vm1777_vm3 = vcmask 523264  }
  0x18   : > { %7156 = vmatpush3.bf16.msra.mxu1 %v1010_v2  ;;  %s351_s25 = scalar_select %p350_p11, %s7478_s12, 3  ;;  %6641 = vmatprep.subr.bf16.mxu0 %v10221_v1  ;;  %v7265_v22 = vld [vmem:[%s10214_s3 + $0x18] sm:$0xff]   ;;  %v7272_v30 = vld [vmem:[%s10216_s5] ss:$8 sps:$4 sm:$0xff]   ;;  %v7274_v31 = vld [vmem:[%s10216_s5 + $0x4] ss:$8 sps:$4 sm:$0xff]  }
  0x19   : > { %6895 = vmatprep.subr.bf16.mxu1 %v10221_v1  ;;  %6642 = vmatpush3.bf16.msra.mxu0 %v1010_v2  ;;  %v7283_v40 = vld [vmem:[%s10216_s5 + $0x10] ss:$8 sps:$4 sm:$0xff]   ;;  %v7285_v41 = vld [vmem:[%s10216_s5 + $0x14] ss:$8 sps:$4 sm:$0xff]   ;;  %v7290_v50 = vld [vmem:[%s10216_s5 + $0x20] ss:$8 sps:$4 sm:$0xff]  }
  0x1a   : > { %s7157_s26 = smul.u32 504, %s351_s25  ;;  %6643 = vmatprep.mubr.msk.bf16.mxu0 %vm7489_vm1, %v10221_v1  ;;  %2801 = vmatprep.subr.bf16.mxu0 %v7274_v31  ;;  %v7292_v51 = vld [vmem:[%s10216_s5 + $0x24] ss:$8 sps:$4 sm:$0xff]   ;;  %v7293_v60 = vld [vmem:[%s10216_s5 + $0x30] ss:$8 sps:$4 sm:$0xff]   ;;  %s346_s29 = sand.u32 1, %s7470_s10  }
  0x1b   : > { %v7295_v61 = vld [vmem:[%s10216_s5 + $0x34] ss:$8 sps:$4 sm:$0xff]   ;;  %s6227_s15 = sshll.u32 %s346_s29, 2  ;;  %s6509_s20 = sshll.u32 %s7478_s12, 6 }
  0x1c   : > { %s7616_s16 = scalar_lea.vmem %s10211_s0, %s7157_s26  ;;  %s10087_s18 = scalar_lea.vmem [#allocation2], %s6227_s15 }
  0x1d   : > { %v7217_v4 = vld [vmem:[%s7616_s16 + $0x100] sm:$0xff]   ;;  %v7219_v7 = vld [vmem:[%s7616_s16 + $0x108] sm:$0xff]   ;;  %v7220_v10 = vld [vmem:[%s7616_s16 + $0x110] sm:$0xff]   ;;  %s10159_s25 = scalar_lea.hbm %s10220_s9, %s6509_s20  ;;  %s6135_s26 = scalar_lea.sflag [#allocation3], %s346_s29 }
  0x1e   : > { %6772 = vmatmul.mubr.msk.bf16.vlgmr.msra.gmra.mrb[0].mxu1 %vm818_vm2, %v7217_v4  ;;  %v7222_v6 = vld [vmem:[%s7616_s16] sm:$0xff]   ;;  %v7224_v9 = vld [vmem:[%s7616_s16 + $0x8] sm:$0xff]   ;;  %v7226_v11 = vld [vmem:[%s7616_s16 + $0x10] sm:$0xff]   ;;  %s7492_s12 = smov [#allocation2]  }
  0x1f   : > { %6896 = vmatpush3.bf16.msra.mxu1 %v7218_v3  ;;  %6775 = vmatprep.mubr.msk.bf16.mxu1 %vm7489_vm1, %v10221_v1  ;;  %v7221_v12 = vld [vmem:[%s7616_s16 + $0x118] sm:$0xff]   ;;  %v7223_v14 = vld [vmem:[%s7616_s16 + $0x120] sm:$0xff]   ;;  %v7225_v16 = vld [vmem:[%s7616_s16 + $0x128] sm:$0xff]   ;;  %s7412_s28 = sshll.u32 %s7492_s12, 4  ;;  %s7413_s28 = int_to_ptr.vmem [resolvable:$false] %s7412_s28 }
  0x20   : > { %6897 = vmatprep.subr.bf16.mxu1 %v10221_v1  ;;  %6644 = vmatmul.mubr.msk.bf16.vlgmr.msra.gmra.mrb[0].mxu0 %vm818_vm2, %v7222_v6  ;;  %v7228_v13 = vld [vmem:[%s7616_s16 + $0x18] sm:$0xff]   ;;  %v7230_v15 = vld [vmem:[%s7616_s16 + $0x20] sm:$0xff]   ;;  %v7233_v17 = vld [vmem:[%s7616_s16 + $0x28] sm:$0xff]   ;;  %s7414_s15 = scalar_lea.vmem %s7413_s28, 128 }
  0x21   : > { %6647 = vmatprep.mubr.msk.bf16.mxu0 %vm7489_vm1, %v10221_v1  ;;  %v7227_v18 = vld [vmem:[%s7616_s16 + $0x130] sm:$0xff]   ;;  %v7229_v20 = vld [vmem:[%s7616_s16 + $0x138] sm:$0xff]   ;;  %v7232_v23 = vld [vmem:[%s7616_s16 + $0x140] sm:$0xff]   ;;  %2802 = vmatpush1.bf16.msra.mxu0 %v7272_v30 }
  0x22   : > { %v7235_v19 = vld [vmem:[%s7616_s16 + $0x30] sm:$0xff]   ;;  %v7237_v21 = vld [vmem:[%s7616_s16 + $0x38] sm:$0xff]   ;;  %v7239_v24 = vld [vmem:[%s7616_s16 + $0x40] sm:$0xff]   ;;  %2803 = vmatprep.subr.bf16.mxu0 %v7285_v41 }
  0x23   : > { %6898 = vmatpush3.bf16.msra.mxu1 %v7231_v5  ;;  %v7234_v25 = vld [vmem:[%s7616_s16 + $0x148] sm:$0xff]   ;;  %v7236_v27 = vld [vmem:[%s7616_s16 + $0x150] sm:$0xff]   ;;  %v7238_v29 = vld [vmem:[%s7616_s16 + $0x158] sm:$0xff]  }
  0x24   : > { %6899 = vmatprep.subr.bf16.mxu1 %v10221_v1  ;;  %v7241_v26 = vld [vmem:[%s7616_s16 + $0x48] sm:$0xff]   ;;  %v7243_v28 = vld [vmem:[%s7616_s16 + $0x50] sm:$0xff]   ;;  %v7245_v32 = vld [vmem:[%s7616_s16 + $0x58] sm:$0xff]  }
  0x25   : > { %v7240_v33 = vld [vmem:[%s7616_s16 + $0x160] sm:$0xff]   ;;  %v7242_v35 = vld [vmem:[%s7616_s16 + $0x168] sm:$0xff]   ;;  %v7244_v37 = vld [vmem:[%s7616_s16 + $0x170] sm:$0xff]   ;;  %2804 = vmatpush1.bf16.msra.mxu0 %v7283_v40 }
  0x26   : > { %6776 = vmatmul.mubr.msk.bf16.gmra.mrb[4].mxu1 %vm818_vm2, %v7219_v7  ;;  %v7247_v34 = vld [vmem:[%s7616_s16 + $0x60] sm:$0xff]   ;;  %v7250_v36 = vld [vmem:[%s7616_s16 + $0x68] sm:$0xff]   ;;  %v7252_v38 = vld [vmem:[%s7616_s16 + $0x70] sm:$0xff]   ;;  %2805 = vmatprep.subr.bf16.mxu0 %v7292_v51 }
  0x27   : > { %6779 = vmatprep.mubr.msk.bf16.mxu1 %vm7489_vm1, %v10221_v1  ;;  %6900 = vmatpush3.bf16.msra.mxu1 %v7248_v8  ;;  %v7246_v39 = vld [vmem:[%s7616_s16 + $0x178] sm:$0xff]   ;;  %v7249_v43 = vld [vmem:[%s7616_s16 + $0x180] sm:$0xff]   ;;  %v7251_v45 = vld [vmem:[%s7616_s16 + $0x188] sm:$0xff]  }
  0x28   : > { %6901 = vmatprep.subr.bf16.mxu1 %v10221_v1  ;;  %6648 = vmatmul.mubr.msk.bf16.gmra.mrb[4].mxu0 %vm818_vm2, %v7224_v9  ;;  %v7254_v42 = vld [vmem:[%s7616_s16 + $0x78] sm:$0xff]   ;;  %v7256_v44 = vld [vmem:[%s7616_s16 + $0x80] sm:$0xff]   ;;  %v7258_v46 = vld [vmem:[%s7616_s16 + $0x88] sm:$0xff]  }
  0x29   : > { %6651 = vmatprep.mubr.msk.bf16.mxu0 %vm7489_vm1, %v10221_v1  ;;  %v7253_v47 = vld [vmem:[%s7616_s16 + $0x190] sm:$0xff]   ;;  %v7255_v49 = vld [vmem:[%s7616_s16 + $0x198] sm:$0xff]   ;;  %2806 = vmatpush1.bf16.msra.mxu0 %v7290_v50  ;;  %v7257_v53 = vld [vmem:[%s7616_s16 + $0x1a0] sm:$0xff]  }
  0x2a   : > { %v7260_v48 = vld [vmem:[%s7616_s16 + $0x90] sm:$0xff]   ;;  %v7262_v52 = vld [vmem:[%s7616_s16 + $0x98] sm:$0xff]   ;;  %v7264_v54 = vld [vmem:[%s7616_s16 + $0xa0] sm:$0xff]   ;;  %2807 = vmatprep.subr.bf16.mxu0 %v7295_v61 }
  0x2b   : > { %6902 = vmatpush3.bf16.msra.mxu1 %v7265_v22  ;;  %v7259_v55 = vld [vmem:[%s7616_s16 + $0x1a8] sm:$0xff]   ;;  %v7261_v57 = vld [vmem:[%s7616_s16 + $0x1b0] sm:$0xff]   ;;  %v7263_v59 = vld [vmem:[%s7616_s16 + $0x1b8] sm:$0xff]  }
  0x2c   : > { %v7267_v56 = vld [vmem:[%s7616_s16 + $0xa8] sm:$0xff]   ;;  %v7269_v58 = vld [vmem:[%s7616_s16 + $0xb0] sm:$0xff]   ;;  %v7271_v62 = vld [vmem:[%s7616_s16 + $0xb8] sm:$0xff]  }
  0x2d   : > { %2808 = vmatpush1.bf16.msra.mxu0 %v7293_v60  ;;  %v7266_v63 = vld [vmem:[%s7616_s16 + $0x1c0] sm:$0xff]   ;;  %v7268_v2 = vld [vmem:[%s7616_s16 + $0x1c8] sm:$0xff]   ;;  %v7270_v4 = vld [vmem:[%s7616_s16 + $0x1d0] sm:$0xff]  }
  0x2e   : > { %6780 = vmatmul.mubr.msk.bf16.gmra.mrb[8].mxu1 %vm818_vm2, %v7220_v10  ;;  %v7276_v0 = vld [vmem:[%s7616_s16 + $0xc0] sm:$0xff]   ;;  %v7278_v3 = vld [vmem:[%s7616_s16 + $0xc8] sm:$0xff]   ;;  %v7280_v5 = vld [vmem:[%s7616_s16 + $0xd0] sm:$0xff]  }
  0x2f   : > { %6783 = vmatprep.mubr.msk.bf16.mxu1 %vm7489_vm1, %v10221_v1  ;;  %v7868_v6 = vld [vmem:[%s10213_s2] ss:$0 sm:$0xff]  ;;  %v7275_v10 = vld [vmem:[%s7616_s16 + $0x1d8] sm:$0xff]   ;;  %v7279_v50 = vld [vmem:[%s7616_s16 + $0x1e8] sm:$0xff]  }
  0x30   : > { %6652 = vmatmul.mubr.msk.bf16.gmra.mrb[8].mxu0 %vm818_vm2, %v7226_v11  ;;  %v7277_v30 = vld [vmem:[%s7616_s16 + $0x1e0] sm:$0xff]   ;;  %v7287_v61 = vld [vmem:[%s7616_s16 + $0xe8] sm:$0xff]  }
  0x31   : > { %6655 = vmatprep.mubr.msk.bf16.mxu0 %vm7489_vm1, %v10221_v1  ;;  %v7286_v41 = vld [vmem:[%s7616_s16 + $0xe0] sm:$0xff]  }
  0x36   : > { %6784 = vmatmul.mubr.msk.bf16.gmra.mrb[12].mxu1 %vm818_vm2, %v7221_v12 }
  0x37   : > { %6787 = vmatprep.mubr.msk.bf16.mxu1 %vm7489_vm1, %v10221_v1 }
  0x38   : > { %6656 = vmatmul.mubr.msk.bf16.gmra.mrb[12].mxu0 %vm818_vm2, %v7228_v13 }
  0x39   : > { %6659 = vmatprep.mubr.msk.bf16.mxu0 %vm7489_vm1, %v10221_v1 }
  0x3e   : > { %6788 = vmatmul.mubr.msk.bf16.gmra.mrb[16].mxu1 %vm818_vm2, %v7223_v14  ;;  %v7296_v14 = vld [vmem:[%s10216_s5 + $0x40] ss:$8 sps:$4 sm:$0xff]  }
  0x3f   : > { %6791 = vmatprep.mubr.msk.bf16.mxu1 %vm7489_vm1, %v10221_v1 }
  0x40   : > { %6660 = vmatmul.mubr.msk.bf16.gmra.mrb[16].mxu0 %vm818_vm2, %v7230_v15  ;;  %v7298_v15 = vld [vmem:[%s10216_s5 + $0x44] ss:$8 sps:$4 sm:$0xff]  }
  0x41   : > { %6663 = vmatprep.mubr.msk.bf16.mxu0 %vm7489_vm1, %v10221_v1  ;;  %2809 = vmatprep.subr.bf16.mxu0 %v7298_v15 }
  0x42   : > { %2810 = vmatpush1.bf16.msra.mxu0 %v7296_v14 }
  0x46   : > { %6792 = vmatmul.mubr.msk.bf16.gmra.mrb[20].mxu1 %vm818_vm2, %v7225_v16 }
  0x47   : > { %6795 = vmatprep.mubr.msk.bf16.mxu1 %vm7489_vm1, %v10221_v1 }
  0x48   : > { %6664 = vmatmul.mubr.msk.bf16.gmra.mrb[20].mxu0 %vm818_vm2, %v7233_v17 }
  0x49   : > { %6667 = vmatprep.mubr.msk.bf16.mxu0 %vm7489_vm1, %v10221_v1 }
  0x4e   : > { %6796 = vmatmul.mubr.msk.bf16.gmra.mrb[24].mxu1 %vm818_vm2, %v7227_v18 }
  0x4f   : > { %6799 = vmatprep.mubr.msk.bf16.mxu1 %vm7489_vm1, %v10221_v1 }
  0x50   : > { %6668 = vmatmul.mubr.msk.bf16.gmra.mrb[24].mxu0 %vm818_vm2, %v7235_v19 }
  0x51   : > { %6671 = vmatprep.mubr.msk.bf16.mxu0 %vm7489_vm1, %v10221_v1 }
  0x56   : > { %6800 = vmatmul.mubr.msk.bf16.gmra.mrb[28].mxu1 %vm818_vm2, %v7229_v20 }
  0x57   : > { %6803 = vmatprep.mubr.msk.bf16.mxu1 %vm7489_vm1, %v10221_v1 }
  0x58   : > { %6672 = vmatmul.mubr.msk.bf16.gmra.mrb[28].mxu0 %vm818_vm2, %v7237_v21  ;;  %v7282_v21 = vld [vmem:[%s7616_s16 + $0xd8] sm:$0xff]  }
  0x59   : > { %6675 = vmatprep.mubr.msk.bf16.mxu0 %vm7489_vm1, %v10221_v1 }
  0x5e   : > { %6804 = vmatmul.mubr.msk.bf16.gmra.mrb[32].mxu1 %vm818_vm2, %v7232_v23 }
  0x5f   : > { %6807 = vmatprep.mubr.msk.bf16.mxu1 %vm7489_vm1, %v10221_v1 }
  0x60   : > { %6676 = vmatmul.mubr.msk.bf16.gmra.mrb[32].mxu0 %vm818_vm2, %v7239_v24 }
  0x61   : > { %6679 = vmatprep.mubr.msk.bf16.mxu0 %vm7489_vm1, %v10221_v1 }
  0x66   : > { %6808 = vmatmul.mubr.msk.bf16.gmra.mrb[36].mxu1 %vm818_vm2, %v7234_v25 }
  0x67   : > { %6811 = vmatprep.mubr.msk.bf16.mxu1 %vm7489_vm1, %v10221_v1 }
  0x68   : > { %6680 = vmatmul.mubr.msk.bf16.gmra.mrb[36].mxu0 %vm818_vm2, %v7241_v26 }
  0x69   : > { %6683 = vmatprep.mubr.msk.bf16.mxu0 %vm7489_vm1, %v10221_v1 }
  0x6e   : > { %6812 = vmatmul.mubr.msk.bf16.gmra.mrb[40].mxu1 %vm818_vm2, %v7236_v27 }
  0x6f   : > { %6815 = vmatprep.mubr.msk.bf16.mxu1 %vm7489_vm1, %v10221_v1 }
  0x70   : > { %6684 = vmatmul.mubr.msk.bf16.gmra.mrb[40].mxu0 %vm818_vm2, %v7243_v28 }
  0x71   : > { %6687 = vmatprep.mubr.msk.bf16.mxu0 %vm7489_vm1, %v10221_v1 }
  0x76   : > { %6816 = vmatmul.mubr.msk.bf16.gmra.mrb[44].mxu1 %vm818_vm2, %v7238_v29 }
  0x77   : > { %6819 = vmatprep.mubr.msk.bf16.mxu1 %vm7489_vm1, %v10221_v1 }
  0x78   : > { %6688 = vmatmul.mubr.msk.bf16.gmra.mrb[44].mxu0 %vm818_vm2, %v7245_v32 }
  0x79   : > { %6691 = vmatprep.mubr.msk.bf16.mxu0 %vm7489_vm1, %v10221_v1 }
  0x7e   : > { %6820 = vmatmul.mubr.msk.bf16.gmra.mrb[48].mxu1 %vm818_vm2, %v7240_v33 }
  0x7f   : > { %6823 = vmatprep.mubr.msk.bf16.mxu1 %vm7489_vm1, %v10221_v1 }
  0x80   : > { %6692 = vmatmul.mubr.msk.bf16.gmra.mrb[48].mxu0 %vm818_vm2, %v7247_v34 }
  0x81   : > { %6695 = vmatprep.mubr.msk.bf16.mxu0 %vm7489_vm1, %v10221_v1 }
  0x86   : > { %6824 = vmatmul.mubr.msk.bf16.gmra.mrb[52].mxu1 %vm818_vm2, %v7242_v35 }
  0x87   : > { %6827 = vmatprep.mubr.msk.bf16.mxu1 %vm7489_vm1, %v10221_v1 }
  0x88   : > { %6696 = vmatmul.mubr.msk.bf16.gmra.mrb[52].mxu0 %vm818_vm2, %v7250_v36 }
  0x89   : > { %6699 = vmatprep.mubr.msk.bf16.mxu0 %vm7489_vm1, %v10221_v1 }
  0x8e   : > { %6828 = vmatmul.mubr.msk.bf16.gmra.mrb[56].mxu1 %vm818_vm2, %v7244_v37 }
  0x8f   : > { %6831 = vmatprep.mubr.msk.bf16.mxu1 %vm7489_vm1, %v10221_v1 }
  0x90   : > { %6700 = vmatmul.mubr.msk.bf16.gmra.mrb[56].mxu0 %vm818_vm2, %v7252_v38 }
  0x91   : > { %6703 = vmatprep.mubr.msk.bf16.mxu0 %vm7489_vm1, %v10221_v1 }
  0x96   : > { %6832 = vmatmul.mubr.msk.bf16.gmra.mrb[60].mxu1 %vm818_vm2, %v7246_v39 }
  0x97   : > { %6835 = vmatprep.mubr.msk.bf16.mxu1 %vm7489_vm1, %v10221_v1 }
  0x98   : > { %6704 = vmatmul.mubr.msk.bf16.gmra.mrb[60].mxu0 %vm818_vm2, %v7254_v42 }
  0x99   : > { %6707 = vmatprep.mubr.msk.bf16.mxu0 %vm7489_vm1, %v10221_v1 }
  0x9e   : > { %6836 = vmatmul.mubr.msk.bf16.gmra.mrb[64].mxu1 %vm818_vm2, %v7249_v43 }
  0x9f   : > { %6839 = vmatprep.mubr.msk.bf16.mxu1 %vm7489_vm1, %v10221_v1 }
  0xa0   : > { %6708 = vmatmul.mubr.msk.bf16.gmra.mrb[64].mxu0 %vm818_vm2, %v7256_v44 }
  0xa1   : > { %6711 = vmatprep.mubr.msk.bf16.mxu0 %vm7489_vm1, %v10221_v1 }
  0xa6   : > { %6840 = vmatmul.mubr.msk.bf16.gmra.mrb[68].mxu1 %vm818_vm2, %v7251_v45 }
  0xa7   : > { %6843 = vmatprep.mubr.msk.bf16.mxu1 %vm7489_vm1, %v10221_v1 }
  0xa8   : > { %6712 = vmatmul.mubr.msk.bf16.gmra.mrb[68].mxu0 %vm818_vm2, %v7258_v46 }
  0xa9   : > { %6715 = vmatprep.mubr.msk.bf16.mxu0 %vm7489_vm1, %v10221_v1 }
  0xae   : > { %6844 = vmatmul.mubr.msk.bf16.gmra.mrb[72].mxu1 %vm818_vm2, %v7253_v47 }
  0xaf   : > { %6847 = vmatprep.mubr.msk.bf16.mxu1 %vm7489_vm1, %v10221_v1 }
  0xb0   : > { %6716 = vmatmul.mubr.msk.bf16.gmra.mrb[72].mxu0 %vm818_vm2, %v7260_v48 }
  0xb1   : > { %6719 = vmatprep.mubr.msk.bf16.mxu0 %vm7489_vm1, %v10221_v1 }
  0xb6   : > { %6848 = vmatmul.mubr.msk.bf16.gmra.mrb[76].mxu1 %vm818_vm2, %v7255_v49 }
  0xb7   : > { %6851 = vmatprep.mubr.msk.bf16.mxu1 %vm7489_vm1, %v10221_v1 }
  0xb8   : > { %6720 = vmatmul.mubr.msk.bf16.gmra.mrb[76].mxu0 %vm818_vm2, %v7262_v52 }
  0xb9   : > { %6723 = vmatprep.mubr.msk.bf16.mxu0 %vm7489_vm1, %v10221_v1 }
  0xbe   : > { %6852 = vmatmul.mubr.msk.bf16.gmra.mrb[80].mxu1 %vm818_vm2, %v7257_v53 }
  0xbf   : > { %6855 = vmatprep.mubr.msk.bf16.mxu1 %vm7489_vm1, %v10221_v1 }
  0xc0   : > { %6724 = vmatmul.mubr.msk.bf16.gmra.mrb[80].mxu0 %vm818_vm2, %v7264_v54 }
  0xc1   : > { %6727 = vmatprep.mubr.msk.bf16.mxu0 %vm7489_vm1, %v10221_v1 }
  0xc6   : > { %6856 = vmatmul.mubr.msk.bf16.gmra.mrb[84].mxu1 %vm818_vm2, %v7259_v55 }
  0xc7   : > { %6859 = vmatprep.mubr.msk.bf16.mxu1 %vm7489_vm1, %v10221_v1 }
  0xc8   : > { %6728 = vmatmul.mubr.msk.bf16.gmra.mrb[84].mxu0 %vm818_vm2, %v7267_v56 }
  0xc9   : > { %6731 = vmatprep.mubr.msk.bf16.mxu0 %vm7489_vm1, %v10221_v1 }
  0xce   : > { %6860 = vmatmul.mubr.msk.bf16.gmra.mrb[88].mxu1 %vm818_vm2, %v7261_v57 }
  0xcf   : > { %6863 = vmatprep.mubr.msk.bf16.mxu1 %vm7489_vm1, %v10221_v1 }
  0xd0   : > { %6732 = vmatmul.mubr.msk.bf16.gmra.mrb[88].mxu0 %vm818_vm2, %v7269_v58 }
  0xd1   : > { %6735 = vmatprep.mubr.msk.bf16.mxu0 %vm7489_vm1, %v10221_v1 }
  0xd6   : > { %6864 = vmatmul.mubr.msk.bf16.gmra.mrb[92].mxu1 %vm818_vm2, %v7263_v59 }
  0xd7   : > { %6867 = vmatprep.mubr.msk.bf16.mxu1 %vm7489_vm1, %v10221_v1 }
  0xd8   : > { %6736 = vmatmul.mubr.msk.bf16.gmra.mrb[92].mxu0 %vm818_vm2, %v7271_v62 }
  0xd9   : > { %6739 = vmatprep.mubr.msk.bf16.mxu0 %vm7489_vm1, %v10221_v1 }
  0xde   : > { %6868 = vmatmul.mubr.msk.bf16.gmra.mrb[96].mxu1 %vm818_vm2, %v7266_v63 }
  0xdf   : > { %6871 = vmatprep.mubr.msk.bf16.mxu1 %vm7489_vm1, %v10221_v1 }
  0xe0   : > { %6740 = vmatmul.mubr.msk.bf16.gmra.mrb[96].mxu0 %vm818_vm2, %v7276_v0 }
  0xe1   : > { %6743 = vmatprep.mubr.msk.bf16.mxu0 %vm7489_vm1, %v10221_v1 }
  0xe6   : > { %6872 = vmatmul.mubr.msk.bf16.gmra.mrb[100].mxu1 %vm818_vm2, %v7268_v2 }
  0xe7   : > { %6875 = vmatprep.mubr.msk.bf16.mxu1 %vm7489_vm1, %v10221_v1 }
  0xe8   : > { %6744 = vmatmul.mubr.msk.bf16.gmra.mrb[100].mxu0 %vm818_vm2, %v7278_v3 }
  0xe9   : > { %6747 = vmatprep.mubr.msk.bf16.mxu0 %vm7489_vm1, %v10221_v1 }
  0xee   : > { %6876 = vmatmul.mubr.msk.bf16.gmra.mrb[104].mxu1 %vm818_vm2, %v7270_v4 }
  0xef   : > { %6879 = vmatprep.mubr.msk.bf16.mxu1 %vm7489_vm1, %v10221_v1 }
  0xf0   : > { %6748 = vmatmul.mubr.msk.bf16.gmra.mrb[104].mxu0 %vm818_vm2, %v7280_v5 }
  0xf1   : > { %v1302_v7 = vpop.f32.mrb[0].mxu1  ;;  %6751 = vmatprep.mubr.msk.bf16.mxu0 %vm7489_vm1, %v10221_v1 }
  0xf2   : > { %v1303_v8 = vadd.f32 %v7868_v6, %v1302_v7  ;;  %v6773_v9 = vpop.f32.mrb[1].mxu1 }
  0xf3   : > { %v1305_v11 = vpop.f32.mrb[2].mxu1  ;;  %v1046_v16 = vpop.f32.mrb[0].mxu0 }
  0xf4   : > { %v1306_v12 = vadd.f32 %v7868_v6, %v1305_v11  ;;  %v6774_v13 = vpop.f32.mrb[3].mxu1  ;;  %v1613_v17 = vmax.f32 %v1303_v8, 0.0  ;;  %v1047_v19 = vadd.f32 %v7868_v6, %v1046_v16  ;;  %v6645_v20 = vpop.f32.mrb[1].mxu0  ;;  %v7281_v8 = vld [vmem:[%s7616_s16 + $0x1f0] sm:$0xff]  }
  0xf5   : > { %v1049_v22 = vpop.f32.mrb[2].mxu0 }
  0xf6   : > { %v1614_v18 = vmax.f32 %v1306_v12, 0.0  ;;  %6880 = vmatmul.mubr.msk.bf16.gmra.mrb[108].mxu1 %vm818_vm2, %v7275_v10  ;;  %v1549_v24 = vmax.f32 %v1047_v19, 0.0  ;;  %v1050_v25 = vadd.f32 %v7868_v6, %v1049_v22  ;;  %v6646_v26 = vpop.f32.mrb[3].mxu0  ;;  %v7288_v19 = vld [vmem:[%s7616_s16 + $0xf0] sm:$0xff]  }
  0xf7   : > { %6883 = vmatprep.mubr.msk.bf16.mxu1 %vm7489_vm1, %v10221_v1 }
  0xf8   : > { %v7889_v23 = vpack.c.bf16 %v1614_v18, %v1613_v17  ;;  %v1550_v31 = vmax.f32 %v1050_v25, 0.0  ;;  %6752 = vmatmul.mubr.msk.bf16.gmra.mrb[108].mxu0 %vm818_vm2, %v7282_v21 }
  0xf9   : > { %v1310_v27 = vpop.f32.mrb[4].mxu1  ;;  %6755 = vmatprep.mubr.msk.bf16.mxu0 %vm7489_vm1, %v10221_v1 }
  0xfa   : > { %v1311_v28 = vadd.f32 %v7868_v6, %v1310_v27  ;;  %v6777_v29 = vpop.f32.mrb[5].mxu1  ;;  %v7898_v35 = vpack.c.bf16 %v1550_v31, %v1549_v24 }
  0xfb   : > { %v1313_v32 = vpop.f32.mrb[6].mxu1  ;;  %v1054_v36 = vpop.f32.mrb[4].mxu0 }
  0xfc   : > { %v1314_v33 = vadd.f32 %v7868_v6, %v1313_v32  ;;  %v6778_v34 = vpop.f32.mrb[7].mxu1  ;;  %v1615_v37 = vmax.f32 %v1311_v28, 0.0  ;;  %v1055_v39 = vadd.f32 %v7868_v6, %v1054_v36  ;;  %v6649_v40 = vpop.f32.mrb[5].mxu0  ;;  %v7301_v36 = vld [vmem:[%s10216_s5 + $0x54] ss:$8 sps:$4 sm:$0xff]  }
  0xfd   : > { %v1057_v42 = vpop.f32.mrb[6].mxu0  ;;  %v7299_v34 = vld [vmem:[%s10216_s5 + $0x50] ss:$8 sps:$4 sm:$0xff]   ;;  %2811 = vmatprep.subr.bf16.mxu0 %v7301_v36 }
  0xfe   : > { %v1616_v38 = vmax.f32 %v1314_v33, 0.0  ;;  %6884 = vmatmul.mubr.msk.bf16.gmra.mrb[112].mxu1 %vm818_vm2, %v7277_v30  ;;  %v1551_v44 = vmax.f32 %v1055_v39, 0.0  ;;  %v1058_v45 = vadd.f32 %v7868_v6, %v1057_v42  ;;  %v6650_v46 = vpop.f32.mrb[7].mxu0  ;;  %v7289_v42 = vld [vmem:[%s7616_s16 + $0xf8] sm:$0xff]   ;;  %2812 = vmatpush1.bf16.msra.mxu0 %v7299_v34  ;;  %s6149_s16 = sshll.u32 %s10087_s18, 4  ;;  %s10161_s16 = int_to_ptr.vmem [resolvable:$true] %s6149_s16 }
  0xff   : > { %6887 = vmatprep.mubr.msk.bf16.mxu1 %vm7489_vm1, %v10221_v1  ;;  %s7408_s27 = scalar_lea.vmem %s10161_s16, 64  ;;  %p7415_p1 = scmp.lt.s32.totalorder %s10161_s16, %s7413_s28 }
 0x100   : > { %v7905_v43 = vpack.c.bf16 %v1616_v38, %v1615_v37  ;;  %v1552_v51 = vmax.f32 %v1058_v45, 0.0  ;;  %6756 = vmatmul.mubr.msk.bf16.gmra.mrb[112].mxu0 %vm818_vm2, %v7286_v41  ;;  %p7409_p12 = scmp.ne.s32.totalorder %s10161_s16, %s7408_s27  ;;  %p7416_p2 = scmp.lt.s32.totalorder %s7414_s15, %s7408_s27 }
 0x101   : > { %v1318_v47 = vpop.f32.mrb[8].mxu1  ;;  %6759 = vmatprep.mubr.msk.bf16.mxu0 %vm7489_vm1, %v10221_v1 }
 0x102   : > { %v1319_v48 = vadd.f32 %v7868_v6, %v1318_v47  ;;  %v6781_v49 = vpop.f32.mrb[9].mxu1  ;;  %v7914_v55 = vpack.c.bf16 %v1552_v51, %v1551_v44  ;;  %p7410_p13 = pnand %p7409_p12, %p7583_p4  ;;  %p7417_p3 = por %p7416_p2, %p7415_p1 }
 0x103   : > { %v1321_v52 = vpop.f32.mrb[10].mxu1  ;;  %v1062_v56 = vpop.f32.mrb[8].mxu0 }
 0x104   : > { %v1322_v53 = vadd.f32 %v7868_v6, %v1321_v52  ;;  %v6782_v54 = vpop.f32.mrb[11].mxu1  ;;  %v1617_v57 = vmax.f32 %v1319_v48, 0.0  ;;  %v1063_v59 = vadd.f32 %v7868_v6, %v1062_v56  ;;  %v6653_v60 = vpop.f32.mrb[9].mxu0  ;;  %p7411_p0 = pneg %p7410_p13 }
 0x105   : > { %v1065_v62 = vpop.f32.mrb[10].mxu0 }
 0x106   : > { %v1618_v58 = vmax.f32 %v1322_v53, 0.0  ;;  %6888 = vmatmul.mubr.msk.bf16.gmra.mrb[116].mxu1 %vm818_vm2, %v7279_v50  ;;  %v1553_v0 = vmax.f32 %v1063_v59, 0.0  ;;  %v1066_v2 = vadd.f32 %v7868_v6, %v1065_v62  ;;  %v6654_v3 = vpop.f32.mrb[11].mxu0  ;;  %p7418_p5 = pnand %p7417_p3, %p7411_p0 }
 0x107   : > { %6891 = vmatprep.mubr.msk.bf16.mxu1 %vm7489_vm1, %v10221_v1 }
 0x108   : > { %v7921_v63 = vpack.c.bf16 %v1618_v58, %v1617_v57  ;;  %v1554_v9 = vmax.f32 %v1066_v2, 0.0  ;;  %6760 = vmatmul.mubr.msk.bf16.gmra.mrb[116].mxu0 %vm818_vm2, %v7287_v61 }
 0x109   : > { %v1326_v4 = vpop.f32.mrb[12].mxu1  ;;  %6763 = vmatprep.mubr.msk.bf16.mxu0 %vm7489_vm1, %v10221_v1 }
 0x10a   : > { %v1327_v5 = vadd.f32 %v7868_v6, %v1326_v4  ;;  %v6785_v7 = vpop.f32.mrb[13].mxu1  ;;  %v7930_v13 = vpack.c.bf16 %v1554_v9, %v1553_v0 }
 0x10b   : > { %v1329_v10 = vpop.f32.mrb[14].mxu1  ;;  %v1070_v14 = vpop.f32.mrb[12].mxu0 }
 0x10c   : > { %v1330_v11 = vadd.f32 %v7868_v6, %v1329_v10  ;;  %v6786_v12 = vpop.f32.mrb[15].mxu1  ;;  %v1619_v15 = vmax.f32 %v1327_v5, 0.0  ;;  %v1071_v17 = vadd.f32 %v7868_v6, %v1070_v14  ;;  %v6657_v18 = vpop.f32.mrb[13].mxu0 }
 0x10d   : > { %v1073_v20 = vpop.f32.mrb[14].mxu0 }
 0x10e   : > { %v1620_v16 = vmax.f32 %v1330_v11, 0.0  ;;  %6892 = vmatmul.mubr.msk.bf16.gmra.mrb[120].mxu1 %vm818_vm2, %v7281_v8  ;;  %v1555_v22 = vmax.f32 %v1071_v17, 0.0  ;;  %v1074_v24 = vadd.f32 %v7868_v6, %v1073_v20  ;;  %v6658_v25 = vpop.f32.mrb[15].mxu0 }
 0x10f   : > { %6903 = vmatprep.mubr.msk.bf16.mxu1 %vm7489_vm1, %v10221_v1 }
 0x110   : > { %v7937_v21 = vpack.c.bf16 %v1620_v16, %v1619_v15  ;;  %v1556_v29 = vmax.f32 %v1074_v24, 0.0  ;;  %6764 = vmatmul.mubr.msk.bf16.gmra.mrb[120].mxu0 %vm818_vm2, %v7288_v19 }
 0x111   : > { %v1334_v26 = vpop.f32.mrb[16].mxu1  ;;  %6767 = vmatprep.mubr.msk.bf16.mxu0 %vm7489_vm1, %v10221_v1 }
 0x112   : > { %v1335_v27 = vadd.f32 %v7868_v6, %v1334_v26  ;;  %v6789_v28 = vpop.f32.mrb[17].mxu1  ;;  %v7945_v33 = vpack.c.bf16 %v1556_v29, %v1555_v22 }
 0x113   : > { %v1337_v30 = vpop.f32.mrb[18].mxu1  ;;  %v1078_v37 = vpop.f32.mrb[16].mxu0 }
 0x114   : > { %v1338_v31 = vadd.f32 %v7868_v6, %v1337_v30  ;;  %v6790_v32 = vpop.f32.mrb[19].mxu1  ;;  %v1621_v38 = vmax.f32 %v1335_v27, 0.0  ;;  %v1079_v40 = vadd.f32 %v7868_v6, %v1078_v37  ;;  %v6661_v41 = vpop.f32.mrb[17].mxu0 }
 0x115   : > { %v1081_v44 = vpop.f32.mrb[18].mxu0 }
 0x116   : > { %v1622_v39 = vmax.f32 %v1338_v31, 0.0  ;;  %6904 = vmatmul.mubr.msk.bf16.vlgmr.msra.gmra.mrb[124].mxu1 %vm1777_vm3, %v7898_v35  ;;  %v1557_v46 = vmax.f32 %v1079_v40, 0.0  ;;  %v1082_v47 = vadd.f32 %v7868_v6, %v1081_v44  ;;  %v6662_v48 = vpop.f32.mrb[19].mxu0 }
 0x117   : > { %6907 = vmatprep.mubr.msk.bf16.mxu1 %vm7489_vm1, %v10221_v1 }
 0x118   : > { %v7959_v45 = vpack.c.bf16 %v1622_v39, %v1621_v38  ;;  %v1558_v51 = vmax.f32 %v1082_v47, 0.0  ;;  %6768 = vmatmul.mubr.msk.bf16.gmra.mrb[124].mxu0 %vm818_vm2, %v7289_v42 }
 0x119   : > { %v1342_v49 = vpop.f32.mrb[20].mxu1 }
 0x11a   : > { %v1343_v50 = vadd.f32 %v7868_v6, %v1342_v49  ;;  %v6793_v35 = vpop.f32.mrb[21].mxu1  ;;  %v7965_v56 = vpack.c.bf16 %v1558_v51, %v1557_v46 }
 0x11b   : > { %v1345_v52 = vpop.f32.mrb[22].mxu1  ;;  %v1086_v57 = vpop.f32.mrb[20].mxu0 }
 0x11c   : > { %v1346_v53 = vadd.f32 %v7868_v6, %v1345_v52  ;;  %v6794_v54 = vpop.f32.mrb[23].mxu1  ;;  %v1623_v58 = vmax.f32 %v1343_v50, 0.0  ;;  %v1087_v60 = vadd.f32 %v7868_v6, %v1086_v57  ;;  %v6665_v61 = vpop.f32.mrb[21].mxu0 }
 0x11d   : > { %v1089_v62 = vpop.f32.mrb[22].mxu0  ;;  %v7304_v54 = vld [vmem:[%s10216_s5 + $0x64] ss:$8 sps:$4 sm:$0xff]  }
 0x11e   : > { %v1624_v59 = vmax.f32 %v1346_v53, 0.0  ;;  %6908 = vmatmul.mubr.msk.bf16.gmra.mrb[128].mxu1 %vm1777_vm3, %v7914_v55  ;;  %v1559_v2 = vmax.f32 %v1087_v60, 0.0  ;;  %v1090_v3 = vadd.f32 %v7868_v6, %v1089_v62  ;;  %v6666_v4 = vpop.f32.mrb[23].mxu0  ;;  %v7302_v53 = vld [vmem:[%s10216_s5 + $0x60] ss:$8 sps:$4 sm:$0xff]   ;;  %2813 = vmatprep.subr.bf16.mxu0 %v7304_v54 }
 0x11f   : > { %6911 = vmatprep.mubr.msk.bf16.mxu1 %vm7489_vm1, %v10221_v1  ;;  %2814 = vmatpush1.bf16.msra.mxu0 %v7302_v53 }
 0x120   : > { %v7972_v0 = vpack.c.bf16 %v1624_v59, %v1623_v58  ;;  %v1560_v9 = vmax.f32 %v1090_v3, 0.0 }
 0x121   : > { %v1350_v5 = vpop.f32.mrb[24].mxu1 }
 0x122   : > { %v1351_v7 = vadd.f32 %v7868_v6, %v1350_v5  ;;  %v6797_v8 = vpop.f32.mrb[25].mxu1  ;;  %v7977_v12 = vpack.c.bf16 %v1560_v9, %v1559_v2 }
 0x123   : > { %v1353_v10 = vpop.f32.mrb[26].mxu1  ;;  %v1094_v14 = vpop.f32.mrb[24].mxu0 }
 0x124   : > { %v1354_v55 = vadd.f32 %v7868_v6, %v1353_v10  ;;  %v6798_v11 = vpop.f32.mrb[27].mxu1  ;;  %v1625_v15 = vmax.f32 %v1351_v7, 0.0  ;;  %v1095_v17 = vadd.f32 %v7868_v6, %v1094_v14  ;;  %v6669_v18 = vpop.f32.mrb[25].mxu0 }
 0x125   : > { %v1097_v19 = vpop.f32.mrb[26].mxu0 }
 0x126   : > { %v1626_v16 = vmax.f32 %v1354_v55, 0.0  ;;  %6912 = vmatmul.mubr.msk.bf16.gmra.mrb[132].mxu1 %vm1777_vm3, %v7930_v13  ;;  %v1561_v22 = vmax.f32 %v1095_v17, 0.0  ;;  %v1098_v24 = vadd.f32 %v7868_v6, %v1097_v19  ;;  %v6670_v25 = vpop.f32.mrb[27].mxu0 }
 0x127   : > { %6915 = vmatprep.mubr.msk.bf16.mxu1 %vm7489_vm1, %v10221_v1 }
 0x128   : > { %v7984_v20 = vpack.c.bf16 %v1626_v16, %v1625_v15  ;;  %v1562_v29 = vmax.f32 %v1098_v24, 0.0 }
 0x129   : > { %v1358_v26 = vpop.f32.mrb[28].mxu1 }
 0x12a   : > { %v1359_v27 = vadd.f32 %v7868_v6, %v1358_v26  ;;  %v6801_v28 = vpop.f32.mrb[29].mxu1  ;;  %v7989_v32 = vpack.c.bf16 %v1562_v29, %v1561_v22 }
 0x12b   : > { %v1361_v30 = vpop.f32.mrb[30].mxu1  ;;  %v1102_v34 = vpop.f32.mrb[28].mxu0 }
 0x12c   : > { %v1362_v13 = vadd.f32 %v7868_v6, %v1361_v30  ;;  %v6802_v31 = vpop.f32.mrb[31].mxu1  ;;  %v1627_v36 = vmax.f32 %v1359_v27, 0.0  ;;  %v1103_v38 = vadd.f32 %v7868_v6, %v1102_v34  ;;  %v6673_v39 = vpop.f32.mrb[29].mxu0 }
 0x12d   : > { %v1105_v40 = vpop.f32.mrb[30].mxu0 }
 0x12e   : > { %v1628_v37 = vmax.f32 %v1362_v13, 0.0  ;;  %6916 = vmatmul.mubr.msk.bf16.gmra.mrb[136].mxu1 %vm1777_vm3, %v7945_v33  ;;  %v1563_v42 = vmax.f32 %v1103_v38, 0.0  ;;  %v1106_v44 = vadd.f32 %v7868_v6, %v1105_v40  ;;  %v6674_v46 = vpop.f32.mrb[31].mxu0 }
 0x12f   : > { %6919 = vmatprep.mubr.msk.bf16.mxu1 %vm7489_vm1, %v10221_v1 }
 0x130   : > { %v7996_v41 = vpack.c.bf16 %v1628_v37, %v1627_v36  ;;  %v1564_v50 = vmax.f32 %v1106_v44, 0.0 }
 0x131   : > { %v1366_v47 = vpop.f32.mrb[32].mxu1 }
 0x132   : > { %v1367_v48 = vadd.f32 %v7868_v6, %v1366_v47  ;;  %v6805_v49 = vpop.f32.mrb[33].mxu1  ;;  %v8001_v52 = vpack.c.bf16 %v1564_v50, %v1563_v42 }
 0x133   : > { %v1369_v35 = vpop.f32.mrb[34].mxu1  ;;  %v1110_v57 = vpop.f32.mrb[32].mxu0 }
 0x134   : > { %v1370_v33 = vadd.f32 %v7868_v6, %v1369_v35  ;;  %v6806_v51 = vpop.f32.mrb[35].mxu1  ;;  %v1629_v58 = vmax.f32 %v1367_v48, 0.0  ;;  %v1111_v60 = vadd.f32 %v7868_v6, %v1110_v57  ;;  %v6677_v61 = vpop.f32.mrb[33].mxu0 }
 0x135   : > { %v1113_v62 = vpop.f32.mrb[34].mxu0 }
 0x136   : > { %v1630_v59 = vmax.f32 %v1370_v33, 0.0  ;;  %6920 = vmatmul.mubr.msk.bf16.gmra.mrb[140].mxu1 %vm1777_vm3, %v7965_v56  ;;  %v1565_v3 = vmax.f32 %v1111_v60, 0.0  ;;  %v1114_v4 = vadd.f32 %v7868_v6, %v1113_v62  ;;  %v6678_v5 = vpop.f32.mrb[35].mxu0 }
 0x137   : > { %6923 = vmatprep.mubr.msk.bf16.mxu1 %vm7489_vm1, %v10221_v1 }
 0x138   : > { %v8014_v2 = vpack.c.bf16 %v1630_v59, %v1629_v58  ;;  %v1566_v56 = vmax.f32 %v1114_v4, 0.0 }
 0x139   : > { %v1374_v7 = vpop.f32.mrb[36].mxu1 }
 0x13a   : > { %v1375_v8 = vadd.f32 %v7868_v6, %v1374_v7  ;;  %v6809_v9 = vpop.f32.mrb[37].mxu1  ;;  %v8019_v14 = vpack.c.bf16 %v1566_v56, %v1565_v3 }
 0x13b   : > { %v1377_v10 = vpop.f32.mrb[38].mxu1  ;;  %v1118_v15 = vpop.f32.mrb[36].mxu0 }
 0x13c   : > { %v1378_v55 = vadd.f32 %v7868_v6, %v1377_v10  ;;  %v6810_v11 = vpop.f32.mrb[39].mxu1  ;;  %v1631_v16 = vmax.f32 %v1375_v8, 0.0  ;;  %v1119_v18 = vadd.f32 %v7868_v6, %v1118_v15  ;;  %v6681_v19 = vpop.f32.mrb[37].mxu0 }
 0x13d   : > { %v1121_v22 = vpop.f32.mrb[38].mxu0 }
 0x13e   : > { %v1632_v17 = vmax.f32 %v1378_v55, 0.0  ;;  %6924 = vmatmul.mubr.msk.bf16.gmra.mrb[144].mxu1 %vm1777_vm3, %v7977_v12  ;;  %v1567_v25 = vmax.f32 %v1119_v18, 0.0  ;;  %v1122_v26 = vadd.f32 %v7868_v6, %v1121_v22  ;;  %v6682_v27 = vpop.f32.mrb[39].mxu0  ;;  %v7307_v18 = vld [vmem:[%s10216_s5 + $0x74] ss:$8 sps:$4 sm:$0xff]  }
 0x13f   : > { %6927 = vmatprep.mubr.msk.bf16.mxu1 %vm7489_vm1, %v10221_v1  ;;  %2815 = vmatprep.subr.bf16.mxu0 %v7307_v18 }
 0x140   : > { %v8026_v24 = vpack.c.bf16 %v1632_v17, %v1631_v16  ;;  %v1568_v13 = vmax.f32 %v1122_v26, 0.0  ;;  %v7305_v17 = vld [vmem:[%s10216_s5 + $0x70] ss:$8 sps:$4 sm:$0xff]  }
 0x141   : > { %v1382_v28 = vpop.f32.mrb[40].mxu1  ;;  %2816 = vmatpush1.bf16.msra.mxu0 %v7305_v17 }
 0x142   : > { %v1383_v29 = vadd.f32 %v7868_v6, %v1382_v28  ;;  %v6813_v30 = vpop.f32.mrb[41].mxu1  ;;  %v8031_v36 = vpack.c.bf16 %v1568_v13, %v1567_v25 }
 0x143   : > { %v1385_v31 = vpop.f32.mrb[42].mxu1  ;;  %v1126_v37 = vpop.f32.mrb[40].mxu0 }
 0x144   : > { %v1386_v12 = vadd.f32 %v7868_v6, %v1385_v31  ;;  %v6814_v34 = vpop.f32.mrb[43].mxu1  ;;  %v1633_v38 = vmax.f32 %v1383_v29, 0.0  ;;  %v1127_v40 = vadd.f32 %v7868_v6, %v1126_v37  ;;  %v6685_v42 = vpop.f32.mrb[41].mxu0 }
 0x145   : > { %v1129_v44 = vpop.f32.mrb[42].mxu0 }
 0x146   : > { %v1634_v39 = vmax.f32 %v1386_v12, 0.0  ;;  %6928 = vmatmul.mubr.msk.bf16.gmra.mrb[148].mxu1 %vm1777_vm3, %v7989_v32  ;;  %v1569_v47 = vmax.f32 %v1127_v40, 0.0  ;;  %v1130_v48 = vadd.f32 %v7868_v6, %v1129_v44  ;;  %v6686_v49 = vpop.f32.mrb[43].mxu0 }
 0x147   : > { %6931 = vmatprep.mubr.msk.bf16.mxu1 %vm7489_vm1, %v10221_v1 }
 0x148   : > { %v8038_v46 = vpack.c.bf16 %v1634_v39, %v1633_v38  ;;  %v1570_v51 = vmax.f32 %v1130_v48, 0.0 }
 0x149   : > { %v1390_v50 = vpop.f32.mrb[44].mxu1 }
 0x14a   : > { %v1391_v35 = vadd.f32 %v7868_v6, %v1390_v50  ;;  %v6817_v33 = vpop.f32.mrb[45].mxu1  ;;  %v8043_v57 = vpack.c.bf16 %v1570_v51, %v1569_v47 }
 0x14b   : > { %v1393_v53 = vpop.f32.mrb[46].mxu1  ;;  %v1134_v58 = vpop.f32.mrb[44].mxu0 }
 0x14c   : > { %v1394_v32 = vadd.f32 %v7868_v6, %v1393_v53  ;;  %v6818_v54 = vpop.f32.mrb[47].mxu1  ;;  %v1635_v59 = vmax.f32 %v1391_v35, 0.0  ;;  %v1135_v61 = vadd.f32 %v7868_v6, %v1134_v58  ;;  %v6689_v62 = vpop.f32.mrb[45].mxu0 }
 0x14d   : > { %v1137_v3 = vpop.f32.mrb[46].mxu0 }
 0x14e   : > { %v1636_v60 = vmax.f32 %v1394_v32, 0.0  ;;  %6932 = vmatmul.mubr.msk.bf16.gmra.mrb[152].mxu1 %vm1777_vm3, %v8001_v52  ;;  %v1571_v5 = vmax.f32 %v1135_v61, 0.0  ;;  %v1138_v7 = vadd.f32 %v7868_v6, %v1137_v3  ;;  %v6690_v8 = vpop.f32.mrb[47].mxu0 }
 0x14f   : > { %6935 = vmatprep.mubr.msk.bf16.mxu1 %vm7489_vm1, %v10221_v1 }
 0x150   : > { %v8050_v4 = vpack.c.bf16 %v1636_v60, %v1635_v59  ;;  %v1572_v55 = vmax.f32 %v1138_v7, 0.0 }
 0x151   : > { %v1398_v9 = vpop.f32.mrb[48].mxu1 }
 0x152   : > { %v1399_v56 = vadd.f32 %v7868_v6, %v1398_v9  ;;  %v6821_v10 = vpop.f32.mrb[49].mxu1  ;;  %v8055_v16 = vpack.c.bf16 %v1572_v55, %v1571_v5 }
 0x153   : > { %v1401_v11 = vpop.f32.mrb[50].mxu1  ;;  %v1142_v19 = vpop.f32.mrb[48].mxu0 }
 0x154   : > { %v1402_v52 = vadd.f32 %v7868_v6, %v1401_v11  ;;  %v6822_v15 = vpop.f32.mrb[51].mxu1  ;;  %v1637_v22 = vmax.f32 %v1399_v56, 0.0  ;;  %v1143_v26 = vadd.f32 %v7868_v6, %v1142_v19  ;;  %v6693_v27 = vpop.f32.mrb[49].mxu0 }
 0x155   : > { %v1145_v28 = vpop.f32.mrb[50].mxu0 }
 0x156   : > { %v1638_v25 = vmax.f32 %v1402_v52, 0.0  ;;  %6936 = vmatmul.mubr.msk.bf16.gmra.mrb[156].mxu1 %vm1777_vm3, %v8019_v14  ;;  %v1573_v30 = vmax.f32 %v1143_v26, 0.0  ;;  %v1146_v13 = vadd.f32 %v7868_v6, %v1145_v28  ;;  %v6694_v31 = vpop.f32.mrb[51].mxu0 }
 0x157   : > { %6939 = vmatprep.mubr.msk.bf16.mxu1 %vm7489_vm1, %v10221_v1 }
 0x158   : > { %v8068_v29 = vpack.c.bf16 %v1638_v25, %v1637_v22  ;;  %v1574_v14 = vmax.f32 %v1146_v13, 0.0 }
 0x159   : > { %v1406_v12 = vpop.f32.mrb[52].mxu1 }
 0x15a   : > { %v1407_v34 = vadd.f32 %v7868_v6, %v1406_v12  ;;  %v6825_v37 = vpop.f32.mrb[53].mxu1  ;;  %v8073_v42 = vpack.c.bf16 %v1574_v14, %v1573_v30 }
 0x15b   : > { %v1409_v38 = vpop.f32.mrb[54].mxu1  ;;  %v1150_v44 = vpop.f32.mrb[52].mxu0 }
 0x15c   : > { %v1410_v39 = vadd.f32 %v7868_v6, %v1409_v38  ;;  %v6826_v40 = vpop.f32.mrb[55].mxu1  ;;  %v1639_v47 = vmax.f32 %v1407_v34, 0.0  ;;  %v1151_v49 = vadd.f32 %v7868_v6, %v1150_v44  ;;  %v6697_v50 = vpop.f32.mrb[53].mxu0  ;;  %v10225_v44 = vmov 0  }
 0x15d   : > { %v1153_v35 = vpop.f32.mrb[54].mxu0  ;;  %2833 = vmatprep.mubr.bf16.mxu0 %v10225_v44 }
 0x15e   : > { %v1640_v48 = vmax.f32 %v1410_v39, 0.0  ;;  %6940 = vmatmul.mubr.msk.bf16.gmra.mrb[160].mxu1 %vm1777_vm3, %v8031_v36  ;;  %v1575_v51 = vmax.f32 %v1151_v49, 0.0  ;;  %v1154_v53 = vadd.f32 %v7868_v6, %v1153_v35  ;;  %v6698_v32 = vpop.f32.mrb[55].mxu0 }
 0x15f   : > { %6943 = vmatprep.mubr.msk.bf16.mxu1 %vm7489_vm1, %v10221_v1  ;;  %v7310_v32 = vld [vmem:[%s10218_s7 + $0x4] ss:$16 sps:$4 sm:$0xff]  }
 0x160   : > { %v8080_v33 = vpack.c.bf16 %v1640_v48, %v1639_v47  ;;  %v1576_v60 = vmax.f32 %v1154_v53, 0.0  ;;  %v7308_v53 = vld [vmem:[%s10218_s7] ss:$16 sps:$4 sm:$0xff]   ;;  %4248 = vmatprep.subr.bf16.mxu1 %v7310_v32 }
 0x161   : > { %v1414_v54 = vpop.f32.mrb[56].mxu1  ;;  %4249 = vmatpush1.bf16.msra.mxu1 %v7308_v53 }
 0x162   : > { %v1415_v58 = vadd.f32 %v7868_v6, %v1414_v54  ;;  %v6829_v59 = vpop.f32.mrb[57].mxu1  ;;  %v8085_v3 = vpack.c.bf16 %v1576_v60, %v1575_v51 }
 0x163   : > { %v1417_v61 = vpop.f32.mrb[58].mxu1  ;;  %v1158_v5 = vpop.f32.mrb[56].mxu0 }
 0x164   : > { %v1418_v36 = vadd.f32 %v7868_v6, %v1417_v61  ;;  %v6830_v62 = vpop.f32.mrb[59].mxu1  ;;  %v1641_v7 = vmax.f32 %v1415_v58, 0.0  ;;  %v1159_v9 = vadd.f32 %v7868_v6, %v1158_v5  ;;  %v6701_v56 = vpop.f32.mrb[57].mxu0  ;;  %v7313_v58 = vld [vmem:[%s10218_s7 + $0xc] ss:$16 sps:$4 sm:$0xff]  }
 0x165   : > { %v1161_v10 = vpop.f32.mrb[58].mxu0  ;;  %4911 = vmatprep.subr.bf16.mxu0 %v7313_v58 }
 0x166   : > { %v1642_v8 = vmax.f32 %v1418_v36, 0.0  ;;  %6944 = vmatmul.mubr.msk.bf16.gmra.mrb[164].mxu1 %vm1777_vm3, %v8043_v57  ;;  %v1577_v11 = vmax.f32 %v1159_v9, 0.0  ;;  %v1162_v52 = vadd.f32 %v7868_v6, %v1161_v10  ;;  %v6702_v15 = vpop.f32.mrb[59].mxu0 }
 0x167   : > { %6947 = vmatprep.mubr.msk.bf16.mxu1 %vm7489_vm1, %v10221_v1 }
 0x168   : > { %v8092_v55 = vpack.c.bf16 %v1642_v8, %v1641_v7  ;;  %v1578_v22 = vmax.f32 %v1162_v52, 0.0 }
 0x169   : > { %v1422_v17 = vpop.f32.mrb[60].mxu1 }
 0x16a   : > { %v1423_v18 = vadd.f32 %v7868_v6, %v1422_v17  ;;  %v6833_v19 = vpop.f32.mrb[61].mxu1  ;;  %v8097_v27 = vpack.c.bf16 %v1578_v22, %v1577_v11 }
 0x16b   : > { %v1425_v25 = vpop.f32.mrb[62].mxu1  ;;  %v1166_v28 = vpop.f32.mrb[60].mxu0 }
 0x16c   : > { %v1426_v57 = vadd.f32 %v7868_v6, %v1425_v25  ;;  %v6834_v26 = vpop.f32.mrb[63].mxu1  ;;  %v1643_v30 = vmax.f32 %v1423_v18, 0.0  ;;  %v1167_v31 = vadd.f32 %v7868_v6, %v1166_v28  ;;  %v6705_v12 = vpop.f32.mrb[61].mxu0 }
 0x16d   : > { %v1169_v34 = vpop.f32.mrb[62].mxu0 }
 0x16e   : > { %v1644_v13 = vmax.f32 %v1426_v57, 0.0  ;;  %6948 = vmatmul.mubr.msk.bf16.gmra.mrb[168].mxu1 %vm1777_vm3, %v8055_v16  ;;  %v1579_v14 = vmax.f32 %v1167_v31, 0.0  ;;  %v1170_v38 = vadd.f32 %v7868_v6, %v1169_v34  ;;  %v6706_v39 = vpop.f32.mrb[63].mxu0 }
 0x16f   : > { %6951 = vmatprep.mubr.msk.bf16.mxu1 %vm7489_vm1, %v10221_v1 }
 0x170   : > { %v8104_v37 = vpack.c.bf16 %v1644_v13, %v1643_v30  ;;  %v1580_v48 = vmax.f32 %v1170_v38, 0.0 }
 0x171   : > { %v1430_v40 = vpop.f32.mrb[64].mxu1 }
 0x172   : > { %v1431_v47 = vadd.f32 %v7868_v6, %v1430_v40  ;;  %v6837_v16 = vpop.f32.mrb[65].mxu1  ;;  %v8110_v51 = vpack.c.bf16 %v1580_v48, %v1579_v14 }
 0x173   : > { %v1433_v49 = vpop.f32.mrb[66].mxu1  ;;  %v1174_v54 = vpop.f32.mrb[64].mxu0 }
 0x174   : > { %v1434_v50 = vadd.f32 %v7868_v6, %v1433_v49  ;;  %v6838_v35 = vpop.f32.mrb[67].mxu1  ;;  %v1645_v59 = vmax.f32 %v1431_v47, 0.0  ;;  %v1175_v61 = vadd.f32 %v7868_v6, %v1174_v54  ;;  %v6709_v36 = vpop.f32.mrb[65].mxu0 }
 0x175   : > { %v1177_v62 = vpop.f32.mrb[66].mxu0 }
 0x176   : > { %v1646_v60 = vmax.f32 %v1434_v50, 0.0  ;;  %6952 = vmatmul.mubr.msk.bf16.gmra.mrb[172].mxu1 %vm1777_vm3, %v8073_v42  ;;  %v1581_v7 = vmax.f32 %v1175_v61, 0.0  ;;  %v1178_v8 = vadd.f32 %v7868_v6, %v1177_v62  ;;  %v6710_v9 = vpop.f32.mrb[67].mxu0 }
 0x177   : > { %6955 = vmatprep.mubr.msk.bf16.mxu1 %vm7489_vm1, %v10221_v1 }
 0x178   : > { %v8126_v5 = vpack.c.bf16 %v1646_v60, %v1645_v59  ;;  %v1582_v11 = vmax.f32 %v1178_v8, 0.0 }
 0x179   : > { %v1438_v56 = vpop.f32.mrb[68].mxu1 }
 0x17a   : > { %v1439_v10 = vadd.f32 %v7868_v6, %v1438_v56  ;;  %v6841_v42 = vpop.f32.mrb[69].mxu1  ;;  %v8131_v18 = vpack.c.bf16 %v1582_v11, %v1581_v7 }
 0x17b   : > { %v1441_v52 = vpop.f32.mrb[70].mxu1  ;;  %v1182_v19 = vpop.f32.mrb[68].mxu0 }
 0x17c   : > { %v1442_v15 = vadd.f32 %v7868_v6, %v1441_v52  ;;  %v6842_v17 = vpop.f32.mrb[71].mxu1  ;;  %v1647_v22 = vmax.f32 %v1439_v10, 0.0  ;;  %v1183_v57 = vadd.f32 %v7868_v6, %v1182_v19  ;;  %v6713_v26 = vpop.f32.mrb[69].mxu0 }
 0x17d   : > { %v1185_v28 = vpop.f32.mrb[70].mxu0 }
 0x17e   : > { %v1648_v25 = vmax.f32 %v1442_v15, 0.0  ;;  %6956 = vmatmul.mubr.msk.bf16.gmra.mrb[176].mxu1 %vm1777_vm3, %v8085_v3  ;;  %v1583_v13 = vmax.f32 %v1183_v57, 0.0  ;;  %v1186_v31 = vadd.f32 %v7868_v6, %v1185_v28  ;;  %v6714_v12 = vpop.f32.mrb[71].mxu0 }
 0x17f   : > { %6959 = vmatprep.mubr.msk.bf16.mxu1 %vm7489_vm1, %v10221_v1 }
 0x180   : > { %v8138_v30 = vpack.c.bf16 %v1648_v25, %v1647_v22  ;;  %v1584_v39 = vmax.f32 %v1186_v31, 0.0 }
 0x181   : > { %v1446_v34 = vpop.f32.mrb[72].mxu1 }
 0x182   : > { %v1447_v14 = vadd.f32 %v7868_v6, %v1446_v34  ;;  %v6845_v38 = vpop.f32.mrb[73].mxu1  ;;  %v8143_v16 = vpack.c.bf16 %v1584_v39, %v1583_v13  ;;  %v7316_v39 = vld [vmem:[%s10218_s7 + $0x24] ss:$16 sps:$4 sm:$0xff]  }
 0x183   : > { %v1449_v40 = vpop.f32.mrb[74].mxu1  ;;  %v1190_v48 = vpop.f32.mrb[72].mxu0  ;;  %v7314_v38 = vld [vmem:[%s10218_s7 + $0x20] ss:$16 sps:$4 sm:$0xff]   ;;  %4250 = vmatprep.subr.bf16.mxu1 %v7316_v39 }
 0x184   : > { %v1450_v3 = vadd.f32 %v7868_v6, %v1449_v40  ;;  %v6846_v47 = vpop.f32.mrb[75].mxu1  ;;  %v1649_v49 = vmax.f32 %v1447_v14, 0.0  ;;  %v1191_v35 = vadd.f32 %v7868_v6, %v1190_v48  ;;  %v6717_v53 = vpop.f32.mrb[73].mxu0  ;;  %4251 = vmatpush1.bf16.msra.mxu1 %v7314_v38 }
 0x185   : > { %v1193_v32 = vpop.f32.mrb[74].mxu0 }
 0x186   : > { %v1650_v50 = vmax.f32 %v1450_v3, 0.0  ;;  %6960 = vmatmul.mubr.msk.bf16.gmra.mrb[180].mxu1 %vm1777_vm3, %v8097_v27  ;;  %v1585_v58 = vmax.f32 %v1191_v35, 0.0  ;;  %v1194_v59 = vadd.f32 %v7868_v6, %v1193_v32  ;;  %v6718_v60 = vpop.f32.mrb[75].mxu0 }
 0x187   : > { %6963 = vmatprep.mubr.msk.bf16.mxu1 %vm7489_vm1, %v10221_v1 }
 0x188   : > { %v8150_v54 = vpack.c.bf16 %v1650_v50, %v1649_v49  ;;  %v1586_v7 = vmax.f32 %v1194_v59, 0.0 }
 0x189   : > { %v1454_v61 = vpop.f32.mrb[76].mxu1 }
 0x18a   : > { %v1455_v36 = vadd.f32 %v7868_v6, %v1454_v61  ;;  %v6849_v62 = vpop.f32.mrb[77].mxu1  ;;  %v8155_v56 = vpack.c.bf16 %v1586_v7, %v1585_v58 }
 0x18b   : > { %v1457_v8 = vpop.f32.mrb[78].mxu1  ;;  %v1198_v10 = vpop.f32.mrb[76].mxu0 }
 0x18c   : > { %v1458_v27 = vadd.f32 %v7868_v6, %v1457_v8  ;;  %v6850_v9 = vpop.f32.mrb[79].mxu1  ;;  %v1651_v42 = vmax.f32 %v1455_v36, 0.0  ;;  %v1199_v52 = vadd.f32 %v7868_v6, %v1198_v10  ;;  %v6721_v15 = vpop.f32.mrb[77].mxu0 }
 0x18d   : > { %v1201_v17 = vpop.f32.mrb[78].mxu0 }
 0x18e   : > { %v1652_v11 = vmax.f32 %v1458_v27, 0.0  ;;  %6964 = vmatmul.mubr.msk.bf16.gmra.mrb[184].mxu1 %vm1777_vm3, %v8110_v51  ;;  %v1587_v22 = vmax.f32 %v1199_v52, 0.0  ;;  %v1202_v25 = vadd.f32 %v7868_v6, %v1201_v17  ;;  %v6722_v57 = vpop.f32.mrb[79].mxu0 }
 0x18f   : > { %6967 = vmatprep.mubr.msk.bf16.mxu1 %vm7489_vm1, %v10221_v1 }
 0x190   : > { %v8162_v19 = vpack.c.bf16 %v1652_v11, %v1651_v42  ;;  %v1588_v31 = vmax.f32 %v1202_v25, 0.0 }
 0x191   : > { %v1462_v26 = vpop.f32.mrb[80].mxu1 }
 0x192   : > { %v1463_v28 = vadd.f32 %v7868_v6, %v1462_v26  ;;  %v6853_v13 = vpop.f32.mrb[81].mxu1  ;;  %v8167_v14 = vpack.c.bf16 %v1588_v31, %v1587_v22 }
 0x193   : > { %v1465_v12 = vpop.f32.mrb[82].mxu1  ;;  %v1206_v40 = vpop.f32.mrb[80].mxu0 }
 0x194   : > { %v1466_v51 = vadd.f32 %v7868_v6, %v1465_v12  ;;  %v6854_v34 = vpop.f32.mrb[83].mxu1  ;;  %v1653_v3 = vmax.f32 %v1463_v28, 0.0  ;;  %v1207_v48 = vadd.f32 %v7868_v6, %v1206_v40  ;;  %v6725_v49 = vpop.f32.mrb[81].mxu0 }
 0x195   : > { %v1209_v50 = vpop.f32.mrb[82].mxu0 }
 0x196   : > { %v1654_v47 = vmax.f32 %v1466_v51, 0.0  ;;  %6968 = vmatmul.mubr.msk.bf16.gmra.mrb[188].mxu1 %vm1777_vm3, %v8131_v18  ;;  %v1589_v53 = vmax.f32 %v1207_v48, 0.0  ;;  %v1210_v32 = vadd.f32 %v7868_v6, %v1209_v50  ;;  %v6726_v58 = vpop.f32.mrb[83].mxu0 }
 0x197   : > { %6971 = vmatprep.mubr.msk.bf16.mxu1 %vm7489_vm1, %v10221_v1 }
 0x198   : > { %v8180_v35 = vpack.c.bf16 %v1654_v47, %v1653_v3  ;;  %v1590_v18 = vmax.f32 %v1210_v32, 0.0 }
 0x199   : > { %v1470_v59 = vpop.f32.mrb[84].mxu1 }
 0x19a   : > { %v1471_v60 = vadd.f32 %v7868_v6, %v1470_v59  ;;  %v6857_v61 = vpop.f32.mrb[85].mxu1  ;;  %v8185_v8 = vpack.c.bf16 %v1590_v18, %v1589_v53 }
 0x19b   : > { %v1473_v36 = vpop.f32.mrb[86].mxu1  ;;  %v1214_v27 = vpop.f32.mrb[84].mxu0 }
 0x19c   : > { %v1474_v62 = vadd.f32 %v7868_v6, %v1473_v36  ;;  %v6858_v7 = vpop.f32.mrb[87].mxu1  ;;  %v1655_v9 = vmax.f32 %v1471_v60, 0.0  ;;  %v1215_v42 = vadd.f32 %v7868_v6, %v1214_v27  ;;  %v6729_v11 = vpop.f32.mrb[85].mxu0 }
 0x19d   : > { %v1217_v52 = vpop.f32.mrb[86].mxu0  ;;  %v7322_v11 = vld [vmem:[%s10218_s7 + $0x44] ss:$16 sps:$4 sm:$0xff]  }
 0x19e   : > { %v1656_v10 = vmax.f32 %v1474_v62, 0.0  ;;  %6972 = vmatmul.mubr.msk.bf16.gmra.mrb[192].mxu1 %vm1777_vm3, %v8143_v16  ;;  %v1591_v17 = vmax.f32 %v1215_v42, 0.0  ;;  %v1218_v22 = vadd.f32 %v7868_v6, %v1217_v52  ;;  %v6730_v25 = vpop.f32.mrb[87].mxu0  ;;  %v7320_v42 = vld [vmem:[%s10218_s7 + $0x40] ss:$16 sps:$4 sm:$0xff]   ;;  %4252 = vmatprep.subr.bf16.mxu1 %v7322_v11 }
 0x19f   : > { %6975 = vmatprep.mubr.msk.bf16.mxu1 %vm7489_vm1, %v10221_v1  ;;  %4253 = vmatpush1.bf16.msra.mxu1 %v7320_v42 }
 0x1a0   : > { %v8192_v15 = vpack.c.bf16 %v1656_v10, %v1655_v9  ;;  %v1592_v13 = vmax.f32 %v1218_v22, 0.0 }
 0x1a1   : > { %v1478_v57 = vpop.f32.mrb[88].mxu1 }
 0x1a2   : > { %v1479_v26 = vadd.f32 %v7868_v6, %v1478_v57  ;;  %v6861_v28 = vpop.f32.mrb[89].mxu1  ;;  %v8197_v51 = vpack.c.bf16 %v1592_v13, %v1591_v17 }
 0x1a3   : > { %v1481_v31 = vpop.f32.mrb[90].mxu1  ;;  %v1222_v34 = vpop.f32.mrb[88].mxu0 }
 0x1a4   : > { %v1482_v16 = vadd.f32 %v7868_v6, %v1481_v31  ;;  %v6862_v12 = vpop.f32.mrb[91].mxu1  ;;  %v1657_v38 = vmax.f32 %v1479_v26, 0.0  ;;  %v1223_v40 = vadd.f32 %v7868_v6, %v1222_v34  ;;  %v6733_v3 = vpop.f32.mrb[89].mxu0 }
 0x1a5   : > { %v1225_v47 = vpop.f32.mrb[90].mxu0 }
 0x1a6   : > { %v1658_v39 = vmax.f32 %v1482_v16, 0.0  ;;  %6976 = vmatmul.mubr.msk.bf16.gmra.mrb[196].mxu1 %vm1777_vm3, %v8155_v56  ;;  %v1593_v49 = vmax.f32 %v1223_v40, 0.0  ;;  %v1226_v50 = vadd.f32 %v7868_v6, %v1225_v47  ;;  %v6734_v53 = vpop.f32.mrb[91].mxu0  ;;  %v8211_v56 = vld [vmem:[%s10213_s2] ss:$0 sm:$0xff] }
 0x1a7   : > { %6979 = vmatprep.mubr.msk.bf16.mxu1 %vm7489_vm1, %v10221_v1 }
 0x1a8   : > { %v8204_v48 = vpack.c.bf16 %v1658_v39, %v1657_v38  ;;  %v1594_v60 = vmax.f32 %v1226_v50, 0.0 }
 0x1a9   : > { %v1486_v32 = vpop.f32.mrb[92].mxu1 }
 0x1aa   : > { %v1487_v58 = vadd.f32 %v7868_v6, %v1486_v32  ;;  %v6865_v59 = vpop.f32.mrb[93].mxu1  ;;  %v8214_v62 = vpack.c.bf16 %v1594_v60, %v1593_v49 }
 0x1ab   : > { %v1489_v61 = vpop.f32.mrb[94].mxu1  ;;  %v1230_v27 = vpop.f32.mrb[92].mxu0 }
 0x1ac   : > { %v1490_v18 = vadd.f32 %v8211_v56, %v1489_v61  ;;  %v6866_v36 = vpop.f32.mrb[95].mxu1  ;;  %v1659_v7 = vmax.f32 %v1487_v58, 0.0  ;;  %v1231_v6 = vadd.f32 %v8211_v56, %v1230_v27  ;;  %v6737_v10 = vpop.f32.mrb[93].mxu0 }
 0x1ad   : > { %v1233_v52 = vpop.f32.mrb[94].mxu0 }
 0x1ae   : > { %v1660_v9 = vmax.f32 %v1490_v18, 0.0  ;;  %6980 = vmatmul.mubr.msk.bf16.gmra.mrb[200].mxu1 %vm1777_vm3, %v8167_v14  ;;  %v1595_v22 = vmax.f32 %v1231_v6, 0.0  ;;  %v1234_v14 = vadd.f32 %v8211_v56, %v1233_v52  ;;  %v6738_v25 = vpop.f32.mrb[95].mxu0 }
 0x1af   : > { %6983 = vmatprep.mubr.msk.bf16.mxu1 %vm7489_vm1, %v10221_v1 }
 0x1b0   : > { %v8227_v17 = vpack.c.bf16 %v1660_v9, %v1659_v7  ;;  %v1596_v13 = vmax.f32 %v1234_v14, 0.0 }
 0x1b1   : > { %v1494_v57 = vpop.f32.mrb[96].mxu1 }
 0x1b2   : > { %v1495_v26 = vadd.f32 %v8211_v56, %v1494_v57  ;;  %v6869_v28 = vpop.f32.mrb[97].mxu1  ;;  %v8232_v34 = vpack.c.bf16 %v1596_v13, %v1595_v22 }
 0x1b3   : > { %v1497_v31 = vpop.f32.mrb[98].mxu1  ;;  %v1238_v38 = vpop.f32.mrb[96].mxu0 }
 0x1b4   : > { %v1498_v16 = vadd.f32 %v8211_v56, %v1497_v31  ;;  %v6870_v12 = vpop.f32.mrb[99].mxu1  ;;  %v1661_v39 = vmax.f32 %v1495_v26, 0.0  ;;  %v1239_v3 = vadd.f32 %v8211_v56, %v1238_v38  ;;  %v6741_v47 = vpop.f32.mrb[97].mxu0 }
 0x1b5   : > { %v1241_v49 = vpop.f32.mrb[98].mxu0 }
 0x1b6   : > { %v1662_v40 = vmax.f32 %v1498_v16, 0.0  ;;  %6984 = vmatmul.mubr.msk.bf16.gmra.mrb[204].mxu1 %vm1777_vm3, %v8185_v8  ;;  %v1597_v53 = vmax.f32 %v1239_v3, 0.0  ;;  %v1242_v32 = vadd.f32 %v8211_v56, %v1241_v49  ;;  %v6742_v58 = vpop.f32.mrb[99].mxu0 }
 0x1b7   : > { %6987 = vmatprep.mubr.msk.bf16.mxu1 %vm7489_vm1, %v10221_v1 }
 0x1b8   : > { %v8239_v50 = vpack.c.bf16 %v1662_v40, %v1661_v39  ;;  %v1598_v18 = vmax.f32 %v1242_v32, 0.0 }
 0x1b9   : > { %v1502_v59 = vpop.f32.mrb[100].mxu1 }
 0x1ba   : > { %v1503_v60 = vadd.f32 %v8211_v56, %v1502_v59  ;;  %v6873_v61 = vpop.f32.mrb[101].mxu1  ;;  %v8244_v27 = vpack.c.bf16 %v1598_v18, %v1597_v53 }
 0x1bb   : > { %v1505_v36 = vpop.f32.mrb[102].mxu1  ;;  %v1246_v9 = vpop.f32.mrb[100].mxu0 }
 0x1bc   : > { %v1506_v8 = vadd.f32 %v8211_v56, %v1505_v36  ;;  %v6874_v7 = vpop.f32.mrb[103].mxu1  ;;  %v1663_v6 = vmax.f32 %v1503_v60, 0.0  ;;  %v1247_v42 = vadd.f32 %v8211_v56, %v1246_v9  ;;  %v6745_v11 = vpop.f32.mrb[101].mxu0 }
 0x1bd   : > { %v1249_v52 = vpop.f32.mrb[102].mxu0 }
 0x1be   : > { %v1664_v10 = vmax.f32 %v1506_v8, 0.0  ;;  %6988 = vmatmul.mubr.msk.bf16.gmra.mrb[208].mxu1 %vm1777_vm3, %v8197_v51  ;;  %v1599_v14 = vmax.f32 %v1247_v42, 0.0  ;;  %v1250_v25 = vadd.f32 %v8211_v56, %v1249_v52  ;;  %v6746_v57 = vpop.f32.mrb[103].mxu0 }
 0x1bf   : > { %6991 = vmatprep.mubr.msk.bf16.mxu1 %vm7489_vm1, %v10221_v1  ;;  %v7328_v57 = vld [vmem:[%s10218_s7 + $0x64] ss:$16 sps:$4 sm:$0xff]  }
 0x1c0   : > { %v8251_v22 = vpack.c.bf16 %v1664_v10, %v1663_v6  ;;  %v1600_v31 = vmax.f32 %v1250_v25, 0.0  ;;  %v7326_v25 = vld [vmem:[%s10218_s7 + $0x60] ss:$16 sps:$4 sm:$0xff]   ;;  %4254 = vmatprep.subr.bf16.mxu1 %v7328_v57 }
 0x1c1   : > { %v1510_v26 = vpop.f32.mrb[104].mxu1  ;;  %4255 = vmatpush1.bf16.msra.mxu1 %v7326_v25 }
 0x1c2   : > { %v1511_v28 = vadd.f32 %v8211_v56, %v1510_v26  ;;  %v6877_v13 = vpop.f32.mrb[105].mxu1  ;;  %v8256_v38 = vpack.c.bf16 %v1600_v31, %v1599_v14 }
 0x1c3   : > { %v1513_v16 = vpop.f32.mrb[106].mxu1  ;;  %v1254_v39 = vpop.f32.mrb[104].mxu0 }
 0x1c4   : > { %v1514_v51 = vadd.f32 %v8211_v56, %v1513_v16  ;;  %v6878_v12 = vpop.f32.mrb[107].mxu1  ;;  %v1665_v40 = vmax.f32 %v1511_v28, 0.0  ;;  %v1255_v47 = vadd.f32 %v8211_v56, %v1254_v39  ;;  %v6749_v49 = vpop.f32.mrb[105].mxu0 }
 0x1c5   : > { %v1257_v53 = vpop.f32.mrb[106].mxu0 }
 0x1c6   : > { %v1666_v3 = vmax.f32 %v1514_v51, 0.0  ;;  %6992 = vmatmul.mubr.msk.bf16.gmra.mrb[212].mxu1 %vm1777_vm3, %v8214_v62  ;;  %v1601_v58 = vmax.f32 %v1255_v47, 0.0  ;;  %v1258_v59 = vadd.f32 %v8211_v56, %v1257_v53  ;;  %v6750_v60 = vpop.f32.mrb[107].mxu0 }
 0x1c7   : > { %6995 = vmatprep.mubr.msk.bf16.mxu1 %vm7489_vm1, %v10221_v1 }
 0x1c8   : > { %v8263_v32 = vpack.c.bf16 %v1666_v3, %v1665_v40  ;;  %v1602_v8 = vmax.f32 %v1258_v59, 0.0 }
 0x1c9   : > { %v1518_v61 = vpop.f32.mrb[108].mxu1 }
 0x1ca   : > { %v1519_v18 = vadd.f32 %v8211_v56, %v1518_v61  ;;  %v6881_v36 = vpop.f32.mrb[109].mxu1  ;;  %v8268_v6 = vpack.c.bf16 %v1602_v8, %v1601_v58 }
 0x1cb   : > { %v1521_v7 = vpop.f32.mrb[110].mxu1  ;;  %v1262_v42 = vpop.f32.mrb[108].mxu0 }
 0x1cc   : > { %v1522_v62 = vadd.f32 %v8211_v56, %v1521_v7  ;;  %v6882_v9 = vpop.f32.mrb[111].mxu1  ;;  %v1667_v10 = vmax.f32 %v1519_v18, 0.0  ;;  %v1263_v52 = vadd.f32 %v8211_v56, %v1262_v42  ;;  %v6753_v14 = vpop.f32.mrb[109].mxu0 }
 0x1cd   : > { %v1265_v26 = vpop.f32.mrb[110].mxu0 }
 0x1ce   : > { %v1668_v11 = vmax.f32 %v1522_v62, 0.0  ;;  %6996 = vmatmul.mubr.msk.bf16.gmra.mrb[216].mxu1 %vm1777_vm3, %v8232_v34  ;;  %v1603_v13 = vmax.f32 %v1263_v52, 0.0  ;;  %v1266_v34 = vadd.f32 %v8211_v56, %v1265_v26  ;;  %v6754_v31 = vpop.f32.mrb[111].mxu0 }
 0x1cf   : > { %6999 = vmatprep.mubr.msk.bf16.mxu1 %vm7489_vm1, %v10221_v1 }
 0x1d0   : > { %v8281_v28 = vpack.c.bf16 %v1668_v11, %v1667_v10  ;;  %v1604_v39 = vmax.f32 %v1266_v34, 0.0 }
 0x1d1   : > { %v1526_v16 = vpop.f32.mrb[112].mxu1 }
 0x1d2   : > { %v1527_v51 = vadd.f32 %v8211_v56, %v1526_v16  ;;  %v6885_v12 = vpop.f32.mrb[113].mxu1  ;;  %v8286_v49 = vpack.c.bf16 %v1604_v39, %v1603_v13 }
 0x1d3   : > { %v1529_v40 = vpop.f32.mrb[114].mxu1  ;;  %v1270_v53 = vpop.f32.mrb[112].mxu0 }
 0x1d4   : > { %v1530_v3 = vadd.f32 %v8211_v56, %v1529_v40  ;;  %v6886_v47 = vpop.f32.mrb[115].mxu1  ;;  %v1669_v58 = vmax.f32 %v1527_v51, 0.0  ;;  %v1271_v60 = vadd.f32 %v8211_v56, %v1270_v53  ;;  %v6757_v61 = vpop.f32.mrb[113].mxu0 }
 0x1d5   : > { %v1273_v18 = vpop.f32.mrb[114].mxu0 }
 0x1d6   : > { %v1670_v59 = vmax.f32 %v1530_v3, 0.0  ;;  %7000 = vmatmul.mubr.msk.bf16.gmra.mrb[220].mxu1 %vm1777_vm3, %v8244_v27  ;;  %v1605_v8 = vmax.f32 %v1271_v60, 0.0  ;;  %v1274_v7 = vadd.f32 %v8211_v56, %v1273_v18  ;;  %v6758_v62 = vpop.f32.mrb[115].mxu0 }
 0x1d7   : > { %7003 = vmatprep.mubr.msk.bf16.mxu1 %vm7489_vm1, %v10221_v1 }
 0x1d8   : > { %v8293_v36 = vpack.c.bf16 %v1670_v59, %v1669_v58  ;;  %v1606_v11 = vmax.f32 %v1274_v7, 0.0 }
 0x1d9   : > { %v1534_v9 = vpop.f32.mrb[116].mxu1 }
 0x1da   : > { %v1535_v10 = vadd.f32 %v8211_v56, %v1534_v9  ;;  %v6889_v42 = vpop.f32.mrb[117].mxu1  ;;  %v8298_v25 = vpack.c.bf16 %v1606_v11, %v1605_v8 }
 0x1db   : > { %v1537_v52 = vpop.f32.mrb[118].mxu1  ;;  %v1278_v57 = vpop.f32.mrb[116].mxu0 }
 0x1dc   : > { %v1538_v27 = vadd.f32 %v8211_v56, %v1537_v52  ;;  %v6890_v14 = vpop.f32.mrb[119].mxu1  ;;  %v1671_v26 = vmax.f32 %v1535_v10, 0.0  ;;  %v1279_v34 = vadd.f32 %v8211_v56, %v1278_v57  ;;  %v6761_v31 = vpop.f32.mrb[117].mxu0  ;;  %v8318_v10 = vld [vmem:[%s10215_s4] ss:$0 sm:$0xff] }
 0x1dd   : > { %v1281_v16 = vpop.f32.mrb[118].mxu0 }
 0x1de   : > { %v1672_v13 = vmax.f32 %v1538_v27, 0.0  ;;  %7004 = vmatmul.mubr.msk.bf16.gmra.mrb[224].mxu1 %vm1777_vm3, %v8256_v38  ;;  %v1607_v12 = vmax.f32 %v1279_v34, 0.0  ;;  %v1282_v39 = vadd.f32 %v8211_v56, %v1281_v16  ;;  %v6762_v40 = vpop.f32.mrb[119].mxu0 }
 0x1df   : > { %7007 = vmatprep.mubr.msk.bf16.mxu1 %vm7489_vm1, %v10221_v1 }
 0x1e0   : > { %v8305_v51 = vpack.c.bf16 %v1672_v13, %v1671_v26  ;;  %v1608_v58 = vmax.f32 %v1282_v39, 0.0 }
 0x1e1   : > { %v1542_v3 = vpop.f32.mrb[120].mxu1 }
 0x1e2   : > { %v1543_v47 = vadd.f32 %v8211_v56, %v1542_v3  ;;  %v6893_v53 = vpop.f32.mrb[121].mxu1  ;;  %v8310_v61 = vpack.c.bf16 %v1608_v58, %v1607_v12  ;;  %v7332_v58 = vld [vmem:[%s10218_s7 + $0x80] ss:$16 sps:$4 sm:$0xff]  }
 0x1e3   : > { %v1545_v59 = vpop.f32.mrb[122].mxu1  ;;  %v1286_v18 = vpop.f32.mrb[120].mxu0 }
 0x1e4   : > { %v1546_v38 = vadd.f32 %v8211_v56, %v1545_v59  ;;  %v6894_v60 = vpop.f32.mrb[123].mxu1  ;;  %v1673_v8 = vmax.f32 %v1543_v47, 0.0  ;;  %v1287_v62 = vadd.f32 %v8211_v56, %v1286_v18  ;;  %v6765_v9 = vpop.f32.mrb[121].mxu0  ;;  %v7334_v59 = vld [vmem:[%s10218_s7 + $0x84] ss:$16 sps:$4 sm:$0xff]  }
 0x1e5   : > { %v1289_v42 = vpop.f32.mrb[122].mxu0  ;;  %4256 = vmatprep.subr.bf16.mxu1 %v7334_v59 }
 0x1e6   : > { %v1674_v7 = vmax.f32 %v1546_v38, 0.0  ;;  %7008 = vmatmul.mubr.msk.bf16.gmra.mrb[228].mxu1 %vm1777_vm3, %v8268_v6  ;;  %v1609_v52 = vmax.f32 %v1287_v62, 0.0  ;;  %v1290_v27 = vadd.f32 %v8211_v56, %v1289_v42  ;;  %v6766_v14 = vpop.f32.mrb[123].mxu0  ;;  %v7311_v38 = vld [vmem:[%s10218_s7 + $0x8] ss:$16 sps:$4 sm:$0xff]  }
 0x1e7   : > { %7011 = vmatprep.mubr.msk.bf16.mxu1 %vm7489_vm1, %v10221_v1  ;;  %v7319_v62 = vld [vmem:[%s10218_s7 + $0x2c] ss:$16 sps:$4 sm:$0xff]   ;;  %4257 = vmatpush1.bf16.msra.mxu1 %v7332_v58  ;;  %v7329_v58 = vld [vmem:[%s10218_s7 + $0x68] ss:$16 sps:$4 sm:$0xff]  }
 0x1e8   : > { %v8322_v11 = vpack.c.bf16 %v1674_v7, %v1673_v8  ;;  %v1610_v13 = vmax.f32 %v1290_v27, 0.0 }
 0x1e9   : > { %v2001_v57 = vpop.f32.mrb[124].mxu1 }
 0x1ea   : > { %v2002_v6 = vadd.f32 %v8318_v10, %v2001_v57  ;;  %v6905_v26 = vpop.f32.mrb[125].mxu1  ;;  %v8327_v12 = vpack.c.bf16 %v1610_v13, %v1609_v52  ;;  %v7325_v13 = vld [vmem:[%s10218_s7 + $0x4c] ss:$16 sps:$4 sm:$0xff]  }
 0x1eb   : > { %v2004_v34 = vpop.f32.mrb[126].mxu1  ;;  %v1294_v40 = vpop.f32.mrb[124].mxu0 }
 0x1ec   : > { %v2005_v31 = vadd.f32 %v8318_v10, %v2004_v34  ;;  %v6906_v16 = vpop.f32.mrb[127].mxu1  ;;  %v2504_v39 = vmax.f32 %v2002_v6, 0.0  ;;  %v1295_v47 = vadd.f32 %v8211_v56, %v1294_v40  ;;  %v6769_v53 = vpop.f32.mrb[125].mxu0  ;;  %v7331_v40 = vld [vmem:[%s10218_s7 + $0x6c] ss:$16 sps:$4 sm:$0xff]  }
 0x1ed   : > { %v1297_v60 = vpop.f32.mrb[126].mxu0  ;;  %v7323_v16 = vld [vmem:[%s10218_s7 + $0x48] ss:$16 sps:$4 sm:$0xff]  }
 0x1ee   : > { %v2505_v3 = vmax.f32 %v2005_v31, 0.0  ;;  %7012 = vmatmul.mubr.msk.bf16.gmra.mrb[232].mxu1 %vm1777_vm3, %v8286_v49  ;;  %v1611_v18 = vmax.f32 %v1295_v47, 0.0  ;;  %v1298_v8 = vadd.f32 %v8211_v56, %v1297_v60  ;;  %v6770_v7 = vpop.f32.mrb[127].mxu0  ;;  %v7317_v56 = vld [vmem:[%s10218_s7 + $0x28] ss:$16 sps:$4 sm:$0xff]  }
 0x1ef   : > { %7015 = vmatprep.mubr.msk.bf16.mxu1 %vm7489_vm1, %v10221_v1  ;;  %v7337_v60 = vld [vmem:[%s10218_s7 + $0x8c] ss:$16 sps:$4 sm:$0xff]  }
 0x1f0   : > { %v2630_v49 = vpack.c.bf16 %v2505_v3, %v2504_v39  ;;  %v1612_v27 = vmax.f32 %v1298_v8, 0.0  ;;  %v7335_v8 = vld [vmem:[%s10218_s7 + $0x88] ss:$16 sps:$4 sm:$0xff]  }
 0x1f1   : > { %v2009_v9 = vpop.f32.mrb[128].mxu1 }
 0x1f2   : > { %v2010_v42 = vadd.f32 %v8318_v10, %v2009_v9  ;;  %v6909_v52 = vpop.f32.mrb[129].mxu1  ;;  %2834 = vmatmul.mubr.bf16.vlgmr.msra.gmra.mrb[128].mxu0 %v2630_v49  ;;  %v1706_v26 = vpack.c.bf16 %v1612_v27, %v1611_v18 }
 0x1f3   : > { %4912 = vmatpush1.bf16.msra.mxu0 %v7311_v38  ;;  %v2012_v14 = vpop.f32.mrb[130].mxu1  ;;  %2843 = vmatprep.mubr.bf16.mxu0 %v10225_v44 }
 0x1f4   : > { %v2013_v57 = vadd.f32 %v8318_v10, %v2012_v14  ;;  %v6910_v6 = vpop.f32.mrb[131].mxu1  ;;  %4913 = vmatprep.subr.bf16.mxu0 %v7319_v62  ;;  %v2506_v34 = vmax.f32 %v2010_v42, 0.0 }
 0x1f6   : > { %v2507_v31 = vmax.f32 %v2013_v57, 0.0  ;;  %7016 = vmatmul.mubr.msk.bf16.gmra.mrb[236].mxu1 %vm1777_vm3, %v8298_v25 }
 0x1f7   : > { %7019 = vmatprep.mubr.msk.bf16.mxu1 %vm7489_vm1, %v10221_v1  ;;  %4914 = vmatpush1.bf16.msra.mxu0 %v7317_v56 }
 0x1f8   : > { %v2631_v39 = vpack.c.bf16 %v2507_v31, %v2506_v34  ;;  %4915 = vmatprep.subr.bf16.mxu0 %v7325_v13 }
 0x1f9   : > { %v2017_v3 = vpop.f32.mrb[132].mxu1 }
 0x1fa   : > { %v2018_v47 = vadd.f32 %v8318_v10, %v2017_v3  ;;  %v6913_v53 = vpop.f32.mrb[133].mxu1  ;;  %2844 = vmatmul.mubr.bf16.gmra.mrb[132].mxu0 %v2631_v39 }
 0x1fb   : > { %v2020_v25 = vpop.f32.mrb[134].mxu1  ;;  %2853 = vmatprep.mubr.bf16.mxu0 %v10225_v44  ;;  %4916 = vmatpush1.bf16.msra.mxu0 %v7323_v16  ;;  %v7341_v53 = vld [vmem:[%s10218_s7 + $0xa8] ss:$16 sps:$4 sm:$0xff]  }
 0x1fc   : > { %v2021_v59 = vadd.f32 %v8318_v10, %v2020_v25  ;;  %v6914_v38 = vpop.f32.mrb[135].mxu1  ;;  %4917 = vmatprep.subr.bf16.mxu0 %v7331_v40  ;;  %v2508_v49 = vmax.f32 %v2018_v47, 0.0  ;;  %v7340_v47 = vld [vmem:[%s10218_s7 + $0xa4] ss:$16 sps:$4 sm:$0xff]   ;;  %v7343_v25 = vld [vmem:[%s10218_s7 + $0xac] ss:$16 sps:$4 sm:$0xff]  }
 0x1fd   : > { %4258 = vmatprep.subr.bf16.mxu1 %v7340_v47 }
 0x1fe   : > { %v2509_v18 = vmax.f32 %v2021_v59, 0.0  ;;  %7020 = vmatmul.mubr.msk.bf16.gmra.mrb[240].mxu1 %vm1777_vm3, %v8310_v61 }
 0x1ff   : > { %7023 = vmatprep.mubr.msk.bf16.mxu1 %vm7489_vm1, %v10221_v1  ;;  %4918 = vmatpush1.bf16.msra.mxu0 %v7329_v58 }
 0x200   : > { %v2632_v7 = vpack.c.bf16 %v2509_v18, %v2508_v49  ;;  %4919 = vmatprep.subr.bf16.mxu0 %v7337_v60 }
 0x201   : > { %v2025_v62 = vpop.f32.mrb[136].mxu1 }
 0x202   : > { %v2026_v9 = vadd.f32 %v8318_v10, %v2025_v62  ;;  %v6917_v42 = vpop.f32.mrb[137].mxu1  ;;  %2854 = vmatmul.mubr.bf16.gmra.mrb[136].mxu0 %v2632_v7 }
 0x203   : > { %v2028_v52 = vpop.f32.mrb[138].mxu1  ;;  %2863 = vmatprep.mubr.bf16.mxu0 %v10225_v44  ;;  %4920 = vmatpush1.bf16.msra.mxu0 %v7335_v8 }
 0x204   : > { %v2029_v61 = vadd.f32 %v8318_v10, %v2028_v52  ;;  %v6918_v27 = vpop.f32.mrb[139].mxu1  ;;  %v2510_v14 = vmax.f32 %v2026_v9, 0.0  ;;  %4921 = vmatprep.subr.bf16.mxu0 %v7343_v25 }
 0x206   : > { %v2511_v56 = vmax.f32 %v2029_v61, 0.0  ;;  %7024 = vmatmul.mubr.msk.bf16.gmra.mrb[244].mxu1 %vm1777_vm3, %v8327_v12  ;;  %v7338_v12 = vld [vmem:[%s10218_s7 + $0xa0] ss:$16 sps:$4 sm:$0xff]  }
 0x207   : > { %7027 = vmatprep.mubr.msk.bf16.mxu1 %vm7489_vm1, %v10221_v1  ;;  %4259 = vmatpush1.bf16.msra.mxu1 %v7338_v12 }
 0x208   : > { %v2633_v57 = vpack.c.bf16 %v2511_v56, %v2510_v14  ;;  %4922 = vmatpush1.bf16.msra.mxu0 %v7341_v53 }
 0x209   : > { %v2033_v6 = vpop.f32.mrb[140].mxu1 }
 0x20a   : > { %v2034_v13 = vadd.f32 %v8318_v10, %v2033_v6  ;;  %v6921_v34 = vpop.f32.mrb[141].mxu1  ;;  %2864 = vmatmul.mubr.bf16.gmra.mrb[140].mxu0 %v2633_v57 }
 0x20b   : > { %v2036_v31 = vpop.f32.mrb[142].mxu1  ;;  %2873 = vmatprep.mubr.bf16.mxu0 %v10225_v44 }
 0x20c   : > { %v2037_v16 = vadd.f32 %v8318_v10, %v2036_v31  ;;  %v6922_v39 = vpop.f32.mrb[143].mxu1  ;;  %v2512_v40 = vmax.f32 %v2034_v13, 0.0 }
 0x20e   : > { %v2513_v3 = vmax.f32 %v2037_v16, 0.0  ;;  %7028 = vmatmul.mubr.msk.bf16.gmra.mrb[248].mxu1 %vm1777_vm3, %v1706_v26 }
 0x20f   : > { %7031 = vmatprep.mubr.msk.bf16.mxu1 %vm7489_vm1, %v10221_v1 }
 0x210   : > { %v2634_v26 = vpack.c.bf16 %v2513_v3, %v2512_v40 }
 0x211   : > { %v2041_v58 = vpop.f32.mrb[144].mxu1 }
 0x212   : > { %v2042_v59 = vadd.f32 %v8318_v10, %v2041_v58  ;;  %v6925_v38 = vpop.f32.mrb[145].mxu1  ;;  %2874 = vmatmul.mubr.bf16.gmra.mrb[144].mxu0 %v2634_v26 }
 0x213   : > { %v2044_v60 = vpop.f32.mrb[146].mxu1  ;;  %2883 = vmatprep.mubr.bf16.mxu0 %v10225_v44 }
 0x214   : > { %v2045_v49 = vadd.f32 %v8318_v10, %v2044_v60  ;;  %v6926_v18 = vpop.f32.mrb[147].mxu1  ;;  %v2514_v8 = vmax.f32 %v2042_v59, 0.0  ;;  %v7346_v60 = vld [vmem:[%s10218_s7 + $0xc4] ss:$16 sps:$4 sm:$0xff]  }
 0x215   : > { %v7349_v18 = vld [vmem:[%s10218_s7 + $0xcc] ss:$16 sps:$4 sm:$0xff]   ;;  %4260 = vmatprep.subr.bf16.mxu1 %v7346_v60 }
 0x216   : > { %v2515_v7 = vmax.f32 %v2045_v49, 0.0  ;;  %7032 = vmatmul.mubr.msk.bf16.gmra.mrb[252].mxu1 %vm1777_vm3, %v7889_v23  ;;  %v7347_v49 = vld [vmem:[%s10218_s7 + $0xc8] ss:$16 sps:$4 sm:$0xff]   ;;  %4923 = vmatprep.subr.bf16.mxu0 %v7349_v18 }
 0x217   : > { %7035 = vmatprep.mubr.msk.bf16.mxu1 %vm7489_vm1, %v10221_v1  ;;  %4924 = vmatpush1.bf16.msra.mxu0 %v7347_v49 }
 0x218   : > { %v2635_v62 = vpack.c.bf16 %v2515_v7, %v2514_v8 }
 0x219   : > { %v2049_v9 = vpop.f32.mrb[148].mxu1 }
 0x21a   : > { %v2050_v42 = vadd.f32 %v8318_v10, %v2049_v9  ;;  %v6929_v52 = vpop.f32.mrb[149].mxu1  ;;  %2884 = vmatmul.mubr.bf16.gmra.mrb[148].mxu0 %v2635_v62 }
 0x21b   : > { %v2052_v61 = vpop.f32.mrb[150].mxu1  ;;  %2893 = vmatprep.mubr.bf16.mxu0 %v10225_v44 }
 0x21c   : > { %v2053_v27 = vadd.f32 %v8318_v10, %v2052_v61  ;;  %v6930_v14 = vpop.f32.mrb[151].mxu1  ;;  %v2516_v56 = vmax.f32 %v2050_v42, 0.0 }
 0x21e   : > { %v2517_v57 = vmax.f32 %v2053_v27, 0.0  ;;  %7036 = vmatmul.mubr.msk.bf16.gmra.mrb[0].mxu1 %vm1777_vm3, %v7905_v43 }
 0x21f   : > { %7039 = vmatprep.mubr.msk.bf16.mxu1 %vm7489_vm1, %v10221_v1 }
 0x220   : > { %v2636_v23 = vpack.c.bf16 %v2517_v57, %v2516_v56 }
 0x221   : > { %v2057_v6 = vpop.f32.mrb[152].mxu1 }
 0x222   : > { %v2058_v13 = vadd.f32 %v8318_v10, %v2057_v6  ;;  %v6933_v34 = vpop.f32.mrb[153].mxu1  ;;  %2894 = vmatmul.mubr.bf16.gmra.mrb[152].mxu0 %v2636_v23 }
 0x223   : > { %v2060_v31 = vpop.f32.mrb[154].mxu1  ;;  %2903 = vmatprep.mubr.bf16.mxu0 %v10225_v44 }
 0x224   : > { %v2061_v16 = vadd.f32 %v8318_v10, %v2060_v31  ;;  %v6934_v39 = vpop.f32.mrb[155].mxu1  ;;  %v2518_v40 = vmax.f32 %v2058_v13, 0.0 }
 0x226   : > { %v2519_v3 = vmax.f32 %v2061_v16, 0.0  ;;  %7040 = vmatmul.mubr.msk.bf16.gmra.mrb[4].mxu1 %vm1777_vm3, %v7921_v63  ;;  %v7344_v63 = vld [vmem:[%s10218_s7 + $0xc0] ss:$16 sps:$4 sm:$0xff]  }
 0x227   : > { %7043 = vmatprep.mubr.msk.bf16.mxu1 %vm7489_vm1, %v10221_v1  ;;  %4261 = vmatpush1.bf16.msra.mxu1 %v7344_v63 }
 0x228   : > { %v2637_v43 = vpack.c.bf16 %v2519_v3, %v2518_v40 }
 0x229   : > { %v2065_v12 = vpop.f32.mrb[156].mxu1 }
 0x22a   : > { %v2066_v47 = vadd.f32 %v8318_v10, %v2065_v12  ;;  %v6937_v53 = vpop.f32.mrb[157].mxu1  ;;  %2904 = vmatmul.mubr.bf16.gmra.mrb[156].mxu0 %v2637_v43 }
 0x22b   : > { %v2068_v25 = vpop.f32.mrb[158].mxu1  ;;  %2913 = vmatprep.mubr.bf16.mxu0 %v10225_v44 }
 0x22c   : > { %v2069_v26 = vadd.f32 %v8318_v10, %v2068_v25  ;;  %v6938_v58 = vpop.f32.mrb[159].mxu1  ;;  %v2520_v59 = vmax.f32 %v2066_v47, 0.0 }
 0x22e   : > { %v2521_v38 = vmax.f32 %v2069_v26, 0.0  ;;  %7044 = vmatmul.mubr.msk.bf16.gmra.mrb[8].mxu1 %vm1777_vm3, %v7937_v21 }
 0x22f   : > { %7047 = vmatprep.mubr.msk.bf16.mxu1 %vm7489_vm1, %v10221_v1 }
 0x230   : > { %v2638_v21 = vpack.c.bf16 %v2521_v38, %v2520_v59 }
 0x231   : > { %v2073_v8 = vpop.f32.mrb[160].mxu1 }
 0x232   : > { %v2074_v7 = vadd.f32 %v8318_v10, %v2073_v8  ;;  %v6941_v62 = vpop.f32.mrb[161].mxu1  ;;  %2914 = vmatmul.mubr.bf16.gmra.mrb[160].mxu0 %v2638_v21  ;;  %v7350_v8 = vld [vmem:[%s10218_s7 + $0xe0] ss:$16 sps:$4 sm:$0xff]  }
 0x233   : > { %v2076_v9 = vpop.f32.mrb[162].mxu1  ;;  %2923 = vmatprep.mubr.bf16.mxu0 %v10225_v44 }
 0x234   : > { %v2077_v42 = vadd.f32 %v8318_v10, %v2076_v9  ;;  %v6942_v52 = vpop.f32.mrb[163].mxu1  ;;  %v2522_v61 = vmax.f32 %v2074_v7, 0.0  ;;  %v7352_v7 = vld [vmem:[%s10218_s7 + $0xe4] ss:$16 sps:$4 sm:$0xff]  }
 0x235   : > { %4262 = vmatprep.subr.bf16.mxu1 %v7352_v7  ;;  %v7361_v7 = vld [vmem:[%s10218_s7 + $0x10c] ss:$16 sps:$4 sm:$0xff]  }
 0x236   : > { %v2523_v27 = vmax.f32 %v2077_v42, 0.0  ;;  %7048 = vmatmul.mubr.msk.bf16.gmra.mrb[12].mxu1 %vm1777_vm3, %v7959_v45  ;;  %v7355_v42 = vld [vmem:[%s10218_s7 + $0xec] ss:$16 sps:$4 sm:$0xff]  }
 0x237   : > { %7051 = vmatprep.mubr.msk.bf16.mxu1 %vm7489_vm1, %v10221_v1  ;;  %4925 = vmatprep.subr.bf16.mxu0 %v7355_v42 }
 0x238   : > { %v2639_v14 = vpack.c.bf16 %v2523_v27, %v2522_v61  ;;  %4263 = vmatpush1.bf16.msra.mxu1 %v7350_v8  ;;  %v7359_v8 = vld [vmem:[%s10218_s7 + $0x108] ss:$16 sps:$4 sm:$0xff]  }
 0x239   : > { %v2081_v56 = vpop.f32.mrb[164].mxu1 }
 0x23a   : > { %v2082_v57 = vadd.f32 %v8318_v10, %v2081_v56  ;;  %v6945_v23 = vpop.f32.mrb[165].mxu1  ;;  %2924 = vmatmul.mubr.bf16.gmra.mrb[164].mxu0 %v2639_v14 }
 0x23b   : > { %v2084_v6 = vpop.f32.mrb[166].mxu1  ;;  %2933 = vmatprep.mubr.bf16.mxu0 %v10225_v44 }
 0x23c   : > { %v2085_v13 = vadd.f32 %v8318_v10, %v2084_v6  ;;  %v6946_v34 = vpop.f32.mrb[167].mxu1  ;;  %v2524_v31 = vmax.f32 %v2082_v57, 0.0 }
 0x23e   : > { %v2525_v16 = vmax.f32 %v2085_v13, 0.0  ;;  %7052 = vmatmul.mubr.msk.bf16.gmra.mrb[16].mxu1 %vm1777_vm3, %v7972_v0 }
 0x23f   : > { %7055 = vmatprep.mubr.msk.bf16.mxu1 %vm7489_vm1, %v10221_v1 }
 0x240   : > { %v2640_v45 = vpack.c.bf16 %v2525_v16, %v2524_v31 }
 0x241   : > { %v2089_v39 = vpop.f32.mrb[168].mxu1 }
 0x242   : > { %v2090_v40 = vadd.f32 %v8318_v10, %v2089_v39  ;;  %v6949_v3 = vpop.f32.mrb[169].mxu1  ;;  %2934 = vmatmul.mubr.bf16.gmra.mrb[168].mxu0 %v2640_v45 }
 0x243   : > { %v2092_v43 = vpop.f32.mrb[170].mxu1  ;;  %2943 = vmatprep.mubr.bf16.mxu0 %v10225_v44 }
 0x244   : > { %v2093_v12 = vadd.f32 %v8318_v10, %v2092_v43  ;;  %v6950_v47 = vpop.f32.mrb[171].mxu1  ;;  %v2526_v53 = vmax.f32 %v2090_v40, 0.0 }
 0x246   : > { %v2527_v25 = vmax.f32 %v2093_v12, 0.0  ;;  %7056 = vmatmul.mubr.msk.bf16.gmra.mrb[20].mxu1 %vm1777_vm3, %v7984_v20 }
 0x247   : > { %7059 = vmatprep.mubr.msk.bf16.mxu1 %vm7489_vm1, %v10221_v1 }
 0x248   : > { %v2641_v0 = vpack.c.bf16 %v2527_v25, %v2526_v53 }
 0x249   : > { %v2097_v26 = vpop.f32.mrb[172].mxu1 }
 0x24a   : > { %v2098_v58 = vadd.f32 %v8318_v10, %v2097_v26  ;;  %v6953_v59 = vpop.f32.mrb[173].mxu1  ;;  %2944 = vmatmul.mubr.bf16.gmra.mrb[172].mxu0 %v2641_v0 }
 0x24b   : > { %v2100_v38 = vpop.f32.mrb[174].mxu1  ;;  %2953 = vmatprep.mubr.bf16.mxu0 %v10225_v44 }
 0x24c   : > { %v2101_v63 = vadd.f32 %v8318_v10, %v2100_v38  ;;  %v6954_v60 = vpop.f32.mrb[175].mxu1  ;;  %v2528_v49 = vmax.f32 %v2098_v58, 0.0 }
 0x24e   : > { %v2529_v18 = vmax.f32 %v2101_v63, 0.0  ;;  %7060 = vmatmul.mubr.msk.bf16.gmra.mrb[24].mxu1 %vm1777_vm3, %v7996_v41  ;;  %v7353_v41 = vld [vmem:[%s10218_s7 + $0xe8] ss:$16 sps:$4 sm:$0xff]  }
 0x24f   : > { %7063 = vmatprep.mubr.msk.bf16.mxu1 %vm7489_vm1, %v10221_v1  ;;  %4926 = vmatpush1.bf16.msra.mxu0 %v7353_v41 }
 0x250   : > { %v2642_v20 = vpack.c.bf16 %v2529_v18, %v2528_v49  ;;  %v7358_v49 = vld [vmem:[%s10218_s7 + $0x104] ss:$16 sps:$4 sm:$0xff]   ;;  %4927 = vmatprep.subr.bf16.mxu0 %v7361_v7 }
 0x251   : > { %v2105_v21 = vpop.f32.mrb[176].mxu1  ;;  %4264 = vmatprep.subr.bf16.mxu1 %v7358_v49 }
 0x252   : > { %v2106_v62 = vadd.f32 %v8318_v10, %v2105_v21  ;;  %v6957_v9 = vpop.f32.mrb[177].mxu1  ;;  %2954 = vmatmul.mubr.bf16.gmra.mrb[176].mxu0 %v2642_v20 }
 0x253   : > { %v2108_v52 = vpop.f32.mrb[178].mxu1  ;;  %2963 = vmatprep.mubr.bf16.mxu0 %v10225_v44  ;;  %4928 = vmatpush1.bf16.msra.mxu0 %v7359_v8 }
 0x254   : > { %v2109_v61 = vadd.f32 %v8318_v10, %v2108_v52  ;;  %v6958_v27 = vpop.f32.mrb[179].mxu1  ;;  %v2530_v14 = vmax.f32 %v2106_v62, 0.0  ;;  %v7364_v62 = vld [vmem:[%s10218_s7 + $0x124] ss:$16 sps:$4 sm:$0xff]  }
 0x256   : > { %v2531_v56 = vmax.f32 %v2109_v61, 0.0  ;;  %7064 = vmatmul.mubr.msk.bf16.gmra.mrb[28].mxu1 %vm1777_vm3, %v8014_v2 }
 0x257   : > { %7067 = vmatprep.mubr.msk.bf16.mxu1 %vm7489_vm1, %v10221_v1 }
 0x258   : > { %v2643_v57 = vpack.c.bf16 %v2531_v56, %v2530_v14  ;;  %v7367_v14 = vld [vmem:[%s10218_s7 + $0x144] ss:$16 sps:$4 sm:$0xff]   ;;  %v7365_v56 = vld [vmem:[%s10218_s7 + $0x140] ss:$16 sps:$4 sm:$0xff]  }
 0x259   : > { %v2113_v23 = vpop.f32.mrb[180].mxu1 }
 0x25a   : > { %v2114_v6 = vadd.f32 %v8318_v10, %v2113_v23  ;;  %v6961_v13 = vpop.f32.mrb[181].mxu1  ;;  %2964 = vmatmul.mubr.bf16.gmra.mrb[180].mxu0 %v2643_v57 }
 0x25b   : > { %v2116_v34 = vpop.f32.mrb[182].mxu1  ;;  %2973 = vmatprep.mubr.bf16.mxu0 %v10225_v44  ;;  %v7370_v13 = vld [vmem:[%s10218_s7 + $0x164] ss:$16 sps:$4 sm:$0xff]  }
 0x25c   : > { %v2117_v31 = vadd.f32 %v8318_v10, %v2116_v34  ;;  %v6962_v16 = vpop.f32.mrb[183].mxu1  ;;  %v2532_v45 = vmax.f32 %v2114_v6, 0.0 }
 0x25e   : > { %v2533_v39 = vmax.f32 %v2117_v31, 0.0  ;;  %7068 = vmatmul.mubr.msk.bf16.gmra.mrb[32].mxu1 %vm1777_vm3, %v8026_v24  ;;  %v7368_v31 = vld [vmem:[%s10218_s7 + $0x160] ss:$16 sps:$4 sm:$0xff]  }
 0x25f   : > { %7071 = vmatprep.mubr.msk.bf16.mxu1 %vm7489_vm1, %v10221_v1 }
 0x260   : > { %v2644_v2 = vpack.c.bf16 %v2533_v39, %v2532_v45 }
 0x261   : > { %v2121_v40 = vpop.f32.mrb[184].mxu1 }
 0x262   : > { %v2122_v3 = vadd.f32 %v8318_v10, %v2121_v40  ;;  %v6965_v43 = vpop.f32.mrb[185].mxu1  ;;  %2974 = vmatmul.mubr.bf16.gmra.mrb[184].mxu0 %v2644_v2  ;;  %v7373_v40 = vld [vmem:[%s10218_s7 + $0x184] ss:$16 sps:$4 sm:$0xff]  }
 0x263   : > { %v2124_v12 = vpop.f32.mrb[186].mxu1  ;;  %2983 = vmatprep.mubr.bf16.mxu0 %v10225_v44 }
 0x264   : > { %v2125_v47 = vadd.f32 %v8318_v10, %v2124_v12  ;;  %v6966_v53 = vpop.f32.mrb[187].mxu1  ;;  %v2534_v25 = vmax.f32 %v2122_v3, 0.0  ;;  %v7371_v3 = vld [vmem:[%s10218_s7 + $0x180] ss:$16 sps:$4 sm:$0xff]  }
 0x265   : > { %v7376_v53 = vld [vmem:[%s10218_s7 + $0x1a4] ss:$16 sps:$4 sm:$0xff]  }
 0x266   : > { %v2535_v0 = vmax.f32 %v2125_v47, 0.0  ;;  %7072 = vmatmul.mubr.msk.bf16.gmra.mrb[36].mxu1 %vm1777_vm3, %v8038_v46  ;;  %v7356_v46 = vld [vmem:[%s10218_s7 + $0x100] ss:$16 sps:$4 sm:$0xff]  }
 0x267   : > { %7075 = vmatprep.mubr.msk.bf16.mxu1 %vm7489_vm1, %v10221_v1  ;;  %4265 = vmatpush1.bf16.msra.mxu1 %v7356_v46 }
 0x268   : > { %v2645_v24 = vpack.c.bf16 %v2535_v0, %v2534_v25  ;;  %4266 = vmatprep.subr.bf16.mxu1 %v7364_v62  ;;  %v7374_v0 = vld [vmem:[%s10218_s7 + $0x1a0] ss:$16 sps:$4 sm:$0xff]  }
 0x269   : > { %v2129_v26 = vpop.f32.mrb[188].mxu1 }
 0x26a   : > { %v2130_v58 = vadd.f32 %v8318_v10, %v2129_v26  ;;  %v6969_v59 = vpop.f32.mrb[189].mxu1  ;;  %2984 = vmatmul.mubr.bf16.gmra.mrb[188].mxu0 %v2645_v24 }
 0x26b   : > { %v2132_v38 = vpop.f32.mrb[190].mxu1  ;;  %2993 = vmatprep.mubr.bf16.mxu0 %v10225_v44 }
 0x26c   : > { %v2133_v63 = vadd.f32 %v8318_v10, %v2132_v38  ;;  %v6970_v60 = vpop.f32.mrb[191].mxu1  ;;  %v2536_v18 = vmax.f32 %v2130_v58, 0.0  ;;  %v7379_v38 = vld [vmem:[%s10218_s7 + $0x1c4] ss:$16 sps:$4 sm:$0xff]  }
 0x26e   : > { %v2537_v20 = vmax.f32 %v2133_v63, 0.0  ;;  %7076 = vmatmul.mubr.msk.bf16.gmra.mrb[40].mxu1 %vm1777_vm3, %v8050_v4  ;;  %v7362_v4 = vld [vmem:[%s10218_s7 + $0x120] ss:$16 sps:$4 sm:$0xff]  }
 0x26f   : > { %7079 = vmatprep.mubr.msk.bf16.mxu1 %vm7489_vm1, %v10221_v1  ;;  %4267 = vmatpush1.bf16.msra.mxu1 %v7362_v4  ;;  %v7377_v63 = vld [vmem:[%s10218_s7 + $0x1c0] ss:$16 sps:$4 sm:$0xff]  }
 0x270   : > { %v2646_v21 = vpack.c.bf16 %v2537_v20, %v2536_v18  ;;  %4268 = vmatprep.subr.bf16.mxu1 %v7367_v14  ;;  %v7382_v18 = vld [vmem:[%s10218_s7 + $0x1e4] ss:$16 sps:$4 sm:$0xff]  }
 0x271   : > { %v2137_v9 = vpop.f32.mrb[192].mxu1 }
 0x272   : > { %v2138_v41 = vadd.f32 %v8318_v10, %v2137_v9  ;;  %v6973_v42 = vpop.f32.mrb[193].mxu1  ;;  %2994 = vmatmul.mubr.bf16.gmra.mrb[192].mxu0 %v2646_v21  ;;  %v7380_v21 = vld [vmem:[%s10218_s7 + $0x1e0] ss:$16 sps:$4 sm:$0xff]  }
 0x273   : > { %v2140_v52 = vpop.f32.mrb[194].mxu1  ;;  %3003 = vmatprep.mubr.bf16.mxu0 %v10225_v44  ;;  %4269 = vmatpush1.bf16.msra.mxu1 %v7365_v56 }
 0x274   : > { %v2141_v61 = vadd.f32 %v8318_v10, %v2140_v52  ;;  %v6974_v27 = vpop.f32.mrb[195].mxu1  ;;  %v2538_v57 = vmax.f32 %v2138_v41, 0.0  ;;  %4270 = vmatprep.subr.bf16.mxu1 %v7370_v13  ;;  %v7383_v52 = vld [vmem:[%s10218_s7 + $0x128] ss:$16 sps:$4 sm:$0xff]  }
 0x276   : > { %v2539_v23 = vmax.f32 %v2141_v61, 0.0  ;;  %7080 = vmatmul.mubr.msk.bf16.gmra.mrb[44].mxu1 %vm1777_vm3, %v8068_v29  ;;  %v7385_v61 = vld [vmem:[%s10218_s7 + $0x12c] ss:$16 sps:$4 sm:$0xff]  }
 0x277   : > { %7083 = vmatprep.mubr.msk.bf16.mxu1 %vm7489_vm1, %v10221_v1  ;;  %4271 = vmatpush1.bf16.msra.mxu1 %v7368_v31 }
 0x278   : > { %v2647_v6 = vpack.c.bf16 %v2539_v23, %v2538_v57  ;;  %4272 = vmatprep.subr.bf16.mxu1 %v7373_v40  ;;  %4929 = vmatprep.subr.bf16.mxu0 %v7385_v61 }
 0x279   : > { %v2145_v34 = vpop.f32.mrb[196].mxu1  ;;  %4930 = vmatpush1.bf16.msra.mxu0 %v7383_v52 }
 0x27a   : > { %v2146_v16 = vadd.f32 %v8318_v10, %v2145_v34  ;;  %v6977_v45 = vpop.f32.mrb[197].mxu1  ;;  %3004 = vmatmul.mubr.bf16.gmra.mrb[196].mxu0 %v2647_v6 }
 0x27b   : > { %v2148_v29 = vpop.f32.mrb[198].mxu1  ;;  %3013 = vmatprep.mubr.bf16.mxu0 %v10225_v44  ;;  %4273 = vmatpush1.bf16.msra.mxu1 %v7371_v3 }
 0x27c   : > { %v2149_v39 = vadd.f32 %v8318_v10, %v2148_v29  ;;  %v6978_v2 = vpop.f32.mrb[199].mxu1  ;;  %v2540_v43 = vmax.f32 %v2146_v16, 0.0  ;;  %4274 = vmatprep.subr.bf16.mxu1 %v7376_v53 }
 0x27e   : > { %v2541_v12 = vmax.f32 %v2149_v39, 0.0  ;;  %7084 = vmatmul.mubr.msk.bf16.gmra.mrb[48].mxu1 %vm1777_vm3, %v8080_v33 }
 0x27f   : > { %7087 = vmatprep.mubr.msk.bf16.mxu1 %vm7489_vm1, %v10221_v1  ;;  %4275 = vmatpush1.bf16.msra.mxu1 %v7374_v0 }
 0x280   : > { %v2648_v47 = vpack.c.bf16 %v2541_v12, %v2540_v43  ;;  %4276 = vmatprep.subr.bf16.mxu1 %v7379_v38 }
 0x281   : > { %v2153_v25 = vpop.f32.mrb[200].mxu1 }
 0x282   : > { %v2154_v24 = vadd.f32 %v8318_v10, %v2153_v25  ;;  %v6981_v26 = vpop.f32.mrb[201].mxu1  ;;  %3014 = vmatmul.mubr.bf16.gmra.mrb[200].mxu0 %v2648_v47 }
 0x283   : > { %v2156_v33 = vpop.f32.mrb[202].mxu1  ;;  %3023 = vmatprep.mubr.bf16.mxu0 %v10225_v44  ;;  %4277 = vmatpush1.bf16.msra.mxu1 %v7377_v63 }
 0x284   : > { %v2157_v58 = vadd.f32 %v8318_v10, %v2156_v33  ;;  %v6982_v59 = vpop.f32.mrb[203].mxu1  ;;  %v2542_v60 = vmax.f32 %v2154_v24, 0.0  ;;  %4278 = vmatprep.subr.bf16.mxu1 %v7382_v18  ;;  %v7386_v18 = vld [vmem:[%s10218_s7 + $0x148] ss:$16 sps:$4 sm:$0xff]  }
 0x286   : > { %v2543_v49 = vmax.f32 %v2157_v58, 0.0  ;;  %7088 = vmatmul.mubr.msk.bf16.gmra.mrb[52].mxu1 %vm1777_vm3, %v8092_v55 }
 0x287   : > { %7091 = vmatprep.mubr.msk.bf16.mxu1 %vm7489_vm1, %v10221_v1  ;;  %4279 = vmatpush1.bf16.msra.mxu1 %v7380_v21 }
 0x288   : > { %v2649_v46 = vpack.c.bf16 %v2543_v49, %v2542_v60 }
 0x289   : > { %v2161_v20 = vpop.f32.mrb[204].mxu1 }
 0x28a   : > { %v2162_v8 = vadd.f32 %v8318_v10, %v2161_v20  ;;  %v6985_v7 = vpop.f32.mrb[205].mxu1  ;;  %3024 = vmatmul.mubr.bf16.gmra.mrb[204].mxu0 %v2649_v46  ;;  %v7388_v20 = vld [vmem:[%s10218_s7 + $0x14c] ss:$16 sps:$4 sm:$0xff]  }
 0x28b   : > { %v2164_v55 = vpop.f32.mrb[206].mxu1  ;;  %3033 = vmatprep.mubr.bf16.mxu0 %v10225_v44  ;;  %4931 = vmatprep.subr.bf16.mxu0 %v7388_v20 }
 0x28c   : > { %v2165_v62 = vadd.f32 %v8318_v10, %v2164_v55  ;;  %v6986_v9 = vpop.f32.mrb[207].mxu1  ;;  %v2544_v4 = vmax.f32 %v2162_v8, 0.0  ;;  %4932 = vmatpush1.bf16.msra.mxu0 %v7386_v18 }
 0x28e   : > { %v2545_v41 = vmax.f32 %v2165_v62, 0.0  ;;  %7092 = vmatmul.mubr.msk.bf16.gmra.mrb[56].mxu1 %vm1777_vm3, %v8104_v37 }
 0x28f   : > { %7095 = vmatprep.mubr.msk.bf16.mxu1 %vm7489_vm1, %v10221_v1 }
 0x290   : > { %v2650_v42 = vpack.c.bf16 %v2545_v41, %v2544_v4  ;;  %v10222_v41 = vlaneseq }
 0x291   : > { %v2169_v27 = vpop.f32.mrb[208].mxu1 }
 0x292   : > { %v2170_v14 = vadd.f32 %v8318_v10, %v2169_v27  ;;  %v6989_v56 = vpop.f32.mrb[209].mxu1  ;;  %3034 = vmatmul.mubr.bf16.gmra.mrb[208].mxu0 %v2650_v42 }
 0x293   : > { %v2172_v57 = vpop.f32.mrb[210].mxu1  ;;  %3043 = vmatprep.mubr.bf16.mxu0 %v10225_v44 }
 0x294   : > { %v2173_v37 = vadd.f32 %v8318_v10, %v2172_v57  ;;  %v6990_v23 = vpop.f32.mrb[211].mxu1  ;;  %v2546_v6 = vmax.f32 %v2170_v14, 0.0  ;;  %v8646_v14 = vshrl.u32 %v10222_v41, 7 }
 0x296   : > { %v2547_v13 = vmax.f32 %v2173_v37, 0.0  ;;  %7096 = vmatmul.mubr.msk.bf16.gmra.mrb[60].mxu1 %vm1777_vm3, %v8126_v5  ;;  %10293 = vst [vmem:[#allocation5_spill] sm:$0xff] %v8646_v14 }
 0x297   : > { %7099 = vmatprep.mubr.msk.bf16.mxu1 %vm7489_vm1, %v10221_v1 }
 0x298   : > { %v2651_v34 = vpack.c.bf16 %v2547_v13, %v2546_v6  ;;  %v10224_v6 = vsub.s32 0, %v8646_v14  ;;  %v2709_v13 = vld [vmem:[%s10217_s6] sm:$0x3] }
 0x299   : > { %v2177_v31 = vpop.f32.mrb[212].mxu1 }
 0x29a   : > { %v2178_v16 = vadd.f32 %v8318_v10, %v2177_v31  ;;  %v6993_v45 = vpop.f32.mrb[213].mxu1  ;;  %3044 = vmatmul.mubr.bf16.gmra.mrb[212].mxu0 %v2651_v34  ;;  %v10223_v34 = vsub.s32 1, %v8646_v14 }
 0x29b   : > { %v2180_v29 = vpop.f32.mrb[214].mxu1  ;;  %3053 = vmatprep.mubr.bf16.mxu0 %v10225_v44 }
 0x29c   : > { %v2181_v39 = vadd.f32 %v8318_v10, %v2180_v29  ;;  %v6994_v2 = vpop.f32.mrb[215].mxu1  ;;  %v2548_v40 = vmax.f32 %v2178_v16, 0.0 }
 0x29d   : > { %v8666_v2 = vrot.slane %v2709_v13, %v10223_v34 }
 0x29e   : > { %v2549_v3 = vmax.f32 %v2181_v39, 0.0  ;;  %7100 = vmatmul.mubr.msk.bf16.gmra.mrb[64].mxu1 %vm1777_vm3, %v8138_v30 }
 0x29f   : > { %7103 = vmatprep.mubr.msk.bf16.mxu1 %vm7489_vm1, %v10221_v1 }
 0x2a0   : > { %v2652_v5 = vpack.c.bf16 %v2549_v3, %v2548_v40 }
 0x2a1   : > { %v2185_v43 = vpop.f32.mrb[216].mxu1 }
 0x2a2   : > { %v2186_v12 = vadd.f32 %v8318_v10, %v2185_v43  ;;  %v6997_v47 = vpop.f32.mrb[217].mxu1  ;;  %3054 = vmatmul.mubr.bf16.gmra.mrb[216].mxu0 %v2652_v5 }
 0x2a3   : > { %v2188_v53 = vpop.f32.mrb[218].mxu1  ;;  %3063 = vmatprep.mubr.bf16.mxu0 %v10225_v44 }
 0x2a4   : > { %v2189_v25 = vadd.f32 %v8318_v10, %v2188_v53  ;;  %v6998_v0 = vpop.f32.mrb[219].mxu1  ;;  %v2550_v24 = vmax.f32 %v2186_v12, 0.0 }
 0x2a6   : > { %v2551_v26 = vmax.f32 %v2189_v25, 0.0  ;;  %7104 = vmatmul.mubr.msk.bf16.gmra.mrb[68].mxu1 %vm1777_vm3, %v8150_v54 }
 0x2a7   : > { %7107 = vmatprep.mubr.msk.bf16.mxu1 %vm7489_vm1, %v10221_v1 }
 0x2a8   : > { %v2653_v30 = vpack.c.bf16 %v2551_v26, %v2550_v24 }
 0x2a9   : > { %v2193_v33 = vpop.f32.mrb[220].mxu1 }
 0x2aa   : > { %v2194_v58 = vadd.f32 %v8318_v10, %v2193_v33  ;;  %v7001_v59 = vpop.f32.mrb[221].mxu1  ;;  %3064 = vmatmul.mubr.bf16.gmra.mrb[220].mxu0 %v2653_v30 }
 0x2ab   : > { %v2196_v38 = vpop.f32.mrb[222].mxu1  ;;  %3073 = vmatprep.mubr.bf16.mxu0 %v10225_v44 }
 0x2ac   : > { %v2197_v63 = vadd.f32 %v8318_v10, %v2196_v38  ;;  %v7002_v60 = vpop.f32.mrb[223].mxu1  ;;  %v2552_v49 = vmax.f32 %v2194_v58, 0.0 }
 0x2ae   : > { %v2553_v46 = vmax.f32 %v2197_v63, 0.0  ;;  %7108 = vmatmul.mubr.msk.bf16.gmra.mrb[72].mxu1 %vm1777_vm3, %v8162_v19 }
 0x2af   : > { %7111 = vmatprep.mubr.msk.bf16.mxu1 %vm7489_vm1, %v10221_v1 }
 0x2b0   : > { %v2654_v54 = vpack.c.bf16 %v2553_v46, %v2552_v49 }
 0x2b1   : > { %v2201_v21 = vpop.f32.mrb[224].mxu1 }
 0x2b2   : > { %v2202_v8 = vadd.f32 %v8318_v10, %v2201_v21  ;;  %v7005_v7 = vpop.f32.mrb[225].mxu1  ;;  %3074 = vmatmul.mubr.bf16.gmra.mrb[224].mxu0 %v2654_v54 }
 0x2b3   : > { %v2204_v55 = vpop.f32.mrb[226].mxu1  ;;  %3083 = vmatprep.mubr.bf16.mxu0 %v10225_v44 }
 0x2b4   : > { %v2205_v19 = vadd.f32 %v8318_v10, %v2204_v55  ;;  %v7006_v62 = vpop.f32.mrb[227].mxu1  ;;  %v2554_v9 = vmax.f32 %v2202_v8, 0.0 }
 0x2b6   : > { %v2555_v4 = vmax.f32 %v2205_v19, 0.0  ;;  %7112 = vmatmul.mubr.msk.bf16.gmra.mrb[76].mxu1 %vm1777_vm3, %v8180_v35 }
 0x2b7   : > { %7115 = vmatprep.mubr.msk.bf16.mxu1 %vm7489_vm1, %v10221_v1 }
 0x2b8   : > { %v2655_v42 = vpack.c.bf16 %v2555_v4, %v2554_v9 }
 0x2b9   : > { %v2209_v52 = vpop.f32.mrb[228].mxu1 }
 0x2ba   : > { %v2210_v61 = vadd.f32 %v8318_v10, %v2209_v52  ;;  %v7009_v27 = vpop.f32.mrb[229].mxu1  ;;  %3084 = vmatmul.mubr.bf16.gmra.mrb[228].mxu0 %v2655_v42 }
 0x2bb   : > { %v2212_v56 = vpop.f32.mrb[230].mxu1  ;;  %3093 = vmatprep.mubr.bf16.mxu0 %v10225_v44  ;;  %v7391_v27 = vld [vmem:[%s10218_s7 + $0x16c] ss:$16 sps:$4 sm:$0xff]  }
 0x2bc   : > { %v2213_v57 = vadd.f32 %v8318_v10, %v2212_v56  ;;  %v7010_v37 = vpop.f32.mrb[231].mxu1  ;;  %v2556_v35 = vmax.f32 %v2210_v61, 0.0  ;;  %v7389_v61 = vld [vmem:[%s10218_s7 + $0x168] ss:$16 sps:$4 sm:$0xff]   ;;  %4933 = vmatprep.subr.bf16.mxu0 %v7391_v27 }
 0x2bd   : > { %4934 = vmatpush1.bf16.msra.mxu0 %v7389_v61 }
 0x2be   : > { %v2557_v23 = vmax.f32 %v2213_v57, 0.0  ;;  %7116 = vmatmul.mubr.msk.bf16.gmra.mrb[80].mxu1 %vm1777_vm3, %v8192_v15  ;;  %v8662_v15 = vrot.slane %v2709_v13, %v10224_v6 }
 0x2bf   : > { %7119 = vmatprep.mubr.msk.bf16.mxu1 %vm7489_vm1, %v10221_v1 }
 0x2c0   : > { %v2656_v31 = vpack.c.bf16 %v2557_v23, %v2556_v35  ;;  %v8702_v35 = vld [vmem:[%s10215_s4] ss:$0 sm:$0xff] }
 0x2c1   : > { %v2217_v16 = vpop.f32.mrb[232].mxu1 }
 0x2c2   : > { %v2218_v45 = vadd.f32 %v8318_v10, %v2217_v16  ;;  %v7013_v29 = vpop.f32.mrb[233].mxu1  ;;  %3094 = vmatmul.mubr.bf16.gmra.mrb[232].mxu0 %v2656_v31 }
 0x2c3   : > { %v2220_v39 = vpop.f32.mrb[234].mxu1  ;;  %3103 = vmatprep.mubr.bf16.mxu0 %v10225_v44 }
 0x2c4   : > { %v2221_v40 = vadd.f32 %v8318_v10, %v2220_v39  ;;  %v7014_v3 = vpop.f32.mrb[235].mxu1  ;;  %v2558_v43 = vmax.f32 %v2218_v45, 0.0 }
 0x2c5   : > { %v2835_v5 = vpop.f32.mrb[128].mxu0 }
 0x2c6   : > { %v2559_v12 = vmax.f32 %v2221_v40, 0.0  ;;  %v2836_v47 = vadd.f32 %v2835_v5, %v8662_v15  ;;  %7120 = vmatmul.mubr.msk.bf16.gmra.mrb[84].mxu1 %vm1777_vm3, %v8204_v48  ;;  %v2837_v53 = vpop.f32.mrb[129].mxu0 }
 0x2c7   : > { %v2838_v25 = vadd.f32 %v2837_v53, %v8666_v2  ;;  %v2839_v0 = vpop.f32.mrb[130].mxu0  ;;  %7123 = vmatprep.mubr.msk.bf16.mxu1 %vm7489_vm1, %v10221_v1 }
 0x2c8   : > { %v2840_v24 = vadd.f32 %v2839_v0, %v8662_v15  ;;  %v2841_v26 = vpop.f32.mrb[131].mxu0  ;;  %v2657_v30 = vpack.c.bf16 %v2559_v12, %v2558_v43  ;;  %v3464_v59 = vmax.f32 %v2836_v47, 0.0 }
 0x2c9   : > { %v2842_v33 = vadd.f32 %v2841_v26, %v8666_v2  ;;  %v2225_v58 = vpop.f32.mrb[236].mxu1  ;;  %v3465_v48 = vmax.f32 %v2838_v25, 0.0 }
 0x2ca   : > { %v3466_v38 = vmax.f32 %v2840_v24, 0.0  ;;  %v2226_v63 = vadd.f32 %v8318_v10, %v2225_v58  ;;  %v7017_v60 = vpop.f32.mrb[237].mxu1  ;;  %3104 = vmatmul.mubr.bf16.gmra.mrb[236].mxu0 %v2657_v30 }
 0x2cb   : > { %v3467_v49 = vmax.f32 %v2842_v33, 0.0  ;;  %v2228_v46 = vpop.f32.mrb[238].mxu1  ;;  %3113 = vmatprep.mubr.bf16.mxu0 %v10225_v44 }
 0x2cc   : > { %v8680_v54 = vpack.c.bf16 %v3466_v38, %v3464_v59  ;;  %v2229_v18 = vadd.f32 %v8318_v10, %v2228_v46  ;;  %v7018_v20 = vpop.f32.mrb[239].mxu1  ;;  %v2560_v7 = vmax.f32 %v2226_v63, 0.0 }
 0x2cd   : > { %v2845_v21 = vpop.f32.mrb[132].mxu0  ;;  %v8683_v8 = vpack.c.bf16 %v3467_v49, %v3465_v48 }
 0x2ce   : > { %v2561_v55 = vmax.f32 %v2229_v18, 0.0  ;;  %v2846_v19 = vadd.f32 %v2845_v21, %v8662_v15  ;;  %7124 = vmatmul.mubr.msk.bf16.gmra.mrb[88].mxu1 %vm1777_vm3, %v8227_v17  ;;  %v2847_v62 = vpop.f32.mrb[133].mxu0 }
 0x2cf   : > { %v2848_v9 = vadd.f32 %v2847_v62, %v8666_v2  ;;  %v2849_v4 = vpop.f32.mrb[134].mxu0  ;;  %7127 = vmatprep.mubr.msk.bf16.mxu1 %vm7489_vm1, %v10221_v1 }
 0x2d0   : > { %v2850_v10 = vadd.f32 %v2849_v4, %v8662_v15  ;;  %v2851_v42 = vpop.f32.mrb[135].mxu0  ;;  %v2658_v52 = vpack.c.bf16 %v2561_v55, %v2560_v7  ;;  %v3468_v57 = vmax.f32 %v2846_v19, 0.0 }
 0x2d1   : > { %v2852_v17 = vadd.f32 %v2851_v42, %v8666_v2  ;;  %v2233_v56 = vpop.f32.mrb[240].mxu1  ;;  %v3469_v31 = vmax.f32 %v2848_v9, 0.0 }
 0x2d2   : > { %v3470_v37 = vmax.f32 %v2850_v10, 0.0  ;;  %v2234_v23 = vadd.f32 %v8702_v35, %v2233_v56  ;;  %v7021_v13 = vpop.f32.mrb[241].mxu1  ;;  %3114 = vmatmul.mubr.bf16.gmra.mrb[240].mxu0 %v2658_v52 }
 0x2d3   : > { %v3471_v16 = vmax.f32 %v2852_v17, 0.0  ;;  %v2236_v45 = vpop.f32.mrb[242].mxu1  ;;  %3123 = vmatprep.mubr.bf16.mxu0 %v10225_v44 }
 0x2d4   : > { %v8706_v29 = vpack.c.bf16 %v3470_v37, %v3468_v57  ;;  %v2237_v39 = vadd.f32 %v8702_v35, %v2236_v45  ;;  %v7022_v40 = vpop.f32.mrb[243].mxu1  ;;  %v2562_v43 = vmax.f32 %v2234_v23, 0.0 }
 0x2d5   : > { %v2855_v3 = vpop.f32.mrb[136].mxu0  ;;  %v8709_v5 = vpack.c.bf16 %v3471_v16, %v3469_v31 }
 0x2d6   : > { %v2563_v12 = vmax.f32 %v2237_v39, 0.0  ;;  %v2856_v47 = vadd.f32 %v2855_v3, %v8662_v15  ;;  %7128 = vmatmul.mubr.msk.bf16.gmra.mrb[92].mxu1 %vm1777_vm3, %v8239_v50  ;;  %v2857_v53 = vpop.f32.mrb[137].mxu0 }
 0x2d7   : > { %v2858_v25 = vadd.f32 %v2857_v53, %v8666_v2  ;;  %v2859_v0 = vpop.f32.mrb[138].mxu0  ;;  %7131 = vmatprep.mubr.msk.bf16.mxu1 %vm7489_vm1, %v10221_v1 }
 0x2d8   : > { %v2860_v24 = vadd.f32 %v2859_v0, %v8662_v15  ;;  %v2861_v26 = vpop.f32.mrb[139].mxu0  ;;  %v2659_v30 = vpack.c.bf16 %v2563_v12, %v2562_v43  ;;  %v3472_v59 = vmax.f32 %v2856_v47, 0.0 }
 0x2d9   : > { %v2862_v33 = vadd.f32 %v2861_v26, %v8666_v2  ;;  %v2241_v58 = vpop.f32.mrb[244].mxu1  ;;  %v3473_v50 = vmax.f32 %v2858_v25, 0.0 }
 0x2da   : > { %v3474_v38 = vmax.f32 %v2860_v24, 0.0  ;;  %v2242_v63 = vadd.f32 %v8702_v35, %v2241_v58  ;;  %v7025_v60 = vpop.f32.mrb[245].mxu1  ;;  %3124 = vmatmul.mubr.bf16.gmra.mrb[244].mxu0 %v2659_v30 }
 0x2db   : > { %v3475_v48 = vmax.f32 %v2862_v33, 0.0  ;;  %v2244_v49 = vpop.f32.mrb[246].mxu1  ;;  %3133 = vmatprep.mubr.bf16.mxu0 %v10225_v44 }
 0x2dc   : > { %v8721_v46 = vpack.c.bf16 %v3474_v38, %v3472_v59  ;;  %v2245_v18 = vadd.f32 %v8702_v35, %v2244_v49  ;;  %v7026_v20 = vpop.f32.mrb[247].mxu1  ;;  %v2564_v55 = vmax.f32 %v2242_v63, 0.0 }
 0x2dd   : > { %v2865_v21 = vpop.f32.mrb[140].mxu0  ;;  %v8724_v7 = vpack.c.bf16 %v3475_v48, %v3473_v50 }
 0x2de   : > { %v2565_v19 = vmax.f32 %v2245_v18, 0.0  ;;  %v2866_v62 = vadd.f32 %v2865_v21, %v8662_v15  ;;  %7132 = vmatmul.mubr.msk.bf16.gmra.mrb[96].mxu1 %vm1777_vm3, %v8251_v22  ;;  %v2867_v9 = vpop.f32.mrb[141].mxu0 }
 0x2df   : > { %v2868_v4 = vadd.f32 %v2867_v9, %v8666_v2  ;;  %v2869_v10 = vpop.f32.mrb[142].mxu0  ;;  %7135 = vmatprep.mubr.msk.bf16.mxu1 %vm7489_vm1, %v10221_v1 }
 0x2e0   : > { %v2870_v42 = vadd.f32 %v2869_v10, %v8662_v15  ;;  %v2871_v52 = vpop.f32.mrb[143].mxu0  ;;  %v2660_v61 = vpack.c.bf16 %v2565_v19, %v2564_v55  ;;  %v3476_v56 = vmax.f32 %v2866_v62, 0.0 }
 0x2e1   : > { %v2872_v27 = vadd.f32 %v2871_v52, %v8666_v2  ;;  %v2249_v17 = vpop.f32.mrb[248].mxu1  ;;  %v3477_v22 = vmax.f32 %v2868_v4, 0.0 }
 0x2e2   : > { %v3478_v57 = vmax.f32 %v2870_v42, 0.0  ;;  %v2250_v37 = vadd.f32 %v8702_v35, %v2249_v17  ;;  %v7029_v23 = vpop.f32.mrb[249].mxu1  ;;  %3134 = vmatmul.mubr.bf16.gmra.mrb[248].mxu0 %v2660_v61  ;;  %v7392_v17 = vld [vmem:[%s10218_s7 + $0x188] ss:$16 sps:$4 sm:$0xff]  }
 0x2e3   : > { %v3479_v13 = vmax.f32 %v2872_v27, 0.0  ;;  %v2252_v31 = vpop.f32.mrb[250].mxu1  ;;  %3143 = vmatprep.mubr.bf16.mxu0 %v10225_v44 }
 0x2e4   : > { %v8736_v16 = vpack.c.bf16 %v3478_v57, %v3476_v56  ;;  %v2253_v45 = vadd.f32 %v8702_v35, %v2252_v31  ;;  %v7030_v39 = vpop.f32.mrb[251].mxu1  ;;  %v2566_v43 = vmax.f32 %v2250_v37, 0.0  ;;  %v7394_v56 = vld [vmem:[%s10218_s7 + $0x18c] ss:$16 sps:$4 sm:$0xff]  }
 0x2e5   : > { %v2875_v40 = vpop.f32.mrb[144].mxu0  ;;  %v8739_v3 = vpack.c.bf16 %v3479_v13, %v3477_v22  ;;  %4935 = vmatprep.subr.bf16.mxu0 %v7394_v56 }
 0x2e6   : > { %v2567_v12 = vmax.f32 %v2253_v45, 0.0  ;;  %v2876_v47 = vadd.f32 %v2875_v40, %v8662_v15  ;;  %7136 = vmatmul.mubr.msk.bf16.gmra.mrb[100].mxu1 %vm1777_vm3, %v8263_v32  ;;  %v2877_v53 = vpop.f32.mrb[145].mxu0  ;;  %4936 = vmatpush1.bf16.msra.mxu0 %v7392_v17 }
 0x2e7   : > { %v2878_v25 = vadd.f32 %v2877_v53, %v8666_v2  ;;  %v2879_v0 = vpop.f32.mrb[146].mxu0  ;;  %7139 = vmatprep.mubr.msk.bf16.mxu1 %vm7489_vm1, %v10221_v1 }
 0x2e8   : > { %v2880_v24 = vadd.f32 %v2879_v0, %v8662_v15  ;;  %v2881_v26 = vpop.f32.mrb[147].mxu0  ;;  %v2661_v30 = vpack.c.bf16 %v2567_v12, %v2566_v43  ;;  %v3480_v59 = vmax.f32 %v2876_v47, 0.0 }
 0x2e9   : > { %v2882_v33 = vadd.f32 %v2881_v26, %v8666_v2  ;;  %v2257_v58 = vpop.f32.mrb[252].mxu1  ;;  %v3481_v32 = vmax.f32 %v2878_v25, 0.0 }
 0x2ea   : > { %v3482_v38 = vmax.f32 %v2880_v24, 0.0  ;;  %v2258_v63 = vadd.f32 %v8702_v35, %v2257_v58  ;;  %v7033_v60 = vpop.f32.mrb[253].mxu1  ;;  %3144 = vmatmul.mubr.bf16.gmra.mrb[252].mxu0 %v2661_v30 }
 0x2eb   : > { %v3483_v50 = vmax.f32 %v2882_v33, 0.0  ;;  %v2260_v48 = vpop.f32.mrb[254].mxu1  ;;  %3153 = vmatprep.mubr.bf16.mxu0 %v10225_v44 }
 0x2ec   : > { %v8751_v49 = vpack.c.bf16 %v3482_v38, %v3480_v59  ;;  %v2261_v18 = vadd.f32 %v8702_v35, %v2260_v48  ;;  %v7034_v20 = vpop.f32.mrb[255].mxu1  ;;  %v2568_v19 = vmax.f32 %v2258_v63, 0.0 }
 0x2ed   : > { %v2885_v21 = vpop.f32.mrb[148].mxu0  ;;  %v8754_v55 = vpack.c.bf16 %v3483_v50, %v3481_v32 }
 0x2ee   : > { %v2569_v62 = vmax.f32 %v2261_v18, 0.0  ;;  %v2886_v9 = vadd.f32 %v2885_v21, %v8662_v15  ;;  %7140 = vmatmul.mubr.msk.bf16.gmra.mrb[104].mxu1 %vm1777_vm3, %v8281_v28  ;;  %v2887_v4 = vpop.f32.mrb[149].mxu0 }
 0x2ef   : > { %v2888_v10 = vadd.f32 %v2887_v4, %v8666_v2  ;;  %v2889_v42 = vpop.f32.mrb[150].mxu0  ;;  %7143 = vmatprep.mubr.msk.bf16.mxu1 %vm7489_vm1, %v10221_v1 }
 0x2f0   : > { %v2662_v52 = vpack.c.bf16 %v2569_v62, %v2568_v19  ;;  %v2890_v61 = vadd.f32 %v2889_v42, %v8662_v15  ;;  %v2891_v27 = vpop.f32.mrb[151].mxu0  ;;  %v3484_v37 = vmax.f32 %v2886_v9, 0.0 }
 0x2f1   : > { %v2892_v28 = vadd.f32 %v2891_v27, %v8666_v2  ;;  %v2265_v57 = vpop.f32.mrb[0].mxu1  ;;  %v3485_v31 = vmax.f32 %v2888_v10, 0.0 }
 0x2f2   : > { %v3486_v23 = vmax.f32 %v2890_v61, 0.0  ;;  %v2266_v22 = vadd.f32 %v8702_v35, %v2265_v57  ;;  %v7037_v13 = vpop.f32.mrb[1].mxu1  ;;  %3154 = vmatmul.mubr.bf16.gmra.mrb[0].mxu0 %v2662_v52 }
 0x2f3   : > { %v3487_v45 = vmax.f32 %v2892_v28, 0.0  ;;  %v2268_v39 = vpop.f32.mrb[2].mxu1  ;;  %3163 = vmatprep.mubr.bf16.mxu0 %v10225_v44 }
 0x2f4   : > { %v8772_v40 = vpack.c.bf16 %v3486_v23, %v3484_v37  ;;  %v2269_v43 = vadd.f32 %v8702_v35, %v2268_v39  ;;  %v7038_v12 = vpop.f32.mrb[3].mxu1  ;;  %v2570_v25 = vmax.f32 %v2266_v22, 0.0 }
 0x2f5   : > { %v2895_v47 = vpop.f32.mrb[152].mxu0  ;;  %v8775_v53 = vpack.c.bf16 %v3487_v45, %v3485_v31 }
 0x2f6   : > { %v2571_v0 = vmax.f32 %v2269_v43, 0.0  ;;  %v2896_v24 = vadd.f32 %v2895_v47, %v8662_v15  ;;  %7144 = vmatmul.mubr.msk.bf16.gmra.mrb[108].mxu1 %vm1777_vm3, %v8293_v36  ;;  %v2897_v26 = vpop.f32.mrb[153].mxu0 }
 0x2f7   : > { %v2898_v30 = vadd.f32 %v2897_v26, %v8666_v2  ;;  %v2899_v33 = vpop.f32.mrb[154].mxu0  ;;  %7147 = vmatprep.mubr.msk.bf16.mxu1 %vm7489_vm1, %v10221_v1 }
 0x2f8   : > { %v2663_v58 = vpack.c.bf16 %v2571_v0, %v2570_v25  ;;  %v2900_v59 = vadd.f32 %v2899_v33, %v8662_v15  ;;  %v2901_v38 = vpop.f32.mrb[155].mxu0  ;;  %v3488_v32 = vmax.f32 %v2896_v24, 0.0 }
 0x2f9   : > { %v2902_v63 = vadd.f32 %v2901_v38, %v8666_v2  ;;  %v2273_v60 = vpop.f32.mrb[4].mxu1  ;;  %v3489_v36 = vmax.f32 %v2898_v30, 0.0 }
 0x2fa   : > { %v3490_v50 = vmax.f32 %v2900_v59, 0.0  ;;  %v2274_v48 = vadd.f32 %v8702_v35, %v2273_v60  ;;  %v7041_v18 = vpop.f32.mrb[5].mxu1  ;;  %3164 = vmatmul.mubr.bf16.gmra.mrb[4].mxu0 %v2663_v58 }
 0x2fb   : > { %v3491_v20 = vmax.f32 %v2902_v63, 0.0  ;;  %v2276_v21 = vpop.f32.mrb[6].mxu1  ;;  %3173 = vmatprep.mubr.bf16.mxu0 %v10225_v44 }
 0x2fc   : > { %v8787_v19 = vpack.c.bf16 %v3490_v50, %v3488_v32  ;;  %v2277_v62 = vadd.f32 %v8702_v35, %v2276_v21  ;;  %v7042_v9 = vpop.f32.mrb[7].mxu1  ;;  %v2572_v42 = vmax.f32 %v2274_v48, 0.0 }
 0x2fd   : > { %v2905_v4 = vpop.f32.mrb[156].mxu0  ;;  %v8790_v10 = vpack.c.bf16 %v3491_v20, %v3489_v36 }
 0x2fe   : > { %v2573_v52 = vmax.f32 %v2277_v62, 0.0  ;;  %v2906_v61 = vadd.f32 %v2905_v4, %v8662_v15  ;;  %7148 = vmatmul.mubr.msk.bf16.gmra.mrb[112].mxu1 %vm1777_vm3, %v8305_v51  ;;  %v2907_v27 = vpop.f32.mrb[157].mxu0 }
 0x2ff   : > { %v2908_v17 = vadd.f32 %v2907_v27, %v8666_v2  ;;  %v2909_v56 = vpop.f32.mrb[158].mxu0  ;;  %7151 = vmatprep.mubr.msk.bf16.mxu1 %vm7489_vm1, %v10221_v1 }
 0x300   : > { %v2664_v28 = vpack.c.bf16 %v2573_v52, %v2572_v42  ;;  %v2910_v57 = vadd.f32 %v2909_v56, %v8662_v15  ;;  %v2911_v37 = vpop.f32.mrb[159].mxu0  ;;  %v3492_v13 = vmax.f32 %v2906_v61, 0.0 }
 0x301   : > { %v2912_v23 = vadd.f32 %v2911_v37, %v8666_v2  ;;  %v2281_v22 = vpop.f32.mrb[8].mxu1  ;;  %v3493_v51 = vmax.f32 %v2908_v17, 0.0 }
 0x302   : > { %v3494_v31 = vmax.f32 %v2910_v57, 0.0  ;;  %v2282_v45 = vadd.f32 %v8702_v35, %v2281_v22  ;;  %v7045_v39 = vpop.f32.mrb[9].mxu1  ;;  %3174 = vmatmul.mubr.bf16.gmra.mrb[8].mxu0 %v2664_v28 }
 0x303   : > { %v3495_v43 = vmax.f32 %v2912_v23, 0.0  ;;  %v2284_v12 = vpop.f32.mrb[10].mxu1  ;;  %3183 = vmatprep.mubr.bf16.mxu0 %v10225_v44  ;;  %v7395_v39 = vld [vmem:[%s10218_s7 + $0x1a8] ss:$16 sps:$4 sm:$0xff]  }
 0x304   : > { %v8802_v47 = vpack.c.bf16 %v3494_v31, %v3492_v13  ;;  %v2285_v25 = vadd.f32 %v8702_v35, %v2284_v12  ;;  %v7046_v0 = vpop.f32.mrb[11].mxu1  ;;  %v2574_v30 = vmax.f32 %v2282_v45, 0.0 }
 0x305   : > { %v2915_v24 = vpop.f32.mrb[160].mxu0  ;;  %v8805_v26 = vpack.c.bf16 %v3495_v43, %v3493_v51  ;;  %v7397_v51 = vld [vmem:[%s10218_s7 + $0x1ac] ss:$16 sps:$4 sm:$0xff]  }
 0x306   : > { %v2575_v33 = vmax.f32 %v2285_v25, 0.0  ;;  %v2916_v58 = vadd.f32 %v2915_v24, %v8662_v15  ;;  %7152 = vmatmul.mubr.msk.bf16.gmra.mrb[116].mxu1 %vm1777_vm3, %v8322_v11  ;;  %v2917_v59 = vpop.f32.mrb[161].mxu0  ;;  %4937 = vmatprep.subr.bf16.mxu0 %v7397_v51 }
 0x307   : > { %v2918_v38 = vadd.f32 %v2917_v59, %v8666_v2  ;;  %v2919_v63 = vpop.f32.mrb[162].mxu0  ;;  %4280 = vmatprep.mubr.bf16.mxu1 %v8683_v8  ;;  %4938 = vmatpush1.bf16.msra.mxu0 %v7395_v39 }
 0x308   : > { %v2665_v60 = vpack.c.bf16 %v2575_v33, %v2574_v30  ;;  %v2920_v32 = vadd.f32 %v2919_v63, %v8662_v15  ;;  %v2921_v50 = vpop.f32.mrb[163].mxu0  ;;  %v3496_v36 = vmax.f32 %v2916_v58, 0.0 }
 0x309   : > { %v2922_v48 = vadd.f32 %v2921_v50, %v8666_v2  ;;  %v2289_v18 = vpop.f32.mrb[12].mxu1  ;;  %v3497_v11 = vmax.f32 %v2918_v38, 0.0 }
 0x30a   : > { %v3498_v20 = vmax.f32 %v2920_v32, 0.0  ;;  %v2290_v21 = vadd.f32 %v8702_v35, %v2289_v18  ;;  %v7049_v62 = vpop.f32.mrb[13].mxu1  ;;  %3184 = vmatmul.mubr.bf16.gmra.mrb[12].mxu0 %v2665_v60 }
 0x30b   : > { %v3499_v9 = vmax.f32 %v2922_v48, 0.0  ;;  %v2292_v4 = vpop.f32.mrb[14].mxu1  ;;  %3193 = vmatprep.mubr.bf16.mxu0 %v10225_v44 }
 0x30c   : > { %v8816_v42 = vpack.c.bf16 %v3498_v20, %v3496_v36  ;;  %v2293_v52 = vadd.f32 %v8702_v35, %v2292_v4  ;;  %v7050_v61 = vpop.f32.mrb[15].mxu1  ;;  %v2576_v56 = vmax.f32 %v2290_v21, 0.0 }
 0x30d   : > { %v2925_v27 = vpop.f32.mrb[164].mxu0  ;;  %v8819_v17 = vpack.c.bf16 %v3499_v9, %v3497_v11 }
 0x30e   : > { %v2577_v28 = vmax.f32 %v2293_v52, 0.0  ;;  %v2926_v57 = vadd.f32 %v2925_v27, %v8662_v15  ;;  %v2927_v37 = vpop.f32.mrb[165].mxu0  ;;  %4281 = vmatmul.mubr.bf16.vlgmr.msra.gmra.mrb[120].mxu1 %v8680_v54 }
 0x30f   : > { %v2928_v23 = vadd.f32 %v2927_v37, %v8666_v2  ;;  %v2929_v22 = vpop.f32.mrb[166].mxu0  ;;  %4290 = vmatprep.mubr.bf16.mxu1 %v8709_v5 }
 0x310   : > { %v2666_v13 = vpack.c.bf16 %v2577_v28, %v2576_v56  ;;  %v2930_v31 = vadd.f32 %v2929_v22, %v8662_v15  ;;  %v2931_v45 = vpop.f32.mrb[167].mxu0  ;;  %v3500_v25 = vmax.f32 %v2926_v57, 0.0 }
 0x311   : > { %v2932_v43 = vadd.f32 %v2931_v45, %v8666_v2  ;;  %v2297_v12 = vpop.f32.mrb[16].mxu1  ;;  %v3501_v33 = vmax.f32 %v2928_v23, 0.0 }
 0x312   : > { %v3502_v0 = vmax.f32 %v2930_v31, 0.0  ;;  %v2298_v24 = vadd.f32 %v8702_v35, %v2297_v12  ;;  %v7053_v30 = vpop.f32.mrb[17].mxu1  ;;  %3194 = vmatmul.mubr.bf16.gmra.mrb[16].mxu0 %v2666_v13 }
 0x313   : > { %v3503_v58 = vmax.f32 %v2932_v43, 0.0  ;;  %v2300_v59 = vpop.f32.mrb[18].mxu1  ;;  %3203 = vmatprep.mubr.bf16.mxu0 %v10225_v44 }
 0x314   : > { %v8835_v38 = vpack.c.bf16 %v3502_v0, %v3500_v25  ;;  %v2301_v63 = vadd.f32 %v8702_v35, %v2300_v59  ;;  %v7054_v60 = vpop.f32.mrb[19].mxu1  ;;  %v2578_v48 = vmax.f32 %v2298_v24, 0.0 }
 0x315   : > { %v2935_v32 = vpop.f32.mrb[168].mxu0  ;;  %v8838_v50 = vpack.c.bf16 %v3503_v58, %v3501_v33 }
 0x316   : > { %v2579_v18 = vmax.f32 %v2301_v63, 0.0  ;;  %v2936_v36 = vadd.f32 %v2935_v32, %v8662_v15  ;;  %v2937_v20 = vpop.f32.mrb[169].mxu0  ;;  %4291 = vmatmul.mubr.bf16.gmra.mrb[124].mxu1 %v8706_v29 }
 0x317   : > { %v2938_v21 = vadd.f32 %v2937_v20, %v8666_v2  ;;  %v2939_v62 = vpop.f32.mrb[170].mxu0  ;;  %4300 = vmatprep.mubr.bf16.mxu1 %v8724_v7 }
 0x318   : > { %v2667_v11 = vpack.c.bf16 %v2579_v18, %v2578_v48  ;;  %v2940_v9 = vadd.f32 %v2939_v62, %v8662_v15  ;;  %v2941_v4 = vpop.f32.mrb[171].mxu0  ;;  %v3504_v27 = vmax.f32 %v2936_v36, 0.0 }
 0x319   : > { %v2942_v52 = vadd.f32 %v2941_v4, %v8666_v2  ;;  %v2305_v61 = vpop.f32.mrb[20].mxu1  ;;  %v3505_v37 = vmax.f32 %v2938_v21, 0.0 }
 0x31a   : > { %v3506_v56 = vmax.f32 %v2940_v9, 0.0  ;;  %v2306_v28 = vadd.f32 %v8702_v35, %v2305_v61  ;;  %v7057_v57 = vpop.f32.mrb[21].mxu1  ;;  %3204 = vmatmul.mubr.bf16.gmra.mrb[20].mxu0 %v2667_v11 }
 0x31b   : > { %v3507_v23 = vmax.f32 %v2942_v52, 0.0  ;;  %v2308_v22 = vpop.f32.mrb[22].mxu1  ;;  %3213 = vmatprep.mubr.bf16.mxu0 %v10225_v44 }
 0x31c   : > { %v8848_v13 = vpack.c.bf16 %v3506_v56, %v3504_v27  ;;  %v2309_v31 = vadd.f32 %v8702_v35, %v2308_v22  ;;  %v7058_v45 = vpop.f32.mrb[23].mxu1  ;;  %v2580_v43 = vmax.f32 %v2306_v28, 0.0 }
 0x31d   : > { %v2945_v39 = vpop.f32.mrb[172].mxu0  ;;  %v8851_v51 = vpack.c.bf16 %v3507_v23, %v3505_v37 }
 0x31e   : > { %v2581_v12 = vmax.f32 %v2309_v31, 0.0  ;;  %v2946_v25 = vadd.f32 %v2945_v39, %v8662_v15  ;;  %v2947_v0 = vpop.f32.mrb[173].mxu0  ;;  %4301 = vmatmul.mubr.bf16.gmra.mrb[128].mxu1 %v8721_v46 }
 0x31f   : > { %v2948_v24 = vadd.f32 %v2947_v0, %v8666_v2  ;;  %v2949_v30 = vpop.f32.mrb[174].mxu0  ;;  %4310 = vmatprep.mubr.bf16.mxu1 %v8739_v3 }
 0x320   : > { %v2668_v33 = vpack.c.bf16 %v2581_v12, %v2580_v43  ;;  %v2950_v58 = vadd.f32 %v2949_v30, %v8662_v15  ;;  %v2951_v59 = vpop.f32.mrb[175].mxu0  ;;  %v3508_v32 = vmax.f32 %v2946_v25, 0.0 }
 0x321   : > { %v2952_v63 = vadd.f32 %v2951_v59, %v8666_v2  ;;  %v2313_v60 = vpop.f32.mrb[24].mxu1  ;;  %v3509_v20 = vmax.f32 %v2948_v24, 0.0 }
 0x322   : > { %v3510_v48 = vmax.f32 %v2950_v58, 0.0  ;;  %v2314_v18 = vadd.f32 %v8702_v35, %v2313_v60  ;;  %v7061_v36 = vpop.f32.mrb[25].mxu1  ;;  %3214 = vmatmul.mubr.bf16.gmra.mrb[24].mxu0 %v2668_v33 }
 0x323   : > { %v3511_v21 = vmax.f32 %v2952_v63, 0.0  ;;  %v2316_v62 = vpop.f32.mrb[26].mxu1  ;;  %3223 = vmatprep.mubr.bf16.mxu0 %v10225_v44 }
 0x324   : > { %v8861_v11 = vpack.c.bf16 %v3510_v48, %v3508_v32  ;;  %v2317_v9 = vadd.f32 %v8702_v35, %v2316_v62  ;;  %v7062_v4 = vpop.f32.mrb[27].mxu1  ;;  %v2582_v27 = vmax.f32 %v2314_v18, 0.0  ;;  %v7398_v32 = vld [vmem:[%s10218_s7 + $0x1c8] ss:$16 sps:$4 sm:$0xff]   ;;  %v7400_v48 = vld [vmem:[%s10218_s7 + $0x1cc] ss:$16 sps:$4 sm:$0xff]  }
 0x325   : > { %v2955_v52 = vpop.f32.mrb[176].mxu0  ;;  %v8864_v61 = vpack.c.bf16 %v3511_v21, %v3509_v20  ;;  %4939 = vmatprep.subr.bf16.mxu0 %v7400_v48 }
 0x326   : > { %v2583_v56 = vmax.f32 %v2317_v9, 0.0  ;;  %v2956_v28 = vadd.f32 %v2955_v52, %v8662_v15  ;;  %v2957_v57 = vpop.f32.mrb[177].mxu0  ;;  %4311 = vmatmul.mubr.bf16.gmra.mrb[132].mxu1 %v8736_v16  ;;  %4940 = vmatpush1.bf16.msra.mxu0 %v7398_v32 }
 0x327   : > { %v2958_v37 = vadd.f32 %v2957_v57, %v8666_v2  ;;  %v2959_v23 = vpop.f32.mrb[178].mxu0  ;;  %4320 = vmatprep.mubr.bf16.mxu1 %v8754_v55 }
 0x328   : > { %v2669_v22 = vpack.c.bf16 %v2583_v56, %v2582_v27  ;;  %v2960_v31 = vadd.f32 %v2959_v23, %v8662_v15  ;;  %v2961_v45 = vpop.f32.mrb[179].mxu0  ;;  %v3512_v12 = vmax.f32 %v2956_v28, 0.0 }
 0x329   : > { %v2962_v39 = vadd.f32 %v2961_v45, %v8666_v2  ;;  %v2321_v43 = vpop.f32.mrb[28].mxu1  ;;  %v3513_v30 = vmax.f32 %v2958_v37, 0.0 }
 0x32a   : > { %v3514_v25 = vmax.f32 %v2960_v31, 0.0  ;;  %v2322_v0 = vadd.f32 %v8702_v35, %v2321_v43  ;;  %v7065_v24 = vpop.f32.mrb[29].mxu1  ;;  %3224 = vmatmul.mubr.bf16.gmra.mrb[28].mxu0 %v2669_v22 }
 0x32b   : > { %v3515_v33 = vmax.f32 %v2962_v39, 0.0  ;;  %v2324_v58 = vpop.f32.mrb[30].mxu1  ;;  %3233 = vmatprep.mubr.bf16.mxu0 %v10225_v44 }
 0x32c   : > { %v8874_v59 = vpack.c.bf16 %v3514_v25, %v3512_v12  ;;  %v2325_v63 = vadd.f32 %v8702_v35, %v2324_v58  ;;  %v7066_v60 = vpop.f32.mrb[31].mxu1  ;;  %v2584_v20 = vmax.f32 %v2322_v0, 0.0 }
 0x32d   : > { %v2965_v18 = vpop.f32.mrb[180].mxu0  ;;  %v8883_v36 = vpack.c.bf16 %v3515_v33, %v3513_v30 }
 0x32e   : > { %10294 = vst [vmem:[#allocation6_spill] sm:$0xff] %v8874_v59  ;;  %v2585_v21 = vmax.f32 %v2325_v63, 0.0  ;;  %v2966_v62 = vadd.f32 %v2965_v18, %v8662_v15  ;;  %v2967_v9 = vpop.f32.mrb[181].mxu0  ;;  %4321 = vmatmul.mubr.bf16.gmra.mrb[136].mxu1 %v8751_v49 }
 0x32f   : > { %v2968_v4 = vadd.f32 %v2967_v9, %v8666_v2  ;;  %v2969_v52 = vpop.f32.mrb[182].mxu0  ;;  %4330 = vmatprep.mubr.bf16.mxu1 %v8775_v53 }
 0x330   : > { %v2670_v27 = vpack.c.bf16 %v2585_v21, %v2584_v20  ;;  %v2970_v56 = vadd.f32 %v2969_v52, %v8662_v15  ;;  %v2971_v28 = vpop.f32.mrb[183].mxu0  ;;  %v3516_v23 = vmax.f32 %v2966_v62, 0.0 }
 0x331   : > { %v2972_v57 = vadd.f32 %v2971_v28, %v8666_v2  ;;  %v2329_v37 = vpop.f32.mrb[32].mxu1  ;;  %v3517_v39 = vmax.f32 %v2968_v4, 0.0 }
 0x332   : > { %v3518_v22 = vmax.f32 %v2970_v56, 0.0  ;;  %v2330_v31 = vadd.f32 %v8702_v35, %v2329_v37  ;;  %v7069_v45 = vpop.f32.mrb[33].mxu1  ;;  %3234 = vmatmul.mubr.bf16.gmra.mrb[32].mxu0 %v2670_v27 }
 0x333   : > { %v3519_v43 = vmax.f32 %v2972_v57, 0.0  ;;  %v2332_v12 = vpop.f32.mrb[34].mxu1  ;;  %3243 = vmatprep.mubr.bf16.mxu0 %v10225_v44 }
 0x334   : > { %v8893_v25 = vpack.c.bf16 %v3518_v22, %v3516_v23  ;;  %v2333_v0 = vadd.f32 %v8702_v35, %v2332_v12  ;;  %v7070_v24 = vpop.f32.mrb[35].mxu1  ;;  %v2586_v58 = vmax.f32 %v2330_v31, 0.0 }
 0x335   : > { %v2975_v30 = vpop.f32.mrb[184].mxu0  ;;  %v8896_v33 = vpack.c.bf16 %v3519_v43, %v3517_v39 }
 0x336   : > { %10295 = vst [vmem:[#allocation7_spill] sm:$0xff] %v8893_v25  ;;  %v2587_v63 = vmax.f32 %v2333_v0, 0.0  ;;  %v2976_v60 = vadd.f32 %v2975_v30, %v8662_v15  ;;  %v2977_v32 = vpop.f32.mrb[185].mxu0  ;;  %4331 = vmatmul.mubr.bf16.gmra.mrb[140].mxu1 %v8772_v40 }
 0x337   : > { %10296 = vst [vmem:[#allocation8_spill] sm:$0xff] %v8896_v33  ;;  %v2978_v48 = vadd.f32 %v2977_v32, %v8666_v2  ;;  %v2979_v18 = vpop.f32.mrb[186].mxu0  ;;  %4340 = vmatprep.mubr.bf16.mxu1 %v8790_v10 }
 0x338   : > { %v2671_v20 = vpack.c.bf16 %v2587_v63, %v2586_v58  ;;  %v2980_v21 = vadd.f32 %v2979_v18, %v8662_v15  ;;  %v2981_v62 = vpop.f32.mrb[187].mxu0  ;;  %v3520_v52 = vmax.f32 %v2976_v60, 0.0 }
 0x339   : > { %v2982_v9 = vadd.f32 %v2981_v62, %v8666_v2  ;;  %v2337_v4 = vpop.f32.mrb[36].mxu1  ;;  %v3521_v57 = vmax.f32 %v2978_v48, 0.0 }
 0x33a   : > { %v3522_v27 = vmax.f32 %v2980_v21, 0.0  ;;  %v2338_v56 = vadd.f32 %v8702_v35, %v2337_v4  ;;  %v7073_v28 = vpop.f32.mrb[37].mxu1  ;;  %3244 = vmatmul.mubr.bf16.gmra.mrb[36].mxu0 %v2671_v20 }
 0x33b   : > { %v3523_v37 = vmax.f32 %v2982_v9, 0.0  ;;  %v2340_v23 = vpop.f32.mrb[38].mxu1  ;;  %3253 = vmatprep.mubr.bf16.mxu0 %v10225_v44 }
 0x33c   : > { %v8906_v22 = vpack.c.bf16 %v3522_v27, %v3520_v52  ;;  %v2341_v31 = vadd.f32 %v8702_v35, %v2340_v23  ;;  %v7074_v45 = vpop.f32.mrb[39].mxu1  ;;  %v2588_v12 = vmax.f32 %v2338_v56, 0.0 }
 0x33d   : > { %v2985_v39 = vpop.f32.mrb[188].mxu0  ;;  %v8909_v43 = vpack.c.bf16 %v3523_v37, %v3521_v57 }
 0x33e   : > { %10297 = vst [vmem:[#allocation9_spill] sm:$0xff] %v8906_v22  ;;  %v2589_v0 = vmax.f32 %v2341_v31, 0.0  ;;  %v2986_v24 = vadd.f32 %v2985_v39, %v8662_v15  ;;  %v2987_v30 = vpop.f32.mrb[189].mxu0  ;;  %4341 = vmatmul.mubr.bf16.gmra.mrb[144].mxu1 %v8787_v19 }
 0x33f   : > { %10298 = vst [vmem:[#allocation10_spill] sm:$0xff] %v8909_v43  ;;  %v2988_v58 = vadd.f32 %v2987_v30, %v8666_v2  ;;  %v2989_v63 = vpop.f32.mrb[190].mxu0  ;;  %4350 = vmatprep.mubr.bf16.mxu1 %v8805_v26 }
 0x340   : > { %v2672_v60 = vpack.c.bf16 %v2589_v0, %v2588_v12  ;;  %v2990_v32 = vadd.f32 %v2989_v63, %v8662_v15  ;;  %v2991_v48 = vpop.f32.mrb[191].mxu0  ;;  %v3524_v21 = vmax.f32 %v2986_v24, 0.0 }
 0x341   : > { %v2992_v18 = vadd.f32 %v2991_v48, %v8666_v2  ;;  %v2345_v20 = vpop.f32.mrb[40].mxu1  ;;  %v3525_v52 = vmax.f32 %v2988_v58, 0.0 }
 0x342   : > { %v3526_v62 = vmax.f32 %v2990_v32, 0.0  ;;  %v2346_v9 = vadd.f32 %v8702_v35, %v2345_v20  ;;  %v7077_v4 = vpop.f32.mrb[41].mxu1  ;;  %3254 = vmatmul.mubr.bf16.gmra.mrb[40].mxu0 %v2672_v60 }
 0x343   : > { %v3527_v27 = vmax.f32 %v2992_v18, 0.0  ;;  %v2348_v56 = vpop.f32.mrb[42].mxu1  ;;  %3263 = vmatprep.mubr.bf16.mxu0 %v10225_v44 }
 0x344   : > { %v8919_v28 = vpack.c.bf16 %v3526_v62, %v3524_v21  ;;  %v2349_v57 = vadd.f32 %v8702_v35, %v2348_v56  ;;  %v7078_v37 = vpop.f32.mrb[43].mxu1  ;;  %v2590_v45 = vmax.f32 %v2346_v9, 0.0 }
 0x345   : > { %v2995_v23 = vpop.f32.mrb[192].mxu0  ;;  %v8922_v31 = vpack.c.bf16 %v3527_v27, %v3525_v52  ;;  %v7401_v37 = vld [vmem:[%s10218_s7 + $0x1e8] ss:$16 sps:$4 sm:$0xff]  }
 0x346   : > { %10299 = vst [vmem:[#allocation11_spill] sm:$0xff] %v8919_v28  ;;  %v2591_v39 = vmax.f32 %v2349_v57, 0.0  ;;  %v2996_v12 = vadd.f32 %v2995_v23, %v8662_v15  ;;  %v2997_v0 = vpop.f32.mrb[193].mxu0  ;;  %4351 = vmatmul.mubr.bf16.gmra.mrb[148].mxu1 %v8802_v47  ;;  %v7403_v23 = vld [vmem:[%s10218_s7 + $0x1ec] ss:$16 sps:$4 sm:$0xff]  }
 0x347   : > { %10300 = vst [vmem:[#allocation12_spill] sm:$0xff] %v8922_v31  ;;  %v2998_v24 = vadd.f32 %v2997_v0, %v8666_v2  ;;  %v2999_v30 = vpop.f32.mrb[194].mxu0  ;;  %4360 = vmatprep.mubr.bf16.mxu1 %v8819_v17  ;;  %4941 = vmatprep.subr.bf16.mxu0 %v7403_v23 }
 0x348   : > { %v2673_v58 = vpack.c.bf16 %v2591_v39, %v2590_v45  ;;  %v3000_v63 = vadd.f32 %v2999_v30, %v8662_v15  ;;  %v3001_v60 = vpop.f32.mrb[195].mxu0  ;;  %v3528_v18 = vmax.f32 %v2996_v12, 0.0  ;;  %4942 = vmatpush1.bf16.msra.mxu0 %v7401_v37 }
 0x349   : > { %v3002_v32 = vadd.f32 %v3001_v60, %v8666_v2  ;;  %v2353_v48 = vpop.f32.mrb[44].mxu1  ;;  %v3529_v9 = vmax.f32 %v2998_v24, 0.0 }
 0x34a   : > { %v3530_v20 = vmax.f32 %v3000_v63, 0.0  ;;  %v2354_v21 = vadd.f32 %v8702_v35, %v2353_v48  ;;  %v7081_v62 = vpop.f32.mrb[45].mxu1  ;;  %3264 = vmatmul.mubr.bf16.gmra.mrb[44].mxu0 %v2673_v58 }
 0x34b   : > { %v3531_v4 = vmax.f32 %v3002_v32, 0.0  ;;  %v2356_v52 = vpop.f32.mrb[46].mxu1  ;;  %3273 = vmatprep.mubr.bf16.mxu0 %v10225_v44 }
 0x34c   : > { %v8932_v27 = vpack.c.bf16 %v3530_v20, %v3528_v18  ;;  %v2357_v56 = vadd.f32 %v8702_v35, %v2356_v52  ;;  %v7082_v57 = vpop.f32.mrb[47].mxu1  ;;  %v2592_v12 = vmax.f32 %v2354_v21, 0.0 }
 0x34d   : > { %v3005_v45 = vpop.f32.mrb[196].mxu0  ;;  %v8941_v39 = vpack.c.bf16 %v3531_v4, %v3529_v9 }
 0x34e   : > { %10301 = vst [vmem:[#allocation13_spill] sm:$0xff] %v8932_v27  ;;  %v2593_v0 = vmax.f32 %v2357_v56, 0.0  ;;  %v3006_v24 = vadd.f32 %v3005_v45, %v8662_v15  ;;  %v3007_v30 = vpop.f32.mrb[197].mxu0  ;;  %4361 = vmatmul.mubr.bf16.gmra.mrb[152].mxu1 %v8816_v42 }
 0x34f   : > { %10302 = vst [vmem:[#allocation14_spill] sm:$0xff] %v8941_v39  ;;  %v3008_v58 = vadd.f32 %v3007_v30, %v8666_v2  ;;  %v3009_v63 = vpop.f32.mrb[198].mxu0  ;;  %4370 = vmatprep.mubr.bf16.mxu1 %v8838_v50 }
 0x350   : > { %v2674_v60 = vpack.c.bf16 %v2593_v0, %v2592_v12  ;;  %v3010_v32 = vadd.f32 %v3009_v63, %v8662_v15  ;;  %v3011_v48 = vpop.f32.mrb[199].mxu0  ;;  %v3532_v21 = vmax.f32 %v3006_v24, 0.0 }
 0x351   : > { %v3012_v18 = vadd.f32 %v3011_v48, %v8666_v2  ;;  %v2361_v20 = vpop.f32.mrb[48].mxu1  ;;  %v3533_v52 = vmax.f32 %v3008_v58, 0.0 }
 0x352   : > { %v3534_v62 = vmax.f32 %v3010_v32, 0.0  ;;  %v2362_v9 = vadd.f32 %v8702_v35, %v2361_v20  ;;  %v7085_v4 = vpop.f32.mrb[49].mxu1  ;;  %3274 = vmatmul.mubr.bf16.gmra.mrb[48].mxu0 %v2674_v60 }
 0x353   : > { %v3535_v56 = vmax.f32 %v3012_v18, 0.0  ;;  %v2364_v57 = vpop.f32.mrb[50].mxu1  ;;  %3283 = vmatprep.mubr.bf16.mxu0 %v10225_v44 }
 0x354   : > { %v8951_v23 = vpack.c.bf16 %v3534_v62, %v3532_v21  ;;  %v2365_v37 = vadd.f32 %v8702_v35, %v2364_v57  ;;  %v7086_v45 = vpop.f32.mrb[51].mxu1  ;;  %v2594_v30 = vmax.f32 %v2362_v9, 0.0 }
 0x355   : > { %v3015_v12 = vpop.f32.mrb[200].mxu0  ;;  %v8954_v0 = vpack.c.bf16 %v3535_v56, %v3533_v52 }
 0x356   : > { %10303 = vst [vmem:[#allocation15_spill] sm:$0xff] %v8951_v23  ;;  %v2595_v24 = vmax.f32 %v2365_v37, 0.0  ;;  %v3016_v63 = vadd.f32 %v3015_v12, %v8662_v15  ;;  %v3017_v32 = vpop.f32.mrb[201].mxu0  ;;  %4371 = vmatmul.mubr.bf16.gmra.mrb[156].mxu1 %v8835_v38 }
 0x357   : > { %10304 = vst [vmem:[#allocation16_spill] sm:$0xff] %v8954_v0  ;;  %v3018_v58 = vadd.f32 %v3017_v32, %v8666_v2  ;;  %v3019_v60 = vpop.f32.mrb[202].mxu0  ;;  %4380 = vmatprep.mubr.bf16.mxu1 %v8851_v51 }
 0x358   : > { %v2675_v48 = vpack.c.bf16 %v2595_v24, %v2594_v30  ;;  %v3020_v18 = vadd.f32 %v3019_v60, %v8662_v15  ;;  %v3021_v20 = vpop.f32.mrb[203].mxu0  ;;  %v3536_v4 = vmax.f32 %v3016_v63, 0.0 }
 0x359   : > { %v3022_v21 = vadd.f32 %v3021_v20, %v8666_v2  ;;  %v2369_v62 = vpop.f32.mrb[52].mxu1  ;;  %v3537_v57 = vmax.f32 %v3018_v58, 0.0 }
 0x35a   : > { %v3538_v9 = vmax.f32 %v3020_v18, 0.0  ;;  %v2370_v52 = vadd.f32 %v8702_v35, %v2369_v62  ;;  %v7089_v56 = vpop.f32.mrb[53].mxu1  ;;  %3284 = vmatmul.mubr.bf16.gmra.mrb[52].mxu0 %v2675_v48 }
 0x35b   : > { %v3539_v37 = vmax.f32 %v3022_v21, 0.0  ;;  %v2372_v45 = vpop.f32.mrb[54].mxu1  ;;  %3293 = vmatprep.mubr.bf16.mxu0 %v10225_v44 }
 0x35c   : > { %v8964_v12 = vpack.c.bf16 %v3538_v9, %v3536_v4  ;;  %v2373_v30 = vadd.f32 %v8702_v35, %v2372_v45  ;;  %v7090_v24 = vpop.f32.mrb[55].mxu1  ;;  %v2596_v20 = vmax.f32 %v2370_v52, 0.0 }
 0x35d   : > { %v3025_v32 = vpop.f32.mrb[204].mxu0  ;;  %v8967_v60 = vpack.c.bf16 %v3539_v37, %v3537_v57 }
 0x35e   : > { %10305 = vst [vmem:[#allocation17_spill] sm:$0xff] %v8964_v12  ;;  %v2597_v63 = vmax.f32 %v2373_v30, 0.0  ;;  %v3026_v18 = vadd.f32 %v3025_v32, %v8662_v15  ;;  %v3027_v62 = vpop.f32.mrb[205].mxu0  ;;  %4381 = vmatmul.mubr.bf16.gmra.mrb[160].mxu1 %v8848_v13 }
 0x35f   : > { %10306 = vst [vmem:[#allocation18_spill] sm:$0xff] %v8967_v60  ;;  %v3028_v58 = vadd.f32 %v3027_v62, %v8666_v2  ;;  %v3029_v48 = vpop.f32.mrb[206].mxu0  ;;  %4390 = vmatprep.mubr.bf16.mxu1 %v8864_v61 }
 0x360   : > { %v2676_v21 = vpack.c.bf16 %v2597_v63, %v2596_v20  ;;  %v3030_v4 = vadd.f32 %v3029_v48, %v8662_v15  ;;  %v3031_v9 = vpop.f32.mrb[207].mxu0  ;;  %v3540_v37 = vmax.f32 %v3026_v18, 0.0  ;;  %v8982_v20 = vld [vmem:[%s10215_s4] ss:$0 sm:$0xff] }
 0x361   : > { %v3032_v56 = vadd.f32 %v3031_v9, %v8666_v2  ;;  %v2377_v57 = vpop.f32.mrb[56].mxu1  ;;  %v3541_v24 = vmax.f32 %v3028_v58, 0.0 }
 0x362   : > { %v3542_v52 = vmax.f32 %v3030_v4, 0.0  ;;  %v2378_v45 = vadd.f32 %v8702_v35, %v2377_v57  ;;  %v7093_v30 = vpop.f32.mrb[57].mxu1  ;;  %3294 = vmatmul.mubr.bf16.gmra.mrb[56].mxu0 %v2676_v21 }
 0x363   : > { %v3543_v32 = vmax.f32 %v3032_v56, 0.0  ;;  %v2380_v1 = vpop.f32.mrb[58].mxu1  ;;  %3303 = vmatprep.mubr.bf16.mxu0 %v10225_v44 }
 0x364   : > { %v8977_v62 = vpack.c.bf16 %v3542_v52, %v3540_v37  ;;  %v2381_v63 = vadd.f32 %v8982_v20, %v2380_v1  ;;  %v7094_v18 = vpop.f32.mrb[59].mxu1  ;;  %v2598_v35 = vmax.f32 %v2378_v45, 0.0 }
 0x365   : > { %v3035_v48 = vpop.f32.mrb[208].mxu0  ;;  %v8985_v4 = vpack.c.bf16 %v3543_v32, %v3541_v24 }
 0x366   : > { %10307 = vst [vmem:[#allocation19_spill] sm:$0xff] %v8977_v62  ;;  %v2599_v21 = vmax.f32 %v2381_v63, 0.0  ;;  %v3036_v58 = vadd.f32 %v3035_v48, %v8662_v15  ;;  %v3037_v9 = vpop.f32.mrb[209].mxu0  ;;  %4391 = vmatmul.mubr.bf16.gmra.mrb[164].mxu1 %v8861_v11 }
 0x367   : > { %10308 = vst [vmem:[#allocation20_spill] sm:$0xff] %v8985_v4  ;;  %v3038_v56 = vadd.f32 %v3037_v9, %v8666_v2  ;;  %v3039_v57 = vpop.f32.mrb[210].mxu0  ;;  %4400 = vmatprep.mubr.bf16.mxu1 %v8883_v36 }
 0x368   : > { %v2677_v37 = vpack.c.bf16 %v2599_v21, %v2598_v35  ;;  %v3040_v52 = vadd.f32 %v3039_v57, %v8662_v15  ;;  %v3041_v1 = vpop.f32.mrb[211].mxu0  ;;  %v3544_v32 = vmax.f32 %v3036_v58, 0.0 }
 0x369   : > { %v3042_v30 = vadd.f32 %v3041_v1, %v8666_v2  ;;  %v2385_v24 = vpop.f32.mrb[60].mxu1  ;;  %v3545_v48 = vmax.f32 %v3038_v56, 0.0 }
 0x36a   : > { %v3546_v45 = vmax.f32 %v3040_v52, 0.0  ;;  %v2386_v63 = vadd.f32 %v8982_v20, %v2385_v24  ;;  %v7097_v18 = vpop.f32.mrb[61].mxu1  ;;  %3304 = vmatmul.mubr.bf16.gmra.mrb[60].mxu0 %v2677_v37 }
 0x36b   : > { %v3547_v41 = vmax.f32 %v3042_v30, 0.0  ;;  %v2388_v34 = vpop.f32.mrb[62].mxu1  ;;  %3313 = vmatprep.mubr.bf16.mxu0 %v10225_v44 }
 0x36c   : > { %v8995_v9 = vpack.c.bf16 %v3546_v45, %v3544_v32  ;;  %v2389_v35 = vadd.f32 %v8982_v20, %v2388_v34  ;;  %v7098_v21 = vpop.f32.mrb[63].mxu1  ;;  %v2600_v1 = vmax.f32 %v2386_v63, 0.0 }
 0x36d   : > { %v3045_v57 = vpop.f32.mrb[212].mxu0  ;;  %v8998_v6 = vpack.c.bf16 %v3547_v41, %v3545_v48 }
 0x36e   : > { %10309 = vst [vmem:[#allocation21_spill] sm:$0xff] %v8995_v9  ;;  %v2601_v58 = vmax.f32 %v2389_v35, 0.0  ;;  %v3046_v52 = vadd.f32 %v3045_v57, %v8662_v15  ;;  %v3047_v24 = vpop.f32.mrb[213].mxu0  ;;  %4401 = vmatmul.mubr.bf16.gmra.mrb[168].mxu1 %v8874_v59 }
 0x36f   : > { %10310 = vst [vmem:[#allocation22_spill] sm:$0xff] %v8998_v6  ;;  %v3048_v56 = vadd.f32 %v3047_v24, %v8666_v2  ;;  %v3049_v37 = vpop.f32.mrb[214].mxu0  ;;  %4410 = vmatprep.mubr.bf16.mxu1 %v8896_v33  ;;  %v10311_v24 = vmov 0  }
 0x370   : > { %v2678_v30 = vpack.c.bf16 %v2601_v58, %v2600_v1  ;;  %v3050_v32 = vadd.f32 %v3049_v37, %v8662_v15  ;;  %v3051_v34 = vpop.f32.mrb[215].mxu0  ;;  %v3548_v18 = vmax.f32 %v3046_v52, 0.0 }
 0x371   : > { %v3052_v45 = vadd.f32 %v3051_v34, %v8666_v2  ;;  %v2393_v41 = vpop.f32.mrb[64].mxu1  ;;  %v3549_v21 = vmax.f32 %v3048_v56, 0.0 }
 0x372   : > { %v3550_v63 = vmax.f32 %v3050_v32, 0.0  ;;  %v2394_v48 = vadd.f32 %v8982_v20, %v2393_v41  ;;  %v7101_v35 = vpop.f32.mrb[65].mxu1  ;;  %3314 = vmatmul.mubr.bf16.gmra.mrb[64].mxu0 %v2678_v30 }
 0x373   : > { %v3551_v57 = vmax.f32 %v3052_v45, 0.0  ;;  %v2396_v44 = vpop.f32.mrb[66].mxu1  ;;  %3323 = vmatprep.mubr.bf16.mxu0 %v10311_v24 }
 0x374   : > { %v9008_v59 = vpack.c.bf16 %v3550_v63, %v3548_v18  ;;  %v2397_v1 = vadd.f32 %v8982_v20, %v2396_v44  ;;  %v7102_v58 = vpop.f32.mrb[67].mxu1  ;;  %v2602_v34 = vmax.f32 %v2394_v48, 0.0 }
 0x375   : > { %v3055_v37 = vpop.f32.mrb[216].mxu0  ;;  %v9011_v33 = vpack.c.bf16 %v3551_v57, %v3549_v21 }
 0x376   : > { %10312 = vst [vmem:[#allocation23_spill] sm:$0xff] %v9008_v59  ;;  %v2603_v52 = vmax.f32 %v2397_v1, 0.0  ;;  %v3056_v32 = vadd.f32 %v3055_v37, %v8662_v15  ;;  %v3057_v41 = vpop.f32.mrb[217].mxu0  ;;  %4411 = vmatmul.mubr.bf16.gmra.mrb[172].mxu1 %v8893_v25 }
 0x377   : > { %10313 = vst [vmem:[#allocation24_spill] sm:$0xff] %v9011_v33  ;;  %v3058_v56 = vadd.f32 %v3057_v41, %v8666_v2  ;;  %v3059_v30 = vpop.f32.mrb[218].mxu0  ;;  %4420 = vmatprep.mubr.bf16.mxu1 %v8909_v43 }
 0x378   : > { %v2679_v45 = vpack.c.bf16 %v2603_v52, %v2602_v34  ;;  %v3060_v18 = vadd.f32 %v3059_v30, %v8662_v15  ;;  %v3061_v44 = vpop.f32.mrb[219].mxu0  ;;  %v3552_v21 = vmax.f32 %v3056_v32, 0.0 }
 0x379   : > { %v3062_v63 = vadd.f32 %v3061_v44, %v8666_v2  ;;  %v2401_v35 = vpop.f32.mrb[68].mxu1  ;;  %v3553_v58 = vmax.f32 %v3058_v56, 0.0 }
 0x37a   : > { %v3554_v48 = vmax.f32 %v3060_v18, 0.0  ;;  %v2402_v57 = vadd.f32 %v8982_v20, %v2401_v35  ;;  %v7105_v1 = vpop.f32.mrb[69].mxu1  ;;  %3324 = vmatmul.mubr.bf16.gmra.mrb[68].mxu0 %v2679_v45 }
 0x37b   : > { %v3555_v37 = vmax.f32 %v3062_v63, 0.0  ;;  %v2404_v25 = vpop.f32.mrb[70].mxu1  ;;  %3333 = vmatprep.mubr.bf16.mxu0 %v10311_v24 }
 0x37c   : > { %v9021_v41 = vpack.c.bf16 %v3554_v48, %v3552_v21  ;;  %v2405_v34 = vadd.f32 %v8982_v20, %v2404_v25  ;;  %v7106_v52 = vpop.f32.mrb[71].mxu1  ;;  %v2604_v44 = vmax.f32 %v2402_v57, 0.0 }
 0x37d   : > { %v3065_v30 = vpop.f32.mrb[220].mxu0  ;;  %v9024_v43 = vpack.c.bf16 %v3555_v37, %v3553_v58 }
 0x37e   : > { %10314 = vst [vmem:[#allocation25_spill] sm:$0xff] %v9021_v41  ;;  %v2605_v32 = vmax.f32 %v2405_v34, 0.0  ;;  %v3066_v18 = vadd.f32 %v3065_v30, %v8662_v15  ;;  %v3067_v35 = vpop.f32.mrb[221].mxu0  ;;  %4421 = vmatmul.mubr.bf16.gmra.mrb[176].mxu1 %v8906_v22 }
 0x37f   : > { %10315 = vst [vmem:[#allocation26_spill] sm:$0xff] %v9024_v43  ;;  %v3068_v56 = vadd.f32 %v3067_v35, %v8666_v2  ;;  %v3069_v45 = vpop.f32.mrb[222].mxu0  ;;  %4430 = vmatprep.mubr.bf16.mxu1 %v8922_v31 }
 0x380   : > { %v2680_v63 = vpack.c.bf16 %v2605_v32, %v2604_v44  ;;  %v3070_v21 = vadd.f32 %v3069_v45, %v8662_v15  ;;  %v3071_v25 = vpop.f32.mrb[223].mxu0  ;;  %v3556_v58 = vmax.f32 %v3066_v18, 0.0 }
 0x381   : > { %v3072_v48 = vadd.f32 %v3071_v25, %v8666_v2  ;;  %v2409_v1 = vpop.f32.mrb[72].mxu1  ;;  %v3557_v52 = vmax.f32 %v3068_v56, 0.0 }
 0x382   : > { %v3558_v57 = vmax.f32 %v3070_v21, 0.0  ;;  %v2410_v37 = vadd.f32 %v8982_v20, %v2409_v1  ;;  %v7109_v34 = vpop.f32.mrb[73].mxu1  ;;  %3334 = vmatmul.mubr.bf16.gmra.mrb[72].mxu0 %v2680_v63 }
 0x383   : > { %v3559_v30 = vmax.f32 %v3072_v48, 0.0  ;;  %v2412_v22 = vpop.f32.mrb[74].mxu1  ;;  %3343 = vmatprep.mubr.bf16.mxu0 %v10311_v24 }
 0x384   : > { %v9034_v35 = vpack.c.bf16 %v3558_v57, %v3556_v58  ;;  %v2413_v44 = vadd.f32 %v8982_v20, %v2412_v22  ;;  %v7110_v32 = vpop.f32.mrb[75].mxu1  ;;  %v2606_v25 = vmax.f32 %v2410_v37, 0.0 }
 0x385   : > { %v3075_v45 = vpop.f32.mrb[224].mxu0  ;;  %v9037_v31 = vpack.c.bf16 %v3559_v30, %v3557_v52 }
 0x386   : > { %10316 = vst [vmem:[#allocation27_spill] sm:$0xff] %v9034_v35  ;;  %v2607_v18 = vmax.f32 %v2413_v44, 0.0  ;;  %v3076_v21 = vadd.f32 %v3075_v45, %v8662_v15  ;;  %v3077_v1 = vpop.f32.mrb[225].mxu0  ;;  %4431 = vmatmul.mubr.bf16.gmra.mrb[180].mxu1 %v8919_v28 }
 0x387   : > { %10317 = vst [vmem:[#allocation28_spill] sm:$0xff] %v9037_v31  ;;  %v3078_v56 = vadd.f32 %v3077_v1, %v8666_v2  ;;  %v3079_v63 = vpop.f32.mrb[226].mxu0  ;;  %4440 = vmatprep.mubr.bf16.mxu1 %v8941_v39 }
 0x388   : > { %v2681_v48 = vpack.c.bf16 %v2607_v18, %v2606_v25  ;;  %v3080_v58 = vadd.f32 %v3079_v63, %v8662_v15  ;;  %v3081_v22 = vpop.f32.mrb[227].mxu0  ;;  %v3560_v52 = vmax.f32 %v3076_v21, 0.0 }
 0x389   : > { %v3082_v57 = vadd.f32 %v3081_v22, %v8666_v2  ;;  %v2417_v34 = vpop.f32.mrb[76].mxu1  ;;  %v3561_v32 = vmax.f32 %v3078_v56, 0.0 }
 0x38a   : > { %v3562_v37 = vmax.f32 %v3080_v58, 0.0  ;;  %v2418_v30 = vadd.f32 %v8982_v20, %v2417_v34  ;;  %v7113_v44 = vpop.f32.mrb[77].mxu1  ;;  %3344 = vmatmul.mubr.bf16.gmra.mrb[76].mxu0 %v2681_v48 }
 0x38b   : > { %v3563_v45 = vmax.f32 %v3082_v57, 0.0  ;;  %v2420_v28 = vpop.f32.mrb[78].mxu1  ;;  %3353 = vmatprep.mubr.bf16.mxu0 %v10311_v24 }
 0x38c   : > { %v9047_v1 = vpack.c.bf16 %v3562_v37, %v3560_v52  ;;  %v2421_v25 = vadd.f32 %v8982_v20, %v2420_v28  ;;  %v7114_v18 = vpop.f32.mrb[79].mxu1  ;;  %v2608_v22 = vmax.f32 %v2418_v30, 0.0 }
 0x38d   : > { %v3085_v63 = vpop.f32.mrb[228].mxu0  ;;  %v9050_v39 = vpack.c.bf16 %v3563_v45, %v3561_v32 }
 0x38e   : > { %10318 = vst [vmem:[#allocation29_spill] sm:$0xff] %v9047_v1  ;;  %v2609_v21 = vmax.f32 %v2421_v25, 0.0  ;;  %v3086_v58 = vadd.f32 %v3085_v63, %v8662_v15  ;;  %v3087_v34 = vpop.f32.mrb[229].mxu0  ;;  %4441 = vmatmul.mubr.bf16.gmra.mrb[184].mxu1 %v8932_v27 }
 0x38f   : > { %10319 = vst [vmem:[#allocation30_spill] sm:$0xff] %v9050_v39  ;;  %v3088_v56 = vadd.f32 %v3087_v34, %v8666_v2  ;;  %v3089_v48 = vpop.f32.mrb[230].mxu0  ;;  %4450 = vmatprep.mubr.bf16.mxu1 %v8954_v0 }
 0x390   : > { %v2682_v57 = vpack.c.bf16 %v2609_v21, %v2608_v22  ;;  %v3090_v52 = vadd.f32 %v3089_v48, %v8662_v15  ;;  %v3091_v28 = vpop.f32.mrb[231].mxu0  ;;  %v3564_v32 = vmax.f32 %v3086_v58, 0.0 }
 0x391   : > { %v3092_v37 = vadd.f32 %v3091_v28, %v8666_v2  ;;  %v2425_v44 = vpop.f32.mrb[80].mxu1  ;;  %v3565_v18 = vmax.f32 %v3088_v56, 0.0 }
 0x392   : > { %v3566_v30 = vmax.f32 %v3090_v52, 0.0  ;;  %v2426_v45 = vadd.f32 %v8982_v20, %v2425_v44  ;;  %v7117_v25 = vpop.f32.mrb[81].mxu1  ;;  %3354 = vmatmul.mubr.bf16.gmra.mrb[80].mxu0 %v2682_v57 }
 0x393   : > { %v3567_v63 = vmax.f32 %v3092_v37, 0.0  ;;  %v2428_v27 = vpop.f32.mrb[82].mxu1  ;;  %3363 = vmatprep.mubr.bf16.mxu0 %v10311_v24 }
 0x394   : > { %v9060_v34 = vpack.c.bf16 %v3566_v30, %v3564_v32  ;;  %v2429_v22 = vadd.f32 %v8982_v20, %v2428_v27  ;;  %v7118_v21 = vpop.f32.mrb[83].mxu1  ;;  %v2610_v28 = vmax.f32 %v2426_v45, 0.0 }
 0x395   : > { %v3095_v48 = vpop.f32.mrb[232].mxu0  ;;  %v9063_v0 = vpack.c.bf16 %v3567_v63, %v3565_v18 }
 0x396   : > { %10320 = vst [vmem:[#allocation31_spill] sm:$0xff] %v9060_v34  ;;  %v2611_v58 = vmax.f32 %v2429_v22, 0.0  ;;  %v3096_v52 = vadd.f32 %v3095_v48, %v8662_v15  ;;  %v3097_v44 = vpop.f32.mrb[233].mxu0  ;;  %4451 = vmatmul.mubr.bf16.gmra.mrb[188].mxu1 %v8951_v23 }
 0x397   : > { %10321 = vst [vmem:[#allocation32_spill] sm:$0xff] %v9063_v0  ;;  %v3098_v56 = vadd.f32 %v3097_v44, %v8666_v2  ;;  %v3099_v57 = vpop.f32.mrb[234].mxu0  ;;  %4460 = vmatprep.mubr.bf16.mxu1 %v8967_v60 }
 0x398   : > { %v2683_v37 = vpack.c.bf16 %v2611_v58, %v2610_v28  ;;  %v3100_v32 = vadd.f32 %v3099_v57, %v8662_v15  ;;  %v3101_v27 = vpop.f32.mrb[235].mxu0  ;;  %v3568_v18 = vmax.f32 %v3096_v52, 0.0 }
 0x399   : > { %v3102_v30 = vadd.f32 %v3101_v27, %v8666_v2  ;;  %v2433_v25 = vpop.f32.mrb[84].mxu1  ;;  %v3569_v21 = vmax.f32 %v3098_v56, 0.0 }
 0x39a   : > { %v3570_v45 = vmax.f32 %v3100_v32, 0.0  ;;  %v2434_v63 = vadd.f32 %v8982_v20, %v2433_v25  ;;  %v7121_v22 = vpop.f32.mrb[85].mxu1  ;;  %3364 = vmatmul.mubr.bf16.gmra.mrb[84].mxu0 %v2683_v37 }
 0x39b   : > { %v3571_v48 = vmax.f32 %v3102_v30, 0.0  ;;  %v2436_v23 = vpop.f32.mrb[86].mxu1  ;;  %3373 = vmatprep.mubr.bf16.mxu0 %v10311_v24 }
 0x39c   : > { %v9073_v44 = vpack.c.bf16 %v3570_v45, %v3568_v18  ;;  %v2437_v28 = vadd.f32 %v8982_v20, %v2436_v23  ;;  %v7122_v58 = vpop.f32.mrb[87].mxu1  ;;  %v2612_v27 = vmax.f32 %v2434_v63, 0.0 }
 0x39d   : > { %v3105_v57 = vpop.f32.mrb[236].mxu0  ;;  %v9076_v60 = vpack.c.bf16 %v3571_v48, %v3569_v21 }
 0x39e   : > { %10322 = vst [vmem:[#allocation33_spill] sm:$0xff] %v9073_v44  ;;  %v2613_v52 = vmax.f32 %v2437_v28, 0.0  ;;  %v3106_v32 = vadd.f32 %v3105_v57, %v8662_v15  ;;  %v3107_v25 = vpop.f32.mrb[237].mxu0  ;;  %4461 = vmatmul.mubr.bf16.gmra.mrb[192].mxu1 %v8964_v12 }
 0x39f   : > { %v3108_v56 = vadd.f32 %v3107_v25, %v8666_v2  ;;  %v3109_v37 = vpop.f32.mrb[238].mxu0  ;;  %4470 = vmatprep.mubr.bf16.mxu1 %v8985_v4 }
 0x3a0   : > { %v2684_v30 = vpack.c.bf16 %v2613_v52, %v2612_v27  ;;  %v3110_v18 = vadd.f32 %v3109_v37, %v8662_v15  ;;  %v3111_v23 = vpop.f32.mrb[239].mxu0  ;;  %v3572_v21 = vmax.f32 %v3106_v32, 0.0 }
 0x3a1   : > { %v3112_v45 = vadd.f32 %v3111_v23, %v8666_v2  ;;  %v2441_v22 = vpop.f32.mrb[88].mxu1  ;;  %v3573_v58 = vmax.f32 %v3108_v56, 0.0 }
 0x3a2   : > { %v3574_v63 = vmax.f32 %v3110_v18, 0.0  ;;  %v2442_v48 = vadd.f32 %v8982_v20, %v2441_v22  ;;  %v7125_v28 = vpop.f32.mrb[89].mxu1  ;;  %3374 = vmatmul.mubr.bf16.gmra.mrb[88].mxu0 %v2684_v30 }
 0x3a3   : > { %v3575_v57 = vmax.f32 %v3112_v45, 0.0  ;;  %v2444_v12 = vpop.f32.mrb[90].mxu1  ;;  %3383 = vmatprep.mubr.bf16.mxu0 %v10311_v24 }
 0x3a4   : > { %v9086_v25 = vpack.c.bf16 %v3574_v63, %v3572_v21  ;;  %v2445_v27 = vadd.f32 %v8982_v20, %v2444_v12  ;;  %v7126_v52 = vpop.f32.mrb[91].mxu1  ;;  %v2614_v23 = vmax.f32 %v2442_v48, 0.0 }
 0x3a5   : > { %v3115_v37 = vpop.f32.mrb[240].mxu0  ;;  %v9089_v4 = vpack.c.bf16 %v3575_v57, %v3573_v58 }
 0x3a6   : > { %10323 = vst [vmem:[#allocation34_spill] sm:$0xff] %v9086_v25  ;;  %v2615_v32 = vmax.f32 %v2445_v27, 0.0  ;;  %v3116_v18 = vadd.f32 %v3115_v37, %v8662_v15  ;;  %v3117_v22 = vpop.f32.mrb[241].mxu0  ;;  %4471 = vmatmul.mubr.bf16.gmra.mrb[196].mxu1 %v8977_v62 }
 0x3a7   : > { %10324 = vst [vmem:[#allocation35_spill] sm:$0xff] %v9089_v4  ;;  %v3118_v56 = vadd.f32 %v3117_v22, %v8666_v2  ;;  %v3119_v30 = vpop.f32.mrb[242].mxu0  ;;  %4480 = vmatprep.mubr.bf16.mxu1 %v8998_v6 }
 0x3a8   : > { %v2685_v45 = vpack.c.bf16 %v2615_v32, %v2614_v23  ;;  %v3120_v21 = vadd.f32 %v3119_v30, %v8662_v15  ;;  %v3121_v12 = vpop.f32.mrb[243].mxu0  ;;  %v3576_v58 = vmax.f32 %v3116_v18, 0.0 }
 0x3a9   : > { %v3122_v63 = vadd.f32 %v3121_v12, %v8666_v2  ;;  %v2449_v28 = vpop.f32.mrb[92].mxu1  ;;  %v3577_v52 = vmax.f32 %v3118_v56, 0.0 }
 0x3aa   : > { %v3578_v48 = vmax.f32 %v3120_v21, 0.0  ;;  %v2450_v57 = vadd.f32 %v8982_v20, %v2449_v28  ;;  %v7129_v27 = vpop.f32.mrb[93].mxu1  ;;  %3384 = vmatmul.mubr.bf16.gmra.mrb[92].mxu0 %v2685_v45 }
 0x3ab   : > { %v3579_v37 = vmax.f32 %v3122_v63, 0.0  ;;  %v2452_v62 = vpop.f32.mrb[94].mxu1  ;;  %3393 = vmatprep.mubr.bf16.mxu0 %v10311_v24 }
 0x3ac   : > { %v9099_v22 = vpack.c.bf16 %v3578_v48, %v3576_v58  ;;  %v2453_v23 = vadd.f32 %v8982_v20, %v2452_v62  ;;  %v7130_v32 = vpop.f32.mrb[95].mxu1  ;;  %v2616_v12 = vmax.f32 %v2450_v57, 0.0 }
 0x3ad   : > { %v3125_v30 = vpop.f32.mrb[244].mxu0  ;;  %v9102_v6 = vpack.c.bf16 %v3579_v37, %v3577_v52 }
 0x3ae   : > { %v2617_v18 = vmax.f32 %v2453_v23, 0.0  ;;  %v3126_v21 = vadd.f32 %v3125_v30, %v8662_v15  ;;  %v3127_v28 = vpop.f32.mrb[245].mxu0  ;;  %4481 = vmatmul.mubr.bf16.gmra.mrb[200].mxu1 %v8995_v9 }
 0x3af   : > { %10325 = vst [vmem:[#allocation36_spill] sm:$0xff] %v9102_v6  ;;  %v3128_v56 = vadd.f32 %v3127_v28, %v8666_v2  ;;  %v3129_v45 = vpop.f32.mrb[246].mxu0  ;;  %4490 = vmatprep.mubr.bf16.mxu1 %v9011_v33 }
 0x3b0   : > { %v2686_v63 = vpack.c.bf16 %v2617_v18, %v2616_v12  ;;  %v3130_v58 = vadd.f32 %v3129_v45, %v8662_v15  ;;  %v3131_v62 = vpop.f32.mrb[247].mxu0  ;;  %v3580_v52 = vmax.f32 %v3126_v21, 0.0 }
 0x3b1   : > { %v3132_v48 = vadd.f32 %v3131_v62, %v8666_v2  ;;  %v2457_v27 = vpop.f32.mrb[96].mxu1  ;;  %v3581_v32 = vmax.f32 %v3128_v56, 0.0 }
 0x3b2   : > { %v3582_v57 = vmax.f32 %v3130_v58, 0.0  ;;  %v2458_v37 = vadd.f32 %v8982_v20, %v2457_v27  ;;  %v7133_v23 = vpop.f32.mrb[97].mxu1  ;;  %3394 = vmatmul.mubr.bf16.gmra.mrb[96].mxu0 %v2686_v63 }
 0x3b3   : > { %v3583_v30 = vmax.f32 %v3132_v48, 0.0  ;;  %v2460_v9 = vpop.f32.mrb[98].mxu1  ;;  %3403 = vmatprep.mubr.bf16.mxu0 %v10311_v24 }
 0x3b4   : > { %v9112_v28 = vpack.c.bf16 %v3582_v57, %v3580_v52  ;;  %v2461_v12 = vadd.f32 %v8982_v20, %v2460_v9  ;;  %v7134_v18 = vpop.f32.mrb[99].mxu1  ;;  %v2618_v62 = vmax.f32 %v2458_v37, 0.0 }
 0x3b5   : > { %v3135_v45 = vpop.f32.mrb[248].mxu0  ;;  %v9115_v33 = vpack.c.bf16 %v3583_v30, %v3581_v32 }
 0x3b6   : > { %v2619_v21 = vmax.f32 %v2461_v12, 0.0  ;;  %v3136_v58 = vadd.f32 %v3135_v45, %v8662_v15  ;;  %v3137_v27 = vpop.f32.mrb[249].mxu0  ;;  %4491 = vmatmul.mubr.bf16.gmra.mrb[204].mxu1 %v9008_v59 }
 0x3b7   : > { %v3138_v56 = vadd.f32 %v3137_v27, %v8666_v2  ;;  %v3139_v63 = vpop.f32.mrb[250].mxu0  ;;  %4500 = vmatprep.mubr.bf16.mxu1 %v9024_v43 }
 0x3b8   : > { %v2687_v48 = vpack.c.bf16 %v2619_v21, %v2618_v62  ;;  %v3140_v52 = vadd.f32 %v3139_v63, %v8662_v15  ;;  %v3141_v9 = vpop.f32.mrb[251].mxu0  ;;  %v3584_v32 = vmax.f32 %v3136_v58, 0.0 }
 0x3b9   : > { %v3142_v57 = vadd.f32 %v3141_v9, %v8666_v2  ;;  %v2465_v23 = vpop.f32.mrb[100].mxu1  ;;  %v3585_v18 = vmax.f32 %v3138_v56, 0.0 }
 0x3ba   : > { %v3586_v37 = vmax.f32 %v3140_v52, 0.0  ;;  %v2466_v30 = vadd.f32 %v8982_v20, %v2465_v23  ;;  %v7137_v12 = vpop.f32.mrb[101].mxu1  ;;  %3404 = vmatmul.mubr.bf16.gmra.mrb[100].mxu0 %v2687_v48 }
 0x3bb   : > { %v3587_v45 = vmax.f32 %v3142_v57, 0.0  ;;  %v2468_v59 = vpop.f32.mrb[102].mxu1  ;;  %3413 = vmatprep.mubr.bf16.mxu0 %v10311_v24 }
 0x3bc   : > { %v9125_v27 = vpack.c.bf16 %v3586_v37, %v3584_v32  ;;  %v2469_v62 = vadd.f32 %v8982_v20, %v2468_v59  ;;  %v7138_v21 = vpop.f32.mrb[103].mxu1  ;;  %v2620_v9 = vmax.f32 %v2466_v30, 0.0 }
 0x3bd   : > { %v3145_v63 = vpop.f32.mrb[252].mxu0  ;;  %v9128_v43 = vpack.c.bf16 %v3587_v45, %v3585_v18 }
 0x3be   : > { %v2621_v58 = vmax.f32 %v2469_v62, 0.0  ;;  %v3146_v52 = vadd.f32 %v3145_v63, %v8662_v15  ;;  %v3147_v23 = vpop.f32.mrb[253].mxu0  ;;  %4501 = vmatmul.mubr.bf16.gmra.mrb[208].mxu1 %v9021_v41 }
 0x3bf   : > { %v3148_v56 = vadd.f32 %v3147_v23, %v8666_v2  ;;  %v3149_v48 = vpop.f32.mrb[254].mxu0  ;;  %4510 = vmatprep.mubr.bf16.mxu1 %v9037_v31 }
 0x3c0   : > { %v2688_v57 = vpack.c.bf16 %v2621_v58, %v2620_v9  ;;  %v3150_v32 = vadd.f32 %v3149_v48, %v8662_v15  ;;  %v3151_v59 = vpop.f32.mrb[255].mxu0  ;;  %v3588_v18 = vmax.f32 %v3146_v52, 0.0 }
 0x3c1   : > { %v3152_v37 = vadd.f32 %v3151_v59, %v8666_v2  ;;  %v2473_v12 = vpop.f32.mrb[104].mxu1  ;;  %v3589_v21 = vmax.f32 %v3148_v56, 0.0 }
 0x3c2   : > { %v3590_v30 = vmax.f32 %v3150_v32, 0.0  ;;  %v2474_v45 = vadd.f32 %v8982_v20, %v2473_v12  ;;  %v7141_v62 = vpop.f32.mrb[105].mxu1  ;;  %3414 = vmatmul.mubr.bf16.gmra.mrb[104].mxu0 %v2688_v57 }
 0x3c3   : > { %v3591_v63 = vmax.f32 %v3152_v37, 0.0  ;;  %v2476_v41 = vpop.f32.mrb[106].mxu1  ;;  %3423 = vmatprep.mubr.bf16.mxu0 %v10311_v24 }
 0x3c4   : > { %v9138_v23 = vpack.c.bf16 %v3590_v30, %v3588_v18  ;;  %v2477_v9 = vadd.f32 %v8982_v20, %v2476_v41  ;;  %v7142_v58 = vpop.f32.mrb[107].mxu1  ;;  %v2622_v59 = vmax.f32 %v2474_v45, 0.0 }
 0x3c5   : > { %v3155_v48 = vpop.f32.mrb[0].mxu0  ;;  %v9141_v31 = vpack.c.bf16 %v3591_v63, %v3589_v21 }
 0x3c6   : > { %v2623_v52 = vmax.f32 %v2477_v9, 0.0  ;;  %v3156_v32 = vadd.f32 %v3155_v48, %v8662_v15  ;;  %v3157_v12 = vpop.f32.mrb[1].mxu0  ;;  %4511 = vmatmul.mubr.bf16.gmra.mrb[212].mxu1 %v9034_v35 }
 0x3c7   : > { %v3158_v56 = vadd.f32 %v3157_v12, %v8666_v2  ;;  %v3159_v57 = vpop.f32.mrb[2].mxu0  ;;  %4520 = vmatprep.mubr.bf16.mxu1 %v9050_v39 }
 0x3c8   : > { %v2689_v37 = vpack.c.bf16 %v2623_v52, %v2622_v59  ;;  %v3160_v18 = vadd.f32 %v3159_v57, %v8662_v15  ;;  %v3161_v41 = vpop.f32.mrb[3].mxu0  ;;  %v3592_v21 = vmax.f32 %v3156_v32, 0.0 }
 0x3c9   : > { %v3162_v30 = vadd.f32 %v3161_v41, %v8666_v2  ;;  %v2481_v62 = vpop.f32.mrb[108].mxu1  ;;  %v3593_v58 = vmax.f32 %v3158_v56, 0.0 }
 0x3ca   : > { %v3594_v45 = vmax.f32 %v3160_v18, 0.0  ;;  %v2482_v63 = vadd.f32 %v8982_v20, %v2481_v62  ;;  %v7145_v9 = vpop.f32.mrb[109].mxu1  ;;  %3424 = vmatmul.mubr.bf16.gmra.mrb[108].mxu0 %v2689_v37 }
 0x3cb   : > { %v3595_v48 = vmax.f32 %v3162_v30, 0.0  ;;  %v2484_v35 = vpop.f32.mrb[110].mxu1  ;;  %3433 = vmatprep.mubr.bf16.mxu0 %v10311_v24 }
 0x3cc   : > { %v9151_v12 = vpack.c.bf16 %v3594_v45, %v3592_v21  ;;  %v2485_v59 = vadd.f32 %v8982_v20, %v2484_v35  ;;  %v7146_v52 = vpop.f32.mrb[111].mxu1  ;;  %v2624_v41 = vmax.f32 %v2482_v63, 0.0 }
 0x3cd   : > { %v3165_v57 = vpop.f32.mrb[4].mxu0  ;;  %v9154_v39 = vpack.c.bf16 %v3595_v48, %v3593_v58 }
 0x3ce   : > { %v2625_v32 = vmax.f32 %v2485_v59, 0.0  ;;  %v3166_v18 = vadd.f32 %v3165_v57, %v8662_v15  ;;  %v3167_v62 = vpop.f32.mrb[5].mxu0  ;;  %4521 = vmatmul.mubr.bf16.gmra.mrb[216].mxu1 %v9047_v1 }
 0x3cf   : > { %v3168_v56 = vadd.f32 %v3167_v62, %v8666_v2  ;;  %v3169_v37 = vpop.f32.mrb[6].mxu0  ;;  %4530 = vmatprep.mubr.bf16.mxu1 %v9063_v0 }
 0x3d0   : > { %v2690_v30 = vpack.c.bf16 %v2625_v32, %v2624_v41  ;;  %v3170_v21 = vadd.f32 %v3169_v37, %v8662_v15  ;;  %v3171_v35 = vpop.f32.mrb[7].mxu0  ;;  %v3596_v58 = vmax.f32 %v3166_v18, 0.0 }
 0x3d1   : > { %v3172_v45 = vadd.f32 %v3171_v35, %v8666_v2  ;;  %v2489_v9 = vpop.f32.mrb[112].mxu1  ;;  %v3597_v52 = vmax.f32 %v3168_v56, 0.0 }
 0x3d2   : > { %v3598_v63 = vmax.f32 %v3170_v21, 0.0  ;;  %v2490_v48 = vadd.f32 %v8982_v20, %v2489_v9  ;;  %v7149_v59 = vpop.f32.mrb[113].mxu1  ;;  %3434 = vmatmul.mubr.bf16.gmra.mrb[112].mxu0 %v2690_v30 }
 0x3d3   : > { %v3599_v57 = vmax.f32 %v3172_v45, 0.0  ;;  %v2492_v1 = vpop.f32.mrb[114].mxu1  ;;  %3443 = vmatprep.mubr.bf16.mxu0 %v10311_v24 }
 0x3d4   : > { %v9164_v62 = vpack.c.bf16 %v3598_v63, %v3596_v58  ;;  %v2493_v41 = vadd.f32 %v8982_v20, %v2492_v1  ;;  %v7150_v32 = vpop.f32.mrb[115].mxu1  ;;  %v2626_v35 = vmax.f32 %v2490_v48, 0.0 }
 0x3d5   : > { %v3175_v37 = vpop.f32.mrb[8].mxu0  ;;  %v9167_v0 = vpack.c.bf16 %v3599_v57, %v3597_v52 }
 0x3d6   : > { %v2627_v18 = vmax.f32 %v2493_v41, 0.0  ;;  %v3176_v21 = vadd.f32 %v3175_v37, %v8662_v15  ;;  %v3177_v9 = vpop.f32.mrb[9].mxu0  ;;  %4531 = vmatmul.mubr.bf16.gmra.mrb[220].mxu1 %v9060_v34 }
 0x3d7   : > { %v3178_v56 = vadd.f32 %v3177_v9, %v8666_v2  ;;  %v3179_v30 = vpop.f32.mrb[10].mxu0  ;;  %4540 = vmatprep.mubr.bf16.mxu1 %v9076_v60 }
 0x3d8   : > { %v2691_v45 = vpack.c.bf16 %v2627_v18, %v2626_v35  ;;  %v3180_v58 = vadd.f32 %v3179_v30, %v8662_v15  ;;  %v3181_v1 = vpop.f32.mrb[11].mxu0  ;;  %v3600_v52 = vmax.f32 %v3176_v21, 0.0  ;;  %v3906_v21 = vld [vmem:[%s10219_s8] sm:$0xf] }
 0x3d9   : > { %v3182_v63 = vadd.f32 %v3181_v1, %v8666_v2  ;;  %v2497_v59 = vpop.f32.mrb[116].mxu1  ;;  %v3601_v32 = vmax.f32 %v3178_v56, 0.0 }
 0x3da   : > { %v3602_v48 = vmax.f32 %v3180_v58, 0.0  ;;  %v2498_v57 = vadd.f32 %v8982_v20, %v2497_v59  ;;  %v7153_v41 = vpop.f32.mrb[117].mxu1  ;;  %3444 = vmatmul.mubr.bf16.gmra.mrb[116].mxu0 %v2691_v45 }
 0x3db   : > { %v3603_v37 = vmax.f32 %v3182_v63, 0.0  ;;  %v2500_v34 = vpop.f32.mrb[118].mxu1  ;;  %3453 = vmatprep.mubr.bf16.mxu0 %v10311_v24 }
 0x3dc   : > { %v9177_v9 = vpack.c.bf16 %v3602_v48, %v3600_v52  ;;  %v2501_v35 = vadd.f32 %v8982_v20, %v2500_v34  ;;  %v7154_v18 = vpop.f32.mrb[119].mxu1  ;;  %v2628_v1 = vmax.f32 %v2498_v57, 0.0  ;;  %v10326_v48 = vsub.s32 0, %v8646_v14 }
 0x3dd   : > { %v3185_v30 = vpop.f32.mrb[12].mxu0  ;;  %v9183_v58 = vpack.c.bf16 %v3603_v37, %v3601_v32  ;;  %v10327_v37 = vsub.s32 1, %v8646_v14 }
 0x3de   : > { %v2629_v59 = vmax.f32 %v2501_v35, 0.0  ;;  %v3186_v56 = vadd.f32 %v3185_v30, %v8662_v15  ;;  %v3187_v45 = vpop.f32.mrb[13].mxu0  ;;  %4541 = vmatmul.mubr.bf16.gmra.mrb[224].mxu1 %v9073_v44  ;;  %v9192_v41 = vrot.slane %v3906_v21, %v10326_v48 }
 0x3df   : > { %v3188_v24 = vadd.f32 %v3187_v45, %v8666_v2  ;;  %v3189_v63 = vpop.f32.mrb[14].mxu0  ;;  %4550 = vmatprep.mubr.bf16.mxu1 %v9089_v4  ;;  %v9197_v35 = vrot.slane %v3906_v21, %v10327_v37 }
 0x3e0   : > { %v2692_v20 = vpack.c.bf16 %v2629_v59, %v2628_v1  ;;  %v3190_v34 = vadd.f32 %v3189_v63, %v8662_v15  ;;  %v3191_v52 = vpop.f32.mrb[15].mxu0  ;;  %v3604_v18 = vmax.f32 %v3186_v56, 0.0 }
 0x3e1   : > { %v3192_v57 = vadd.f32 %v3191_v52, %v8666_v2  ;;  %v4282_v32 = vpop.f32.mrb[120].mxu1  ;;  %v3605_v4 = vmax.f32 %v3188_v24, 0.0 }
 0x3e2   : > { %v3606_v30 = vmax.f32 %v3190_v34, 0.0  ;;  %3454 = vmatmul.mubr.bf16.gmra.mrb[120].mxu0 %v2692_v20  ;;  %v4284_v45 = vpop.f32.mrb[121].mxu1  ;;  %v4283_v48 = vadd.f32 %v4282_v32, %v9192_v41 }
 0x3e3   : > { %v3607_v1 = vmax.f32 %v3192_v57, 0.0  ;;  %v4286_v59 = vpop.f32.mrb[122].mxu1  ;;  %4943 = vmatprep.mubr.bf16.mxu0 %v8683_v8  ;;  %v4285_v14 = vadd.f32 %v4284_v45, %v9197_v35 }
 0x3e4   : > { %v9200_v63 = vpack.c.bf16 %v3606_v30, %v3604_v18  ;;  %v4287_v52 = vadd.f32 %v4286_v59, %v9192_v41  ;;  %v4288_v44 = vpop.f32.mrb[123].mxu1 }
 0x3e5   : > { %v4289_v21 = vadd.f32 %v4288_v44, %v9197_v35  ;;  %v3195_v56 = vpop.f32.mrb[16].mxu0  ;;  %v9206_v34 = vpack.c.bf16 %v3607_v1, %v3605_v4 }
 0x3e6   : > { %v5575_v20 = vmax.f32 %v4283_v48, %v4287_v52  ;;  %v3196_v24 = vadd.f32 %v3195_v56, %v8662_v15  ;;  %v3197_v57 = vpop.f32.mrb[17].mxu0  ;;  %4551 = vmatmul.mubr.bf16.gmra.mrb[228].mxu1 %v9086_v25 }
 0x3e7   : > { %v5706_v8 = vmax.f32 %v4285_v14, %v4289_v21  ;;  %v3198_v37 = vadd.f32 %v3197_v57, %v8666_v2  ;;  %v3199_v32 = vpop.f32.mrb[18].mxu0  ;;  %4560 = vmatprep.mubr.bf16.mxu1 %v9102_v6 }
 0x3e8   : > { %v3200_v18 = vadd.f32 %v3199_v32, %v8662_v15  ;;  %v3201_v30 = vpop.f32.mrb[19].mxu0  ;;  %v3608_v4 = vmax.f32 %v3196_v24, 0.0 }
 0x3e9   : > { %v3202_v44 = vadd.f32 %v3201_v30, %v8666_v2  ;;  %v4292_v45 = vpop.f32.mrb[124].mxu1  ;;  %v3609_v52 = vmax.f32 %v3198_v37, 0.0 }
 0x3ea   : > { %v3610_v1 = vmax.f32 %v3200_v18, 0.0  ;;  %v4293_v59 = vadd.f32 %v4292_v45, %v9192_v41  ;;  %v4294_v48 = vpop.f32.mrb[125].mxu1  ;;  %4944 = vmatmul.mubr.bf16.vlgmr.msra.gmra.mrb[124].mxu0 %v8680_v54 }
 0x3eb   : > { %v3611_v14 = vmax.f32 %v3202_v44, 0.0  ;;  %v4295_v21 = vadd.f32 %v4294_v48, %v9197_v35  ;;  %v4296_v56 = vpop.f32.mrb[126].mxu1  ;;  %4953 = vmatprep.mubr.bf16.mxu0 %v8709_v5 }
 0x3ec   : > { %v9218_v57 = vpack.c.bf16 %v3610_v1, %v3608_v4  ;;  %v5576_v32 = vmax.f32 %v5575_v20, %v4293_v59  ;;  %v4297_v30 = vadd.f32 %v4296_v56, %v9192_v41  ;;  %v4298_v6 = vpop.f32.mrb[127].mxu1 }
 0x3ed   : > { %v5707_v24 = vmax.f32 %v5706_v8, %v4295_v21  ;;  %v4299_v18 = vadd.f32 %v4298_v6, %v9197_v35  ;;  %v3205_v45 = vpop.f32.mrb[20].mxu0  ;;  %v9222_v25 = vpack.c.bf16 %v3611_v14, %v3609_v52 }
 0x3ee   : > { %v5577_v54 = vmax.f32 %v5576_v32, %v4297_v30  ;;  %v3206_v37 = vadd.f32 %v3205_v45, %v8662_v15  ;;  %v3207_v44 = vpop.f32.mrb[21].mxu0  ;;  %4561 = vmatmul.mubr.bf16.gmra.mrb[232].mxu1 %v9099_v22 }
 0x3ef   : > { %v5708_v48 = vmax.f32 %v5707_v24, %v4299_v18  ;;  %v3208_v5 = vadd.f32 %v3207_v44, %v8666_v2  ;;  %v3209_v4 = vpop.f32.mrb[22].mxu0  ;;  %4570 = vmatprep.mubr.bf16.mxu1 %v9115_v33 }
 0x3f0   : > { %v3210_v20 = vadd.f32 %v3209_v4, %v8662_v15  ;;  %v3211_v8 = vpop.f32.mrb[23].mxu0  ;;  %v3612_v59 = vmax.f32 %v3206_v37, 0.0 }
 0x3f1   : > { %v3212_v6 = vadd.f32 %v3211_v8, %v8666_v2  ;;  %v4302_v1 = vpop.f32.mrb[128].mxu1  ;;  %v3613_v56 = vmax.f32 %v3208_v5, 0.0 }
 0x3f2   : > { %v3614_v52 = vmax.f32 %v3210_v20, 0.0  ;;  %v4303_v14 = vadd.f32 %v4302_v1, %v9192_v41  ;;  %v4304_v21 = vpop.f32.mrb[129].mxu1  ;;  %4954 = vmatmul.mubr.bf16.gmra.mrb[128].mxu0 %v8706_v29 }
 0x3f3   : > { %v3615_v32 = vmax.f32 %v3212_v6, 0.0  ;;  %v4305_v30 = vadd.f32 %v4304_v21, %v9197_v35  ;;  %v4306_v24 = vpop.f32.mrb[130].mxu1  ;;  %4963 = vmatprep.mubr.bf16.mxu0 %v8724_v7 }
 0x3f4   : > { %v9234_v18 = vpack.c.bf16 %v3614_v52, %v3612_v59  ;;  %v5578_v45 = vmax.f32 %v5577_v54, %v4303_v14  ;;  %v4307_v44 = vadd.f32 %v4306_v24, %v9192_v41  ;;  %v4308_v4 = vpop.f32.mrb[131].mxu1 }
 0x3f5   : > { %v5709_v37 = vmax.f32 %v5708_v48, %v4305_v30  ;;  %v4309_v20 = vadd.f32 %v4308_v4, %v9197_v35  ;;  %v3215_v8 = vpop.f32.mrb[24].mxu0  ;;  %v9238_v1 = vpack.c.bf16 %v3615_v32, %v3613_v56 }
 0x3f6   : > { %v5579_v29 = vmax.f32 %v5578_v45, %v4307_v44  ;;  %v3216_v5 = vadd.f32 %v3215_v8, %v8662_v15  ;;  %v3217_v6 = vpop.f32.mrb[25].mxu0  ;;  %4571 = vmatmul.mubr.bf16.gmra.mrb[236].mxu1 %v9112_v28 }
 0x3f7   : > { %v5710_v21 = vmax.f32 %v5709_v37, %v4309_v20  ;;  %v3218_v7 = vadd.f32 %v3217_v6, %v8666_v2  ;;  %v3219_v59 = vpop.f32.mrb[26].mxu0  ;;  %4580 = vmatprep.mubr.bf16.mxu1 %v9128_v43 }
 0x3f8   : > { %v3220_v54 = vadd.f32 %v3219_v59, %v8662_v15  ;;  %v3221_v48 = vpop.f32.mrb[27].mxu0  ;;  %v3616_v56 = vmax.f32 %v3216_v5, 0.0 }
 0x3f9   : > { %v3222_v52 = vadd.f32 %v3221_v48, %v8666_v2  ;;  %v4312_v14 = vpop.f32.mrb[132].mxu1  ;;  %v3617_v45 = vmax.f32 %v3218_v7, 0.0 }
 0x3fa   : > { %v3618_v32 = vmax.f32 %v3220_v54, 0.0  ;;  %v4313_v30 = vadd.f32 %v4312_v14, %v9192_v41  ;;  %v4314_v24 = vpop.f32.mrb[133].mxu1  ;;  %4964 = vmatmul.mubr.bf16.gmra.mrb[132].mxu0 %v8721_v46 }
 0x3fb   : > { %v3619_v44 = vmax.f32 %v3222_v52, 0.0  ;;  %v4315_v4 = vadd.f32 %v4314_v24, %v9197_v35  ;;  %v4316_v37 = vpop.f32.mrb[134].mxu1  ;;  %4973 = vmatprep.mubr.bf16.mxu0 %v8739_v3 }
 0x3fc   : > { %v9250_v20 = vpack.c.bf16 %v3618_v32, %v3616_v56  ;;  %v5580_v8 = vmax.f32 %v5579_v29, %v4313_v30  ;;  %v4317_v6 = vadd.f32 %v4316_v37, %v9192_v41  ;;  %v4318_v59 = vpop.f32.mrb[135].mxu1 }
 0x3fd   : > { %v5711_v5 = vmax.f32 %v5710_v21, %v4315_v4  ;;  %v4319_v54 = vadd.f32 %v4318_v59, %v9197_v35  ;;  %v3225_v48 = vpop.f32.mrb[28].mxu0  ;;  %v9254_v14 = vpack.c.bf16 %v3619_v44, %v3617_v45 }
 0x3fe   : > { %v5581_v46 = vmax.f32 %v5580_v8, %v4317_v6  ;;  %v3226_v7 = vadd.f32 %v3225_v48, %v8662_v15  ;;  %v3227_v52 = vpop.f32.mrb[29].mxu0  ;;  %4581 = vmatmul.mubr.bf16.gmra.mrb[240].mxu1 %v9125_v27 }
 0x3ff   : > { %v5712_v24 = vmax.f32 %v5711_v5, %v4319_v54  ;;  %v3228_v3 = vadd.f32 %v3227_v52, %v8666_v2  ;;  %v3229_v56 = vpop.f32.mrb[30].mxu0  ;;  %4590 = vmatprep.mubr.bf16.mxu1 %v9141_v31 }
 0x400   : > { %v3230_v29 = vadd.f32 %v3229_v56, %v8662_v15  ;;  %v3231_v21 = vpop.f32.mrb[31].mxu0  ;;  %v3620_v45 = vmax.f32 %v3226_v7, 0.0 }
 0x401   : > { %v3232_v32 = vadd.f32 %v3231_v21, %v8666_v2  ;;  %v4322_v30 = vpop.f32.mrb[136].mxu1  ;;  %v3621_v8 = vmax.f32 %v3228_v3, 0.0 }
 0x402   : > { %v3622_v44 = vmax.f32 %v3230_v29, 0.0  ;;  %v4323_v4 = vadd.f32 %v4322_v30, %v9192_v41  ;;  %v4324_v37 = vpop.f32.mrb[137].mxu1  ;;  %4974 = vmatmul.mubr.bf16.gmra.mrb[136].mxu0 %v8736_v16 }
 0x403   : > { %v3623_v6 = vmax.f32 %v3232_v32, 0.0  ;;  %v4325_v59 = vadd.f32 %v4324_v37, %v9197_v35  ;;  %v4326_v5 = vpop.f32.mrb[138].mxu1  ;;  %4983 = vmatprep.mubr.bf16.mxu0 %v8754_v55 }
 0x404   : > { %v9266_v54 = vpack.c.bf16 %v3622_v44, %v3620_v45  ;;  %v5582_v48 = vmax.f32 %v5581_v46, %v4323_v4  ;;  %v4327_v52 = vadd.f32 %v4326_v5, %v9192_v41  ;;  %v4328_v56 = vpop.f32.mrb[139].mxu1 }
 0x405   : > { %v5713_v7 = vmax.f32 %v5712_v24, %v4325_v59  ;;  %v4329_v29 = vadd.f32 %v4328_v56, %v9197_v35  ;;  %v3235_v21 = vpop.f32.mrb[32].mxu0  ;;  %v9270_v30 = vpack.c.bf16 %v3623_v6, %v3621_v8 }
 0x406   : > { %10328 = vst [vmem:[#allocation37_spill] sm:$0xff] %v9266_v54  ;;  %v5583_v16 = vmax.f32 %v5582_v48, %v4327_v52  ;;  %v3236_v3 = vadd.f32 %v3235_v21, %v8662_v15  ;;  %v3237_v32 = vpop.f32.mrb[33].mxu0  ;;  %4591 = vmatmul.mubr.bf16.gmra.mrb[244].mxu1 %v9138_v23 }
 0x407   : > { %v5714_v37 = vmax.f32 %v5713_v7, %v4329_v29  ;;  %v3238_v55 = vadd.f32 %v3237_v32, %v8666_v2  ;;  %v3239_v45 = vpop.f32.mrb[34].mxu0  ;;  %4600 = vmatprep.mubr.bf16.mxu1 %v9154_v39 }
 0x408   : > { %v3240_v46 = vadd.f32 %v3239_v45, %v8662_v15  ;;  %v3241_v24 = vpop.f32.mrb[35].mxu0  ;;  %v3624_v8 = vmax.f32 %v3236_v3, 0.0 }
 0x409   : > { %v3242_v44 = vadd.f32 %v3241_v24, %v8666_v2  ;;  %v4332_v4 = vpop.f32.mrb[140].mxu1  ;;  %v3625_v48 = vmax.f32 %v3238_v55, 0.0 }
 0x40a   : > { %v3626_v6 = vmax.f32 %v3240_v46, 0.0  ;;  %v4333_v59 = vadd.f32 %v4332_v4, %v9192_v41  ;;  %v4334_v5 = vpop.f32.mrb[141].mxu1  ;;  %4984 = vmatmul.mubr.bf16.gmra.mrb[140].mxu0 %v8751_v49 }
 0x40b   : > { %v3627_v52 = vmax.f32 %v3242_v44, 0.0  ;;  %v4335_v56 = vadd.f32 %v4334_v5, %v9197_v35  ;;  %v4336_v7 = vpop.f32.mrb[142].mxu1  ;;  %4993 = vmatprep.mubr.bf16.mxu0 %v8775_v53 }
 0x40c   : > { %v9282_v29 = vpack.c.bf16 %v3626_v6, %v3624_v8  ;;  %v5584_v21 = vmax.f32 %v5583_v16, %v4333_v59  ;;  %v4337_v32 = vadd.f32 %v4336_v7, %v9192_v41  ;;  %v4338_v45 = vpop.f32.mrb[143].mxu1 }
 0x40d   : > { %v5715_v3 = vmax.f32 %v5714_v37, %v4335_v56  ;;  %v4339_v46 = vadd.f32 %v4338_v45, %v9197_v35  ;;  %v3245_v24 = vpop.f32.mrb[36].mxu0  ;;  %v9286_v4 = vpack.c.bf16 %v3627_v52, %v3625_v48 }
 0x40e   : > { %10329 = vst [vmem:[#allocation38_spill] sm:$0xff] %v9282_v29  ;;  %v5585_v49 = vmax.f32 %v5584_v21, %v4337_v32  ;;  %v3246_v55 = vadd.f32 %v3245_v24, %v8662_v15  ;;  %v3247_v44 = vpop.f32.mrb[37].mxu0  ;;  %4601 = vmatmul.mubr.bf16.gmra.mrb[248].mxu1 %v9151_v12 }
 0x40f   : > { %10330 = vst [vmem:[#allocation39_spill] sm:$0xff] %v9286_v4  ;;  %v5716_v5 = vmax.f32 %v5715_v3, %v4339_v46  ;;  %v3248_v53 = vadd.f32 %v3247_v44, %v8666_v2  ;;  %v3249_v8 = vpop.f32.mrb[38].mxu0  ;;  %4610 = vmatprep.mubr.bf16.mxu1 %v9167_v0 }
 0x410   : > { %v3250_v16 = vadd.f32 %v3249_v8, %v8662_v15  ;;  %v3251_v37 = vpop.f32.mrb[39].mxu0  ;;  %v3628_v48 = vmax.f32 %v3246_v55, 0.0 }
 0x411   : > { %v3252_v6 = vadd.f32 %v3251_v37, %v8666_v2  ;;  %v4342_v59 = vpop.f32.mrb[144].mxu1  ;;  %v3629_v21 = vmax.f32 %v3248_v53, 0.0 }
 0x412   : > { %v3630_v52 = vmax.f32 %v3250_v16, 0.0  ;;  %v4343_v56 = vadd.f32 %v4342_v59, %v9192_v41  ;;  %v4344_v7 = vpop.f32.mrb[145].mxu1  ;;  %4994 = vmatmul.mubr.bf16.gmra.mrb[144].mxu0 %v8772_v40 }
 0x413   : > { %v3631_v32 = vmax.f32 %v3252_v6, 0.0  ;;  %v4345_v45 = vadd.f32 %v4344_v7, %v9197_v35  ;;  %v4346_v3 = vpop.f32.mrb[146].mxu1  ;;  %5003 = vmatprep.mubr.bf16.mxu0 %v8790_v10 }
 0x414   : > { %v9298_v46 = vpack.c.bf16 %v3630_v52, %v3628_v48  ;;  %v5586_v24 = vmax.f32 %v5585_v49, %v4343_v56  ;;  %v4347_v44 = vadd.f32 %v4346_v3, %v9192_v41  ;;  %v4348_v8 = vpop.f32.mrb[147].mxu1 }
 0x415   : > { %v5717_v55 = vmax.f32 %v5716_v5, %v4345_v45  ;;  %v4349_v16 = vadd.f32 %v4348_v8, %v9197_v35  ;;  %v3255_v37 = vpop.f32.mrb[40].mxu0  ;;  %v9302_v59 = vpack.c.bf16 %v3631_v32, %v3629_v21 }
 0x416   : > { %10331 = vst [vmem:[#allocation40_spill] sm:$0xff] %v9298_v46  ;;  %v5587_v40 = vmax.f32 %v5586_v24, %v4347_v44  ;;  %v3256_v53 = vadd.f32 %v3255_v37, %v8662_v15  ;;  %v3257_v6 = vpop.f32.mrb[41].mxu0  ;;  %4611 = vmatmul.mubr.bf16.gmra.mrb[252].mxu1 %v9164_v62 }
 0x417   : > { %10332 = vst [vmem:[#allocation41_spill] sm:$0xff] %v9302_v59  ;;  %v5718_v7 = vmax.f32 %v5717_v55, %v4349_v16  ;;  %v3258_v10 = vadd.f32 %v3257_v6, %v8666_v2  ;;  %v3259_v48 = vpop.f32.mrb[42].mxu0  ;;  %4620 = vmatprep.mubr.bf16.mxu1 %v9183_v58 }
 0x418   : > { %v3260_v49 = vadd.f32 %v3259_v48, %v8662_v15  ;;  %v3261_v5 = vpop.f32.mrb[43].mxu0  ;;  %v3632_v21 = vmax.f32 %v3256_v53, 0.0 }
 0x419   : > { %v3262_v52 = vadd.f32 %v3261_v5, %v8666_v2  ;;  %v4352_v56 = vpop.f32.mrb[148].mxu1  ;;  %v3633_v24 = vmax.f32 %v3258_v10, 0.0 }
 0x41a   : > { %v3634_v32 = vmax.f32 %v3260_v49, 0.0  ;;  %v4353_v45 = vadd.f32 %v4352_v56, %v9192_v41  ;;  %v4354_v3 = vpop.f32.mrb[149].mxu1  ;;  %5004 = vmatmul.mubr.bf16.gmra.mrb[148].mxu0 %v8787_v19 }
 0x41b   : > { %v3635_v44 = vmax.f32 %v3262_v52, 0.0  ;;  %v4355_v8 = vadd.f32 %v4354_v3, %v9197_v35  ;;  %v4356_v55 = vpop.f32.mrb[150].mxu1  ;;  %5013 = vmatprep.mubr.bf16.mxu0 %v8805_v26 }
 0x41c   : > { %v9314_v16 = vpack.c.bf16 %v3634_v32, %v3632_v21  ;;  %v5588_v37 = vmax.f32 %v5587_v40, %v4353_v45  ;;  %v4357_v6 = vadd.f32 %v4356_v55, %v9192_v41  ;;  %v4358_v48 = vpop.f32.mrb[151].mxu1 }
 0x41d   : > { %v5719_v53 = vmax.f32 %v5718_v7, %v4355_v8  ;;  %v4359_v49 = vadd.f32 %v4358_v48, %v9197_v35  ;;  %v3265_v5 = vpop.f32.mrb[44].mxu0  ;;  %v9318_v56 = vpack.c.bf16 %v3635_v44, %v3633_v24 }
 0x41e   : > { %10333 = vst [vmem:[#allocation42_spill] sm:$0xff] %v9314_v16  ;;  %v5589_v19 = vmax.f32 %v5588_v37, %v4357_v6  ;;  %v3266_v10 = vadd.f32 %v3265_v5, %v8662_v15  ;;  %v3267_v52 = vpop.f32.mrb[45].mxu0  ;;  %4621 = vmatmul.mubr.bf16.gmra.mrb[0].mxu1 %v9177_v9 }
 0x41f   : > { %10334 = vst [vmem:[#allocation43_spill] sm:$0xff] %v9318_v56  ;;  %v5720_v3 = vmax.f32 %v5719_v53, %v4359_v49  ;;  %v3268_v26 = vadd.f32 %v3267_v52, %v8666_v2  ;;  %v3269_v21 = vpop.f32.mrb[46].mxu0  ;;  %4630 = vmatprep.mubr.bf16.mxu1 %v9206_v34 }
 0x420   : > { %v3270_v40 = vadd.f32 %v3269_v21, %v8662_v15  ;;  %v3271_v7 = vpop.f32.mrb[47].mxu0  ;;  %v3636_v24 = vmax.f32 %v3266_v10, 0.0 }
 0x421   : > { %v3272_v32 = vadd.f32 %v3271_v7, %v8666_v2  ;;  %v4362_v45 = vpop.f32.mrb[152].mxu1  ;;  %v3637_v37 = vmax.f32 %v3268_v26, 0.0 }
 0x422   : > { %v3638_v44 = vmax.f32 %v3270_v40, 0.0  ;;  %v4363_v8 = vadd.f32 %v4362_v45, %v9192_v41  ;;  %v4364_v55 = vpop.f32.mrb[153].mxu1  ;;  %5014 = vmatmul.mubr.bf16.gmra.mrb[152].mxu0 %v8802_v47 }
 0x423   : > { %v3639_v6 = vmax.f32 %v3272_v32, 0.0  ;;  %v4365_v48 = vadd.f32 %v4364_v55, %v9197_v35  ;;  %v4366_v53 = vpop.f32.mrb[154].mxu1  ;;  %5023 = vmatprep.mubr.bf16.mxu0 %v8819_v17 }
 0x424   : > { %v9330_v49 = vpack.c.bf16 %v3638_v44, %v3636_v24  ;;  %v5590_v5 = vmax.f32 %v5589_v19, %v4363_v8  ;;  %v4367_v52 = vadd.f32 %v4366_v53, %v9192_v41  ;;  %v4368_v21 = vpop.f32.mrb[155].mxu1 }
 0x425   : > { %v5721_v10 = vmax.f32 %v5720_v3, %v4365_v48  ;;  %v4369_v40 = vadd.f32 %v4368_v21, %v9197_v35  ;;  %v3275_v7 = vpop.f32.mrb[48].mxu0  ;;  %v9334_v45 = vpack.c.bf16 %v3639_v6, %v3637_v37 }
 0x426   : > { %10335 = vst [vmem:[#allocation44_spill] sm:$0xff] %v9330_v49  ;;  %v5591_v47 = vmax.f32 %v5590_v5, %v4367_v52  ;;  %v3276_v26 = vadd.f32 %v3275_v7, %v8662_v15  ;;  %v3277_v32 = vpop.f32.mrb[49].mxu0  ;;  %4631 = vmatmul.mubr.bf16.gmra.mrb[4].mxu1 %v9200_v63 }
 0x427   : > { %10336 = vst [vmem:[#allocation45_spill] sm:$0xff] %v9334_v45  ;;  %v5722_v55 = vmax.f32 %v5721_v10, %v4369_v40  ;;  %v3278_v17 = vadd.f32 %v3277_v32, %v8666_v2  ;;  %v3279_v24 = vpop.f32.mrb[50].mxu0  ;;  %4640 = vmatprep.mubr.bf16.mxu1 %v9222_v25 }
 0x428   : > { %v3280_v19 = vadd.f32 %v3279_v24, %v8662_v15  ;;  %v3281_v3 = vpop.f32.mrb[51].mxu0  ;;  %v3640_v37 = vmax.f32 %v3276_v26, 0.0 }
 0x429   : > { %v3282_v44 = vadd.f32 %v3281_v3, %v8666_v2  ;;  %v4372_v8 = vpop.f32.mrb[156].mxu1  ;;  %v3641_v5 = vmax.f32 %v3278_v17, 0.0 }
 0x42a   : > { %v3642_v6 = vmax.f32 %v3280_v19, 0.0  ;;  %v4373_v48 = vadd.f32 %v4372_v8, %v9192_v41  ;;  %v4374_v53 = vpop.f32.mrb[157].mxu1  ;;  %5024 = vmatmul.mubr.bf16.gmra.mrb[156].mxu0 %v8816_v42 }
 0x42b   : > { %v3643_v52 = vmax.f32 %v3282_v44, 0.0  ;;  %v4375_v21 = vadd.f32 %v4374_v53, %v9197_v35  ;;  %v4376_v10 = vpop.f32.mrb[158].mxu1  ;;  %5033 = vmatprep.mubr.bf16.mxu0 %v8838_v50 }
 0x42c   : > { %v9346_v40 = vpack.c.bf16 %v3642_v6, %v3640_v37  ;;  %v5592_v7 = vmax.f32 %v5591_v47, %v4373_v48  ;;  %v4377_v32 = vadd.f32 %v4376_v10, %v9192_v41  ;;  %v4378_v24 = vpop.f32.mrb[159].mxu1 }
 0x42d   : > { %v5723_v26 = vmax.f32 %v5722_v55, %v4375_v21  ;;  %v4379_v19 = vadd.f32 %v4378_v24, %v9197_v35  ;;  %v3285_v3 = vpop.f32.mrb[52].mxu0  ;;  %v9350_v8 = vpack.c.bf16 %v3643_v52, %v3641_v5 }
 0x42e   : > { %10337 = vst [vmem:[#allocation46_spill] sm:$0xff] %v9346_v40  ;;  %v5593_v42 = vmax.f32 %v5592_v7, %v4377_v32  ;;  %v3286_v17 = vadd.f32 %v3285_v3, %v8662_v15  ;;  %v3287_v44 = vpop.f32.mrb[53].mxu0  ;;  %4641 = vmatmul.mubr.bf16.gmra.mrb[8].mxu1 %v9218_v57 }
 0x42f   : > { %10338 = vst [vmem:[#allocation47_spill] sm:$0xff] %v9350_v8  ;;  %v5724_v53 = vmax.f32 %v5723_v26, %v4379_v19  ;;  %v3288_v50 = vadd.f32 %v3287_v44, %v8666_v2  ;;  %v3289_v37 = vpop.f32.mrb[54].mxu0  ;;  %4650 = vmatprep.mubr.bf16.mxu1 %v9238_v1 }
 0x430   : > { %v3290_v47 = vadd.f32 %v3289_v37, %v8662_v15  ;;  %v3291_v55 = vpop.f32.mrb[55].mxu0  ;;  %v3644_v5 = vmax.f32 %v3286_v17, 0.0 }
 0x431   : > { %v3292_v6 = vadd.f32 %v3291_v55, %v8666_v2  ;;  %v4382_v48 = vpop.f32.mrb[160].mxu1  ;;  %v3645_v7 = vmax.f32 %v3288_v50, 0.0 }
 0x432   : > { %v3646_v52 = vmax.f32 %v3290_v47, 0.0  ;;  %v4383_v21 = vadd.f32 %v4382_v48, %v9192_v41  ;;  %v4384_v10 = vpop.f32.mrb[161].mxu1  ;;  %5034 = vmatmul.mubr.bf16.gmra.mrb[160].mxu0 %v8835_v38 }
 0x433   : > { %v3647_v32 = vmax.f32 %v3292_v6, 0.0  ;;  %v4385_v24 = vadd.f32 %v4384_v10, %v9197_v35  ;;  %v4386_v26 = vpop.f32.mrb[162].mxu1  ;;  %5043 = vmatprep.mubr.bf16.mxu0 %v8851_v51 }
 0x434   : > { %v9362_v19 = vpack.c.bf16 %v3646_v52, %v3644_v5  ;;  %v5594_v3 = vmax.f32 %v5593_v42, %v4383_v21  ;;  %v4387_v44 = vadd.f32 %v4386_v26, %v9192_v41  ;;  %v4388_v37 = vpop.f32.mrb[163].mxu1 }
 0x435   : > { %v5725_v17 = vmax.f32 %v5724_v53, %v4385_v24  ;;  %v4389_v47 = vadd.f32 %v4388_v37, %v9197_v35  ;;  %v3295_v55 = vpop.f32.mrb[56].mxu0  ;;  %v9366_v48 = vpack.c.bf16 %v3647_v32, %v3645_v7 }
 0x436   : > { %10339 = vst [vmem:[#allocation48_spill] sm:$0xff] %v9362_v19  ;;  %v5595_v38 = vmax.f32 %v5594_v3, %v4387_v44  ;;  %v3296_v50 = vadd.f32 %v3295_v55, %v8662_v15  ;;  %v3297_v6 = vpop.f32.mrb[57].mxu0  ;;  %4651 = vmatmul.mubr.bf16.gmra.mrb[12].mxu1 %v9234_v18 }
 0x437   : > { %10340 = vst [vmem:[#allocation49_spill] sm:$0xff] %v9366_v48  ;;  %v5726_v10 = vmax.f32 %v5725_v17, %v4389_v47  ;;  %v3298_v51 = vadd.f32 %v3297_v6, %v8666_v2  ;;  %v3299_v5 = vpop.f32.mrb[58].mxu0  ;;  %4660 = vmatprep.mubr.bf16.mxu1 %v9254_v14 }
 0x438   : > { %v3300_v42 = vadd.f32 %v3299_v5, %v8662_v15  ;;  %v3301_v53 = vpop.f32.mrb[59].mxu0  ;;  %v3648_v7 = vmax.f32 %v3296_v50, 0.0 }
 0x439   : > { %v3302_v52 = vadd.f32 %v3301_v53, %v8666_v2  ;;  %v4392_v21 = vpop.f32.mrb[164].mxu1  ;;  %v3649_v3 = vmax.f32 %v3298_v51, 0.0 }
 0x43a   : > { %v3650_v32 = vmax.f32 %v3300_v42, 0.0  ;;  %v4393_v24 = vadd.f32 %v4392_v21, %v9192_v41  ;;  %v4394_v26 = vpop.f32.mrb[165].mxu1  ;;  %5044 = vmatmul.mubr.bf16.gmra.mrb[164].mxu0 %v8848_v13 }
 0x43b   : > { %v3651_v44 = vmax.f32 %v3302_v52, 0.0  ;;  %v4395_v37 = vadd.f32 %v4394_v26, %v9197_v35  ;;  %v4396_v17 = vpop.f32.mrb[166].mxu1  ;;  %5053 = vmatprep.mubr.bf16.mxu0 %v8864_v61 }
 0x43c   : > { %v9378_v47 = vpack.c.bf16 %v3650_v32, %v3648_v7  ;;  %v5596_v55 = vmax.f32 %v5595_v38, %v4393_v24  ;;  %v4397_v6 = vadd.f32 %v4396_v17, %v9192_v41  ;;  %v4398_v5 = vpop.f32.mrb[167].mxu1 }
 0x43d   : > { %v5727_v50 = vmax.f32 %v5726_v10, %v4395_v37  ;;  %v4399_v42 = vadd.f32 %v4398_v5, %v9197_v35  ;;  %v3305_v53 = vpop.f32.mrb[60].mxu0  ;;  %v9382_v21 = vpack.c.bf16 %v3651_v44, %v3649_v3 }
 0x43e   : > { %10341 = vst [vmem:[#allocation50_spill] sm:$0xff] %v9378_v47  ;;  %v5597_v13 = vmax.f32 %v5596_v55, %v4397_v6  ;;  %v3306_v51 = vadd.f32 %v3305_v53, %v8662_v15  ;;  %v3307_v52 = vpop.f32.mrb[61].mxu0  ;;  %4661 = vmatmul.mubr.bf16.gmra.mrb[16].mxu1 %v9250_v20 }
 0x43f   : > { %10342 = vst [vmem:[#allocation51_spill] sm:$0xff] %v9382_v21  ;;  %v5728_v26 = vmax.f32 %v5727_v50, %v4399_v42  ;;  %v3308_v61 = vadd.f32 %v3307_v52, %v8666_v2  ;;  %v3309_v7 = vpop.f32.mrb[62].mxu0  ;;  %4670 = vmatprep.mubr.bf16.mxu1 %v9270_v30 }
 0x440   : > { %v3310_v38 = vadd.f32 %v3309_v7, %v8662_v15  ;;  %v3311_v10 = vpop.f32.mrb[63].mxu0  ;;  %v3652_v3 = vmax.f32 %v3306_v51, 0.0 }
 0x441   : > { %v3312_v32 = vadd.f32 %v3311_v10, %v8666_v2  ;;  %v4402_v24 = vpop.f32.mrb[168].mxu1  ;;  %v3653_v55 = vmax.f32 %v3308_v61, 0.0 }
 0x442   : > { %v3654_v44 = vmax.f32 %v3310_v38, 0.0  ;;  %v4403_v37 = vadd.f32 %v4402_v24, %v9192_v41  ;;  %v4404_v17 = vpop.f32.mrb[169].mxu1  ;;  %5054 = vmatmul.mubr.bf16.gmra.mrb[168].mxu0 %v8861_v11 }
 0x443   : > { %v3655_v6 = vmax.f32 %v3312_v32, 0.0  ;;  %v4405_v5 = vadd.f32 %v4404_v17, %v9197_v35  ;;  %v4406_v50 = vpop.f32.mrb[170].mxu1  ;;  %5063 = vmatprep.mubr.bf16.mxu0 %v8883_v36 }
 0x444   : > { %v9394_v42 = vpack.c.bf16 %v3654_v44, %v3652_v3  ;;  %v5598_v53 = vmax.f32 %v5597_v13, %v4403_v37  ;;  %v4407_v52 = vadd.f32 %v4406_v50, %v9192_v41  ;;  %v4408_v7 = vpop.f32.mrb[171].mxu1 }
 0x445   : > { %v5729_v51 = vmax.f32 %v5728_v26, %v4405_v5  ;;  %v4409_v38 = vadd.f32 %v4408_v7, %v9197_v35  ;;  %v3315_v10 = vpop.f32.mrb[64].mxu0  ;;  %v9398_v24 = vpack.c.bf16 %v3655_v6, %v3653_v55 }
 0x446   : > { %10343 = vst [vmem:[#allocation52_spill] sm:$0xff] %v9394_v42  ;;  %v5599_v11 = vmax.f32 %v5598_v53, %v4407_v52  ;;  %v3316_v61 = vadd.f32 %v3315_v10, %v8662_v15  ;;  %v3317_v32 = vpop.f32.mrb[65].mxu0  ;;  %4671 = vmatmul.mubr.bf16.gmra.mrb[20].mxu1 %v9266_v54  ;;  %v10345_v53 = vld [vmem:[#allocation6_spill] sm:$0xff]  ;;  %v10346_v10 = vld [vmem:[#allocation8_spill] sm:$0xff] }
 0x447   : > { %10344 = vst [vmem:[#allocation53_spill] sm:$0xff] %v9398_v24  ;;  %v5730_v17 = vmax.f32 %v5729_v51, %v4409_v38  ;;  %v3318_v36 = vadd.f32 %v3317_v32, %v8666_v2  ;;  %v3319_v3 = vpop.f32.mrb[66].mxu0  ;;  %4680 = vmatprep.mubr.bf16.mxu1 %v9286_v4 }
 0x448   : > { %v3320_v13 = vadd.f32 %v3319_v3, %v8662_v15  ;;  %v3321_v26 = vpop.f32.mrb[67].mxu0  ;;  %v3656_v55 = vmax.f32 %v3316_v61, 0.0 }
 0x449   : > { %v3322_v44 = vadd.f32 %v3321_v26, %v8666_v2  ;;  %v4412_v37 = vpop.f32.mrb[172].mxu1  ;;  %v3657_v52 = vmax.f32 %v3318_v36, 0.0 }
 0x44a   : > { %v3658_v6 = vmax.f32 %v3320_v13, 0.0  ;;  %v4413_v5 = vadd.f32 %v4412_v37, %v9192_v41  ;;  %v4414_v50 = vpop.f32.mrb[173].mxu1  ;;  %5064 = vmatmul.mubr.bf16.gmra.mrb[172].mxu0 %v10345_v53 }
 0x44b   : > { %v3659_v7 = vmax.f32 %v3322_v44, 0.0  ;;  %v4415_v51 = vadd.f32 %v4414_v50, %v9197_v35  ;;  %v4416_v38 = vpop.f32.mrb[174].mxu1  ;;  %5073 = vmatprep.mubr.bf16.mxu0 %v10346_v10  ;;  %v10349_v10 = vld [vmem:[#allocation7_spill] sm:$0xff] }
 0x44c   : > { %v9410_v32 = vpack.c.bf16 %v3658_v6, %v3656_v55  ;;  %v5600_v3 = vmax.f32 %v5599_v11, %v4413_v5  ;;  %v4417_v26 = vadd.f32 %v4416_v38, %v9192_v41  ;;  %v4418_v4 = vpop.f32.mrb[175].mxu1 }
 0x44d   : > { %v5731_v61 = vmax.f32 %v5730_v17, %v4415_v51  ;;  %v4419_v13 = vadd.f32 %v4418_v4, %v9197_v35  ;;  %v3325_v37 = vpop.f32.mrb[68].mxu0  ;;  %v9414_v54 = vpack.c.bf16 %v3659_v7, %v3657_v52 }
 0x44e   : > { %10347 = vst [vmem:[#allocation6_spill] sm:$0xff] %v9410_v32  ;;  %v5601_v53 = vmax.f32 %v5600_v3, %v4417_v26  ;;  %v3326_v36 = vadd.f32 %v3325_v37, %v8662_v15  ;;  %v3327_v44 = vpop.f32.mrb[69].mxu0  ;;  %4681 = vmatmul.mubr.bf16.gmra.mrb[24].mxu1 %v9282_v29  ;;  %v10350_v37 = vld [vmem:[#allocation10_spill] sm:$0xff] }
 0x44f   : > { %10348 = vst [vmem:[#allocation8_spill] sm:$0xff] %v9414_v54  ;;  %v5732_v50 = vmax.f32 %v5731_v61, %v4419_v13  ;;  %v3328_v55 = vadd.f32 %v3327_v44, %v8666_v2  ;;  %v3329_v6 = vpop.f32.mrb[70].mxu0  ;;  %4690 = vmatprep.mubr.bf16.mxu1 %v9302_v59 }
 0x450   : > { %v3330_v11 = vadd.f32 %v3329_v6, %v8662_v15  ;;  %v3331_v17 = vpop.f32.mrb[71].mxu0  ;;  %v3660_v52 = vmax.f32 %v3326_v36, 0.0 }
 0x451   : > { %v3332_v4 = vadd.f32 %v3331_v17, %v8666_v2  ;;  %v4422_v5 = vpop.f32.mrb[176].mxu1  ;;  %v3661_v3 = vmax.f32 %v3328_v55, 0.0 }
 0x452   : > { %v3662_v7 = vmax.f32 %v3330_v11, 0.0  ;;  %v4423_v51 = vadd.f32 %v4422_v5, %v9192_v41  ;;  %v4424_v38 = vpop.f32.mrb[177].mxu1  ;;  %5074 = vmatmul.mubr.bf16.gmra.mrb[176].mxu0 %v10349_v10 }
 0x453   : > { %v3663_v26 = vmax.f32 %v3332_v4, 0.0  ;;  %v4425_v61 = vadd.f32 %v4424_v38, %v9197_v35  ;;  %v4426_v13 = vpop.f32.mrb[178].mxu1  ;;  %5083 = vmatprep.mubr.bf16.mxu0 %v10350_v37  ;;  %v10353_v37 = vld [vmem:[#allocation9_spill] sm:$0xff] }
 0x454   : > { %v9426_v44 = vpack.c.bf16 %v3662_v7, %v3660_v52  ;;  %v5602_v6 = vmax.f32 %v5601_v53, %v4423_v51  ;;  %v4427_v17 = vadd.f32 %v4426_v13, %v9192_v41  ;;  %v4428_v59 = vpop.f32.mrb[179].mxu1 }
 0x455   : > { %v5733_v36 = vmax.f32 %v5732_v50, %v4425_v61  ;;  %v4429_v11 = vadd.f32 %v4428_v59, %v9197_v35  ;;  %v3335_v5 = vpop.f32.mrb[72].mxu0  ;;  %v9430_v29 = vpack.c.bf16 %v3663_v26, %v3661_v3 }
 0x456   : > { %10351 = vst [vmem:[#allocation7_spill] sm:$0xff] %v9426_v44  ;;  %v5603_v10 = vmax.f32 %v5602_v6, %v4427_v17  ;;  %v3336_v55 = vadd.f32 %v3335_v5, %v8662_v15  ;;  %v3337_v4 = vpop.f32.mrb[73].mxu0  ;;  %4691 = vmatmul.mubr.bf16.gmra.mrb[28].mxu1 %v9298_v46  ;;  %v10354_v5 = vld [vmem:[#allocation12_spill] sm:$0xff] }
 0x457   : > { %10352 = vst [vmem:[#allocation10_spill] sm:$0xff] %v9430_v29  ;;  %v5734_v38 = vmax.f32 %v5733_v36, %v4429_v11  ;;  %v3338_v52 = vadd.f32 %v3337_v4, %v8666_v2  ;;  %v3339_v7 = vpop.f32.mrb[74].mxu0  ;;  %4700 = vmatprep.mubr.bf16.mxu1 %v9318_v56 }
 0x458   : > { %v3340_v53 = vadd.f32 %v3339_v7, %v8662_v15  ;;  %v3341_v50 = vpop.f32.mrb[75].mxu0  ;;  %v3664_v3 = vmax.f32 %v3336_v55, 0.0 }
 0x459   : > { %v3342_v59 = vadd.f32 %v3341_v50, %v8666_v2  ;;  %v4432_v51 = vpop.f32.mrb[180].mxu1  ;;  %v3665_v6 = vmax.f32 %v3338_v52, 0.0 }
 0x45a   : > { %v3666_v26 = vmax.f32 %v3340_v53, 0.0  ;;  %v4433_v61 = vadd.f32 %v4432_v51, %v9192_v41  ;;  %v4434_v13 = vpop.f32.mrb[181].mxu1  ;;  %5084 = vmatmul.mubr.bf16.gmra.mrb[180].mxu0 %v10353_v37 }
 0x45b   : > { %v3667_v17 = vmax.f32 %v3342_v59, 0.0  ;;  %v4435_v36 = vadd.f32 %v4434_v13, %v9197_v35  ;;  %v4436_v11 = vpop.f32.mrb[182].mxu1  ;;  %5093 = vmatprep.mubr.bf16.mxu0 %v10354_v5  ;;  %v10357_v5 = vld [vmem:[#allocation11_spill] sm:$0xff] }
 0x45c   : > { %v9442_v4 = vpack.c.bf16 %v3666_v26, %v3664_v3  ;;  %v5604_v7 = vmax.f32 %v5603_v10, %v4433_v61  ;;  %v4437_v50 = vadd.f32 %v4436_v11, %v9192_v41  ;;  %v4438_v56 = vpop.f32.mrb[183].mxu1 }
 0x45d   : > { %v5735_v55 = vmax.f32 %v5734_v38, %v4435_v36  ;;  %v4439_v53 = vadd.f32 %v4438_v56, %v9197_v35  ;;  %v3345_v51 = vpop.f32.mrb[76].mxu0  ;;  %v9446_v46 = vpack.c.bf16 %v3667_v17, %v3665_v6 }
 0x45e   : > { %10355 = vst [vmem:[#allocation9_spill] sm:$0xff] %v9442_v4  ;;  %v5605_v37 = vmax.f32 %v5604_v7, %v4437_v50  ;;  %v3346_v52 = vadd.f32 %v3345_v51, %v8662_v15  ;;  %v3347_v59 = vpop.f32.mrb[77].mxu0  ;;  %4701 = vmatmul.mubr.bf16.gmra.mrb[32].mxu1 %v9314_v16  ;;  %v10358_v51 = vld [vmem:[#allocation14_spill] sm:$0xff] }
 0x45f   : > { %10356 = vst [vmem:[#allocation12_spill] sm:$0xff] %v9446_v46  ;;  %v5736_v13 = vmax.f32 %v5735_v55, %v4439_v53  ;;  %v3348_v3 = vadd.f32 %v3347_v59, %v8666_v2  ;;  %v3349_v26 = vpop.f32.mrb[78].mxu0  ;;  %4710 = vmatprep.mubr.bf16.mxu1 %v9334_v45 }
 0x460   : > { %v3350_v10 = vadd.f32 %v3349_v26, %v8662_v15  ;;  %v3351_v38 = vpop.f32.mrb[79].mxu0  ;;  %v3668_v6 = vmax.f32 %v3346_v52, 0.0 }
 0x461   : > { %v3352_v56 = vadd.f32 %v3351_v38, %v8666_v2  ;;  %v4442_v61 = vpop.f32.mrb[184].mxu1  ;;  %v3669_v7 = vmax.f32 %v3348_v3, 0.0 }
 0x462   : > { %v3670_v17 = vmax.f32 %v3350_v10, 0.0  ;;  %v4443_v36 = vadd.f32 %v4442_v61, %v9192_v41  ;;  %v4444_v11 = vpop.f32.mrb[185].mxu1  ;;  %5094 = vmatmul.mubr.bf16.gmra.mrb[184].mxu0 %v10357_v5 }
 0x463   : > { %v3671_v50 = vmax.f32 %v3352_v56, 0.0  ;;  %v4445_v55 = vadd.f32 %v4444_v11, %v9197_v35  ;;  %v4446_v53 = vpop.f32.mrb[186].mxu1  ;;  %5103 = vmatprep.mubr.bf16.mxu0 %v10358_v51  ;;  %v10361_v51 = vld [vmem:[#allocation13_spill] sm:$0xff] }
 0x464   : > { %v9458_v59 = vpack.c.bf16 %v3670_v17, %v3668_v6  ;;  %v5606_v26 = vmax.f32 %v5605_v37, %v4443_v36  ;;  %v4447_v38 = vadd.f32 %v4446_v53, %v9192_v41  ;;  %v4448_v45 = vpop.f32.mrb[187].mxu1 }
 0x465   : > { %v5737_v52 = vmax.f32 %v5736_v13, %v4445_v55  ;;  %v4449_v10 = vadd.f32 %v4448_v45, %v9197_v35  ;;  %v3355_v61 = vpop.f32.mrb[80].mxu0  ;;  %v9462_v16 = vpack.c.bf16 %v3671_v50, %v3669_v7 }
 0x466   : > { %10359 = vst [vmem:[#allocation11_spill] sm:$0xff] %v9458_v59  ;;  %v5607_v5 = vmax.f32 %v5606_v26, %v4447_v38  ;;  %v3356_v3 = vadd.f32 %v3355_v61, %v8662_v15  ;;  %v3357_v56 = vpop.f32.mrb[81].mxu0  ;;  %4711 = vmatmul.mubr.bf16.gmra.mrb[36].mxu1 %v9330_v49  ;;  %v10362_v61 = vld [vmem:[#allocation16_spill] sm:$0xff] }
 0x467   : > { %10360 = vst [vmem:[#allocation14_spill] sm:$0xff] %v9462_v16  ;;  %v5738_v11 = vmax.f32 %v5737_v52, %v4449_v10  ;;  %v3358_v6 = vadd.f32 %v3357_v56, %v8666_v2  ;;  %v3359_v17 = vpop.f32.mrb[82].mxu0  ;;  %4720 = vmatprep.mubr.bf16.mxu1 %v9350_v8 }
 0x468   : > { %v3360_v37 = vadd.f32 %v3359_v17, %v8662_v15  ;;  %v3361_v13 = vpop.f32.mrb[83].mxu0  ;;  %v3672_v7 = vmax.f32 %v3356_v3, 0.0 }
 0x469   : > { %v3362_v45 = vadd.f32 %v3361_v13, %v8666_v2  ;;  %v4452_v36 = vpop.f32.mrb[188].mxu1  ;;  %v3673_v26 = vmax.f32 %v3358_v6, 0.0 }
 0x46a   : > { %v3674_v50 = vmax.f32 %v3360_v37, 0.0  ;;  %v4453_v55 = vadd.f32 %v4452_v36, %v9192_v41  ;;  %v4454_v53 = vpop.f32.mrb[189].mxu1  ;;  %5104 = vmatmul.mubr.bf16.gmra.mrb[188].mxu0 %v10361_v51 }
 0x46b   : > { %v3675_v38 = vmax.f32 %v3362_v45, 0.0  ;;  %v4455_v52 = vadd.f32 %v4454_v53, %v9197_v35  ;;  %v4456_v10 = vpop.f32.mrb[190].mxu1  ;;  %5113 = vmatprep.mubr.bf16.mxu0 %v10362_v61  ;;  %v10364_v61 = vld [vmem:[#allocation15_spill] sm:$0xff] }
 0x46c   : > { %v9474_v56 = vpack.c.bf16 %v3674_v50, %v3672_v7  ;;  %v5608_v17 = vmax.f32 %v5607_v5, %v4453_v55  ;;  %v4457_v13 = vadd.f32 %v4456_v10, %v9192_v41  ;;  %v4458_v8 = vpop.f32.mrb[191].mxu1 }
 0x46d   : > { %v5739_v3 = vmax.f32 %v5738_v11, %v4455_v52  ;;  %v4459_v37 = vadd.f32 %v4458_v8, %v9197_v35  ;;  %v3365_v36 = vpop.f32.mrb[84].mxu0  ;;  %v9478_v49 = vpack.c.bf16 %v3675_v38, %v3673_v26 }
 0x46e   : > { %v5609_v51 = vmax.f32 %v5608_v17, %v4457_v13  ;;  %v3366_v6 = vadd.f32 %v3365_v36, %v8662_v15  ;;  %v3367_v45 = vpop.f32.mrb[85].mxu0  ;;  %4721 = vmatmul.mubr.bf16.gmra.mrb[40].mxu1 %v9346_v40  ;;  %v10365_v36 = vld [vmem:[#allocation18_spill] sm:$0xff] }
 0x46f   : > { %10363 = vst [vmem:[#allocation13_spill] sm:$0xff] %v9478_v49  ;;  %v5740_v53 = vmax.f32 %v5739_v3, %v4459_v37  ;;  %v3368_v7 = vadd.f32 %v3367_v45, %v8666_v2  ;;  %v3369_v50 = vpop.f32.mrb[86].mxu0  ;;  %4730 = vmatprep.mubr.bf16.mxu1 %v9366_v48 }
 0x470   : > { %v3370_v5 = vadd.f32 %v3369_v50, %v8662_v15  ;;  %v3371_v11 = vpop.f32.mrb[87].mxu0  ;;  %v3676_v26 = vmax.f32 %v3366_v6, 0.0 }
 0x471   : > { %v3372_v8 = vadd.f32 %v3371_v11, %v8666_v2  ;;  %v4462_v55 = vpop.f32.mrb[192].mxu1  ;;  %v3677_v17 = vmax.f32 %v3368_v7, 0.0 }
 0x472   : > { %v3678_v38 = vmax.f32 %v3370_v5, 0.0  ;;  %v4463_v52 = vadd.f32 %v4462_v55, %v9192_v41  ;;  %v4464_v10 = vpop.f32.mrb[193].mxu1  ;;  %5114 = vmatmul.mubr.bf16.gmra.mrb[192].mxu0 %v10364_v61 }
 0x473   : > { %v3679_v13 = vmax.f32 %v3372_v8, 0.0  ;;  %v4465_v3 = vadd.f32 %v4464_v10, %v9197_v35  ;;  %v4466_v37 = vpop.f32.mrb[194].mxu1  ;;  %5123 = vmatprep.mubr.bf16.mxu0 %v10365_v36  ;;  %v10368_v36 = vld [vmem:[#allocation17_spill] sm:$0xff] }
 0x474   : > { %v9490_v45 = vpack.c.bf16 %v3678_v38, %v3676_v26  ;;  %v5610_v50 = vmax.f32 %v5609_v51, %v4463_v52  ;;  %v4467_v11 = vadd.f32 %v4466_v37, %v9192_v41  ;;  %v4468_v48 = vpop.f32.mrb[195].mxu1 }
 0x475   : > { %v5741_v6 = vmax.f32 %v5740_v53, %v4465_v3  ;;  %v4469_v5 = vadd.f32 %v4468_v48, %v9197_v35  ;;  %v3375_v55 = vpop.f32.mrb[88].mxu0  ;;  %v9494_v40 = vpack.c.bf16 %v3679_v13, %v3677_v17 }
 0x476   : > { %10366 = vst [vmem:[#allocation16_spill] sm:$0xff] %v9490_v45  ;;  %v5611_v61 = vmax.f32 %v5610_v50, %v4467_v11  ;;  %v3376_v7 = vadd.f32 %v3375_v55, %v8662_v15  ;;  %v3377_v8 = vpop.f32.mrb[89].mxu0  ;;  %4731 = vmatmul.mubr.bf16.gmra.mrb[44].mxu1 %v9362_v19  ;;  %v10369_v55 = vld [vmem:[#allocation20_spill] sm:$0xff] }
 0x477   : > { %10367 = vst [vmem:[#allocation15_spill] sm:$0xff] %v9494_v40  ;;  %v5742_v10 = vmax.f32 %v5741_v6, %v4469_v5  ;;  %v3378_v26 = vadd.f32 %v3377_v8, %v8666_v2  ;;  %v3379_v38 = vpop.f32.mrb[90].mxu0  ;;  %4740 = vmatprep.mubr.bf16.mxu1 %v9382_v21 }
 0x478   : > { %v3380_v51 = vadd.f32 %v3379_v38, %v8662_v15  ;;  %v3381_v53 = vpop.f32.mrb[91].mxu0  ;;  %v3680_v17 = vmax.f32 %v3376_v7, 0.0 }
 0x479   : > { %v3382_v48 = vadd.f32 %v3381_v53, %v8666_v2  ;;  %v4472_v52 = vpop.f32.mrb[196].mxu1  ;;  %v3681_v50 = vmax.f32 %v3378_v26, 0.0 }
 0x47a   : > { %v3682_v13 = vmax.f32 %v3380_v51, 0.0  ;;  %v4473_v3 = vadd.f32 %v4472_v52, %v9192_v41  ;;  %v4474_v37 = vpop.f32.mrb[197].mxu1  ;;  %5124 = vmatmul.mubr.bf16.gmra.mrb[196].mxu0 %v10368_v36 }
 0x47b   : > { %v3683_v11 = vmax.f32 %v3382_v48, 0.0  ;;  %v4475_v6 = vadd.f32 %v4474_v37, %v9197_v35  ;;  %v4476_v5 = vpop.f32.mrb[198].mxu1  ;;  %5133 = vmatprep.mubr.bf16.mxu0 %v10369_v55  ;;  %v10371_v55 = vld [vmem:[#allocation19_spill] sm:$0xff] }
 0x47c   : > { %v9506_v8 = vpack.c.bf16 %v3682_v13, %v3680_v17  ;;  %v5612_v38 = vmax.f32 %v5611_v61, %v4473_v3  ;;  %v4477_v53 = vadd.f32 %v4476_v5, %v9192_v41  ;;  %v4478_v21 = vpop.f32.mrb[199].mxu1 }
 0x47d   : > { %v5743_v7 = vmax.f32 %v5742_v10, %v4475_v6  ;;  %v4479_v51 = vadd.f32 %v4478_v21, %v9197_v35  ;;  %v3385_v52 = vpop.f32.mrb[92].mxu0  ;;  %v9510_v19 = vpack.c.bf16 %v3683_v11, %v3681_v50 }
 0x47e   : > { %v5613_v36 = vmax.f32 %v5612_v38, %v4477_v53  ;;  %v3386_v26 = vadd.f32 %v3385_v52, %v8662_v15  ;;  %v3387_v48 = vpop.f32.mrb[93].mxu0  ;;  %4741 = vmatmul.mubr.bf16.gmra.mrb[48].mxu1 %v9378_v47  ;;  %v10372_v52 = vld [vmem:[#allocation22_spill] sm:$0xff] }
 0x47f   : > { %10370 = vst [vmem:[#allocation18_spill] sm:$0xff] %v9510_v19  ;;  %v5744_v37 = vmax.f32 %v5743_v7, %v4479_v51  ;;  %v3388_v17 = vadd.f32 %v3387_v48, %v8666_v2  ;;  %v3389_v13 = vpop.f32.mrb[94].mxu0  ;;  %4750 = vmatprep.mubr.bf16.mxu1 %v9398_v24 }
 0x480   : > { %v3390_v61 = vadd.f32 %v3389_v13, %v8662_v15  ;;  %v3391_v10 = vpop.f32.mrb[95].mxu0  ;;  %v3684_v50 = vmax.f32 %v3386_v26, 0.0 }
 0x481   : > { %v3392_v21 = vadd.f32 %v3391_v10, %v8666_v2  ;;  %v4482_v3 = vpop.f32.mrb[200].mxu1  ;;  %v3685_v38 = vmax.f32 %v3388_v17, 0.0 }
 0x482   : > { %v3686_v11 = vmax.f32 %v3390_v61, 0.0  ;;  %v4483_v6 = vadd.f32 %v4482_v3, %v9192_v41  ;;  %v4484_v5 = vpop.f32.mrb[201].mxu1  ;;  %5134 = vmatmul.mubr.bf16.gmra.mrb[200].mxu0 %v10371_v55 }
 0x483   : > { %v3687_v53 = vmax.f32 %v3392_v21, 0.0  ;;  %v4485_v7 = vadd.f32 %v4484_v5, %v9197_v35  ;;  %v4486_v51 = vpop.f32.mrb[202].mxu1  ;;  %5143 = vmatprep.mubr.bf16.mxu0 %v10372_v52  ;;  %v10374_v52 = vld [vmem:[#allocation21_spill] sm:$0xff] }
 0x484   : > { %v9522_v48 = vpack.c.bf16 %v3686_v11, %v3684_v50  ;;  %v5614_v13 = vmax.f32 %v5613_v36, %v4483_v6  ;;  %v4487_v10 = vadd.f32 %v4486_v51, %v9192_v41  ;;  %v4488_v24 = vpop.f32.mrb[203].mxu1 }
 0x485   : > { %v5745_v26 = vmax.f32 %v5744_v37, %v4485_v7  ;;  %v4489_v61 = vadd.f32 %v4488_v24, %v9197_v35  ;;  %v3395_v3 = vpop.f32.mrb[96].mxu0  ;;  %v9526_v47 = vpack.c.bf16 %v3687_v53, %v3685_v38 }
 0x486   : > { %v5615_v55 = vmax.f32 %v5614_v13, %v4487_v10  ;;  %v3396_v17 = vadd.f32 %v3395_v3, %v8662_v15  ;;  %v3397_v21 = vpop.f32.mrb[97].mxu0  ;;  %4751 = vmatmul.mubr.bf16.gmra.mrb[52].mxu1 %v9394_v42  ;;  %v10375_v3 = vld [vmem:[#allocation24_spill] sm:$0xff] }
 0x487   : > { %10373 = vst [vmem:[#allocation17_spill] sm:$0xff] %v9526_v47  ;;  %v5746_v5 = vmax.f32 %v5745_v26, %v4489_v61  ;;  %v3398_v50 = vadd.f32 %v3397_v21, %v8666_v2  ;;  %v3399_v11 = vpop.f32.mrb[98].mxu0  ;;  %4760 = vmatprep.mubr.bf16.mxu1 %v9414_v54 }
 0x488   : > { %v3400_v36 = vadd.f32 %v3399_v11, %v8662_v15  ;;  %v3401_v37 = vpop.f32.mrb[99].mxu0  ;;  %v3688_v38 = vmax.f32 %v3396_v17, 0.0 }
 0x489   : > { %v3402_v24 = vadd.f32 %v3401_v37, %v8666_v2  ;;  %v4492_v6 = vpop.f32.mrb[204].mxu1  ;;  %v3689_v13 = vmax.f32 %v3398_v50, 0.0 }
 0x48a   : > { %v3690_v53 = vmax.f32 %v3400_v36, 0.0  ;;  %v4493_v7 = vadd.f32 %v4492_v6, %v9192_v41  ;;  %v4494_v51 = vpop.f32.mrb[205].mxu1  ;;  %5144 = vmatmul.mubr.bf16.gmra.mrb[204].mxu0 %v10374_v52 }
 0x48b   : > { %v3691_v10 = vmax.f32 %v3402_v24, 0.0  ;;  %v4495_v26 = vadd.f32 %v4494_v51, %v9197_v35  ;;  %v4496_v61 = vpop.f32.mrb[206].mxu1  ;;  %5153 = vmatprep.mubr.bf16.mxu0 %v10375_v3  ;;  %v10376_v3 = vld [vmem:[#allocation23_spill] sm:$0xff] }
 0x48c   : > { %v9538_v21 = vpack.c.bf16 %v3690_v53, %v3688_v38  ;;  %v5616_v11 = vmax.f32 %v5615_v55, %v4493_v7  ;;  %v4497_v37 = vadd.f32 %v4496_v61, %v9192_v41  ;;  %v4498_v54 = vpop.f32.mrb[207].mxu1 }
 0x48d   : > { %v5747_v17 = vmax.f32 %v5746_v5, %v4495_v26  ;;  %v4499_v36 = vadd.f32 %v4498_v54, %v9197_v35  ;;  %v3405_v6 = vpop.f32.mrb[100].mxu0  ;;  %v9542_v42 = vpack.c.bf16 %v3691_v10, %v3689_v13 }
 0x48e   : > { %v5617_v52 = vmax.f32 %v5616_v11, %v4497_v37  ;;  %v3406_v50 = vadd.f32 %v3405_v6, %v8662_v15  ;;  %v3407_v24 = vpop.f32.mrb[101].mxu0  ;;  %4761 = vmatmul.mubr.bf16.gmra.mrb[56].mxu1 %v9410_v32  ;;  %v10377_v6 = vld [vmem:[#allocation26_spill] sm:$0xff] }
 0x48f   : > { %v5748_v51 = vmax.f32 %v5747_v17, %v4499_v36  ;;  %v3408_v38 = vadd.f32 %v3407_v24, %v8666_v2  ;;  %v3409_v53 = vpop.f32.mrb[102].mxu0  ;;  %4770 = vmatprep.mubr.bf16.mxu1 %v9430_v29 }
 0x490   : > { %v3410_v55 = vadd.f32 %v3409_v53, %v8662_v15  ;;  %v3411_v5 = vpop.f32.mrb[103].mxu0  ;;  %v3692_v13 = vmax.f32 %v3406_v50, 0.0 }
 0x491   : > { %v3412_v54 = vadd.f32 %v3411_v5, %v8666_v2  ;;  %v4502_v7 = vpop.f32.mrb[208].mxu1  ;;  %v3693_v11 = vmax.f32 %v3408_v38, 0.0 }
 0x492   : > { %v3694_v10 = vmax.f32 %v3410_v55, 0.0  ;;  %v4503_v26 = vadd.f32 %v4502_v7, %v9192_v41  ;;  %v4504_v61 = vpop.f32.mrb[209].mxu1  ;;  %5154 = vmatmul.mubr.bf16.gmra.mrb[208].mxu0 %v10376_v3 }
 0x493   : > { %v3695_v37 = vmax.f32 %v3412_v54, 0.0  ;;  %v4505_v17 = vadd.f32 %v4504_v61, %v9197_v35  ;;  %v4506_v36 = vpop.f32.mrb[210].mxu1  ;;  %5163 = vmatprep.mubr.bf16.mxu0 %v10377_v6  ;;  %v10378_v6 = vld [vmem:[#allocation25_spill] sm:$0xff] }
 0x494   : > { %v9554_v24 = vpack.c.bf16 %v3694_v10, %v3692_v13  ;;  %v5618_v53 = vmax.f32 %v5617_v52, %v4503_v26  ;;  %v4507_v5 = vadd.f32 %v4506_v36, %v9192_v41  ;;  %v4508_v29 = vpop.f32.mrb[211].mxu1 }
 0x495   : > { %v5749_v50 = vmax.f32 %v5748_v51, %v4505_v17  ;;  %v4509_v55 = vadd.f32 %v4508_v29, %v9197_v35  ;;  %v3415_v7 = vpop.f32.mrb[104].mxu0  ;;  %v9558_v32 = vpack.c.bf16 %v3695_v37, %v3693_v11 }
 0x496   : > { %v5619_v3 = vmax.f32 %v5618_v53, %v4507_v5  ;;  %v3416_v38 = vadd.f32 %v3415_v7, %v8662_v15  ;;  %v3417_v54 = vpop.f32.mrb[105].mxu0  ;;  %4771 = vmatmul.mubr.bf16.gmra.mrb[60].mxu1 %v9426_v44  ;;  %v10379_v7 = vld [vmem:[#allocation28_spill] sm:$0xff] }
 0x497   : > { %v5750_v61 = vmax.f32 %v5749_v50, %v4509_v55  ;;  %v3418_v13 = vadd.f32 %v3417_v54, %v8666_v2  ;;  %v3419_v10 = vpop.f32.mrb[106].mxu0  ;;  %4780 = vmatprep.mubr.bf16.mxu1 %v9446_v46 }
 0x498   : > { %v3420_v52 = vadd.f32 %v3419_v10, %v8662_v15  ;;  %v3421_v51 = vpop.f32.mrb[107].mxu0  ;;  %v3696_v11 = vmax.f32 %v3416_v38, 0.0 }
 0x499   : > { %v3422_v29 = vadd.f32 %v3421_v51, %v8666_v2  ;;  %v4512_v26 = vpop.f32.mrb[212].mxu1  ;;  %v3697_v53 = vmax.f32 %v3418_v13, 0.0 }
 0x49a   : > { %v3698_v37 = vmax.f32 %v3420_v52, 0.0  ;;  %v4513_v17 = vadd.f32 %v4512_v26, %v9192_v41  ;;  %v4514_v36 = vpop.f32.mrb[213].mxu1  ;;  %5164 = vmatmul.mubr.bf16.gmra.mrb[212].mxu0 %v10378_v6 }
 0x49b   : > { %v3699_v5 = vmax.f32 %v3422_v29, 0.0  ;;  %v4515_v50 = vadd.f32 %v4514_v36, %v9197_v35  ;;  %v4516_v55 = vpop.f32.mrb[214].mxu1  ;;  %5173 = vmatprep.mubr.bf16.mxu0 %v10379_v7  ;;  %v10380_v7 = vld [vmem:[#allocation27_spill] sm:$0xff] }
 0x49c   : > { %v9570_v54 = vpack.c.bf16 %v3698_v37, %v3696_v11  ;;  %v5620_v10 = vmax.f32 %v5619_v3, %v4513_v17  ;;  %v4517_v51 = vadd.f32 %v4516_v55, %v9192_v41  ;;  %v4518_v46 = vpop.f32.mrb[215].mxu1 }
 0x49d   : > { %v5751_v38 = vmax.f32 %v5750_v61, %v4515_v50  ;;  %v4519_v52 = vadd.f32 %v4518_v46, %v9197_v35  ;;  %v3425_v26 = vpop.f32.mrb[108].mxu0  ;;  %v9574_v44 = vpack.c.bf16 %v3699_v5, %v3697_v53 }
 0x49e   : > { %v5621_v6 = vmax.f32 %v5620_v10, %v4517_v51  ;;  %v3426_v13 = vadd.f32 %v3425_v26, %v8662_v15  ;;  %v3427_v29 = vpop.f32.mrb[109].mxu0  ;;  %4781 = vmatmul.mubr.bf16.gmra.mrb[64].mxu1 %v9442_v4  ;;  %v10381_v26 = vld [vmem:[#allocation30_spill] sm:$0xff] }
 0x49f   : > { %v5752_v36 = vmax.f32 %v5751_v38, %v4519_v52  ;;  %v3428_v11 = vadd.f32 %v3427_v29, %v8666_v2  ;;  %v3429_v37 = vpop.f32.mrb[110].mxu0  ;;  %4790 = vmatprep.mubr.bf16.mxu1 %v9462_v16 }
 0x4a0   : > { %v3430_v3 = vadd.f32 %v3429_v37, %v8662_v15  ;;  %v3431_v61 = vpop.f32.mrb[111].mxu0  ;;  %v3700_v53 = vmax.f32 %v3426_v13, 0.0 }
 0x4a1   : > { %v3432_v46 = vadd.f32 %v3431_v61, %v8666_v2  ;;  %v4522_v17 = vpop.f32.mrb[216].mxu1  ;;  %v3701_v10 = vmax.f32 %v3428_v11, 0.0 }
 0x4a2   : > { %v3702_v5 = vmax.f32 %v3430_v3, 0.0  ;;  %v4523_v50 = vadd.f32 %v4522_v17, %v9192_v41  ;;  %v4524_v55 = vpop.f32.mrb[217].mxu1  ;;  %5174 = vmatmul.mubr.bf16.gmra.mrb[216].mxu0 %v10380_v7 }
 0x4a3   : > { %v3703_v51 = vmax.f32 %v3432_v46, 0.0  ;;  %v4525_v38 = vadd.f32 %v4524_v55, %v9197_v35  ;;  %v4526_v52 = vpop.f32.mrb[218].mxu1  ;;  %5183 = vmatprep.mubr.bf16.mxu0 %v10381_v26  ;;  %v10382_v26 = vld [vmem:[#allocation29_spill] sm:$0xff] }
 0x4a4   : > { %v9586_v29 = vpack.c.bf16 %v3702_v5, %v3700_v53  ;;  %v5622_v37 = vmax.f32 %v5621_v6, %v4523_v50  ;;  %v4527_v61 = vadd.f32 %v4526_v52, %v9192_v41  ;;  %v4528_v16 = vpop.f32.mrb[219].mxu1 }
 0x4a5   : > { %v5753_v13 = vmax.f32 %v5752_v36, %v4525_v38  ;;  %v4529_v3 = vadd.f32 %v4528_v16, %v9197_v35  ;;  %v3435_v17 = vpop.f32.mrb[112].mxu0  ;;  %v9590_v4 = vpack.c.bf16 %v3703_v51, %v3701_v10 }
 0x4a6   : > { %v5623_v7 = vmax.f32 %v5622_v37, %v4527_v61  ;;  %v3436_v11 = vadd.f32 %v3435_v17, %v8662_v15  ;;  %v3437_v46 = vpop.f32.mrb[113].mxu0  ;;  %4791 = vmatmul.mubr.bf16.gmra.mrb[68].mxu1 %v9458_v59  ;;  %v10383_v17 = vld [vmem:[#allocation32_spill] sm:$0xff] }
 0x4a7   : > { %v5754_v55 = vmax.f32 %v5753_v13, %v4529_v3  ;;  %v3438_v53 = vadd.f32 %v3437_v46, %v8666_v2  ;;  %v3439_v5 = vpop.f32.mrb[114].mxu0  ;;  %4800 = vmatprep.mubr.bf16.mxu1 %v9478_v49 }
 0x4a8   : > { %v3440_v6 = vadd.f32 %v3439_v5, %v8662_v15  ;;  %v3441_v36 = vpop.f32.mrb[115].mxu0  ;;  %v3704_v10 = vmax.f32 %v3436_v11, 0.0 }
 0x4a9   : > { %v3442_v16 = vadd.f32 %v3441_v36, %v8666_v2  ;;  %v4532_v50 = vpop.f32.mrb[220].mxu1  ;;  %v3705_v37 = vmax.f32 %v3438_v53, 0.0 }
 0x4aa   : > { %v3706_v51 = vmax.f32 %v3440_v6, 0.0  ;;  %v4533_v38 = vadd.f32 %v4532_v50, %v9192_v41  ;;  %v4534_v52 = vpop.f32.mrb[221].mxu1  ;;  %5184 = vmatmul.mubr.bf16.gmra.mrb[220].mxu0 %v10382_v26 }
 0x4ab   : > { %v3707_v61 = vmax.f32 %v3442_v16, 0.0  ;;  %v4535_v13 = vadd.f32 %v4534_v52, %v9197_v35  ;;  %v4536_v3 = vpop.f32.mrb[222].mxu1  ;;  %5193 = vmatprep.mubr.bf16.mxu0 %v10383_v17  ;;  %v10384_v17 = vld [vmem:[#allocation31_spill] sm:$0xff] }
 0x4ac   : > { %v9602_v46 = vpack.c.bf16 %v3706_v51, %v3704_v10  ;;  %v5624_v5 = vmax.f32 %v5623_v7, %v4533_v38  ;;  %v4537_v36 = vadd.f32 %v4536_v3, %v9192_v41  ;;  %v4538_v49 = vpop.f32.mrb[223].mxu1 }
 0x4ad   : > { %v5755_v11 = vmax.f32 %v5754_v55, %v4535_v13  ;;  %v4539_v6 = vadd.f32 %v4538_v49, %v9197_v35  ;;  %v3445_v50 = vpop.f32.mrb[116].mxu0  ;;  %v9606_v59 = vpack.c.bf16 %v3707_v61, %v3705_v37 }
 0x4ae   : > { %v5625_v26 = vmax.f32 %v5624_v5, %v4537_v36  ;;  %v3446_v53 = vadd.f32 %v3445_v50, %v8662_v15  ;;  %v3447_v16 = vpop.f32.mrb[117].mxu0  ;;  %4801 = vmatmul.mubr.bf16.gmra.mrb[72].mxu1 %v9474_v56 }
 0x4af   : > { %v5756_v52 = vmax.f32 %v5755_v11, %v4539_v6  ;;  %v3448_v10 = vadd.f32 %v3447_v16, %v8666_v2  ;;  %v3449_v51 = vpop.f32.mrb[118].mxu0  ;;  %4810 = vmatprep.mubr.bf16.mxu1 %v9494_v40 }
 0x4b0   : > { %v3450_v7 = vadd.f32 %v3449_v51, %v8662_v15  ;;  %v3451_v55 = vpop.f32.mrb[119].mxu0  ;;  %v3708_v37 = vmax.f32 %v3446_v53, 0.0 }
 0x4b1   : > { %v3452_v49 = vadd.f32 %v3451_v55, %v8666_v2  ;;  %v4542_v38 = vpop.f32.mrb[224].mxu1  ;;  %v3709_v5 = vmax.f32 %v3448_v10, 0.0 }
 0x4b2   : > { %v3710_v61 = vmax.f32 %v3450_v7, 0.0  ;;  %v4543_v13 = vadd.f32 %v4542_v38, %v9192_v41  ;;  %v4544_v3 = vpop.f32.mrb[225].mxu1  ;;  %5194 = vmatmul.mubr.bf16.gmra.mrb[224].mxu0 %v10384_v17 }
 0x4b3   : > { %v3711_v36 = vmax.f32 %v3452_v49, 0.0  ;;  %v4545_v11 = vadd.f32 %v4544_v3, %v9197_v35  ;;  %v4546_v6 = vpop.f32.mrb[226].mxu1  ;;  %5203 = vmatprep.mubr.bf16.mxu0 %v9076_v60 }
 0x4b4   : > { %v9618_v50 = vpack.c.bf16 %v3710_v61, %v3708_v37  ;;  %v5626_v16 = vmax.f32 %v5625_v26, %v4543_v13  ;;  %v4547_v51 = vadd.f32 %v4546_v6, %v9192_v41  ;;  %v4548_v55 = vpop.f32.mrb[227].mxu1  ;;  %v10385_v26 = vld [vmem:[#allocation5_spill] sm:$0xff] }
 0x4b5   : > { %v5757_v53 = vmax.f32 %v5756_v52, %v4545_v11  ;;  %v4549_v7 = vadd.f32 %v4548_v55, %v9197_v35  ;;  %v3455_v38 = vpop.f32.mrb[120].mxu0  ;;  %v9622_v40 = vpack.c.bf16 %v3711_v36, %v3709_v5  ;;  %v3918_v61 = vsub.s32 2, %v10385_v26 }
 0x4b6   : > { %v5627_v17 = vmax.f32 %v5626_v16, %v4547_v51  ;;  %v3456_v10 = vadd.f32 %v3455_v38, %v8662_v15  ;;  %v3457_v49 = vpop.f32.mrb[121].mxu0  ;;  %4811 = vmatmul.mubr.bf16.gmra.mrb[76].mxu1 %v9490_v45  ;;  %v3922_v5 = vsub.s32 3, %v10385_v26  ;;  %v10387_v45 = vld [vmem:[#allocation35_spill] sm:$0xff] }
 0x4b7   : > { %v5758_v3 = vmax.f32 %v5757_v53, %v4549_v7  ;;  %v3458_v60 = vadd.f32 %v3457_v49, %v8666_v2  ;;  %v3459_v37 = vpop.f32.mrb[122].mxu0  ;;  %4820 = vmatprep.mubr.bf16.mxu1 %v9510_v19  ;;  %v10386_v53 = vld [vmem:[#allocation33_spill] sm:$0xff] }
 0x4b8   : > { %v3460_v52 = vadd.f32 %v3459_v37, %v8662_v15  ;;  %v3461_v13 = vpop.f32.mrb[123].mxu0  ;;  %v3712_v6 = vmax.f32 %v3456_v10, 0.0  ;;  %v7407_v10 = vld [vmem:[%s10219_s8] sm:$0xf] }
 0x4b9   : > { %v3462_v36 = vadd.f32 %v3461_v13, %v8666_v2  ;;  %v4552_v11 = vpop.f32.mrb[228].mxu1  ;;  %v3713_v7 = vmax.f32 %v3458_v60, 0.0 }
 0x4ba   : > { %v3714_v16 = vmax.f32 %v3460_v52, 0.0  ;;  %v4553_v51 = vadd.f32 %v4552_v11, %v9192_v41  ;;  %v4554_v55 = vpop.f32.mrb[229].mxu1  ;;  %5204 = vmatmul.mubr.bf16.gmra.mrb[228].mxu0 %v10386_v53  ;;  %v9642_v52 = vrot.slane %v7407_v10, %v3918_v61  ;;  %v9647_v53 = vrot.slane %v7407_v10, %v3922_v5 }
 0x4bb   : > { %v3715_v38 = vmax.f32 %v3462_v36, 0.0  ;;  %v4555_v49 = vadd.f32 %v4554_v55, %v9197_v35  ;;  %v4556_v19 = vpop.f32.mrb[230].mxu1  ;;  %5213 = vmatprep.mubr.bf16.mxu0 %v10387_v45 }
 0x4bc   : > { %v9636_v15 = vpack.c.bf16 %v3714_v16, %v3712_v6  ;;  %v5628_v37 = vmax.f32 %v5627_v17, %v4553_v51  ;;  %v4557_v2 = vadd.f32 %v4556_v19, %v9192_v41  ;;  %v4558_v13 = vpop.f32.mrb[231].mxu1 }
 0x4bd   : > { %v9644_v11 = vpack.c.bf16 %v3715_v38, %v3713_v7  ;;  %v5759_v60 = vmax.f32 %v5758_v3, %v4555_v49  ;;  %v4559_v36 = vadd.f32 %v4558_v13, %v9197_v35  ;;  %v4945_v55 = vpop.f32.mrb[124].mxu0 }
 0x4be   : > { %v5629_v45 = vmax.f32 %v5628_v37, %v4557_v2  ;;  %4821 = vmatmul.mubr.bf16.gmra.mrb[80].mxu1 %v9506_v8  ;;  %v4947_v17 = vpop.f32.mrb[125].mxu0  ;;  %v4946_v16 = vadd.f32 %v4945_v55, %v9642_v52  ;;  %v10388_v2 = vld [vmem:[#allocation34_spill] sm:$0xff] }
 0x4bf   : > { %v5760_v19 = vmax.f32 %v5759_v60, %v4559_v36  ;;  %4830 = vmatprep.mubr.bf16.mxu1 %v9526_v47  ;;  %v4949_v6 = vpop.f32.mrb[126].mxu0  ;;  %v4948_v3 = vadd.f32 %v4947_v17, %v9647_v53  ;;  %v10389_v36 = vld [vmem:[#allocation36_spill] sm:$0xff] }
 0x4c0   : > { %v4950_v61 = vadd.f32 %v4949_v6, %v9642_v52  ;;  %v4951_v51 = vpop.f32.mrb[127].mxu0 }
 0x4c1   : > { %v4952_v7 = vadd.f32 %v4951_v51, %v9647_v53  ;;  %v4562_v38 = vpop.f32.mrb[232].mxu1 }
 0x4c2   : > { %v5837_v5 = vmax.f32 %v4946_v16, %v4950_v61  ;;  %v4563_v49 = vadd.f32 %v4562_v38, %v9192_v41  ;;  %v4564_v37 = vpop.f32.mrb[233].mxu1  ;;  %5214 = vmatmul.mubr.bf16.gmra.mrb[232].mxu0 %v10388_v2 }
 0x4c3   : > { %v5968_v13 = vmax.f32 %v4948_v3, %v4952_v7  ;;  %v4565_v10 = vadd.f32 %v4564_v37, %v9197_v35  ;;  %v4566_v60 = vpop.f32.mrb[234].mxu1  ;;  %5223 = vmatprep.mubr.bf16.mxu0 %v10389_v36 }
 0x4c4   : > { %v5630_v55 = vmax.f32 %v5629_v45, %v4563_v49  ;;  %v4567_v6 = vadd.f32 %v4566_v60, %v9192_v41  ;;  %v4568_v26 = vpop.f32.mrb[235].mxu1 }
 0x4c5   : > { %v5761_v17 = vmax.f32 %v5760_v19, %v4565_v10  ;;  %v4569_v51 = vadd.f32 %v4568_v26, %v9197_v35  ;;  %v4955_v47 = vpop.f32.mrb[128].mxu0 }
 0x4c6   : > { %v5631_v16 = vmax.f32 %v5630_v55, %v4567_v6  ;;  %v4956_v61 = vadd.f32 %v4955_v47, %v9642_v52  ;;  %4831 = vmatmul.mubr.bf16.gmra.mrb[84].mxu1 %v9522_v48  ;;  %v4957_v38 = vpop.f32.mrb[129].mxu0 }
 0x4c7   : > { %v5762_v3 = vmax.f32 %v5761_v17, %v4569_v51  ;;  %v4958_v7 = vadd.f32 %v4957_v38, %v9647_v53  ;;  %4840 = vmatprep.mubr.bf16.mxu1 %v9542_v42  ;;  %v4959_v37 = vpop.f32.mrb[130].mxu0 }
 0x4c8   : > { %v5838_v45 = vmax.f32 %v5837_v5, %v4956_v61  ;;  %v4960_v49 = vadd.f32 %v4959_v37, %v9642_v52  ;;  %v4961_v2 = vpop.f32.mrb[131].mxu0 }
 0x4c9   : > { %v5969_v19 = vmax.f32 %v5968_v13, %v4958_v7  ;;  %v4962_v26 = vadd.f32 %v4961_v2, %v9647_v53  ;;  %v4572_v10 = vpop.f32.mrb[236].mxu1 }
 0x4ca   : > { %v5839_v60 = vmax.f32 %v5838_v45, %v4960_v49  ;;  %v4573_v47 = vadd.f32 %v4572_v10, %v9192_v41  ;;  %v4574_v36 = vpop.f32.mrb[237].mxu1  ;;  %5224 = vmatmul.mubr.bf16.gmra.mrb[236].mxu0 %v9099_v22 }
 0x4cb   : > { %v5970_v55 = vmax.f32 %v5969_v19, %v4962_v26  ;;  %v4575_v6 = vadd.f32 %v4574_v36, %v9197_v35  ;;  %v4576_v17 = vpop.f32.mrb[238].mxu1  ;;  %5233 = vmatprep.mubr.bf16.mxu0 %v9115_v33 }
 0x4cc   : > { %v5632_v5 = vmax.f32 %v5631_v16, %v4573_v47  ;;  %v4577_v51 = vadd.f32 %v4576_v17, %v9192_v41  ;;  %v4578_v61 = vpop.f32.mrb[239].mxu1 }
 0x4cd   : > { %v5763_v13 = vmax.f32 %v5762_v3, %v4575_v6  ;;  %v4579_v38 = vadd.f32 %v4578_v61, %v9197_v35  ;;  %v4965_v7 = vpop.f32.mrb[132].mxu0 }
 0x4ce   : > { %v5633_v37 = vmax.f32 %v5632_v5, %v4577_v51  ;;  %v4966_v45 = vadd.f32 %v4965_v7, %v9642_v52  ;;  %4841 = vmatmul.mubr.bf16.gmra.mrb[88].mxu1 %v9538_v21  ;;  %v4967_v22 = vpop.f32.mrb[133].mxu0 }
 0x4cf   : > { %v5764_v49 = vmax.f32 %v5763_v13, %v4579_v38  ;;  %v4968_v2 = vadd.f32 %v4967_v22, %v9647_v53  ;;  %4850 = vmatprep.mubr.bf16.mxu1 %v9558_v32  ;;  %v4969_v33 = vpop.f32.mrb[134].mxu0 }
 0x4d0   : > { %v5840_v16 = vmax.f32 %v5839_v60, %v4966_v45  ;;  %v4970_v19 = vadd.f32 %v4969_v33, %v9642_v52  ;;  %v4971_v26 = vpop.f32.mrb[135].mxu0 }
 0x4d1   : > { %v5971_v3 = vmax.f32 %v5970_v55, %v4968_v2  ;;  %v4972_v10 = vadd.f32 %v4971_v26, %v9647_v53  ;;  %v4582_v47 = vpop.f32.mrb[240].mxu1 }
 0x4d2   : > { %v5841_v36 = vmax.f32 %v5840_v16, %v4970_v19  ;;  %v4583_v6 = vadd.f32 %v4582_v47, %v9192_v41  ;;  %v4584_v17 = vpop.f32.mrb[241].mxu1  ;;  %5234 = vmatmul.mubr.bf16.gmra.mrb[240].mxu0 %v9112_v28 }
 0x4d3   : > { %v5972_v5 = vmax.f32 %v5971_v3, %v4972_v10  ;;  %v4585_v51 = vadd.f32 %v4584_v17, %v9197_v35  ;;  %v4586_v61 = vpop.f32.mrb[242].mxu1  ;;  %5243 = vmatprep.mubr.bf16.mxu0 %v9128_v43 }
 0x4d4   : > { %v5634_v60 = vmax.f32 %v5633_v37, %v4583_v6  ;;  %v4587_v13 = vadd.f32 %v4586_v61, %v9192_v41  ;;  %v4588_v38 = vpop.f32.mrb[243].mxu1 }
 0x4d5   : > { %v5765_v55 = vmax.f32 %v5764_v49, %v4585_v51  ;;  %v4589_v7 = vadd.f32 %v4588_v38, %v9197_v35  ;;  %v4975_v45 = vpop.f32.mrb[136].mxu0 }
 0x4d6   : > { %v5635_v22 = vmax.f32 %v5634_v60, %v4587_v13  ;;  %v4976_v2 = vadd.f32 %v4975_v45, %v9642_v52  ;;  %4851 = vmatmul.mubr.bf16.gmra.mrb[92].mxu1 %v9554_v24  ;;  %v4977_v28 = vpop.f32.mrb[137].mxu0 }
 0x4d7   : > { %v5766_v33 = vmax.f32 %v5765_v55, %v4589_v7  ;;  %v4978_v16 = vadd.f32 %v4977_v28, %v9647_v53  ;;  %4860 = vmatprep.mubr.bf16.mxu1 %v9574_v44  ;;  %v4979_v43 = vpop.f32.mrb[138].mxu0 }
 0x4d8   : > { %v5842_v37 = vmax.f32 %v5841_v36, %v4976_v2  ;;  %v4980_v19 = vadd.f32 %v4979_v43, %v9642_v52  ;;  %v4981_v26 = vpop.f32.mrb[139].mxu0 }
 0x4d9   : > { %v5973_v49 = vmax.f32 %v5972_v5, %v4978_v16  ;;  %v4982_v3 = vadd.f32 %v4981_v26, %v9647_v53  ;;  %v4592_v10 = vpop.f32.mrb[244].mxu1 }
 0x4da   : > { %v5843_v47 = vmax.f32 %v5842_v37, %v4980_v19  ;;  %v4593_v6 = vadd.f32 %v4592_v10, %v9192_v41  ;;  %v4594_v17 = vpop.f32.mrb[245].mxu1  ;;  %5244 = vmatmul.mubr.bf16.gmra.mrb[244].mxu0 %v9125_v27 }
 0x4db   : > { %v5974_v51 = vmax.f32 %v5973_v49, %v4982_v3  ;;  %v4595_v61 = vadd.f32 %v4594_v17, %v9197_v35  ;;  %v4596_v60 = vpop.f32.mrb[246].mxu1  ;;  %5253 = vmatprep.mubr.bf16.mxu0 %v9141_v31 }
 0x4dc   : > { %v5636_v36 = vmax.f32 %v5635_v22, %v4593_v6  ;;  %v4597_v13 = vadd.f32 %v4596_v60, %v9192_v41  ;;  %v4598_v38 = vpop.f32.mrb[247].mxu1 }
 0x4dd   : > { %v5767_v5 = vmax.f32 %v5766_v33, %v4595_v61  ;;  %v4599_v55 = vadd.f32 %v4598_v38, %v9197_v35  ;;  %v4985_v7 = vpop.f32.mrb[140].mxu0 }
 0x4de   : > { %v5637_v45 = vmax.f32 %v5636_v36, %v4597_v13  ;;  %v4986_v2 = vadd.f32 %v4985_v7, %v9642_v52  ;;  %4861 = vmatmul.mubr.bf16.gmra.mrb[96].mxu1 %v9570_v54  ;;  %v4987_v27 = vpop.f32.mrb[141].mxu0 }
 0x4df   : > { %v5768_v28 = vmax.f32 %v5767_v5, %v4599_v55  ;;  %v4988_v16 = vadd.f32 %v4987_v27, %v9647_v53  ;;  %4870 = vmatprep.mubr.bf16.mxu1 %v9590_v4  ;;  %v4989_v31 = vpop.f32.mrb[142].mxu0 }
 0x4e0   : > { %v5844_v22 = vmax.f32 %v5843_v47, %v4986_v2  ;;  %v4990_v43 = vadd.f32 %v4989_v31, %v9642_v52  ;;  %v4991_v37 = vpop.f32.mrb[143].mxu0 }
 0x4e1   : > { %v5975_v33 = vmax.f32 %v5974_v51, %v4988_v16  ;;  %v4992_v19 = vadd.f32 %v4991_v37, %v9647_v53  ;;  %v4602_v26 = vpop.f32.mrb[248].mxu1 }
 0x4e2   : > { %v5845_v49 = vmax.f32 %v5844_v22, %v4990_v43  ;;  %v4603_v3 = vadd.f32 %v4602_v26, %v9192_v41  ;;  %v4604_v10 = vpop.f32.mrb[249].mxu1  ;;  %5254 = vmatmul.mubr.bf16.gmra.mrb[248].mxu0 %v9138_v23 }
 0x4e3   : > { %v5976_v6 = vmax.f32 %v5975_v33, %v4992_v19  ;;  %v4605_v17 = vadd.f32 %v4604_v10, %v9197_v35  ;;  %v4606_v61 = vpop.f32.mrb[250].mxu1  ;;  %5263 = vmatprep.mubr.bf16.mxu0 %v9154_v39 }
 0x4e4   : > { %v5638_v47 = vmax.f32 %v5637_v45, %v4603_v3  ;;  %v4607_v60 = vadd.f32 %v4606_v61, %v9192_v41  ;;  %v4608_v36 = vpop.f32.mrb[251].mxu1 }
 0x4e5   : > { %v5769_v51 = vmax.f32 %v5768_v28, %v4605_v17  ;;  %v4609_v13 = vadd.f32 %v4608_v36, %v9197_v35  ;;  %v4995_v38 = vpop.f32.mrb[144].mxu0 }
 0x4e6   : > { %v5639_v5 = vmax.f32 %v5638_v47, %v4607_v60  ;;  %v4996_v55 = vadd.f32 %v4995_v38, %v9642_v52  ;;  %4871 = vmatmul.mubr.bf16.gmra.mrb[100].mxu1 %v9586_v29  ;;  %v4997_v23 = vpop.f32.mrb[145].mxu0 }
 0x4e7   : > { %v5770_v7 = vmax.f32 %v5769_v51, %v4609_v13  ;;  %v4998_v2 = vadd.f32 %v4997_v23, %v9647_v53  ;;  %4880 = vmatprep.mubr.bf16.mxu1 %v9606_v59  ;;  %v4999_v39 = vpop.f32.mrb[146].mxu0 }
 0x4e8   : > { %v5846_v45 = vmax.f32 %v5845_v49, %v4996_v55  ;;  %v5000_v27 = vadd.f32 %v4999_v39, %v9642_v52  ;;  %v5001_v16 = vpop.f32.mrb[147].mxu0 }
 0x4e9   : > { %v5977_v28 = vmax.f32 %v5976_v6, %v4998_v2  ;;  %v5002_v31 = vadd.f32 %v5001_v16, %v9647_v53  ;;  %v4612_v22 = vpop.f32.mrb[252].mxu1 }
 0x4ea   : > { %v5847_v43 = vmax.f32 %v5846_v45, %v5000_v27  ;;  %v4613_v37 = vadd.f32 %v4612_v22, %v9192_v41  ;;  %v4614_v33 = vpop.f32.mrb[253].mxu1  ;;  %5264 = vmatmul.mubr.bf16.gmra.mrb[252].mxu0 %v9151_v12 }
 0x4eb   : > { %v5978_v19 = vmax.f32 %v5977_v28, %v5002_v31  ;;  %v4615_v26 = vadd.f32 %v4614_v33, %v9197_v35  ;;  %v4616_v3 = vpop.f32.mrb[254].mxu1  ;;  %5273 = vmatprep.mubr.bf16.mxu0 %v9167_v0 }
 0x4ec   : > { %v5640_v49 = vmax.f32 %v5639_v5, %v4613_v37  ;;  %v4617_v10 = vadd.f32 %v4616_v3, %v9192_v41  ;;  %v4618_v17 = vpop.f32.mrb[255].mxu1 }
 0x4ed   : > { %v5771_v6 = vmax.f32 %v5770_v7, %v4615_v26  ;;  %v4619_v61 = vadd.f32 %v4618_v17, %v9197_v35  ;;  %v5005_v47 = vpop.f32.mrb[148].mxu0 }
 0x4ee   : > { %v5641_v60 = vmax.f32 %v5640_v49, %v4617_v10  ;;  %v5006_v36 = vadd.f32 %v5005_v47, %v9642_v52  ;;  %4881 = vmatmul.mubr.bf16.gmra.mrb[104].mxu1 %v9602_v46  ;;  %v5007_v12 = vpop.f32.mrb[149].mxu0 }
 0x4ef   : > { %v5772_v51 = vmax.f32 %v5771_v6, %v4619_v61  ;;  %v5008_v13 = vadd.f32 %v5007_v12, %v9647_v53  ;;  %4890 = vmatprep.mubr.bf16.mxu1 %v9622_v40  ;;  %v5009_v0 = vpop.f32.mrb[150].mxu0 }
 0x4f0   : > { %v5848_v38 = vmax.f32 %v5847_v43, %v5006_v36  ;;  %v5010_v5 = vadd.f32 %v5009_v0, %v9642_v52  ;;  %v5011_v55 = vpop.f32.mrb[151].mxu0 }
 0x4f1   : > { %v5979_v23 = vmax.f32 %v5978_v19, %v5008_v13  ;;  %v5012_v7 = vadd.f32 %v5011_v55, %v9647_v53  ;;  %v4622_v2 = vpop.f32.mrb[0].mxu1 }
 0x4f2   : > { %v5849_v39 = vmax.f32 %v5848_v38, %v5010_v5  ;;  %v4623_v45 = vadd.f32 %v4622_v2, %v9192_v41  ;;  %v4624_v27 = vpop.f32.mrb[1].mxu1  ;;  %5274 = vmatmul.mubr.bf16.gmra.mrb[0].mxu0 %v9164_v62 }
 0x4f3   : > { %v5980_v16 = vmax.f32 %v5979_v23, %v5012_v7  ;;  %v4625_v28 = vadd.f32 %v4624_v27, %v9197_v35  ;;  %v4626_v31 = vpop.f32.mrb[2].mxu1  ;;  %5283 = vmatprep.mubr.bf16.mxu0 %v9183_v58 }
 0x4f4   : > { %v5642_v22 = vmax.f32 %v5641_v60, %v4623_v45  ;;  %v4627_v43 = vadd.f32 %v4626_v31, %v9192_v41  ;;  %v4628_v37 = vpop.f32.mrb[3].mxu1 }
 0x4f5   : > { %v5773_v33 = vmax.f32 %v5772_v51, %v4625_v28  ;;  %v4629_v19 = vadd.f32 %v4628_v37, %v9197_v35  ;;  %v5015_v26 = vpop.f32.mrb[152].mxu0 }
 0x4f6   : > { %v5643_v3 = vmax.f32 %v5642_v22, %v4627_v43  ;;  %v5016_v49 = vadd.f32 %v5015_v26, %v9642_v52  ;;  %4891 = vmatmul.mubr.bf16.gmra.mrb[108].mxu1 %v9618_v50  ;;  %v5017_v62 = vpop.f32.mrb[153].mxu0 }
 0x4f7   : > { %v5774_v10 = vmax.f32 %v5773_v33, %v4629_v19  ;;  %v5018_v17 = vadd.f32 %v5017_v62, %v9647_v53  ;;  %4900 = vmatprep.mubr.bf16.mxu1 %v9644_v11  ;;  %v5019_v58 = vpop.f32.mrb[154].mxu0 }
 0x4f8   : > { %v5850_v6 = vmax.f32 %v5849_v39, %v5016_v49  ;;  %v5020_v61 = vadd.f32 %v5019_v58, %v9642_v52  ;;  %v5021_v47 = vpop.f32.mrb[155].mxu0 }
 0x4f9   : > { %v5981_v60 = vmax.f32 %v5980_v16, %v5018_v17  ;;  %v5022_v36 = vadd.f32 %v5021_v47, %v9647_v53  ;;  %v4632_v12 = vpop.f32.mrb[4].mxu1 }
 0x4fa   : > { %v5851_v51 = vmax.f32 %v5850_v6, %v5020_v61  ;;  %v4633_v13 = vadd.f32 %v4632_v12, %v9192_v41  ;;  %v4634_v0 = vpop.f32.mrb[5].mxu1  ;;  %5284 = vmatmul.mubr.bf16.gmra.mrb[4].mxu0 %v9177_v9 }
 0x4fb   : > { %v5982_v38 = vmax.f32 %v5981_v60, %v5022_v36  ;;  %v4635_v5 = vadd.f32 %v4634_v0, %v9197_v35  ;;  %v4636_v55 = vpop.f32.mrb[6].mxu1  ;;  %5293 = vmatprep.mubr.bf16.mxu0 %v9206_v34 }
 0x4fc   : > { %v5644_v23 = vmax.f32 %v5643_v3, %v4633_v13  ;;  %v4637_v7 = vadd.f32 %v4636_v55, %v9192_v41  ;;  %v4638_v2 = vpop.f32.mrb[7].mxu1 }
 0x4fd   : > { %v5775_v39 = vmax.f32 %v5774_v10, %v4635_v5  ;;  %v4639_v45 = vadd.f32 %v4638_v2, %v9197_v35  ;;  %v5025_v27 = vpop.f32.mrb[156].mxu0 }
 0x4fe   : > { %v5645_v16 = vmax.f32 %v5644_v23, %v4637_v7  ;;  %v5026_v28 = vadd.f32 %v5025_v27, %v9642_v52  ;;  %4901 = vmatmul.mubr.bf16.gmra.mrb[112].mxu1 %v9636_v15  ;;  %v5027_v9 = vpop.f32.mrb[157].mxu0 }
 0x4ff   : > { %v5776_v31 = vmax.f32 %v5775_v39, %v4639_v45  ;;  %v5028_v22 = vadd.f32 %v5027_v9, %v9647_v53  ;;  %v5029_v43 = vpop.f32.mrb[158].mxu0 }
 0x500   : > { %v5852_v37 = vmax.f32 %v5851_v51, %v5026_v28  ;;  %v5030_v34 = vadd.f32 %v5029_v43, %v9642_v52  ;;  %v5031_v33 = vpop.f32.mrb[159].mxu0 }
 0x501   : > { %v5983_v19 = vmax.f32 %v5982_v38, %v5028_v22  ;;  %v5032_v26 = vadd.f32 %v5031_v33, %v9647_v53  ;;  %v4642_v3 = vpop.f32.mrb[8].mxu1 }
 0x502   : > { %v5853_v49 = vmax.f32 %v5852_v37, %v5030_v34  ;;  %v4643_v62 = vadd.f32 %v4642_v3, %v9192_v41  ;;  %v4644_v10 = vpop.f32.mrb[9].mxu1  ;;  %5294 = vmatmul.mubr.bf16.gmra.mrb[8].mxu0 %v9200_v63 }
 0x503   : > { %v5984_v17 = vmax.f32 %v5983_v19, %v5032_v26  ;;  %v4645_v58 = vadd.f32 %v4644_v10, %v9197_v35  ;;  %v4646_v6 = vpop.f32.mrb[10].mxu1  ;;  %5303 = vmatprep.mubr.bf16.mxu0 %v9222_v25 }
 0x504   : > { %v5646_v61 = vmax.f32 %v5645_v16, %v4643_v62  ;;  %v4647_v47 = vadd.f32 %v4646_v6, %v9192_v41  ;;  %v4648_v60 = vpop.f32.mrb[11].mxu1 }
 0x505   : > { %v5777_v36 = vmax.f32 %v5776_v31, %v4645_v58  ;;  %v4649_v12 = vadd.f32 %v4648_v60, %v9197_v35  ;;  %v5035_v51 = vpop.f32.mrb[160].mxu0 }
 0x506   : > { %v5647_v13 = vmax.f32 %v5646_v61, %v4647_v47  ;;  %v5036_v0 = vadd.f32 %v5035_v51, %v9642_v52  ;;  %v5037_v38 = vpop.f32.mrb[161].mxu0 }
 0x507   : > { %v5778_v5 = vmax.f32 %v5777_v36, %v4649_v12  ;;  %v5038_v63 = vadd.f32 %v5037_v38, %v9647_v53  ;;  %v5039_v55 = vpop.f32.mrb[162].mxu0 }
 0x508   : > { %v5854_v23 = vmax.f32 %v5853_v49, %v5036_v0  ;;  %v5040_v7 = vadd.f32 %v5039_v55, %v9642_v52  ;;  %v5041_v25 = vpop.f32.mrb[163].mxu0 }
 0x509   : > { %v5985_v2 = vmax.f32 %v5984_v17, %v5038_v63  ;;  %v5042_v39 = vadd.f32 %v5041_v25, %v9647_v53  ;;  %v4652_v45 = vpop.f32.mrb[12].mxu1 }
 0x50a   : > { %v5855_v27 = vmax.f32 %v5854_v23, %v5040_v7  ;;  %v4653_v16 = vadd.f32 %v4652_v45, %v9192_v41  ;;  %v4654_v28 = vpop.f32.mrb[13].mxu1  ;;  %5304 = vmatmul.mubr.bf16.gmra.mrb[12].mxu0 %v9218_v57 }
 0x50b   : > { %v5986_v9 = vmax.f32 %v5985_v2, %v5042_v39  ;;  %v4655_v31 = vadd.f32 %v4654_v28, %v9197_v35  ;;  %v4656_v22 = vpop.f32.mrb[14].mxu1  ;;  %5313 = vmatprep.mubr.bf16.mxu0 %v9238_v1 }
 0x50c   : > { %v5648_v43 = vmax.f32 %v5647_v13, %v4653_v16  ;;  %v4657_v37 = vadd.f32 %v4656_v22, %v9192_v41  ;;  %v4658_v34 = vpop.f32.mrb[15].mxu1 }
 0x50d   : > { %v5779_v33 = vmax.f32 %v5778_v5, %v4655_v31  ;;  %v4659_v19 = vadd.f32 %v4658_v34, %v9197_v35  ;;  %v5045_v26 = vpop.f32.mrb[164].mxu0 }
 0x50e   : > { %v5649_v3 = vmax.f32 %v5648_v43, %v4657_v37  ;;  %v5046_v49 = vadd.f32 %v5045_v26, %v9642_v52  ;;  %v5047_v62 = vpop.f32.mrb[165].mxu0 }
 0x50f   : > { %v5780_v10 = vmax.f32 %v5779_v33, %v4659_v19  ;;  %v5048_v57 = vadd.f32 %v5047_v62, %v9647_v53  ;;  %v5049_v17 = vpop.f32.mrb[166].mxu0 }
 0x510   : > { %v5856_v58 = vmax.f32 %v5855_v27, %v5046_v49  ;;  %v5050_v6 = vadd.f32 %v5049_v17, %v9642_v52  ;;  %v5051_v1 = vpop.f32.mrb[167].mxu0 }
 0x511   : > { %v5987_v61 = vmax.f32 %v5986_v9, %v5048_v57  ;;  %v5052_v47 = vadd.f32 %v5051_v1, %v9647_v53  ;;  %v4662_v60 = vpop.f32.mrb[16].mxu1 }
 0x512   : > { %v5857_v36 = vmax.f32 %v5856_v58, %v5050_v6  ;;  %v4663_v12 = vadd.f32 %v4662_v60, %v9192_v41  ;;  %v4664_v51 = vpop.f32.mrb[17].mxu1  ;;  %5314 = vmatmul.mubr.bf16.gmra.mrb[16].mxu0 %v9234_v18 }
 0x513   : > { %v5988_v13 = vmax.f32 %v5987_v61, %v5052_v47  ;;  %v4665_v0 = vadd.f32 %v4664_v51, %v9197_v35  ;;  %v4666_v38 = vpop.f32.mrb[18].mxu1  ;;  %5323 = vmatprep.mubr.bf16.mxu0 %v9254_v14 }
 0x514   : > { %v5650_v5 = vmax.f32 %v5649_v3, %v4663_v12  ;;  %v4667_v63 = vadd.f32 %v4666_v38, %v9192_v41  ;;  %v4668_v55 = vpop.f32.mrb[19].mxu1 }
 0x515   : > { %v5781_v23 = vmax.f32 %v5780_v10, %v4665_v0  ;;  %v4669_v7 = vadd.f32 %v4668_v55, %v9197_v35  ;;  %v5055_v25 = vpop.f32.mrb[168].mxu0  ;;  %v10390_v55 = vld [vmem:[#allocation37_spill] sm:$0xff] }
 0x516   : > { %v5651_v2 = vmax.f32 %v5650_v5, %v4667_v63  ;;  %v5056_v39 = vadd.f32 %v5055_v25, %v9642_v52  ;;  %v5057_v45 = vpop.f32.mrb[169].mxu0 }
 0x517   : > { %v5782_v27 = vmax.f32 %v5781_v23, %v4669_v7  ;;  %v5058_v18 = vadd.f32 %v5057_v45, %v9647_v53  ;;  %v5059_v16 = vpop.f32.mrb[170].mxu0 }
 0x518   : > { %v5858_v28 = vmax.f32 %v5857_v36, %v5056_v39  ;;  %v5060_v9 = vadd.f32 %v5059_v16, %v9642_v52  ;;  %v5061_v14 = vpop.f32.mrb[171].mxu0 }
 0x519   : > { %v5989_v31 = vmax.f32 %v5988_v13, %v5058_v18  ;;  %v5062_v22 = vadd.f32 %v5061_v14, %v9647_v53  ;;  %v4672_v43 = vpop.f32.mrb[20].mxu1 }
 0x51a   : > { %v5859_v37 = vmax.f32 %v5858_v28, %v5060_v9  ;;  %v4673_v34 = vadd.f32 %v4672_v43, %v9192_v41  ;;  %v4674_v33 = vpop.f32.mrb[21].mxu1  ;;  %5324 = vmatmul.mubr.bf16.gmra.mrb[20].mxu0 %v9250_v20 }
 0x51b   : > { %v5990_v19 = vmax.f32 %v5989_v31, %v5062_v22  ;;  %v4675_v26 = vadd.f32 %v4674_v33, %v9197_v35  ;;  %v4676_v3 = vpop.f32.mrb[22].mxu1  ;;  %5333 = vmatprep.mubr.bf16.mxu0 %v9270_v30 }
 0x51c   : > { %v5652_v49 = vmax.f32 %v5651_v2, %v4673_v34  ;;  %v4677_v62 = vadd.f32 %v4676_v3, %v9192_v41  ;;  %v4678_v10 = vpop.f32.mrb[23].mxu1  ;;  %v10391_v2 = vld [vmem:[#allocation39_spill] sm:$0xff] }
 0x51d   : > { %v5783_v57 = vmax.f32 %v5782_v27, %v4675_v26  ;;  %v4679_v17 = vadd.f32 %v4678_v10, %v9197_v35  ;;  %v5065_v58 = vpop.f32.mrb[172].mxu0 }
 0x51e   : > { %v5653_v6 = vmax.f32 %v5652_v49, %v4677_v62  ;;  %v5066_v1 = vadd.f32 %v5065_v58, %v9642_v52  ;;  %v5067_v61 = vpop.f32.mrb[173].mxu0 }
 0x51f   : > { %v5784_v47 = vmax.f32 %v5783_v57, %v4679_v17  ;;  %v5068_v20 = vadd.f32 %v5067_v61, %v9647_v53  ;;  %v5069_v60 = vpop.f32.mrb[174].mxu0  ;;  %v10392_v17 = vld [vmem:[#allocation38_spill] sm:$0xff]  ;;  %v10393_v61 = vld [vmem:[#allocation41_spill] sm:$0xff] }
 0x520   : > { %v5860_v36 = vmax.f32 %v5859_v37, %v5066_v1  ;;  %v5070_v12 = vadd.f32 %v5069_v60, %v9642_v52  ;;  %v5071_v30 = vpop.f32.mrb[175].mxu0 }
 0x521   : > { %v5991_v51 = vmax.f32 %v5990_v19, %v5068_v20  ;;  %v5072_v13 = vadd.f32 %v5071_v30, %v9647_v53  ;;  %v4682_v0 = vpop.f32.mrb[24].mxu1 }
 0x522   : > { %v5861_v38 = vmax.f32 %v5860_v36, %v5070_v12  ;;  %v4683_v5 = vadd.f32 %v4682_v0, %v9192_v41  ;;  %v4684_v63 = vpop.f32.mrb[25].mxu1  ;;  %5334 = vmatmul.mubr.bf16.gmra.mrb[24].mxu0 %v10390_v55 }
 0x523   : > { %v5992_v23 = vmax.f32 %v5991_v51, %v5072_v13  ;;  %v4685_v7 = vadd.f32 %v4684_v63, %v9197_v35  ;;  %v4686_v25 = vpop.f32.mrb[26].mxu1  ;;  %5343 = vmatprep.mubr.bf16.mxu0 %v10391_v2 }
 0x524   : > { %v5654_v39 = vmax.f32 %v5653_v6, %v4683_v5  ;;  %v4687_v45 = vadd.f32 %v4686_v25, %v9192_v41  ;;  %v4688_v27 = vpop.f32.mrb[27].mxu1 }
 0x525   : > { %v5785_v18 = vmax.f32 %v5784_v47, %v4685_v7  ;;  %v4689_v16 = vadd.f32 %v4688_v27, %v9197_v35  ;;  %v5075_v28 = vpop.f32.mrb[176].mxu0 }
 0x526   : > { %v5655_v9 = vmax.f32 %v5654_v39, %v4687_v45  ;;  %v5076_v14 = vadd.f32 %v5075_v28, %v9642_v52  ;;  %v5077_v31 = vpop.f32.mrb[177].mxu0 }
 0x527   : > { %v5786_v22 = vmax.f32 %v5785_v18, %v4689_v16  ;;  %v5078_v43 = vadd.f32 %v5077_v31, %v9647_v53  ;;  %v5079_v37 = vpop.f32.mrb[178].mxu0  ;;  %v10394_v16 = vld [vmem:[#allocation40_spill] sm:$0xff]  ;;  %v10395_v31 = vld [vmem:[#allocation43_spill] sm:$0xff] }
 0x528   : > { %v5862_v34 = vmax.f32 %v5861_v38, %v5076_v14  ;;  %v5080_v33 = vadd.f32 %v5079_v37, %v9642_v52  ;;  %v5081_v19 = vpop.f32.mrb[179].mxu0 }
 0x529   : > { %v5993_v26 = vmax.f32 %v5992_v23, %v5078_v43  ;;  %v5082_v3 = vadd.f32 %v5081_v19, %v9647_v53  ;;  %v4692_v49 = vpop.f32.mrb[28].mxu1 }
 0x52a   : > { %v5863_v62 = vmax.f32 %v5862_v34, %v5080_v33  ;;  %v4693_v10 = vadd.f32 %v4692_v49, %v9192_v41  ;;  %v4694_v57 = vpop.f32.mrb[29].mxu1  ;;  %5344 = vmatmul.mubr.bf16.gmra.mrb[28].mxu0 %v10392_v17 }
 0x52b   : > { %v5994_v58 = vmax.f32 %v5993_v26, %v5082_v3  ;;  %v4695_v6 = vadd.f32 %v4694_v57, %v9197_v35  ;;  %v4696_v1 = vpop.f32.mrb[30].mxu1  ;;  %5353 = vmatprep.mubr.bf16.mxu0 %v10393_v61 }
 0x52c   : > { %v5656_v47 = vmax.f32 %v5655_v9, %v4693_v10  ;;  %v4697_v20 = vadd.f32 %v4696_v1, %v9192_v41  ;;  %v4698_v60 = vpop.f32.mrb[31].mxu1 }
 0x52d   : > { %v5787_v36 = vmax.f32 %v5786_v22, %v4695_v6  ;;  %v4699_v12 = vadd.f32 %v4698_v60, %v9197_v35  ;;  %v5085_v30 = vpop.f32.mrb[180].mxu0 }
 0x52e   : > { %v5657_v51 = vmax.f32 %v5656_v47, %v4697_v20  ;;  %v5086_v13 = vadd.f32 %v5085_v30, %v9642_v52  ;;  %v5087_v0 = vpop.f32.mrb[181].mxu0 }
 0x52f   : > { %v5788_v38 = vmax.f32 %v5787_v36, %v4699_v12  ;;  %v5088_v5 = vadd.f32 %v5087_v0, %v9647_v53  ;;  %v5089_v63 = vpop.f32.mrb[182].mxu0  ;;  %v10396_v12 = vld [vmem:[#allocation42_spill] sm:$0xff]  ;;  %v10397_v0 = vld [vmem:[#allocation45_spill] sm:$0xff] }
 0x530   : > { %v5864_v55 = vmax.f32 %v5863_v62, %v5086_v13  ;;  %v5090_v23 = vadd.f32 %v5089_v63, %v9642_v52  ;;  %v5091_v7 = vpop.f32.mrb[183].mxu0 }
 0x531   : > { %v5995_v25 = vmax.f32 %v5994_v58, %v5088_v5  ;;  %v5092_v2 = vadd.f32 %v5091_v7, %v9647_v53  ;;  %v4702_v39 = vpop.f32.mrb[32].mxu1 }
 0x532   : > { %v5865_v45 = vmax.f32 %v5864_v55, %v5090_v23  ;;  %v4703_v27 = vadd.f32 %v4702_v39, %v9192_v41  ;;  %v4704_v18 = vpop.f32.mrb[33].mxu1  ;;  %5354 = vmatmul.mubr.bf16.gmra.mrb[32].mxu0 %v10394_v16 }
 0x533   : > { %v5996_v28 = vmax.f32 %v5995_v25, %v5092_v2  ;;  %v4705_v9 = vadd.f32 %v4704_v18, %v9197_v35  ;;  %v4706_v14 = vpop.f32.mrb[34].mxu1  ;;  %5363 = vmatprep.mubr.bf16.mxu0 %v10395_v31 }
 0x534   : > { %v5658_v22 = vmax.f32 %v5657_v51, %v4703_v27  ;;  %v4707_v43 = vadd.f32 %v4706_v14, %v9192_v41  ;;  %v4708_v37 = vpop.f32.mrb[35].mxu1 }
 0x535   : > { %v5789_v34 = vmax.f32 %v5788_v38, %v4705_v9  ;;  %v4709_v33 = vadd.f32 %v4708_v37, %v9197_v35  ;;  %v5095_v19 = vpop.f32.mrb[184].mxu0 }
 0x536   : > { %v5659_v26 = vmax.f32 %v5658_v22, %v4707_v43  ;;  %v5096_v3 = vadd.f32 %v5095_v19, %v9642_v52  ;;  %v5097_v49 = vpop.f32.mrb[185].mxu0 }
 0x537   : > { %v5790_v62 = vmax.f32 %v5789_v34, %v4709_v33  ;;  %v5098_v10 = vadd.f32 %v5097_v49, %v9647_v53  ;;  %v5099_v57 = vpop.f32.mrb[186].mxu0  ;;  %v10398_v33 = vld [vmem:[#allocation44_spill] sm:$0xff]  ;;  %v10399_v49 = vld [vmem:[#allocation47_spill] sm:$0xff] }
 0x538   : > { %v5866_v17 = vmax.f32 %v5865_v45, %v5096_v3  ;;  %v5100_v58 = vadd.f32 %v5099_v57, %v9642_v52  ;;  %v5101_v6 = vpop.f32.mrb[187].mxu0 }
 0x539   : > { %v5997_v1 = vmax.f32 %v5996_v28, %v5098_v10  ;;  %v5102_v61 = vadd.f32 %v5101_v6, %v9647_v53  ;;  %v4712_v47 = vpop.f32.mrb[36].mxu1 }
 0x53a   : > { %v5867_v20 = vmax.f32 %v5866_v17, %v5100_v58  ;;  %v4713_v60 = vadd.f32 %v4712_v47, %v9192_v41  ;;  %v4714_v36 = vpop.f32.mrb[37].mxu1  ;;  %5364 = vmatmul.mubr.bf16.gmra.mrb[36].mxu0 %v10396_v12 }
 0x53b   : > { %v5998_v30 = vmax.f32 %v5997_v1, %v5102_v61  ;;  %v4715_v51 = vadd.f32 %v4714_v36, %v9197_v35  ;;  %v4716_v13 = vpop.f32.mrb[38].mxu1  ;;  %5373 = vmatprep.mubr.bf16.mxu0 %v10397_v0 }
 0x53c   : > { %v5660_v38 = vmax.f32 %v5659_v26, %v4713_v60  ;;  %v4717_v5 = vadd.f32 %v4716_v13, %v9192_v41  ;;  %v4718_v63 = vpop.f32.mrb[39].mxu1 }
 0x53d   : > { %v5791_v55 = vmax.f32 %v5790_v62, %v4715_v51  ;;  %v4719_v23 = vadd.f32 %v4718_v63, %v9197_v35  ;;  %v5105_v7 = vpop.f32.mrb[188].mxu0 }
 0x53e   : > { %v5661_v25 = vmax.f32 %v5660_v38, %v4717_v5  ;;  %v5106_v2 = vadd.f32 %v5105_v7, %v9642_v52  ;;  %v5107_v39 = vpop.f32.mrb[189].mxu0 }
 0x53f   : > { %v5792_v45 = vmax.f32 %v5791_v55, %v4719_v23  ;;  %v5108_v27 = vadd.f32 %v5107_v39, %v9647_v53  ;;  %v5109_v18 = vpop.f32.mrb[190].mxu0  ;;  %v10400_v23 = vld [vmem:[#allocation46_spill] sm:$0xff]  ;;  %v10401_v39 = vld [vmem:[#allocation49_spill] sm:$0xff] }
 0x540   : > { %v5868_v16 = vmax.f32 %v5867_v20, %v5106_v2  ;;  %v5110_v28 = vadd.f32 %v5109_v18, %v9642_v52  ;;  %v5111_v9 = vpop.f32.mrb[191].mxu0 }
 0x541   : > { %v5999_v14 = vmax.f32 %v5998_v30, %v5108_v27  ;;  %v5112_v31 = vadd.f32 %v5111_v9, %v9647_v53  ;;  %v4722_v22 = vpop.f32.mrb[40].mxu1 }
 0x542   : > { %v5869_v43 = vmax.f32 %v5868_v16, %v5110_v28  ;;  %v4723_v37 = vadd.f32 %v4722_v22, %v9192_v41  ;;  %v4724_v34 = vpop.f32.mrb[41].mxu1  ;;  %5374 = vmatmul.mubr.bf16.gmra.mrb[40].mxu0 %v10398_v33 }
 0x543   : > { %v6000_v19 = vmax.f32 %v5999_v14, %v5112_v31  ;;  %v4725_v26 = vadd.f32 %v4724_v34, %v9197_v35  ;;  %v4726_v3 = vpop.f32.mrb[42].mxu1  ;;  %5383 = vmatprep.mubr.bf16.mxu0 %v10399_v49 }
 0x544   : > { %v5662_v62 = vmax.f32 %v5661_v25, %v4723_v37  ;;  %v4727_v10 = vadd.f32 %v4726_v3, %v9192_v41  ;;  %v4728_v57 = vpop.f32.mrb[43].mxu1 }
 0x545   : > { %v5793_v17 = vmax.f32 %v5792_v45, %v4725_v26  ;;  %v4729_v58 = vadd.f32 %v4728_v57, %v9197_v35  ;;  %v5115_v6 = vpop.f32.mrb[192].mxu0 }
 0x546   : > { %v5663_v1 = vmax.f32 %v5662_v62, %v4727_v10  ;;  %v5116_v61 = vadd.f32 %v5115_v6, %v9642_v52  ;;  %v5117_v47 = vpop.f32.mrb[193].mxu0 }
 0x547   : > { %v5794_v20 = vmax.f32 %v5793_v17, %v4729_v58  ;;  %v5118_v60 = vadd.f32 %v5117_v47, %v9647_v53  ;;  %v5119_v36 = vpop.f32.mrb[194].mxu0  ;;  %v10402_v58 = vld [vmem:[#allocation48_spill] sm:$0xff]  ;;  %v10403_v47 = vld [vmem:[#allocation51_spill] sm:$0xff] }
 0x548   : > { %v5870_v12 = vmax.f32 %v5869_v43, %v5116_v61  ;;  %v5120_v30 = vadd.f32 %v5119_v36, %v9642_v52  ;;  %v5121_v51 = vpop.f32.mrb[195].mxu0 }
 0x549   : > { %v6001_v13 = vmax.f32 %v6000_v19, %v5118_v60  ;;  %v5122_v0 = vadd.f32 %v5121_v51, %v9647_v53  ;;  %v4732_v38 = vpop.f32.mrb[44].mxu1 }
 0x54a   : > { %v5871_v5 = vmax.f32 %v5870_v12, %v5120_v30  ;;  %v4733_v63 = vadd.f32 %v4732_v38, %v9192_v41  ;;  %v4734_v55 = vpop.f32.mrb[45].mxu1  ;;  %5384 = vmatmul.mubr.bf16.gmra.mrb[44].mxu0 %v10400_v23 }
 0x54b   : > { %v6002_v7 = vmax.f32 %v6001_v13, %v5122_v0  ;;  %v4735_v25 = vadd.f32 %v4734_v55, %v9197_v35  ;;  %v4736_v2 = vpop.f32.mrb[46].mxu1  ;;  %5393 = vmatprep.mubr.bf16.mxu0 %v10401_v39 }
 0x54c   : > { %v5664_v45 = vmax.f32 %v5663_v1, %v4733_v63  ;;  %v4737_v27 = vadd.f32 %v4736_v2, %v9192_v41  ;;  %v4738_v18 = vpop.f32.mrb[47].mxu1 }
 0x54d   : > { %v5795_v16 = vmax.f32 %v5794_v20, %v4735_v25  ;;  %v4739_v28 = vadd.f32 %v4738_v18, %v9197_v35  ;;  %v5125_v9 = vpop.f32.mrb[196].mxu0 }
 0x54e   : > { %v5665_v14 = vmax.f32 %v5664_v45, %v4737_v27  ;;  %v5126_v31 = vadd.f32 %v5125_v9, %v9642_v52  ;;  %v5127_v22 = vpop.f32.mrb[197].mxu0 }
 0x54f   : > { %v5796_v43 = vmax.f32 %v5795_v16, %v4739_v28  ;;  %v5128_v37 = vadd.f32 %v5127_v22, %v9647_v53  ;;  %v5129_v34 = vpop.f32.mrb[198].mxu0  ;;  %v10404_v28 = vld [vmem:[#allocation50_spill] sm:$0xff]  ;;  %v10405_v22 = vld [vmem:[#allocation53_spill] sm:$0xff] }
 0x550   : > { %v5872_v33 = vmax.f32 %v5871_v5, %v5126_v31  ;;  %v5130_v19 = vadd.f32 %v5129_v34, %v9642_v52  ;;  %v5131_v26 = vpop.f32.mrb[199].mxu0 }
 0x551   : > { %v6003_v3 = vmax.f32 %v6002_v7, %v5128_v37  ;;  %v5132_v49 = vadd.f32 %v5131_v26, %v9647_v53  ;;  %v4742_v62 = vpop.f32.mrb[48].mxu1 }
 0x552   : > { %v5873_v10 = vmax.f32 %v5872_v33, %v5130_v19  ;;  %v4743_v57 = vadd.f32 %v4742_v62, %v9192_v41  ;;  %v4744_v17 = vpop.f32.mrb[49].mxu1  ;;  %5394 = vmatmul.mubr.bf16.gmra.mrb[48].mxu0 %v10402_v58 }
 0x553   : > { %v6004_v6 = vmax.f32 %v6003_v3, %v5132_v49  ;;  %v4745_v1 = vadd.f32 %v4744_v17, %v9197_v35  ;;  %v4746_v61 = vpop.f32.mrb[50].mxu1  ;;  %5403 = vmatprep.mubr.bf16.mxu0 %v10403_v47 }
 0x554   : > { %v5666_v20 = vmax.f32 %v5665_v14, %v4743_v57  ;;  %v4747_v60 = vadd.f32 %v4746_v61, %v9192_v41  ;;  %v4748_v36 = vpop.f32.mrb[51].mxu1 }
 0x555   : > { %v5797_v12 = vmax.f32 %v5796_v43, %v4745_v1  ;;  %v4749_v30 = vadd.f32 %v4748_v36, %v9197_v35  ;;  %v5135_v51 = vpop.f32.mrb[200].mxu0 }
 0x556   : > { %v5667_v13 = vmax.f32 %v5666_v20, %v4747_v60  ;;  %v5136_v0 = vadd.f32 %v5135_v51, %v9642_v52  ;;  %v5137_v38 = vpop.f32.mrb[201].mxu0 }
 0x557   : > { %v5798_v5 = vmax.f32 %v5797_v12, %v4749_v30  ;;  %v5138_v63 = vadd.f32 %v5137_v38, %v9647_v53  ;;  %v5139_v55 = vpop.f32.mrb[202].mxu0  ;;  %v10406_v30 = vld [vmem:[#allocation52_spill] sm:$0xff] }
 0x558   : > { %v5874_v23 = vmax.f32 %v5873_v10, %v5136_v0  ;;  %v5140_v7 = vadd.f32 %v5139_v55, %v9642_v52  ;;  %v5141_v25 = vpop.f32.mrb[203].mxu0  ;;  %v10407_v38 = vld [vmem:[#allocation8_spill] sm:$0xff] }
 0x559   : > { %v6005_v2 = vmax.f32 %v6004_v6, %v5138_v63  ;;  %v5142_v39 = vadd.f32 %v5141_v25, %v9647_v53  ;;  %v4752_v45 = vpop.f32.mrb[52].mxu1 }
 0x55a   : > { %v5875_v27 = vmax.f32 %v5874_v23, %v5140_v7  ;;  %v4753_v18 = vadd.f32 %v4752_v45, %v9192_v41  ;;  %v4754_v16 = vpop.f32.mrb[53].mxu1  ;;  %5404 = vmatmul.mubr.bf16.gmra.mrb[52].mxu0 %v10404_v28 }
 0x55b   : > { %v6006_v9 = vmax.f32 %v6005_v2, %v5142_v39  ;;  %v4755_v14 = vadd.f32 %v4754_v16, %v9197_v35  ;;  %v4756_v31 = vpop.f32.mrb[54].mxu1  ;;  %5413 = vmatprep.mubr.bf16.mxu0 %v10405_v22 }
 0x55c   : > { %v5668_v43 = vmax.f32 %v5667_v13, %v4753_v18  ;;  %v4757_v37 = vadd.f32 %v4756_v31, %v9192_v41  ;;  %v4758_v34 = vpop.f32.mrb[55].mxu1 }
 0x55d   : > { %v5799_v33 = vmax.f32 %v5798_v5, %v4755_v14  ;;  %v4759_v19 = vadd.f32 %v4758_v34, %v9197_v35  ;;  %v5145_v26 = vpop.f32.mrb[204].mxu0 }
 0x55e   : > { %v5669_v3 = vmax.f32 %v5668_v43, %v4757_v37  ;;  %v5146_v49 = vadd.f32 %v5145_v26, %v9642_v52  ;;  %v5147_v62 = vpop.f32.mrb[205].mxu0 }
 0x55f   : > { %v5800_v10 = vmax.f32 %v5799_v33, %v4759_v19  ;;  %v5148_v57 = vadd.f32 %v5147_v62, %v9647_v53  ;;  %v5149_v17 = vpop.f32.mrb[206].mxu0  ;;  %v10408_v19 = vld [vmem:[#allocation6_spill] sm:$0xff] }
 0x560   : > { %v5876_v58 = vmax.f32 %v5875_v27, %v5146_v49  ;;  %v5150_v6 = vadd.f32 %v5149_v17, %v9642_v52  ;;  %v5151_v1 = vpop.f32.mrb[207].mxu0  ;;  %v10409_v62 = vld [vmem:[#allocation10_spill] sm:$0xff] }
 0x561   : > { %v6007_v61 = vmax.f32 %v6006_v9, %v5148_v57  ;;  %v5152_v47 = vadd.f32 %v5151_v1, %v9647_v53  ;;  %v4762_v20 = vpop.f32.mrb[56].mxu1 }
 0x562   : > { %v5877_v60 = vmax.f32 %v5876_v58, %v5150_v6  ;;  %v4763_v36 = vadd.f32 %v4762_v20, %v9192_v41  ;;  %v4764_v12 = vpop.f32.mrb[57].mxu1  ;;  %5414 = vmatmul.mubr.bf16.gmra.mrb[56].mxu0 %v10406_v30 }
 0x563   : > { %v6008_v51 = vmax.f32 %v6007_v61, %v5152_v47  ;;  %v4765_v13 = vadd.f32 %v4764_v12, %v9197_v35  ;;  %v4766_v0 = vpop.f32.mrb[58].mxu1  ;;  %5423 = vmatprep.mubr.bf16.mxu0 %v10407_v38 }
 0x564   : > { %v5670_v5 = vmax.f32 %v5669_v3, %v4763_v36  ;;  %v4767_v63 = vadd.f32 %v4766_v0, %v9192_v41  ;;  %v4768_v55 = vpop.f32.mrb[59].mxu1 }
 0x565   : > { %v5801_v23 = vmax.f32 %v5800_v10, %v4765_v13  ;;  %v4769_v7 = vadd.f32 %v4768_v55, %v9197_v35  ;;  %v5155_v25 = vpop.f32.mrb[208].mxu0 }
 0x566   : > { %v5671_v2 = vmax.f32 %v5670_v5, %v4767_v63  ;;  %v5156_v39 = vadd.f32 %v5155_v25, %v9642_v52  ;;  %v5157_v45 = vpop.f32.mrb[209].mxu0 }
 0x567   : > { %v5802_v27 = vmax.f32 %v5801_v23, %v4769_v7  ;;  %v5158_v18 = vadd.f32 %v5157_v45, %v9647_v53  ;;  %v5159_v16 = vpop.f32.mrb[210].mxu0  ;;  %v10410_v7 = vld [vmem:[#allocation7_spill] sm:$0xff]  ;;  %v10411_v45 = vld [vmem:[#allocation12_spill] sm:$0xff] }
 0x568   : > { %v5878_v28 = vmax.f32 %v5877_v60, %v5156_v39  ;;  %v5160_v9 = vadd.f32 %v5159_v16, %v9642_v52  ;;  %v5161_v14 = vpop.f32.mrb[211].mxu0 }
 0x569   : > { %v6009_v31 = vmax.f32 %v6008_v51, %v5158_v18  ;;  %v5162_v22 = vadd.f32 %v5161_v14, %v9647_v53  ;;  %v4772_v43 = vpop.f32.mrb[60].mxu1 }
 0x56a   : > { %v5879_v37 = vmax.f32 %v5878_v28, %v5160_v9  ;;  %v4773_v34 = vadd.f32 %v4772_v43, %v9192_v41  ;;  %v4774_v33 = vpop.f32.mrb[61].mxu1  ;;  %5424 = vmatmul.mubr.bf16.gmra.mrb[60].mxu0 %v10408_v19 }
 0x56b   : > { %v6010_v26 = vmax.f32 %v6009_v31, %v5162_v22  ;;  %v4775_v3 = vadd.f32 %v4774_v33, %v9197_v35  ;;  %v4776_v49 = vpop.f32.mrb[62].mxu1  ;;  %5433 = vmatprep.mubr.bf16.mxu0 %v10409_v62 }
 0x56c   : > { %v5672_v10 = vmax.f32 %v5671_v2, %v4773_v34  ;;  %v4777_v57 = vadd.f32 %v4776_v49, %v9192_v41  ;;  %v4778_v17 = vpop.f32.mrb[63].mxu1 }
 0x56d   : > { %v5803_v58 = vmax.f32 %v5802_v27, %v4775_v3  ;;  %v4779_v6 = vadd.f32 %v4778_v17, %v9197_v35  ;;  %v5165_v1 = vpop.f32.mrb[212].mxu0 }
 0x56e   : > { %v5673_v61 = vmax.f32 %v5672_v10, %v4777_v57  ;;  %v5166_v47 = vadd.f32 %v5165_v1, %v9642_v52  ;;  %v5167_v20 = vpop.f32.mrb[213].mxu0 }
 0x56f   : > { %v5804_v60 = vmax.f32 %v5803_v58, %v4779_v6  ;;  %v5168_v36 = vadd.f32 %v5167_v20, %v9647_v53  ;;  %v5169_v12 = vpop.f32.mrb[214].mxu0  ;;  %v10412_v6 = vld [vmem:[#allocation9_spill] sm:$0xff]  ;;  %v10413_v20 = vld [vmem:[#allocation14_spill] sm:$0xff] }
 0x570   : > { %v5880_v30 = vmax.f32 %v5879_v37, %v5166_v47  ;;  %v5170_v51 = vadd.f32 %v5169_v12, %v9642_v52  ;;  %v5171_v13 = vpop.f32.mrb[215].mxu0 }
 0x571   : > { %v6011_v0 = vmax.f32 %v6010_v26, %v5168_v36  ;;  %v5172_v38 = vadd.f32 %v5171_v13, %v9647_v53  ;;  %v4782_v5 = vpop.f32.mrb[64].mxu1 }
 0x572   : > { %v5881_v63 = vmax.f32 %v5880_v30, %v5170_v51  ;;  %v4783_v55 = vadd.f32 %v4782_v5, %v9192_v41  ;;  %v4784_v23 = vpop.f32.mrb[65].mxu1  ;;  %5434 = vmatmul.mubr.bf16.gmra.mrb[64].mxu0 %v10410_v7 }
 0x573   : > { %v6012_v25 = vmax.f32 %v6011_v0, %v5172_v38  ;;  %v4785_v2 = vadd.f32 %v4784_v23, %v9197_v35  ;;  %v4786_v39 = vpop.f32.mrb[66].mxu1  ;;  %5443 = vmatprep.mubr.bf16.mxu0 %v10411_v45 }
 0x574   : > { %v5674_v27 = vmax.f32 %v5673_v61, %v4783_v55  ;;  %v4787_v18 = vadd.f32 %v4786_v39, %v9192_v41  ;;  %v4788_v16 = vpop.f32.mrb[67].mxu1 }
 0x575   : > { %v5805_v28 = vmax.f32 %v5804_v60, %v4785_v2  ;;  %v4789_v9 = vadd.f32 %v4788_v16, %v9197_v35  ;;  %v5175_v14 = vpop.f32.mrb[216].mxu0 }
 0x576   : > { %v5675_v31 = vmax.f32 %v5674_v27, %v4787_v18  ;;  %v5176_v22 = vadd.f32 %v5175_v14, %v9642_v52  ;;  %v5177_v43 = vpop.f32.mrb[217].mxu0 }
 0x577   : > { %v5806_v37 = vmax.f32 %v5805_v28, %v4789_v9  ;;  %v5178_v34 = vadd.f32 %v5177_v43, %v9647_v53  ;;  %v5179_v33 = vpop.f32.mrb[218].mxu0  ;;  %v10414_v9 = vld [vmem:[#allocation11_spill] sm:$0xff]  ;;  %v10415_v43 = vld [vmem:[#allocation13_spill] sm:$0xff] }
 0x578   : > { %v5882_v19 = vmax.f32 %v5881_v63, %v5176_v22  ;;  %v5180_v26 = vadd.f32 %v5179_v33, %v9642_v52  ;;  %v5181_v3 = vpop.f32.mrb[219].mxu0 }
 0x579   : > { %v6013_v49 = vmax.f32 %v6012_v25, %v5178_v34  ;;  %v5182_v62 = vadd.f32 %v5181_v3, %v9647_v53  ;;  %v4792_v10 = vpop.f32.mrb[68].mxu1 }
 0x57a   : > { %v5883_v57 = vmax.f32 %v5882_v19, %v5180_v26  ;;  %v4793_v17 = vadd.f32 %v4792_v10, %v9192_v41  ;;  %v4794_v58 = vpop.f32.mrb[69].mxu1  ;;  %5444 = vmatmul.mubr.bf16.gmra.mrb[68].mxu0 %v10412_v6 }
 0x57b   : > { %v6014_v1 = vmax.f32 %v6013_v49, %v5182_v62  ;;  %v4795_v61 = vadd.f32 %v4794_v58, %v9197_v35  ;;  %v4796_v47 = vpop.f32.mrb[70].mxu1  ;;  %5453 = vmatprep.mubr.bf16.mxu0 %v10413_v20 }
 0x57c   : > { %v5676_v60 = vmax.f32 %v5675_v31, %v4793_v17  ;;  %v4797_v36 = vadd.f32 %v4796_v47, %v9192_v41  ;;  %v4798_v12 = vpop.f32.mrb[71].mxu1 }
 0x57d   : > { %v5807_v30 = vmax.f32 %v5806_v37, %v4795_v61  ;;  %v4799_v51 = vadd.f32 %v4798_v12, %v9197_v35  ;;  %v5185_v13 = vpop.f32.mrb[220].mxu0 }
 0x57e   : > { %v5677_v0 = vmax.f32 %v5676_v60, %v4797_v36  ;;  %v5186_v38 = vadd.f32 %v5185_v13, %v9642_v52  ;;  %v5187_v5 = vpop.f32.mrb[221].mxu0 }
 0x57f   : > { %v5808_v63 = vmax.f32 %v5807_v30, %v4799_v51  ;;  %v5188_v55 = vadd.f32 %v5187_v5, %v9647_v53  ;;  %v5189_v23 = vpop.f32.mrb[222].mxu0 }
 0x580   : > { %v5884_v7 = vmax.f32 %v5883_v57, %v5186_v38  ;;  %v5190_v25 = vadd.f32 %v5189_v23, %v9642_v52  ;;  %v5191_v2 = vpop.f32.mrb[223].mxu0  ;;  %v10416_v38 = vld [vmem:[#allocation15_spill] sm:$0xff] }
 0x581   : > { %v6015_v39 = vmax.f32 %v6014_v1, %v5188_v55  ;;  %v5192_v45 = vadd.f32 %v5191_v2, %v9647_v53  ;;  %v4802_v27 = vpop.f32.mrb[72].mxu1 }
 0x582   : > { %v5885_v18 = vmax.f32 %v5884_v7, %v5190_v25  ;;  %v4803_v16 = vadd.f32 %v4802_v27, %v9192_v41  ;;  %v4804_v28 = vpop.f32.mrb[73].mxu1  ;;  %5454 = vmatmul.mubr.bf16.gmra.mrb[72].mxu0 %v10414_v9 }
 0x583   : > { %v6016_v14 = vmax.f32 %v6015_v39, %v5192_v45  ;;  %v4805_v31 = vadd.f32 %v4804_v28, %v9197_v35  ;;  %v4806_v22 = vpop.f32.mrb[74].mxu1  ;;  %5463 = vmatprep.mubr.bf16.mxu0 %v10415_v43 }
 0x584   : > { %v5678_v37 = vmax.f32 %v5677_v0, %v4803_v16  ;;  %v4807_v34 = vadd.f32 %v4806_v22, %v9192_v41  ;;  %v4808_v33 = vpop.f32.mrb[75].mxu1 }
 0x585   : > { %v5809_v19 = vmax.f32 %v5808_v63, %v4805_v31  ;;  %v4809_v26 = vadd.f32 %v4808_v33, %v9197_v35  ;;  %v5195_v3 = vpop.f32.mrb[224].mxu0  ;;  %v10417_v33 = vld [vmem:[#allocation16_spill] sm:$0xff] }
 0x586   : > { %v5679_v49 = vmax.f32 %v5678_v37, %v4807_v34  ;;  %v5196_v62 = vadd.f32 %v5195_v3, %v9642_v52  ;;  %v5197_v10 = vpop.f32.mrb[225].mxu0 }
 0x587   : > { %v5810_v57 = vmax.f32 %v5809_v19, %v4809_v26  ;;  %v5198_v17 = vadd.f32 %v5197_v10, %v9647_v53  ;;  %v5199_v58 = vpop.f32.mrb[226].mxu0 }
 0x588   : > { %v5886_v6 = vmax.f32 %v5885_v18, %v5196_v62  ;;  %v5200_v1 = vadd.f32 %v5199_v58, %v9642_v52  ;;  %v5201_v61 = vpop.f32.mrb[227].mxu0 }
 0x589   : > { %v6017_v47 = vmax.f32 %v6016_v14, %v5198_v17  ;;  %v5202_v20 = vadd.f32 %v5201_v61, %v9647_v53  ;;  %v4812_v60 = vpop.f32.mrb[76].mxu1 }
 0x58a   : > { %v5887_v36 = vmax.f32 %v5886_v6, %v5200_v1  ;;  %v4813_v12 = vadd.f32 %v4812_v60, %v9192_v41  ;;  %v4814_v30 = vpop.f32.mrb[77].mxu1  ;;  %5464 = vmatmul.mubr.bf16.gmra.mrb[76].mxu0 %v9474_v56 }
 0x58b   : > { %v6018_v51 = vmax.f32 %v6017_v47, %v5202_v20  ;;  %v4815_v13 = vadd.f32 %v4814_v30, %v9197_v35  ;;  %v4816_v0 = vpop.f32.mrb[78].mxu1  ;;  %5473 = vmatprep.mubr.bf16.mxu0 %v10416_v38 }
 0x58c   : > { %v5680_v5 = vmax.f32 %v5679_v49, %v4813_v12  ;;  %v4817_v63 = vadd.f32 %v4816_v0, %v9192_v41  ;;  %v4818_v55 = vpop.f32.mrb[79].mxu1  ;;  %v10418_v49 = vld [vmem:[#allocation18_spill] sm:$0xff] }
 0x58d   : > { %v5811_v23 = vmax.f32 %v5810_v57, %v4815_v13  ;;  %v4819_v7 = vadd.f32 %v4818_v55, %v9197_v35  ;;  %v5205_v25 = vpop.f32.mrb[228].mxu0 }
 0x58e   : > { %v5681_v2 = vmax.f32 %v5680_v5, %v4817_v63  ;;  %v5206_v39 = vadd.f32 %v5205_v25, %v9642_v52  ;;  %v5207_v45 = vpop.f32.mrb[229].mxu0 }
 0x58f   : > { %v5812_v27 = vmax.f32 %v5811_v23, %v4819_v7  ;;  %v5208_v56 = vadd.f32 %v5207_v45, %v9647_v53  ;;  %v5209_v18 = vpop.f32.mrb[230].mxu0 }
 0x590   : > { %v5888_v16 = vmax.f32 %v5887_v36, %v5206_v39  ;;  %v5210_v28 = vadd.f32 %v5209_v18, %v9642_v52  ;;  %v5211_v9 = vpop.f32.mrb[231].mxu0 }
 0x591   : > { %v6019_v14 = vmax.f32 %v6018_v51, %v5208_v56  ;;  %v5212_v31 = vadd.f32 %v5211_v9, %v9647_v53  ;;  %v4822_v22 = vpop.f32.mrb[80].mxu1 }
 0x592   : > { %v5889_v43 = vmax.f32 %v5888_v16, %v5210_v28  ;;  %v4823_v37 = vadd.f32 %v4822_v22, %v9192_v41  ;;  %v4824_v34 = vpop.f32.mrb[81].mxu1  ;;  %5474 = vmatmul.mubr.bf16.gmra.mrb[80].mxu0 %v10417_v33 }
 0x593   : > { %v6020_v19 = vmax.f32 %v6019_v14, %v5212_v31  ;;  %v4825_v26 = vadd.f32 %v4824_v34, %v9197_v35  ;;  %v4826_v3 = vpop.f32.mrb[82].mxu1  ;;  %5483 = vmatprep.mubr.bf16.mxu0 %v10418_v49 }
 0x594   : > { %v5682_v62 = vmax.f32 %v5681_v2, %v4823_v37  ;;  %v4827_v10 = vadd.f32 %v4826_v3, %v9192_v41  ;;  %v4828_v57 = vpop.f32.mrb[83].mxu1  ;;  %v10419_v2 = vld [vmem:[#allocation17_spill] sm:$0xff] }
 0x595   : > { %v5813_v17 = vmax.f32 %v5812_v27, %v4825_v26  ;;  %v4829_v58 = vadd.f32 %v4828_v57, %v9197_v35  ;;  %v5215_v6 = vpop.f32.mrb[232].mxu0 }
 0x596   : > { %v5683_v1 = vmax.f32 %v5682_v62, %v4827_v10  ;;  %v5216_v61 = vadd.f32 %v5215_v6, %v9642_v52  ;;  %v5217_v47 = vpop.f32.mrb[233].mxu0 }
 0x597   : > { %v5814_v20 = vmax.f32 %v5813_v17, %v4829_v58  ;;  %v5218_v60 = vadd.f32 %v5217_v47, %v9647_v53  ;;  %v5219_v36 = vpop.f32.mrb[234].mxu0 }
 0x598   : > { %v5890_v12 = vmax.f32 %v5889_v43, %v5216_v61  ;;  %v5220_v30 = vadd.f32 %v5219_v36, %v9642_v52  ;;  %v5221_v51 = vpop.f32.mrb[235].mxu0 }
 0x599   : > { %v6021_v13 = vmax.f32 %v6020_v19, %v5218_v60  ;;  %v5222_v0 = vadd.f32 %v5221_v51, %v9647_v53  ;;  %v4832_v38 = vpop.f32.mrb[84].mxu1 }
 0x59a   : > { %v5891_v5 = vmax.f32 %v5890_v12, %v5220_v30  ;;  %v4833_v63 = vadd.f32 %v4832_v38, %v9192_v41  ;;  %v4834_v55 = vpop.f32.mrb[85].mxu1  ;;  %5484 = vmatmul.mubr.bf16.gmra.mrb[84].mxu0 %v9506_v8 }
 0x59b   : > { %v6022_v23 = vmax.f32 %v6021_v13, %v5222_v0  ;;  %v4835_v7 = vadd.f32 %v4834_v55, %v9197_v35  ;;  %v4836_v25 = vpop.f32.mrb[86].mxu1  ;;  %5493 = vmatprep.mubr.bf16.mxu0 %v10419_v2 }
 0x59c   : > { %v5684_v39 = vmax.f32 %v5683_v1, %v4833_v63  ;;  %v4837_v45 = vadd.f32 %v4836_v25, %v9192_v41  ;;  %v4838_v27 = vpop.f32.mrb[87].mxu1 }
 0x59d   : > { %v5815_v56 = vmax.f32 %v5814_v20, %v4835_v7  ;;  %v4839_v18 = vadd.f32 %v4838_v27, %v9197_v35  ;;  %v5225_v16 = vpop.f32.mrb[236].mxu0 }
 0x59e   : > { %v5685_v28 = vmax.f32 %v5684_v39, %v4837_v45  ;;  %v5226_v9 = vadd.f32 %v5225_v16, %v9642_v52  ;;  %v5227_v14 = vpop.f32.mrb[237].mxu0 }
 0x59f   : > { %v5816_v31 = vmax.f32 %v5815_v56, %v4839_v18  ;;  %v5228_v8 = vadd.f32 %v5227_v14, %v9647_v53  ;;  %v5229_v22 = vpop.f32.mrb[238].mxu0 }
 0x5a0   : > { %v5892_v43 = vmax.f32 %v5891_v5, %v5226_v9  ;;  %v5230_v37 = vadd.f32 %v5229_v22, %v9642_v52  ;;  %v5231_v34 = vpop.f32.mrb[239].mxu0 }
 0x5a1   : > { %v6023_v33 = vmax.f32 %v6022_v23, %v5228_v8  ;;  %v5232_v19 = vadd.f32 %v5231_v34, %v9647_v53  ;;  %v4842_v26 = vpop.f32.mrb[88].mxu1 }
 0x5a2   : > { %v5893_v3 = vmax.f32 %v5892_v43, %v5230_v37  ;;  %v4843_v49 = vadd.f32 %v4842_v26, %v9192_v41  ;;  %v4844_v62 = vpop.f32.mrb[89].mxu1  ;;  %5494 = vmatmul.mubr.bf16.gmra.mrb[88].mxu0 %v9522_v48 }
 0x5a3   : > { %v6024_v10 = vmax.f32 %v6023_v33, %v5232_v19  ;;  %v4845_v57 = vadd.f32 %v4844_v62, %v9197_v35  ;;  %v4846_v17 = vpop.f32.mrb[90].mxu1  ;;  %5503 = vmatprep.mubr.bf16.mxu0 %v9542_v42 }
 0x5a4   : > { %v5686_v58 = vmax.f32 %v5685_v28, %v4843_v49  ;;  %v4847_v6 = vadd.f32 %v4846_v17, %v9192_v41  ;;  %v4848_v1 = vpop.f32.mrb[91].mxu1 }
 0x5a5   : > { %v5817_v61 = vmax.f32 %v5816_v31, %v4845_v57  ;;  %v4849_v47 = vadd.f32 %v4848_v1, %v9197_v35  ;;  %v5235_v20 = vpop.f32.mrb[240].mxu0 }
 0x5a6   : > { %v5687_v60 = vmax.f32 %v5686_v58, %v4847_v6  ;;  %v5236_v36 = vadd.f32 %v5235_v20, %v9642_v52  ;;  %v5237_v12 = vpop.f32.mrb[241].mxu0 }
 0x5a7   : > { %v5818_v30 = vmax.f32 %v5817_v61, %v4849_v47  ;;  %v5238_v48 = vadd.f32 %v5237_v12, %v9647_v53  ;;  %v5239_v51 = vpop.f32.mrb[242].mxu0 }
 0x5a8   : > { %v5894_v13 = vmax.f32 %v5893_v3, %v5236_v36  ;;  %v5240_v0 = vadd.f32 %v5239_v51, %v9642_v52  ;;  %v5241_v42 = vpop.f32.mrb[243].mxu0 }
 0x5a9   : > { %v6025_v38 = vmax.f32 %v6024_v10, %v5238_v48  ;;  %v5242_v5 = vadd.f32 %v5241_v42, %v9647_v53  ;;  %v4852_v63 = vpop.f32.mrb[92].mxu1 }
 0x5aa   : > { %v5895_v55 = vmax.f32 %v5894_v13, %v5240_v0  ;;  %v4853_v23 = vadd.f32 %v4852_v63, %v9192_v41  ;;  %v4854_v7 = vpop.f32.mrb[93].mxu1  ;;  %5504 = vmatmul.mubr.bf16.gmra.mrb[92].mxu0 %v9538_v21 }
 0x5ab   : > { %v6026_v25 = vmax.f32 %v6025_v38, %v5242_v5  ;;  %v4855_v2 = vadd.f32 %v4854_v7, %v9197_v35  ;;  %v4856_v39 = vpop.f32.mrb[94].mxu1  ;;  %5513 = vmatprep.mubr.bf16.mxu0 %v9558_v32 }
 0x5ac   : > { %v5688_v45 = vmax.f32 %v5687_v60, %v4853_v23  ;;  %v4857_v27 = vadd.f32 %v4856_v39, %v9192_v41  ;;  %v4858_v56 = vpop.f32.mrb[95].mxu1 }
 0x5ad   : > { %v5819_v18 = vmax.f32 %v5818_v30, %v4855_v2  ;;  %v4859_v16 = vadd.f32 %v4858_v56, %v9197_v35  ;;  %v5245_v28 = vpop.f32.mrb[244].mxu0 }
 0x5ae   : > { %v5689_v9 = vmax.f32 %v5688_v45, %v4857_v27  ;;  %v5246_v14 = vadd.f32 %v5245_v28, %v9642_v52  ;;  %v5247_v31 = vpop.f32.mrb[245].mxu0 }
 0x5af   : > { %v5820_v8 = vmax.f32 %v5819_v18, %v4859_v16  ;;  %v5248_v21 = vadd.f32 %v5247_v31, %v9647_v53  ;;  %v5249_v22 = vpop.f32.mrb[246].mxu0 }
 0x5b0   : > { %v5896_v43 = vmax.f32 %v5895_v55, %v5246_v14  ;;  %v5250_v37 = vadd.f32 %v5249_v22, %v9642_v52  ;;  %v5251_v32 = vpop.f32.mrb[247].mxu0 }
 0x5b1   : > { %v6027_v34 = vmax.f32 %v6026_v25, %v5248_v21  ;;  %v5252_v33 = vadd.f32 %v5251_v32, %v9647_v53  ;;  %v4862_v19 = vpop.f32.mrb[96].mxu1 }
 0x5b2   : > { %v5897_v26 = vmax.f32 %v5896_v43, %v5250_v37  ;;  %v4863_v3 = vadd.f32 %v4862_v19, %v9192_v41  ;;  %v4864_v49 = vpop.f32.mrb[97].mxu1  ;;  %5514 = vmatmul.mubr.bf16.gmra.mrb[96].mxu0 %v9554_v24 }
 0x5b3   : > { %v6028_v62 = vmax.f32 %v6027_v34, %v5252_v33  ;;  %v4865_v10 = vadd.f32 %v4864_v49, %v9197_v35  ;;  %v4866_v57 = vpop.f32.mrb[98].mxu1  ;;  %5523 = vmatprep.mubr.bf16.mxu0 %v9574_v44 }
 0x5b4   : > { %v5690_v17 = vmax.f32 %v5689_v9, %v4863_v3  ;;  %v4867_v58 = vadd.f32 %v4866_v57, %v9192_v41  ;;  %v4868_v6 = vpop.f32.mrb[99].mxu1 }
 0x5b5   : > { %v5821_v1 = vmax.f32 %v5820_v8, %v4865_v10  ;;  %v4869_v61 = vadd.f32 %v4868_v6, %v9197_v35  ;;  %v5255_v47 = vpop.f32.mrb[248].mxu0 }
 0x5b6   : > { %v5691_v20 = vmax.f32 %v5690_v17, %v4867_v58  ;;  %v5256_v60 = vadd.f32 %v5255_v47, %v9642_v52  ;;  %v5257_v36 = vpop.f32.mrb[249].mxu0 }
 0x5b7   : > { %v5822_v12 = vmax.f32 %v5821_v1, %v4869_v61  ;;  %v5258_v24 = vadd.f32 %v5257_v36, %v9647_v53  ;;  %v5259_v30 = vpop.f32.mrb[250].mxu0 }
 0x5b8   : > { %v5898_v48 = vmax.f32 %v5897_v26, %v5256_v60  ;;  %v5260_v51 = vadd.f32 %v5259_v30, %v9642_v52  ;;  %v5261_v44 = vpop.f32.mrb[251].mxu0 }
 0x5b9   : > { %v6029_v13 = vmax.f32 %v6028_v62, %v5258_v24  ;;  %v5262_v0 = vadd.f32 %v5261_v44, %v9647_v53  ;;  %v4872_v42 = vpop.f32.mrb[100].mxu1 }
 0x5ba   : > { %v5899_v38 = vmax.f32 %v5898_v48, %v5260_v51  ;;  %v4873_v5 = vadd.f32 %v4872_v42, %v9192_v41  ;;  %v4874_v63 = vpop.f32.mrb[101].mxu1  ;;  %5524 = vmatmul.mubr.bf16.gmra.mrb[100].mxu0 %v9570_v54 }
 0x5bb   : > { %v6030_v55 = vmax.f32 %v6029_v13, %v5262_v0  ;;  %v4875_v23 = vadd.f32 %v4874_v63, %v9197_v35  ;;  %v4876_v7 = vpop.f32.mrb[102].mxu1  ;;  %5533 = vmatprep.mubr.bf16.mxu0 %v9590_v4 }
 0x5bc   : > { %v5692_v25 = vmax.f32 %v5691_v20, %v4873_v5  ;;  %v4877_v2 = vadd.f32 %v4876_v7, %v9192_v41  ;;  %v4878_v39 = vpop.f32.mrb[103].mxu1 }
 0x5bd   : > { %v5823_v45 = vmax.f32 %v5822_v12, %v4875_v23  ;;  %v4879_v27 = vadd.f32 %v4878_v39, %v9197_v35  ;;  %v5265_v56 = vpop.f32.mrb[252].mxu0 }
 0x5be   : > { %v5693_v18 = vmax.f32 %v5692_v25, %v4877_v2  ;;  %v5266_v16 = vadd.f32 %v5265_v56, %v9642_v52  ;;  %v5267_v28 = vpop.f32.mrb[253].mxu0 }
 0x5bf   : > { %v5824_v9 = vmax.f32 %v5823_v45, %v4879_v27  ;;  %v5268_v54 = vadd.f32 %v5267_v28, %v9647_v53  ;;  %v5269_v14 = vpop.f32.mrb[254].mxu0 }
 0x5c0   : > { %v5900_v31 = vmax.f32 %v5899_v38, %v5266_v16  ;;  %v5270_v8 = vadd.f32 %v5269_v14, %v9642_v52  ;;  %v5271_v4 = vpop.f32.mrb[255].mxu0 }
 0x5c1   : > { %v6031_v21 = vmax.f32 %v6030_v55, %v5268_v54  ;;  %v5272_v22 = vadd.f32 %v5271_v4, %v9647_v53  ;;  %v4882_v43 = vpop.f32.mrb[104].mxu1 }
 0x5c2   : > { %v5901_v37 = vmax.f32 %v5900_v31, %v5270_v8  ;;  %v4883_v32 = vadd.f32 %v4882_v43, %v9192_v41  ;;  %v4884_v34 = vpop.f32.mrb[105].mxu1  ;;  %5534 = vmatmul.mubr.bf16.gmra.mrb[104].mxu0 %v9586_v29 }
 0x5c3   : > { %v6032_v33 = vmax.f32 %v6031_v21, %v5272_v22  ;;  %v4885_v19 = vadd.f32 %v4884_v34, %v9197_v35  ;;  %v4886_v26 = vpop.f32.mrb[106].mxu1  ;;  %5543 = vmatprep.mubr.bf16.mxu0 %v9606_v59 }
 0x5c4   : > { %v5694_v3 = vmax.f32 %v5693_v18, %v4883_v32  ;;  %v4887_v49 = vadd.f32 %v4886_v26, %v9192_v41  ;;  %v4888_v62 = vpop.f32.mrb[107].mxu1 }
 0x5c5   : > { %v5825_v10 = vmax.f32 %v5824_v9, %v4885_v19  ;;  %v4889_v57 = vadd.f32 %v4888_v62, %v9197_v35  ;;  %v5275_v17 = vpop.f32.mrb[0].mxu0 }
 0x5c6   : > { %v5695_v58 = vmax.f32 %v5694_v3, %v4887_v49  ;;  %v5276_v6 = vadd.f32 %v5275_v17, %v9642_v52  ;;  %v5277_v1 = vpop.f32.mrb[1].mxu0 }
 0x5c7   : > { %v5826_v61 = vmax.f32 %v5825_v10, %v4889_v57  ;;  %v5278_v29 = vadd.f32 %v5277_v1, %v9647_v53  ;;  %v5279_v47 = vpop.f32.mrb[2].mxu0 }
 0x5c8   : > { %v5902_v20 = vmax.f32 %v5901_v37, %v5276_v6  ;;  %v5280_v60 = vadd.f32 %v5279_v47, %v9642_v52  ;;  %v5281_v59 = vpop.f32.mrb[3].mxu0 }
 0x5c9   : > { %v6033_v36 = vmax.f32 %v6032_v33, %v5278_v29  ;;  %v5282_v12 = vadd.f32 %v5281_v59, %v9647_v53  ;;  %v4892_v24 = vpop.f32.mrb[108].mxu1 }
 0x5ca   : > { %v5903_v30 = vmax.f32 %v5902_v20, %v5280_v60  ;;  %v4893_v48 = vadd.f32 %v4892_v24, %v9192_v41  ;;  %v4894_v51 = vpop.f32.mrb[109].mxu1  ;;  %5544 = vmatmul.mubr.bf16.gmra.mrb[108].mxu0 %v9602_v46 }
 0x5cb   : > { %v6034_v44 = vmax.f32 %v6033_v36, %v5282_v12  ;;  %v4895_v13 = vadd.f32 %v4894_v51, %v9197_v35  ;;  %v4896_v0 = vpop.f32.mrb[110].mxu1  ;;  %5553 = vmatprep.mubr.bf16.mxu0 %v9622_v40 }
 0x5cc   : > { %v5696_v42 = vmax.f32 %v5695_v58, %v4893_v48  ;;  %v4897_v38 = vadd.f32 %v4896_v0, %v9192_v41  ;;  %v4898_v5 = vpop.f32.mrb[111].mxu1 }
 0x5cd   : > { %v5827_v63 = vmax.f32 %v5826_v61, %v4895_v13  ;;  %v4899_v55 = vadd.f32 %v4898_v5, %v9197_v35  ;;  %v5285_v23 = vpop.f32.mrb[4].mxu0 }
 0x5ce   : > { %v5697_v7 = vmax.f32 %v5696_v42, %v4897_v38  ;;  %v5286_v25 = vadd.f32 %v5285_v23, %v9642_v52  ;;  %v5287_v2 = vpop.f32.mrb[5].mxu0 }
 0x5cf   : > { %v5828_v39 = vmax.f32 %v5827_v63, %v4899_v55  ;;  %v5288_v46 = vadd.f32 %v5287_v2, %v9647_v53  ;;  %v5289_v45 = vpop.f32.mrb[6].mxu0 }
 0x5d0   : > { %v5904_v27 = vmax.f32 %v5903_v30, %v5286_v25  ;;  %v5290_v56 = vadd.f32 %v5289_v45, %v9642_v52  ;;  %v5291_v40 = vpop.f32.mrb[7].mxu0 }
 0x5d1   : > { %v6035_v18 = vmax.f32 %v6034_v44, %v5288_v46  ;;  %v5292_v16 = vadd.f32 %v5291_v40, %v9647_v53  ;;  %v4902_v28 = vpop.f32.mrb[112].mxu1 }
 0x5d2   : > { %v5905_v9 = vmax.f32 %v5904_v27, %v5290_v56  ;;  %v4903_v54 = vadd.f32 %v4902_v28, %v9192_v41  ;;  %v4904_v14 = vpop.f32.mrb[113].mxu1  ;;  %5554 = vmatmul.mubr.bf16.gmra.mrb[112].mxu0 %v9618_v50 }
 0x5d3   : > { %v6036_v31 = vmax.f32 %v6035_v18, %v5292_v16  ;;  %v4905_v8 = vadd.f32 %v4904_v14, %v9197_v35  ;;  %v4906_v4 = vpop.f32.mrb[114].mxu1  ;;  %5563 = vmatprep.mubr.bf16.mxu0 %v9644_v11 }
 0x5d4   : > { %v5698_v21 = vmax.f32 %v5697_v7, %v4903_v54  ;;  %v4907_v22 = vadd.f32 %v4906_v4, %v9192_v41  ;;  %v4908_v43 = vpop.f32.mrb[115].mxu1 }
 0x5d5   : > { %v5829_v37 = vmax.f32 %v5828_v39, %v4905_v8  ;;  %v4909_v32 = vadd.f32 %v4908_v43, %v9197_v35  ;;  %v5295_v34 = vpop.f32.mrb[8].mxu0 }
 0x5d6   : > { %v5699_v33 = vmax.f32 %v5698_v21, %v4907_v22  ;;  %v5296_v19 = vadd.f32 %v5295_v34, %v9642_v52  ;;  %v5297_v26 = vpop.f32.mrb[9].mxu0 }
 0x5d7   : > { %v5830_v3 = vmax.f32 %v5829_v37, %v4909_v32  ;;  %v5298_v50 = vadd.f32 %v5297_v26, %v9647_v53  ;;  %v5299_v49 = vpop.f32.mrb[10].mxu0 }
 0x5d8   : > { %v5700_v62 = vrot.slane %v5699_v33, 4  ;;  %v5906_v10 = vmax.f32 %v5905_v9, %v5296_v19  ;;  %v5300_v11 = vadd.f32 %v5299_v49, %v9642_v52  ;;  %v5301_v57 = vpop.f32.mrb[11].mxu0 }
 0x5d9   : > { %v5831_v17 = vrot.slane %v5830_v3, 4  ;;  %v6037_v41 = vmax.f32 %v6036_v31, %v5298_v50  ;;  %v5302_v58 = vadd.f32 %v5301_v57, %v9647_v53 }
 0x5da   : > { %v5701_v6 = vmax.f32 %v5699_v33, %v5700_v62  ;;  %v5907_v35 = vmax.f32 %v5906_v10, %v5300_v11  ;;  %5564 = vmatmul.mubr.bf16.gmra.mrb[116].mxu0 %v9636_v15 }
 0x5db   : > { %v5832_v1 = vmax.f32 %v5830_v3, %v5831_v17  ;;  %v6038_v61 = vmax.f32 %v6037_v41, %v5302_v58 }
 0x5dc   : > { %v5702_v29 = vrot.slane %v5701_v6, 2 }
 0x5dd   : > { %v5833_v47 = vrot.slane %v5832_v1, 2  ;;  %v5305_v20 = vpop.f32.mrb[12].mxu0 }
 0x5de   : > { %v5703_v60 = vmax.f32 %v5701_v6, %v5702_v29  ;;  %v5306_v59 = vadd.f32 %v5305_v20, %v9642_v52  ;;  %v5307_v36 = vpop.f32.mrb[13].mxu0 }
 0x5df   : > { %v5834_v12 = vmax.f32 %v5832_v1, %v5833_v47  ;;  %v5308_v24 = vadd.f32 %v5307_v36, %v9647_v53  ;;  %v5309_v30 = vpop.f32.mrb[14].mxu0 }
 0x5e0   : > { %v5704_v48 = vrot.slane %v5703_v60, 1  ;;  %v5908_v51 = vmax.f32 %v5907_v35, %v5306_v59  ;;  %v5310_v44 = vadd.f32 %v5309_v30, %v9642_v52  ;;  %v5311_v13 = vpop.f32.mrb[15].mxu0 }
 0x5e1   : > { %v5835_v0 = vrot.slane %v5834_v12, 1  ;;  %v6039_v15 = vmax.f32 %v6038_v61, %v5308_v24  ;;  %v5312_v42 = vadd.f32 %v5311_v13, %v9647_v53 }
 0x5e2   : > { %v10025_v38 = vmax.f32 %v5703_v60, %v5704_v48  ;;  %v5909_v5 = vmax.f32 %v5908_v51, %v5310_v44 }
 0x5e3   : > { %v10027_v63 = vmax.f32 %v5834_v12, %v5835_v0  ;;  %v6040_v55 = vmax.f32 %v6039_v15, %v5312_v42 }
 0x5e5   : > { %v6103_v23 = vcombine.low %v10025_v38, %v10027_v63  ;;  %v5315_v7 = vpop.f32.mrb[16].mxu0 }
 0x5e6   : > { %v5316_v25 = vadd.f32 %v5315_v7, %v9642_v52  ;;  %v5317_v2 = vpop.f32.mrb[17].mxu0 }
 0x5e7   : > { %v5318_v39 = vadd.f32 %v5317_v2, %v9647_v53  ;;  %v5319_v46 = vpop.f32.mrb[18].mxu0 }
 0x5e8   : > { %v5910_v45 = vmax.f32 %v5909_v5, %v5316_v25  ;;  %v5320_v27 = vadd.f32 %v5319_v46, %v9642_v52  ;;  %v5321_v56 = vpop.f32.mrb[19].mxu0 }
 0x5e9   : > { %v6041_v40 = vmax.f32 %v6040_v55, %v5318_v39  ;;  %v5322_v18 = vadd.f32 %v5321_v56, %v9647_v53 }
 0x5ea   : > { %v5911_v16 = vmax.f32 %v5910_v45, %v5320_v27 }
 0x5eb   : > { %v6042_v28 = vmax.f32 %v6041_v40, %v5322_v18 }
 0x5ed   : > { %v5325_v9 = vpop.f32.mrb[20].mxu0 }
 0x5ee   : > { %v5326_v54 = vadd.f32 %v5325_v9, %v9642_v52  ;;  %v5327_v14 = vpop.f32.mrb[21].mxu0 }
 0x5ef   : > { %v5328_v31 = vadd.f32 %v5327_v14, %v9647_v53  ;;  %v5329_v8 = vpop.f32.mrb[22].mxu0 }
 0x5f0   : > { %v5912_v4 = vmax.f32 %v5911_v16, %v5326_v54  ;;  %v5330_v21 = vadd.f32 %v5329_v8, %v9642_v52  ;;  %v5331_v22 = vpop.f32.mrb[23].mxu0 }
 0x5f1   : > { %v6043_v43 = vmax.f32 %v6042_v28, %v5328_v31  ;;  %v5332_v37 = vadd.f32 %v5331_v22, %v9647_v53 }
 0x5f2   : > { %v5913_v32 = vmax.f32 %v5912_v4, %v5330_v21 }
 0x5f3   : > { %v6044_v34 = vmax.f32 %v6043_v43, %v5332_v37 }
 0x5f5   : > { %v5335_v33 = vpop.f32.mrb[24].mxu0 }
 0x5f6   : > { %v5336_v19 = vadd.f32 %v5335_v33, %v9642_v52  ;;  %v5337_v26 = vpop.f32.mrb[25].mxu0 }
 0x5f7   : > { %v5338_v3 = vadd.f32 %v5337_v26, %v9647_v53  ;;  %v5339_v50 = vpop.f32.mrb[26].mxu0 }
 0x5f8   : > { %v5914_v49 = vmax.f32 %v5913_v32, %v5336_v19  ;;  %v5340_v62 = vadd.f32 %v5339_v50, %v9642_v52  ;;  %v5341_v10 = vpop.f32.mrb[27].mxu0 }
 0x5f9   : > { %v6045_v11 = vmax.f32 %v6044_v34, %v5338_v3  ;;  %v5342_v57 = vadd.f32 %v5341_v10, %v9647_v53 }
 0x5fa   : > { %v5915_v17 = vmax.f32 %v5914_v49, %v5340_v62 }
 0x5fb   : > { %v6046_v41 = vmax.f32 %v6045_v11, %v5342_v57 }
 0x5fd   : > { %v5345_v58 = vpop.f32.mrb[28].mxu0 }
 0x5fe   : > { %v5346_v6 = vadd.f32 %v5345_v58, %v9642_v52  ;;  %v5347_v35 = vpop.f32.mrb[29].mxu0 }
 0x5ff   : > { %v5348_v1 = vadd.f32 %v5347_v35, %v9647_v53  ;;  %v5349_v61 = vpop.f32.mrb[30].mxu0 }
 0x600   : > { %v5916_v29 = vmax.f32 %v5915_v17, %v5346_v6  ;;  %v5350_v47 = vadd.f32 %v5349_v61, %v9642_v52  ;;  %v5351_v20 = vpop.f32.mrb[31].mxu0 }
 0x601   : > { %v6047_v60 = vmax.f32 %v6046_v41, %v5348_v1  ;;  %v5352_v59 = vadd.f32 %v5351_v20, %v9647_v53 }
 0x602   : > { %v5917_v36 = vmax.f32 %v5916_v29, %v5350_v47 }
 0x603   : > { %v6048_v12 = vmax.f32 %v6047_v60, %v5352_v59 }
 0x605   : > { %v5355_v24 = vpop.f32.mrb[32].mxu0 }
 0x606   : > { %v5356_v30 = vadd.f32 %v5355_v24, %v9642_v52  ;;  %v5357_v48 = vpop.f32.mrb[33].mxu0 }
 0x607   : > { %v5358_v51 = vadd.f32 %v5357_v48, %v9647_v53  ;;  %v5359_v44 = vpop.f32.mrb[34].mxu0 }
 0x608   : > { %v5918_v13 = vmax.f32 %v5917_v36, %v5356_v30  ;;  %v5360_v0 = vadd.f32 %v5359_v44, %v9642_v52  ;;  %v5361_v15 = vpop.f32.mrb[35].mxu0 }
 0x609   : > { %v6049_v42 = vmax.f32 %v6048_v12, %v5358_v51  ;;  %v5362_v5 = vadd.f32 %v5361_v15, %v9647_v53 }
 0x60a   : > { %v5919_v55 = vmax.f32 %v5918_v13, %v5360_v0 }
 0x60b   : > { %v6050_v7 = vmax.f32 %v6049_v42, %v5362_v5 }
 0x60d   : > { %v5365_v25 = vpop.f32.mrb[36].mxu0 }
 0x60e   : > { %v5366_v2 = vadd.f32 %v5365_v25, %v9642_v52  ;;  %v5367_v39 = vpop.f32.mrb[37].mxu0 }
 0x60f   : > { %v5368_v46 = vadd.f32 %v5367_v39, %v9647_v53  ;;  %v5369_v45 = vpop.f32.mrb[38].mxu0 }
 0x610   : > { %v5920_v27 = vmax.f32 %v5919_v55, %v5366_v2  ;;  %v5370_v56 = vadd.f32 %v5369_v45, %v9642_v52  ;;  %v5371_v40 = vpop.f32.mrb[39].mxu0 }
 0x611   : > { %v6051_v18 = vmax.f32 %v6050_v7, %v5368_v46  ;;  %v5372_v16 = vadd.f32 %v5371_v40, %v9647_v53 }
 0x612   : > { %v5921_v28 = vmax.f32 %v5920_v27, %v5370_v56 }
 0x613   : > { %v6052_v9 = vmax.f32 %v6051_v18, %v5372_v16 }
 0x615   : > { %v5375_v54 = vpop.f32.mrb[40].mxu0 }
 0x616   : > { %v5376_v14 = vadd.f32 %v5375_v54, %v9642_v52  ;;  %v5377_v31 = vpop.f32.mrb[41].mxu0 }
 0x617   : > { %v5378_v8 = vadd.f32 %v5377_v31, %v9647_v53  ;;  %v5379_v4 = vpop.f32.mrb[42].mxu0 }
 0x618   : > { %v5922_v21 = vmax.f32 %v5921_v28, %v5376_v14  ;;  %v5380_v22 = vadd.f32 %v5379_v4, %v9642_v52  ;;  %v5381_v43 = vpop.f32.mrb[43].mxu0 }
 0x619   : > { %v6053_v37 = vmax.f32 %v6052_v9, %v5378_v8  ;;  %v5382_v32 = vadd.f32 %v5381_v43, %v9647_v53 }
 0x61a   : > { %v5923_v34 = vmax.f32 %v5922_v21, %v5380_v22 }
 0x61b   : > { %v6054_v33 = vmax.f32 %v6053_v37, %v5382_v32  ;;  %v10420_v32 = vlaneseq }
 0x61d   : > { %v5385_v19 = vpop.f32.mrb[44].mxu0  ;;  %vm10082_vm4 = vcmp.lt.s32.totalorder %v10420_v32, 512 }
 0x61e   : > { %v5386_v26 = vadd.f32 %v5385_v19, %v9642_v52  ;;  %v5387_v3 = vpop.f32.mrb[45].mxu0 }
 0x61f   : > { %v5388_v50 = vadd.f32 %v5387_v3, %v9647_v53  ;;  %v5389_v49 = vpop.f32.mrb[46].mxu0 }
 0x620   : > { %v5924_v62 = vmax.f32 %v5923_v34, %v5386_v26  ;;  %v5390_v10 = vadd.f32 %v5389_v49, %v9642_v52  ;;  %v5391_v11 = vpop.f32.mrb[47].mxu0  ;;  %v10423_v26 = vmov 0.0  }
 0x621   : > { %v6055_v57 = vmax.f32 %v6054_v33, %v5388_v50  ;;  %v5392_v17 = vadd.f32 %v5391_v11, %v9647_v53  ;;  %368 = vst.msk [vmem:[%s10087_s18] sm:$0xf] %vm10082_vm4, %v10423_v26 }
 0x622   : > { %v5925_v41 = vmax.f32 %v5924_v62, %v5390_v10 }
 0x623   : > { %v6056_v58 = vmax.f32 %v6055_v57, %v5392_v17 }
 0x625   : > { %v5395_v6 = vpop.f32.mrb[48].mxu0 }
 0x626   : > { %v5396_v35 = vadd.f32 %v5395_v6, %v9642_v52  ;;  %v5397_v1 = vpop.f32.mrb[49].mxu0 }
 0x627   : > { %v5398_v61 = vadd.f32 %v5397_v1, %v9647_v53  ;;  %v5399_v29 = vpop.f32.mrb[50].mxu0 }
 0x628   : > { %v5926_v47 = vmax.f32 %v5925_v41, %v5396_v35  ;;  %v5400_v20 = vadd.f32 %v5399_v29, %v9642_v52  ;;  %v5401_v60 = vpop.f32.mrb[51].mxu0 }
 0x629   : > { %v6057_v59 = vmax.f32 %v6056_v58, %v5398_v61  ;;  %v5402_v36 = vadd.f32 %v5401_v60, %v9647_v53 }
 0x62a   : > { %v5927_v12 = vmax.f32 %v5926_v47, %v5400_v20 }
 0x62b   : > { %v6058_v24 = vmax.f32 %v6057_v59, %v5402_v36 }
 0x62d   : > { %v5405_v30 = vpop.f32.mrb[52].mxu0 }
 0x62e   : > { %v5406_v48 = vadd.f32 %v5405_v30, %v9642_v52  ;;  %v5407_v51 = vpop.f32.mrb[53].mxu0 }
 0x62f   : > { %v5408_v44 = vadd.f32 %v5407_v51, %v9647_v53  ;;  %v5409_v13 = vpop.f32.mrb[54].mxu0 }
 0x630   : > { %v5928_v0 = vmax.f32 %v5927_v12, %v5406_v48  ;;  %v5410_v15 = vadd.f32 %v5409_v13, %v9642_v52  ;;  %v5411_v42 = vpop.f32.mrb[55].mxu0 }
 0x631   : > { %v6059_v5 = vmax.f32 %v6058_v24, %v5408_v44  ;;  %v5412_v55 = vadd.f32 %v5411_v42, %v9647_v53 }
 0x632   : > { %v5929_v7 = vmax.f32 %v5928_v0, %v5410_v15 }
 0x633   : > { %v6060_v25 = vmax.f32 %v6059_v5, %v5412_v55 }
 0x635   : > { %v5415_v2 = vpop.f32.mrb[56].mxu0 }
 0x636   : > { %v5416_v39 = vadd.f32 %v5415_v2, %v9642_v52  ;;  %v5417_v46 = vpop.f32.mrb[57].mxu0 }
 0x637   : > { %v5418_v45 = vadd.f32 %v5417_v46, %v9647_v53  ;;  %v5419_v27 = vpop.f32.mrb[58].mxu0 }
 0x638   : > { %v5930_v56 = vmax.f32 %v5929_v7, %v5416_v39  ;;  %v5420_v40 = vadd.f32 %v5419_v27, %v9642_v52  ;;  %v5421_v18 = vpop.f32.mrb[59].mxu0 }
 0x639   : > { %v6061_v16 = vmax.f32 %v6060_v25, %v5418_v45  ;;  %v5422_v28 = vadd.f32 %v5421_v18, %v9647_v53 }
 0x63a   : > { %v5931_v9 = vmax.f32 %v5930_v56, %v5420_v40 }
 0x63b   : > { %v6062_v54 = vmax.f32 %v6061_v16, %v5422_v28 }
 0x63d   : > { %v5425_v14 = vpop.f32.mrb[60].mxu0 }
 0x63e   : > { %v5426_v31 = vadd.f32 %v5425_v14, %v9642_v52  ;;  %v5427_v8 = vpop.f32.mrb[61].mxu0 }
 0x63f   : > { %v5428_v4 = vadd.f32 %v5427_v8, %v9647_v53  ;;  %v5429_v21 = vpop.f32.mrb[62].mxu0 }
 0x640   : > { %v5932_v22 = vmax.f32 %v5931_v9, %v5426_v31  ;;  %v5430_v43 = vadd.f32 %v5429_v21, %v9642_v52  ;;  %v5431_v37 = vpop.f32.mrb[63].mxu0 }
 0x641   : > { %v6063_v33 = vmax.f32 %v6062_v54, %v5428_v4  ;;  %v5432_v19 = vadd.f32 %v5431_v37, %v9647_v53 }
 0x642   : > { %v5933_v3 = vmax.f32 %v5932_v22, %v5430_v43 }
 0x643   : > { %v6064_v50 = vmax.f32 %v6063_v33, %v5432_v19 }
 0x645   : > { %v5435_v49 = vpop.f32.mrb[64].mxu0 }
 0x646   : > { %v5436_v62 = vadd.f32 %v5435_v49, %v9642_v52  ;;  %v5437_v10 = vpop.f32.mrb[65].mxu0 }
 0x647   : > { %v5438_v11 = vadd.f32 %v5437_v10, %v9647_v53  ;;  %v5439_v57 = vpop.f32.mrb[66].mxu0 }
 0x648   : > { %v5934_v17 = vmax.f32 %v5933_v3, %v5436_v62  ;;  %v5440_v41 = vadd.f32 %v5439_v57, %v9642_v52  ;;  %v5441_v58 = vpop.f32.mrb[67].mxu0 }
 0x649   : > { %v6065_v6 = vmax.f32 %v6064_v50, %v5438_v11  ;;  %v5442_v35 = vadd.f32 %v5441_v58, %v9647_v53 }
 0x64a   : > { %v5935_v1 = vmax.f32 %v5934_v17, %v5440_v41 }
 0x64b   : > { %v6066_v61 = vmax.f32 %v6065_v6, %v5442_v35 }
 0x64d   : > { %v5445_v29 = vpop.f32.mrb[68].mxu0 }
 0x64e   : > { %v5446_v47 = vadd.f32 %v5445_v29, %v9642_v52  ;;  %v5447_v20 = vpop.f32.mrb[69].mxu0 }
 0x64f   : > { %v5448_v60 = vadd.f32 %v5447_v20, %v9647_v53  ;;  %v5449_v59 = vpop.f32.mrb[70].mxu0 }
 0x650   : > { %v5936_v36 = vmax.f32 %v5935_v1, %v5446_v47  ;;  %v5450_v12 = vadd.f32 %v5449_v59, %v9642_v52  ;;  %v5451_v24 = vpop.f32.mrb[71].mxu0 }
 0x651   : > { %v6067_v30 = vmax.f32 %v6066_v61, %v5448_v60  ;;  %v5452_v48 = vadd.f32 %v5451_v24, %v9647_v53 }
 0x652   : > { %v5937_v51 = vmax.f32 %v5936_v36, %v5450_v12 }
 0x653   : > { %v6068_v44 = vmax.f32 %v6067_v30, %v5452_v48 }
 0x655   : > { %v5455_v13 = vpop.f32.mrb[72].mxu0 }
 0x656   : > { %v5456_v0 = vadd.f32 %v5455_v13, %v9642_v52  ;;  %v5457_v15 = vpop.f32.mrb[73].mxu0 }
 0x657   : > { %v5458_v42 = vadd.f32 %v5457_v15, %v9647_v53  ;;  %v5459_v5 = vpop.f32.mrb[74].mxu0 }
 0x658   : > { %v5938_v55 = vmax.f32 %v5937_v51, %v5456_v0  ;;  %v5460_v7 = vadd.f32 %v5459_v5, %v9642_v52  ;;  %v5461_v25 = vpop.f32.mrb[75].mxu0 }
 0x659   : > { %v6069_v2 = vmax.f32 %v6068_v44, %v5458_v42  ;;  %v5462_v39 = vadd.f32 %v5461_v25, %v9647_v53 }
 0x65a   : > { %v5939_v46 = vmax.f32 %v5938_v55, %v5460_v7 }
 0x65b   : > { %v6070_v45 = vmax.f32 %v6069_v2, %v5462_v39 }
 0x65d   : > { %v5465_v27 = vpop.f32.mrb[76].mxu0 }
 0x65e   : > { %v5466_v56 = vadd.f32 %v5465_v27, %v9642_v52  ;;  %v5467_v40 = vpop.f32.mrb[77].mxu0 }
 0x65f   : > { %v5468_v18 = vadd.f32 %v5467_v40, %v9647_v53  ;;  %v5469_v16 = vpop.f32.mrb[78].mxu0 }
 0x660   : > { %v5940_v28 = vmax.f32 %v5939_v46, %v5466_v56  ;;  %v5470_v9 = vadd.f32 %v5469_v16, %v9642_v52  ;;  %v5471_v54 = vpop.f32.mrb[79].mxu0 }
 0x661   : > { %v6071_v14 = vmax.f32 %v6070_v45, %v5468_v18  ;;  %v5472_v31 = vadd.f32 %v5471_v54, %v9647_v53 }
 0x662   : > { %v5941_v8 = vmax.f32 %v5940_v28, %v5470_v9 }
 0x663   : > { %v6072_v4 = vmax.f32 %v6071_v14, %v5472_v31 }
 0x665   : > { %v5475_v21 = vpop.f32.mrb[80].mxu0 }
 0x666   : > { %v5476_v22 = vadd.f32 %v5475_v21, %v9642_v52  ;;  %v5477_v43 = vpop.f32.mrb[81].mxu0 }
 0x667   : > { %v5478_v37 = vadd.f32 %v5477_v43, %v9647_v53  ;;  %v5479_v32 = vpop.f32.mrb[82].mxu0 }
 0x668   : > { %v5942_v33 = vmax.f32 %v5941_v8, %v5476_v22  ;;  %v5480_v19 = vadd.f32 %v5479_v32, %v9642_v52  ;;  %v5481_v26 = vpop.f32.mrb[83].mxu0 }
 0x669   : > { %v6073_v3 = vmax.f32 %v6072_v4, %v5478_v37  ;;  %v5482_v50 = vadd.f32 %v5481_v26, %v9647_v53 }
 0x66a   : > { %v5943_v49 = vmax.f32 %v5942_v33, %v5480_v19 }
 0x66b   : > { %v6074_v62 = vmax.f32 %v6073_v3, %v5482_v50 }
 0x66d   : > { %v5485_v10 = vpop.f32.mrb[84].mxu0 }
 0x66e   : > { %v5486_v11 = vadd.f32 %v5485_v10, %v9642_v52  ;;  %v5487_v57 = vpop.f32.mrb[85].mxu0 }
 0x66f   : > { %v5488_v17 = vadd.f32 %v5487_v57, %v9647_v53  ;;  %v5489_v41 = vpop.f32.mrb[86].mxu0 }
 0x670   : > { %v5944_v58 = vmax.f32 %v5943_v49, %v5486_v11  ;;  %v5490_v6 = vadd.f32 %v5489_v41, %v9642_v52  ;;  %v5491_v35 = vpop.f32.mrb[87].mxu0 }
 0x671   : > { %v6075_v1 = vmax.f32 %v6074_v62, %v5488_v17  ;;  %v5492_v61 = vadd.f32 %v5491_v35, %v9647_v53 }
 0x672   : > { %v5945_v29 = vmax.f32 %v5944_v58, %v5490_v6 }
 0x673   : > { %v6076_v47 = vmax.f32 %v6075_v1, %v5492_v61 }
 0x675   : > { %v5495_v20 = vpop.f32.mrb[88].mxu0 }
 0x676   : > { %v5496_v60 = vadd.f32 %v5495_v20, %v9642_v52  ;;  %v5497_v59 = vpop.f32.mrb[89].mxu0 }
 0x677   : > { %v5498_v36 = vadd.f32 %v5497_v59, %v9647_v53  ;;  %v5499_v12 = vpop.f32.mrb[90].mxu0 }
 0x678   : > { %v5946_v24 = vmax.f32 %v5945_v29, %v5496_v60  ;;  %v5500_v30 = vadd.f32 %v5499_v12, %v9642_v52  ;;  %v5501_v48 = vpop.f32.mrb[91].mxu0 }
 0x679   : > { %v6077_v51 = vmax.f32 %v6076_v47, %v5498_v36  ;;  %v5502_v44 = vadd.f32 %v5501_v48, %v9647_v53 }
 0x67a   : > { %v5947_v13 = vmax.f32 %v5946_v24, %v5500_v30 }
 0x67b   : > { %v6078_v0 = vmax.f32 %v6077_v51, %v5502_v44 }
 0x67d   : > { %v5505_v15 = vpop.f32.mrb[92].mxu0 }
 0x67e   : > { %v5506_v42 = vadd.f32 %v5505_v15, %v9642_v52  ;;  %v5507_v5 = vpop.f32.mrb[93].mxu0 }
 0x67f   : > { %v5508_v55 = vadd.f32 %v5507_v5, %v9647_v53  ;;  %v5509_v7 = vpop.f32.mrb[94].mxu0 }
 0x680   : > { %v5948_v25 = vmax.f32 %v5947_v13, %v5506_v42  ;;  %v5510_v2 = vadd.f32 %v5509_v7, %v9642_v52  ;;  %v5511_v39 = vpop.f32.mrb[95].mxu0 }
 0x681   : > { %v6079_v46 = vmax.f32 %v6078_v0, %v5508_v55  ;;  %v5512_v45 = vadd.f32 %v5511_v39, %v9647_v53 }
 0x682   : > { %v5949_v27 = vmax.f32 %v5948_v25, %v5510_v2 }
 0x683   : > { %v6080_v56 = vmax.f32 %v6079_v46, %v5512_v45 }
 0x685   : > { %v5515_v40 = vpop.f32.mrb[96].mxu0 }
 0x686   : > { %v5516_v18 = vadd.f32 %v5515_v40, %v9642_v52  ;;  %v5517_v16 = vpop.f32.mrb[97].mxu0 }
 0x687   : > { %v5518_v28 = vadd.f32 %v5517_v16, %v9647_v53  ;;  %v5519_v9 = vpop.f32.mrb[98].mxu0 }
 0x688   : > { %v5950_v54 = vmax.f32 %v5949_v27, %v5516_v18  ;;  %v5520_v14 = vadd.f32 %v5519_v9, %v9642_v52  ;;  %v5521_v31 = vpop.f32.mrb[99].mxu0 }
 0x689   : > { %v6081_v8 = vmax.f32 %v6080_v56, %v5518_v28  ;;  %v5522_v4 = vadd.f32 %v5521_v31, %v9647_v53 }
 0x68a   : > { %v5951_v21 = vmax.f32 %v5950_v54, %v5520_v14 }
 0x68b   : > { %v6082_v22 = vmax.f32 %v6081_v8, %v5522_v4 }
 0x68d   : > { %v5525_v43 = vpop.f32.mrb[100].mxu0 }
 0x68e   : > { %v5526_v37 = vadd.f32 %v5525_v43, %v9642_v52  ;;  %v5527_v32 = vpop.f32.mrb[101].mxu0 }
 0x68f   : > { %v5528_v33 = vadd.f32 %v5527_v32, %v9647_v53  ;;  %v5529_v19 = vpop.f32.mrb[102].mxu0 }
 0x690   : > { %v5952_v26 = vmax.f32 %v5951_v21, %v5526_v37  ;;  %v5530_v3 = vadd.f32 %v5529_v19, %v9642_v52  ;;  %v5531_v50 = vpop.f32.mrb[103].mxu0 }
 0x691   : > { %v6083_v49 = vmax.f32 %v6082_v22, %v5528_v33  ;;  %v5532_v62 = vadd.f32 %v5531_v50, %v9647_v53 }
 0x692   : > { %v5953_v10 = vmax.f32 %v5952_v26, %v5530_v3  ;;  %v7491_v26 = vmov 1966171168  }
 0x693   : > { %v6084_v11 = vmax.f32 %v6083_v49, %v5532_v62  ;;  %v6106_v3 = vunpack.c.l.s4 %v7491_v26 }
 0x695   : > { %v5535_v57 = vpop.f32.mrb[104].mxu0 }
 0x696   : > { %v5536_v17 = vadd.f32 %v5535_v57, %v9642_v52  ;;  %v5537_v41 = vpop.f32.mrb[105].mxu0 }
 0x697   : > { %v5538_v58 = vadd.f32 %v5537_v41, %v9647_v53  ;;  %v5539_v6 = vpop.f32.mrb[106].mxu0  ;;  %v10424_v41 = vld [vmem:[#allocation5_spill] sm:$0xff] }
 0x698   : > { %v5954_v35 = vmax.f32 %v5953_v10, %v5536_v17  ;;  %v5540_v1 = vadd.f32 %v5539_v6, %v9642_v52  ;;  %v5541_v61 = vpop.f32.mrb[107].mxu0 }
 0x699   : > { %v6085_v29 = vmax.f32 %v6084_v11, %v5538_v58  ;;  %v5542_v47 = vadd.f32 %v5541_v61, %v9647_v53  ;;  %v6107_v11 = vunpack.c.0.s8 %v6106_v3 }
 0x69a   : > { %v5955_v20 = vmax.f32 %v5954_v35, %v5540_v1 }
 0x69b   : > { %v6086_v60 = vmax.f32 %v6085_v29, %v5542_v47  ;;  %v6110_v58 = vsub.s32 %v6107_v11, %v10424_v41  ;;  %v5574_v47 = vld [vmem:[%s10087_s18] sm:$0xf] }
 0x69d   : > { %v5545_v59 = vpop.f32.mrb[108].mxu0  ;;  %v6111_v1 = vrot.slane %v6103_v23, %v6110_v58 }
 0x69e   : > { %v5546_v36 = vadd.f32 %v5545_v59, %v9642_v52  ;;  %v5547_v12 = vpop.f32.mrb[109].mxu0 }
 0x69f   : > { %v5548_v24 = vadd.f32 %v5547_v12, %v9647_v53  ;;  %v5549_v30 = vpop.f32.mrb[110].mxu0 }
 0x6a0   : > { %v5956_v48 = vmax.f32 %v5955_v20, %v5546_v36  ;;  %v5550_v51 = vadd.f32 %v5549_v30, %v9642_v52  ;;  %v5551_v44 = vpop.f32.mrb[111].mxu0 }
 0x6a1   : > { %v6087_v13 = vmax.f32 %v6086_v60, %v5548_v24  ;;  %v5552_v0 = vadd.f32 %v5551_v44, %v9647_v53 }
 0x6a2   : > { %v5957_v15 = vmax.f32 %v5956_v48, %v5550_v51 }
 0x6a3   : > { %v6088_v42 = vmax.f32 %v6087_v13, %v5552_v0 }
 0x6a5   : > { %v5555_v5 = vpop.f32.mrb[112].mxu0 }
 0x6a6   : > { %v5556_v55 = vadd.f32 %v5555_v5, %v9642_v52  ;;  %v5557_v7 = vpop.f32.mrb[113].mxu0 }
 0x6a7   : > { %v5558_v25 = vadd.f32 %v5557_v7, %v9647_v53  ;;  %v5559_v2 = vpop.f32.mrb[114].mxu0 }
 0x6a8   : > { %v5958_v39 = vmax.f32 %v5957_v15, %v5556_v55  ;;  %v5560_v46 = vadd.f32 %v5559_v2, %v9642_v52  ;;  %v5561_v45 = vpop.f32.mrb[115].mxu0 }
 0x6a9   : > { %v6089_v27 = vmax.f32 %v6088_v42, %v5558_v25  ;;  %v5562_v56 = vadd.f32 %v5561_v45, %v9647_v53 }
 0x6aa   : > { %v5959_v40 = vmax.f32 %v5958_v39, %v5560_v46 }
 0x6ab   : > { %v6090_v18 = vmax.f32 %v6089_v27, %v5562_v56 }
 0x6ad   : > { %v5565_v16 = vpop.f32.mrb[116].mxu0 }
 0x6ae   : > { %v5566_v28 = vadd.f32 %v5565_v16, %v9642_v52  ;;  %v5567_v9 = vpop.f32.mrb[117].mxu0 }
 0x6af   : > { %v5568_v54 = vadd.f32 %v5567_v9, %v9647_v53  ;;  %v5569_v14 = vpop.f32.mrb[118].mxu0 }
 0x6b0   : > { %v5960_v31 = vmax.f32 %v5959_v40, %v5566_v28  ;;  %v5570_v8 = vadd.f32 %v5569_v14, %v9642_v52  ;;  %v5571_v4 = vpop.f32.mrb[119].mxu0 }
 0x6b1   : > { %v6091_v21 = vmax.f32 %v6090_v18, %v5568_v54  ;;  %v5572_v22 = vadd.f32 %v5571_v4, %v9647_v53 }
 0x6b2   : > { %v5961_v43 = vmax.f32 %v5960_v31, %v5570_v8 }
 0x6b3   : > { %v6092_v37 = vmax.f32 %v6091_v21, %v5572_v22 }
 0x6b4   : > { %v5962_v32 = vrot.slane %v5961_v43, 4 }
 0x6b5   : > { %v6093_v33 = vrot.slane %v6092_v37, 4 }
 0x6b6   : > { %v5963_v19 = vmax.f32 %v5961_v43, %v5962_v32 }
 0x6b7   : > { %v6094_v50 = vmax.f32 %v6092_v37, %v6093_v33 }
 0x6b8   : > { %v5964_v49 = vrot.slane %v5963_v19, 2 }
 0x6b9   : > { %v6095_v62 = vrot.slane %v6094_v50, 2 }
 0x6ba   : > { %v5965_v10 = vmax.f32 %v5963_v19, %v5964_v49 }
 0x6bb   : > { %v6096_v52 = vmax.f32 %v6094_v50, %v6095_v62 }
 0x6bc   : > { %v5966_v57 = vrot.slane %v5965_v10, 1 }
 0x6bd   : > { %v6097_v17 = vrot.slane %v6096_v52, 1 }
 0x6be   : > { %v5967_v53 = vmax.f32 %v5965_v10, %v5966_v57 }
 0x6bf   : > { %v6098_v6 = vmax.f32 %v6096_v52, %v6097_v17 }
 0x6c1   : > { %v6104_v35 = vcombine.low %v5967_v53, %v6098_v6 }
 0x6c3   : > { %v6118_v61 = vrot.slane %v6104_v35, %v6110_v58 }
 0x6c5   : > { %v6119_v29 = vcombine.low %v6111_v1, %v6118_v61 }
 0x6c7   : > { %v6126_v20 = vrot.slane %v6119_v29, %v6110_v58 }
 0x6c9   : > { %v6128_v60 = vmax.f32 %v5574_v47, %v6126_v20 }
 0x6cb   : > { %6133 = vst.msk [vmem:[%s10087_s18] sm:$0xf] %vm10082_vm4, %v6128_v60 }
 0x6cc   : > { %7421 = shalt.err (!%p7418_p5)
}
 0x6cd   : > { %s7422_s29 = scalar_lea.hbm %s10159_s25, 64  ;;  %s7426_s23 = scalar_lea.hbm %s10220_s9, 256 }
 0x6ce   : > { %p7423_p6 = scmp.ne.s32.totalorder %s10159_s25, %s7422_s29  ;;  %p7427_p10 = scmp.lt.u32.totalorder %s10159_s25, %s10220_s9 }
 0x6cf   : > { %p7428_p11 = scmp.lt.u32.totalorder %s7426_s23, %s7422_s29  ;;  %p7430_p13 = scmp.lt.u32.totalorder %s7422_s29, %s10159_s25 }
 0x6d0   : > { %p7424_p7 = pnand %p7423_p6, %p7583_p4 }
 0x6d1   : > { %p7429_p12 = por %p7428_p11, %p7427_p10 }
 0x6d2   : > { %p7425_p9 = pneg %p7424_p7 }
 0x6d3   : > { %p7431_p0 = por %p7430_p13, %p7429_p12 }
 0x6d5   : > { %p7432_p1 = pnand %p7431_p0, %p7425_p9 }
 0x6d7   : > { %7435 = shalt.err (!%p7432_p1)
}
 0x6d8   : > { %7158 = dma.vmem_to_hbm [thread:$0]  (%p7583_p4), %s10161_s16, 64, %s10159_s25, %s6135_s26  }
 0x6d9 PF: > { %p7164_p2 = scmp.ge.s32.totalorder %s7486_s14, 2  ;;  %s6161_s27 = sand.u32 1, %s7466_s30  }
 0x6da   : > { %s6162_s28 = scalar_lea.sflag [#allocation3], %s6161_s27 }
 0x6db   : > { %p7161_p3 = pnand %p7164_p2, %p7590_p8 }
 0x6dd   : > { %7461 = dma.done.wait (!%p7161_p3), %s6162_s28, 64  }
 0x6de   : > { %7463 = vsyncadd (!%p7161_p3), %s6162_s28, 4294967232  ;;  %s22_s14 = sadd.s32 1, %s7486_s14   ;;  %s10425_s30 = smov %s7470_s10 }
 0x6df   : > { %p19_p5 = scmp.ge.s32.totalorder %s22_s14, 6   ;;  %s10426_s10 = smov %s7474_s11 }
 0x6e0   : > { %s10427_s11 = smov %s7596_s22  ;;  %s10428_s12 = smov %s7482_s13 }
 0x6e1   : > { %s10429_s13 = smov %s10431_s17  ;;  %21 = sbr.rel (!%p19_p5) target bundleno = 4 (0x4), region = 95 }
 0x6e8   :  { %6167 = vsyncpa [#allocation3], 1 }
 0x6e9   :  { %6169 = vsyncpa [#allocation3 + $0x1], 1 }

</bundles_post_ra>
